<compile_context>
chip_gen: v6e
topology: v6e:2x2x1
jax: 0.10.0
libtpu: 0.0.40
codegen_flags: <defaults>
</compile_context>

<pallas_src>
import jax
import jax.numpy as jnp
import numpy as np
from jax.experimental import pallas as pl
from jax.experimental.pallas import tpu as pltpu

# ---- sizes implied by the PyTorch module -------------------------------
MAP_SIZE = 100
WINDOW = 11
STRIDE = 11
LSTM_BSIZE = 9                    # 3 x 3 windows
EGO_MAP = 33                      # params.grid_size
N_CLASSES = 4                     # len(params.semantic_classes)
GRID_INP = N_CLASSES + 2          # concatxy = True
LSTM_IN = WINDOW * WINDOW * GRID_INP      # 726
LSTM_HID = 1000
LSTM_LAYERS = 2
LSTM_OUT = WINDOW * WINDOW * N_CLASSES    # 484

# ---- kernel layout constants --------------------------------------------
H_PAD = 1024                      # lane-aligned hidden width (1000 -> 1024, zero pad)
IN_PAD = 768                      # LSTM layer-0 input 726 -> 768 => K0 = 1792 (8/128 aligned)
N_HALF = 512                      # per-gate column half tile (v7x megacore split)
N_SPLIT = H_PAD // N_HALF         # 2
N_BLOCKS = 4 * N_SPLIT            # 8 pre-blocked weight slabs per LSTM layer
FC1_PAD = 768                     # fc1: 750 -> 768 cols
FC2_PAD = 512                     # fc2: 500 -> 512 cols
OUT_PAD = 512                     # fc3: 484 -> 512 cols (lane-dense output)
VMEM_LIMIT = 48 * 1024 * 1024
WEIGHT_DTYPE = jnp.bfloat16       # weight storage dtype (f32 accumulation in-kernel)


# ------------------------- fused LSTM layer kernel ------------------------
def _lstm_layer_kernel(xh_ref, w_ref, b_ref, c_ref, h_out_ref, c_out_ref, ig_scr):
    """One (column-half, gate) tile of a fused LSTM layer step.

    Grid = (N_SPLIT, 4).  Weights are pre-blocked as (8, K, N_HALF) with block
    index g*N_SPLIT + n, gate order [i | f | g | o].

    NOTE (do NOT reorder the grid): the gate axis must stay the LAST grid axis
    and "arbitrary" -- ig_scr written at gate 0 is consumed at gate 2, and
    c_out/h_out rely on output-block residency across the gate loop (h_out is
    only written at gate 3).
    """
    gate = pl.program_id(1)
    # bf16 activations x bf16 weights on the MXU, f32 accumulation; bias in f32.
    pre = jnp.dot(xh_ref[...].astype(jnp.bfloat16), w_ref[0],
                  preferred_element_type=jnp.float32) + b_ref[...]

    @pl.when(gate == 0)                      # input gate
    def _():
        ig_scr[...] = jax.nn.sigmoid(pre)

    @pl.when(gate == 1)                      # forget gate
    def _():
        c_out_ref[...] = jax.nn.sigmoid(pre) * c_ref[...]

    @pl.when(gate == 2)                      # cell candidate
    def _():
        c_out_ref[...] = c_out_ref[...] + ig_scr[...] * jnp.tanh(pre)

    @pl.when(gate == 3)                      # output gate
    def _():
        h_out_ref[...] = jax.nn.sigmoid(pre) * jnp.tanh(c_out_ref[...])


def lstm_layer(xh, c_prev, w, b):
    """One LSTM layer step (seq_len = 1).

    xh:(M, K) f32 = [x | h_prev_padded]
    w:(8, K, N_HALF) bf16 pre-blocked fused [W_ih; W_hh] (contiguous DMA slabs)
    b:(1, 4*H_PAD) f32 = b_ih + b_hh (gate-col padded)
    c_prev:(M, H_PAD) f32.  Returns (h_new, c_new), both (M, H_PAD) f32."""
    M, K = xh.shape
    assert w.shape == (N_BLOCKS, K, N_HALF)
    return pl.pallas_call(
        _lstm_layer_kernel,
        out_shape=(jax.ShapeDtypeStruct((M, H_PAD), jnp.float32),
                   jax.ShapeDtypeStruct((M, H_PAD), jnp.float32)),
        grid_spec=pltpu.PrefetchScalarGridSpec(
            num_scalar_prefetch=0,
            grid=(N_SPLIT, 4),   # (column half [parallel], gate [arbitrary, LAST])
            in_specs=[
                pl.BlockSpec((M, K), lambda n, g: (0, 0)),                      # resident
                pl.BlockSpec((1, K, N_HALF), lambda n, g: (g * N_SPLIT + n, 0, 0)),
                pl.BlockSpec((1, N_HALF), lambda n, g: (0, g * N_SPLIT + n)),
                pl.BlockSpec((M, N_HALF), lambda n, g: (0, n)),
            ],
            out_specs=(pl.BlockSpec((M, N_HALF), lambda n, g: (0, n)),
                       pl.BlockSpec((M, N_HALF), lambda n, g: (0, n))),
            scratch_shapes=[pltpu.VMEM((M, N_HALF), jnp.float32)],
        ),
        compiler_params=pltpu.CompilerParams(
            dimension_semantics=("parallel", "arbitrary"),
            vmem_limit_bytes=VMEM_LIMIT,
        ),
    )(xh, w, b, c_prev)


# ------------------------- fused MLP head kernel --------------------------
def _mlp_kernel(x_ref, w1_ref, b1_ref, w2_ref, b2_ref, w3_ref, b3_ref, o_ref):
    h1 = jnp.dot(x_ref[...].astype(jnp.bfloat16), w1_ref[...],
                 preferred_element_type=jnp.float32) + b1_ref[...]
    h1 = jnp.maximum(h1, 0.0)
    h2 = jnp.dot(h1.astype(jnp.bfloat16), w2_ref[...],
                 preferred_element_type=jnp.float32) + b2_ref[...]
    h2 = jnp.maximum(h2, 0.0)
    o_ref[...] = jnp.dot(h2.astype(jnp.bfloat16), w3_ref[...],
                         preferred_element_type=jnp.float32) + b3_ref[...]


def mlp_head(x, w1, b1, w2, b2, w3, b3):
    """Fused Linear(1024->768)+ReLU -> Linear(768->512)+ReLU -> Linear(512->512).
    (Lane-padded versions of 1000->750->500->484; pads are zero.)  bf16 weights
    fully resident in VMEM (~2.8 MB), f32 accumulation."""
    M = x.shape[0]
    operands = (x, w1, b1, w2, b2, w3, b3)
    return pl.pallas_call(
        _mlp_kernel,
        out_shape=jax.ShapeDtypeStruct((M, w3.shape[1]), jnp.float32),
        grid_spec=pltpu.PrefetchScalarGridSpec(
            num_scalar_prefetch=0,
            grid=(1,),
            in_specs=[pl.BlockSpec(op.shape, lambda i: (0, 0)) for op in operands],
            out_specs=pl.BlockSpec((M, w3.shape[1]), lambda i: (0, 0)),
        ),
        compiler_params=pltpu.CompilerParams(
            dimension_semantics=("arbitrary",),
            vmem_limit_bytes=VMEM_LIMIT,
        ),
    )(*operands)


# ------------------------- parameters & state -----------------------------
def init_raw_params(key):
    """Deterministic synthetic parameters (PyTorch-uniform-like init), stored
    transposed (K, N) w.r.t. torch's (out_features, in_features)."""
    def uni(k, shape, scale):
        return jax.random.uniform(k, shape, jnp.float32, -scale, scale)

    keys = jax.random.split(key, 14)
    s = 1.0 / float(np.sqrt(LSTM_HID))
    return {
        "w_ih_l0": uni(keys[0], (LSTM_IN, 4 * LSTM_HID), s),
        "w_hh_l0": uni(keys[1], (LSTM_HID, 4 * LSTM_HID), s),
        "b_ih_l0": uni(keys[2], (4 * LSTM_HID,), s),
        "b_hh_l0": uni(keys[3], (4 * LSTM_HID,), s),
        "w_ih_l1": uni(keys[4], (LSTM_HID, 4 * LSTM_HID), s),
        "w_hh_l1": uni(keys[5], (LSTM_HID, 4 * LSTM_HID), s),
        "b_ih_l1": uni(keys[6], (4 * LSTM_HID,), s),
        "b_hh_l1": uni(keys[7], (4 * LSTM_HID,), s),
        "w_fc1": uni(keys[8], (LSTM_HID, 750), 1.0 / float(np.sqrt(1000.0))),
        "b_fc1": uni(keys[9], (750,), 1.0 / float(np.sqrt(1000.0))),
        "w_fc2": uni(keys[10], (750, 500), 1.0 / float(np.sqrt(750.0))),
        "b_fc2": uni(keys[11], (500,), 1.0 / float(np.sqrt(750.0))),
        "w_fc3": uni(keys[12], (500, LSTM_OUT), 1.0 / float(np.sqrt(500.0))),
        "b_fc3": uni(keys[13], (LSTM_OUT,), 1.0 / float(np.sqrt(500.0))),
    }


def _pad_gate_cols(w):
    """(K, 4*LSTM_HID) -> (K, 4*H_PAD): zero-pad each gate slab 1000 -> 1024."""
    K = w.shape[0]
    w4 = w.reshape(K, 4, LSTM_HID)
    w4 = jnp.pad(w4, ((0, 0), (0, 0), (0, H_PAD - LSTM_HID)))
    return w4.reshape(K, 4 * H_PAD)


def _pad_rows(w, rows):
    return jnp.pad(w, ((0, rows - w.shape[0]), (0, 0)))


def _block_lstm_weight(w_ih, w_hh, rows_ih, dtype):
    """Fuse [W_ih; W_hh], gate-col pad, row pad, then pre-block into a
    contiguous (8, K, N_HALF) layout; block index = gate*N_SPLIT + half."""
    w_ih = _pad_rows(_pad_gate_cols(w_ih), rows_ih)
    w_hh = _pad_rows(_pad_gate_cols(w_hh), H_PAD)
    w = jnp.concatenate([w_ih, w_hh], axis=0)                # (K, 4*H_PAD)
    K = w.shape[0]
    w = w.reshape(K, 4, N_SPLIT, N_HALF)
    w = jnp.transpose(w, (1, 2, 0, 3)).reshape(N_BLOCKS, K, N_HALF)
    return w.astype(dtype)


def prepare_params(raw, dtype=WEIGHT_DTYPE):
    """One-time weight fusion / padding / pre-blocking / bf16 cast -- none of
    this runs in the hot path.  Biases stay f32 (negligible bytes)."""
    p = {}
    in_rows = (IN_PAD, H_PAD)                                # layer-0 / layer-1 input rows
    for l in range(LSTM_LAYERS):
        p[f"w_l{l}"] = _block_lstm_weight(raw[f"w_ih_l{l}"], raw[f"w_hh_l{l}"],
                                          in_rows[l], dtype)
        p[f"b_l{l}"] = _pad_gate_cols(
            (raw[f"b_ih_l{l}"] + raw[f"b_hh_l{l}"]).reshape(1, 4 * LSTM_HID))
    p["w_fc1"] = jnp.pad(raw["w_fc1"],
                         ((0, H_PAD - LSTM_HID), (0, FC1_PAD - 750))).astype(dtype)
    p["b_fc1"] = jnp.pad(raw["b_fc1"], (0, FC1_PAD - 750)).reshape(1, -1)
    p["w_fc2"] = jnp.pad(raw["w_fc2"],
                         ((0, FC1_PAD - 750), (0, FC2_PAD - 500))).astype(dtype)
    p["b_fc2"] = jnp.pad(raw["b_fc2"], (0, FC2_PAD - 500)).reshape(1, -1)
    p["w_fc3"] = jnp.pad(raw["w_fc3"],
                         ((0, FC2_PAD - 500), (0, OUT_PAD - LSTM_OUT))).astype(dtype)
    p["b_fc3"] = jnp.pad(raw["b_fc3"], (0, OUT_PAD - LSTM_OUT)).reshape(1, -1)
    return p


def node_pos_emb():
    ii = jnp.arange(MAP_SIZE, dtype=jnp.float32) / float(MAP_SIZE)
    gi, gj = jnp.meshgrid(ii, ii, indexing="ij")
    return jnp.stack([gi, gj], axis=-1)                          # (100, 100, 2)


def init_state():
    # h/c stored H_PAD-wide; the 24 padded columns are ZERO (and stay zero
    # under the LSTM recurrence since every weight row/col that touches them
    # is zero) -- real columns keep the module's 0.5 init.
    real = 0.5 * jnp.ones((LSTM_LAYERS, LSTM_BSIZE, LSTM_HID), jnp.float32)
    pad = jnp.zeros((LSTM_LAYERS, LSTM_BSIZE, H_PAD - LSTM_HID), jnp.float32)
    hc = jnp.concatenate([real, pad], axis=-1)
    return {
        "c_disp": jnp.zeros((2,), jnp.int32),
        "h": hc,
        "c": hc,
        "node_positions": node_pos_emb(),
    }


# ------------------------- TAN forward ------------------------------------
def _build_lstm_input(node_positions, c_disp, gcn_output):
    """relu -> (33,33,4), crop xy-embedding, concat, torch-unfold(11,11) -> (9,726)."""
    h = jnp.maximum(gcn_output, 0.0)
    half, ego_half = MAP_SIZE // 2, EGO_MAP // 2
    start0 = half - ego_half + c_disp[0]
    start1 = half - ego_half + c_disp[1]
    # TODO(synk): lax.dynamic_slice clamps out-of-range starts; PyTorch slicing
    # would instead shrink / wrap for negative indices.
    pos = jax.lax.dynamic_slice(node_positions,
                                (start0, start1, jnp.int32(0)),
                                (EGO_MAP, EGO_MAP, 2))
    h_r = h.reshape(EGO_MAP, EGO_MAP, N_CLASSES)
    b = jnp.concatenate([h_r, pos], axis=2)                      # (33, 33, 6)
    # torch: c = b.unfold(0,11,11).unfold(1,11,11) -> (3,3,6,11,11); d = (1,9,726)
    nwin = EGO_MAP // WINDOW                                     # 3
    c = b.reshape(nwin, WINDOW, nwin, WINDOW, GRID_INP)
    c = jnp.transpose(c, (0, 2, 4, 1, 3))                        # (i, j, ch, wi, wj)
    return c.reshape(LSTM_BSIZE, LSTM_IN)                        # (9, 726)


@jax.jit
def tan_forward(params, state, gcn_output, motion):
    """Mirror of TAN.forward.  gcn_output:(33*33,4) f32, motion:(2,) int32.
    Module state (hidden, c_disp) is threaded explicitly."""
    c_disp = state["c_disp"] + motion.astype(jnp.int32)
    d = _build_lstm_input(state["node_positions"], c_disp, gcn_output)   # (9, 726)
    d = jnp.pad(d, ((0, 0), (0, IN_PAD - LSTM_IN)))                      # (9, 768)

    h_state, c_state = state["h"], state["c"]
    layer_in = d
    h_new, c_new = [], []
    for l in range(LSTM_LAYERS):
        xh = jnp.concatenate([layer_in, h_state[l]], axis=1)     # tiny (9, <=2048)
        hl, cl = lstm_layer(xh, c_state[l], params[f"w_l{l}"], params[f"b_l{l}"])
        h_new.append(hl)
        c_new.append(cl)
        layer_in = hl                                            # (9, H_PAD)

    out = mlp_head(layer_in,
                   params["w_fc1"], params["b_fc1"],
                   params["w_fc2"], params["b_fc2"],
                   params["w_fc3"], params["b_fc3"])             # (9, OUT_PAD)
    out = out[:, :LSTM_OUT].reshape(EGO_MAP * EGO_MAP, N_CLASSES)

    new_state = {
        "c_disp": c_disp,
        "h": jnp.stack(h_new, axis=0),
        "c": jnp.stack(c_new, axis=0),
        "node_positions": state["node_positions"],
    }
    return out, new_state


# ------------------------- precision-matched pure-JAX reference -----------
def _bf16r(x):
    """Round to bf16 and back to f32 (what the MXU sees on the Pallas path)."""
    return x.astype(jnp.bfloat16).astype(jnp.float32)


def tan_forward_ref(raw, state, gcn_output, motion):
    """Reference with the SAME precision as the kernel path: every matmul
    operand rounded to bf16, accumulation / biases / nonlinearities in f32."""
    c_disp = state["c_disp"] + motion.astype(jnp.int32)
    d = _build_lstm_input(state["node_positions"], c_disp, gcn_output)
    h_state = state["h"][:, :, :LSTM_HID]
    c_state = state["c"][:, :, :LSTM_HID]
    layer_in = d
    for l in range(LSTM_LAYERS):
        gates = (_bf16r(layer_in) @ _bf16r(raw[f"w_ih_l{l}"])
                 + _bf16r(h_state[l]) @ _bf16r(raw[f"w_hh_l{l}"])
                 + raw[f"b_ih_l{l}"] + raw[f"b_hh_l{l}"])
        i, f, g, o = jnp.split(gates, 4, axis=1)
        c_new = jax.nn.sigmoid(f) * c_state[l] + jax.nn.sigmoid(i) * jnp.tanh(g)
        layer_in = jax.nn.sigmoid(o) * jnp.tanh(c_new)
    out = jnp.maximum(_bf16r(layer_in) @ _bf16r(raw["w_fc1"]) + raw["b_fc1"], 0.0)
    out = jnp.maximum(_bf16r(out) @ _bf16r(raw["w_fc2"]) + raw["b_fc2"], 0.0)
    out = _bf16r(out) @ _bf16r(raw["w_fc3"]) + raw["b_fc3"]
    return out.reshape(EGO_MAP * EGO_MAP, N_CLASSES)


# ------------------------------ main --------------------------------------
if __name__ == "__main__":
    key = jax.random.PRNGKey(0)
    k_par, k_in = jax.random.split(key)
    raw = init_raw_params(k_par)
    params = prepare_params(raw)          # one-time fusion / padding / bf16 cast
    state = init_state()

    gcn_output = jax.random.normal(
        k_in, (EGO_MAP * EGO_MAP, N_CLASSES), jnp.float32)
    motion = jnp.array([1, -2], dtype=jnp.int32)

    out, new_state = tan_forward(params, state, gcn_output, motion)
    out = jax.block_until_ready(out)
    assert out.shape == (EGO_MAP * EGO_MAP, N_CLASSES)
    assert bool(jnp.all(jnp.isfinite(out)))

    # correctness vs precision-matched reference: same bf16-rounded matmul
    # operands, f32 accumulation; residual error is accumulation-order noise,
    # bf16 rounding ties on intermediate activations and transcendental deltas.
    ref = tan_forward_ref(raw, state, gcn_output, motion)
    np.testing.assert_allclose(np.asarray(out), np.asarray(ref),
                               rtol=1e-2, atol=2e-3)

    # second step: exercise the threaded (padded) LSTM state under jit
    out2, _ = tan_forward(params, new_state, gcn_output, motion)
    out2 = jax.block_until_ready(out2)
    assert bool(jnp.all(jnp.isfinite(out2)))

    print("KERNEL_OK")
</pallas_src>

<mosaic_0001>
module attributes {stable_mosaic.version = 11 : i64} {
  func.func @_lstm_layer_kernel(%arg0: i32, %arg1: i32, %arg2: memref<9x1792xf32, #tpu.memory_space<vmem>>, %arg3: memref<1x1792x512xbf16, #tpu.memory_space<vmem>>, %arg4: memref<1x512xf32, #tpu.memory_space<vmem>>, %arg5: memref<9x512xf32, #tpu.memory_space<vmem>>, %arg6: memref<9x512xf32, #tpu.memory_space<vmem>>, %arg7: memref<9x512xf32, #tpu.memory_space<vmem>>, %arg8: memref<9x512xf32, #tpu.memory_space<vmem>>) attributes {dimension_semantics = [#tpu.dimension_semantics<parallel>, #tpu.dimension_semantics<arbitrary>], iteration_bounds = array<i64: 2, 4>, scalar_prefetch = 0 : i64, scratch_operands = 1 : i64, tpu.core_type = #tpu.core_type<tc>, window_params = [{pipeline_mode = #tpu.pipeline_mode<synchronous>, transform_indices = @transform_0, window_bounds = array<i64: 9, 1792>}, {transform_indices = @transform_1, window_bounds = array<i64: 1, 1792, 512>}, {transform_indices = @transform_2, window_bounds = array<i64: 1, 512>}, {transform_indices = @transform_3, window_bounds = array<i64: 9, 512>}, {transform_indices = @transform_4, window_bounds = array<i64: 9, 512>}, {transform_indices = @transform_5, window_bounds = array<i64: 9, 512>}]} {
    %c0 = arith.constant 0 : index
    %c0_0 = arith.constant 0 : index
    %0 = vector.load %arg2[%c0, %c0_0] : memref<9x1792xf32, #tpu.memory_space<vmem>>, vector<9x1792xf32>
    %1 = arith.truncf %0 : vector<9x1792xf32> to vector<9x1792xbf16>
    %c0_1 = arith.constant 0 : index
    %c0_2 = arith.constant 0 : index
    %c0_3 = arith.constant 0 : index
    %2 = vector.load %arg3[%c0_1, %c0_2, %c0_3] : memref<1x1792x512xbf16, #tpu.memory_space<vmem>>, vector<1x1792x512xbf16>
    %3 = vector.shape_cast %2 : vector<1x1792x512xbf16> to vector<1792x512xbf16>
    %cst = arith.constant dense<0.000000e+00> : vector<9x512xf32>
    %4 = tpu.matmul %1, %3, %cst {dimension_numbers = #tpu.dot_dimension_numbers<[1], [0], [0], [1], [0, 0, 1, 1], [], []>} : vector<9x1792xbf16>, vector<1792x512xbf16>, vector<9x512xf32> -> vector<9x512xf32>
    %c0_4 = arith.constant 0 : index
    %c0_5 = arith.constant 0 : index
    %5 = vector.load %arg4[%c0_4, %c0_5] : memref<1x512xf32, #tpu.memory_space<vmem>>, vector<1x512xf32>
    %6 = vector.broadcast %5 : vector<1x512xf32> to vector<9x512xf32>
    %7 = arith.addf %4, %6 : vector<9x512xf32>
    %c0_i32 = arith.constant 0 : i32
    %8 = arith.cmpi eq, %arg1, %c0_i32 : i32
    %9 = arith.extui %8 : i1 to i32
    %c0_i32_6 = arith.constant 0 : i32
    %10 = arith.cmpi ne, %9, %c0_i32_6 : i32
    scf.if %10 {
      %20 = arith.negf %7 : vector<9x512xf32>
      %21 = math.exp %20 : vector<9x512xf32>
      %cst_10 = arith.constant 1.000000e+00 : f32
      %22 = vector.broadcast %cst_10 : f32 to vector<9x512xf32>
      %23 = arith.addf %22, %21 : vector<9x512xf32>
      %24 = arith.divf %22, %23 : vector<9x512xf32>
      %c0_11 = arith.constant 0 : index
      %c0_12 = arith.constant 0 : index
      %25 = vector.load %arg8[%c0_11, %c0_12] : memref<9x512xf32, #tpu.memory_space<vmem>>, vector<9x512xf32>
      tpu.vector_store %arg8[%c0_11, %c0_12], %24 {strides = array<i32>} : memref<9x512xf32, #tpu.memory_space<vmem>>, vector<9x512xf32>,
    } else {
    }
    %c1_i32 = arith.constant 1 : i32
    %11 = arith.cmpi eq, %arg1, %c1_i32 : i32
    %12 = arith.extui %11 : i1 to i32
    %c0_i32_7 = arith.constant 0 : i32
    %13 = arith.cmpi ne, %12, %c0_i32_7 : i32
    scf.if %13 {
      %20 = arith.negf %7 : vector<9x512xf32>
      %21 = math.exp %20 : vector<9x512xf32>
      %cst_10 = arith.constant 1.000000e+00 : f32
      %22 = vector.broadcast %cst_10 : f32 to vector<9x512xf32>
      %23 = arith.addf %22, %21 : vector<9x512xf32>
      %24 = arith.divf %22, %23 : vector<9x512xf32>
      %c0_11 = arith.constant 0 : index
      %c0_12 = arith.constant 0 : index
      %25 = vector.load %arg5[%c0_11, %c0_12] : memref<9x512xf32, #tpu.memory_space<vmem>>, vector<9x512xf32>
      %26 = arith.mulf %24, %25 : vector<9x512xf32>
      %c0_13 = arith.constant 0 : index
      %c0_14 = arith.constant 0 : index
      %27 = vector.load %arg7[%c0_13, %c0_14] : memref<9x512xf32, #tpu.memory_space<vmem>>, vector<9x512xf32>
      tpu.vector_store %arg7[%c0_13, %c0_14], %26 {strides = array<i32>} : memref<9x512xf32, #tpu.memory_space<vmem>>, vector<9x512xf32>,
    } else {
    }
    %c2_i32 = arith.constant 2 : i32
    %14 = arith.cmpi eq, %arg1, %c2_i32 : i32
    %15 = arith.extui %14 : i1 to i32
    %c0_i32_8 = arith.constant 0 : i32
    %16 = arith.cmpi ne, %15, %c0_i32_8 : i32
    scf.if %16 {
      %c0_10 = arith.constant 0 : index
      %c0_11 = arith.constant 0 : index
      %20 = vector.load %arg7[%c0_10, %c0_11] : memref<9x512xf32, #tpu.memory_space<vmem>>, vector<9x512xf32>
      %c0_12 = arith.constant 0 : index
      %c0_13 = arith.constant 0 : index
      %21 = vector.load %arg8[%c0_12, %c0_13] : memref<9x512xf32, #tpu.memory_space<vmem>>, vector<9x512xf32>
      %22 = math.tanh %7 : vector<9x512xf32>
      %23 = arith.mulf %21, %22 : vector<9x512xf32>
      %24 = arith.addf %20, %23 : vector<9x512xf32>
      %c0_14 = arith.constant 0 : index
      %c0_15 = arith.constant 0 : index
      %25 = vector.load %arg7[%c0_14, %c0_15] : memref<9x512xf32, #tpu.memory_space<vmem>>, vector<9x512xf32>
      tpu.vector_store %arg7[%c0_14, %c0_15], %24 {strides = array<i32>} : memref<9x512xf32, #tpu.memory_space<vmem>>, vector<9x512xf32>,
    } else {
    }
    %c3_i32 = arith.constant 3 : i32
    %17 = arith.cmpi eq, %arg1, %c3_i32 : i32
    %18 = arith.extui %17 : i1 to i32
    %c0_i32_9 = arith.constant 0 : i32
    %19 = arith.cmpi ne, %18, %c0_i32_9 : i32
    scf.if %19 {
      %20 = arith.negf %7 : vector<9x512xf32>
      %21 = math.exp %20 : vector<9x512xf32>
      %cst_10 = arith.constant 1.000000e+00 : f32
      %22 = vector.broadcast %cst_10 : f32 to vector<9x512xf32>
      %23 = arith.addf %22, %21 : vector<9x512xf32>
      %24 = arith.divf %22, %23 : vector<9x512xf32>
      %c0_11 = arith.constant 0 : index
      %c0_12 = arith.constant 0 : index
      %25 = vector.load %arg7[%c0_11, %c0_12] : memref<9x512xf32, #tpu.memory_space<vmem>>, vector<9x512xf32>
      %26 = math.tanh %25 : vector<9x512xf32>
      %27 = arith.mulf %24, %26 : vector<9x512xf32>
      %c0_13 = arith.constant 0 : index
      %c0_14 = arith.constant 0 : index
      %28 = vector.load %arg6[%c0_13, %c0_14] : memref<9x512xf32, #tpu.memory_space<vmem>>, vector<9x512xf32>
      tpu.vector_store %arg6[%c0_13, %c0_14], %27 {strides = array<i32>} : memref<9x512xf32, #tpu.memory_space<vmem>>, vector<9x512xf32>,
    } else {
    }
    return
  }
  func.func @transform_0(%arg0: i32, %arg1: i32) -> (i32, i32) {
    %c0_i32 = arith.constant 0 : i32
    %c0_i32_0 = arith.constant 0 : i32
    %c0_i32_1 = arith.constant 0 : i32
    return %c0_i32, %c0_i32_0 : i32, i32
  }
  func.func @transform_1(%arg0: i32, %arg1: i32) -> (i32, i32, i32) {
    %c2_i32 = arith.constant 2 : i32
    %0 = arith.muli %arg1, %c2_i32 : i32
    %1 = arith.addi %0, %arg0 : i32
    %c0_i32 = arith.constant 0 : i32
    %c0_i32_0 = arith.constant 0 : i32
    %c0_i32_1 = arith.constant 0 : i32
    return %1, %c0_i32, %c0_i32_0 : i32, i32, i32
  }
  func.func @transform_2(%arg0: i32, %arg1: i32) -> (i32, i32) {
    %c2_i32 = arith.constant 2 : i32
    %0 = arith.muli %arg1, %c2_i32 : i32
    %1 = arith.addi %0, %arg0 : i32
    %c0_i32 = arith.constant 0 : i32
    %c0_i32_0 = arith.constant 0 : i32
    return %c0_i32, %1 : i32, i32
  }
  func.func @transform_3(%arg0: i32, %arg1: i32) -> (i32, i32) {
    %c0_i32 = arith.constant 0 : i32
    %c0_i32_0 = arith.constant 0 : i32
    return %c0_i32, %arg0 : i32, i32
  }
  func.func @transform_4(%arg0: i32, %arg1: i32) -> (i32, i32) {
    %c0_i32 = arith.constant 0 : i32
    %c0_i32_0 = arith.constant 0 : i32
    return %c0_i32, %arg0 : i32, i32
  }
  func.func @transform_5(%arg0: i32, %arg1: i32) -> (i32, i32) {
    %c0_i32 = arith.constant 0 : i32
    %c0_i32_0 = arith.constant 0 : i32
    return %c0_i32, %arg0 : i32, i32
  }
}

module attributes {stable_mosaic.version = 11 : i64} {
  func.func @_lstm_layer_kernel(%arg0: i32, %arg1: i32, %arg2: memref<9x2048xf32, #tpu.memory_space<vmem>>, %arg3: memref<1x2048x512xbf16, #tpu.memory_space<vmem>>, %arg4: memref<1x512xf32, #tpu.memory_space<vmem>>, %arg5: memref<9x512xf32, #tpu.memory_space<vmem>>, %arg6: memref<9x512xf32, #tpu.memory_space<vmem>>, %arg7: memref<9x512xf32, #tpu.memory_space<vmem>>, %arg8: memref<9x512xf32, #tpu.memory_space<vmem>>) attributes {dimension_semantics = [#tpu.dimension_semantics<parallel>, #tpu.dimension_semantics<arbitrary>], iteration_bounds = array<i64: 2, 4>, scalar_prefetch = 0 : i64, scratch_operands = 1 : i64, tpu.core_type = #tpu.core_type<tc>, window_params = [{pipeline_mode = #tpu.pipeline_mode<synchronous>, transform_indices = @transform_0, window_bounds = array<i64: 9, 2048>}, {transform_indices = @transform_1, window_bounds = array<i64: 1, 2048, 512>}, {transform_indices = @transform_2, window_bounds = array<i64: 1, 512>}, {transform_indices = @transform_3, window_bounds = array<i64: 9, 512>}, {transform_indices = @transform_4, window_bounds = array<i64: 9, 512>}, {transform_indices = @transform_5, window_bounds = array<i64: 9, 512>}]} {
    %c0 = arith.constant 0 : index
    %c0_0 = arith.constant 0 : index
    %0 = vector.load %arg2[%c0, %c0_0] : memref<9x2048xf32, #tpu.memory_space<vmem>>, vector<9x2048xf32>
    %1 = arith.truncf %0 : vector<9x2048xf32> to vector<9x2048xbf16>
    %c0_1 = arith.constant 0 : index
    %c0_2 = arith.constant 0 : index
    %c0_3 = arith.constant 0 : index
    %2 = vector.load %arg3[%c0_1, %c0_2, %c0_3] : memref<1x2048x512xbf16, #tpu.memory_space<vmem>>, vector<1x2048x512xbf16>
    %3 = vector.shape_cast %2 : vector<1x2048x512xbf16> to vector<2048x512xbf16>
    %cst = arith.constant dense<0.000000e+00> : vector<9x512xf32>
    %4 = tpu.matmul %1, %3, %cst {dimension_numbers = #tpu.dot_dimension_numbers<[1], [0], [0], [1], [0, 0, 1, 1], [], []>} : vector<9x2048xbf16>, vector<2048x512xbf16>, vector<9x512xf32> -> vector<9x512xf32>
    %c0_4 = arith.constant 0 : index
    %c0_5 = arith.constant 0 : index
    %5 = vector.load %arg4[%c0_4, %c0_5] : memref<1x512xf32, #tpu.memory_space<vmem>>, vector<1x512xf32>
    %6 = vector.broadcast %5 : vector<1x512xf32> to vector<9x512xf32>
    %7 = arith.addf %4, %6 : vector<9x512xf32>
    %c0_i32 = arith.constant 0 : i32
    %8 = arith.cmpi eq, %arg1, %c0_i32 : i32
    %9 = arith.extui %8 : i1 to i32
    %c0_i32_6 = arith.constant 0 : i32
    %10 = arith.cmpi ne, %9, %c0_i32_6 : i32
    scf.if %10 {
      %20 = arith.negf %7 : vector<9x512xf32>
      %21 = math.exp %20 : vector<9x512xf32>
      %cst_10 = arith.constant 1.000000e+00 : f32
      %22 = vector.broadcast %cst_10 : f32 to vector<9x512xf32>
      %23 = arith.addf %22, %21 : vector<9x512xf32>
      %24 = arith.divf %22, %23 : vector<9x512xf32>
      %c0_11 = arith.constant 0 : index
      %c0_12 = arith.constant 0 : index
      %25 = vector.load %arg8[%c0_11, %c0_12] : memref<9x512xf32, #tpu.memory_space<vmem>>, vector<9x512xf32>
      tpu.vector_store %arg8[%c0_11, %c0_12], %24 {strides = array<i32>} : memref<9x512xf32, #tpu.memory_space<vmem>>, vector<9x512xf32>,
    } else {
    }
    %c1_i32 = arith.constant 1 : i32
    %11 = arith.cmpi eq, %arg1, %c1_i32 : i32
    %12 = arith.extui %11 : i1 to i32
    %c0_i32_7 = arith.constant 0 : i32
    %13 = arith.cmpi ne, %12, %c0_i32_7 : i32
    scf.if %13 {
      %20 = arith.negf %7 : vector<9x512xf32>
      %21 = math.exp %20 : vector<9x512xf32>
      %cst_10 = arith.constant 1.000000e+00 : f32
      %22 = vector.broadcast %cst_10 : f32 to vector<9x512xf32>
      %23 = arith.addf %22, %21 : vector<9x512xf32>
      %24 = arith.divf %22, %23 : vector<9x512xf32>
      %c0_11 = arith.constant 0 : index
      %c0_12 = arith.constant 0 : index
      %25 = vector.load %arg5[%c0_11, %c0_12] : memref<9x512xf32, #tpu.memory_space<vmem>>, vector<9x512xf32>
      %26 = arith.mulf %24, %25 : vector<9x512xf32>
      %c0_13 = arith.constant 0 : index
      %c0_14 = arith.constant 0 : index
      %27 = vector.load %arg7[%c0_13, %c0_14] : memref<9x512xf32, #tpu.memory_space<vmem>>, vector<9x512xf32>
      tpu.vector_store %arg7[%c0_13, %c0_14], %26 {strides = array<i32>} : memref<9x512xf32, #tpu.memory_space<vmem>>, vector<9x512xf32>,
    } else {
    }
    %c2_i32 = arith.constant 2 : i32
    %14 = arith.cmpi eq, %arg1, %c2_i32 : i32
    %15 = arith.extui %14 : i1 to i32
    %c0_i32_8 = arith.constant 0 : i32
    %16 = arith.cmpi ne, %15, %c0_i32_8 : i32
    scf.if %16 {
      %c0_10 = arith.constant 0 : index
      %c0_11 = arith.constant 0 : index
      %20 = vector.load %arg7[%c0_10, %c0_11] : memref<9x512xf32, #tpu.memory_space<vmem>>, vector<9x512xf32>
      %c0_12 = arith.constant 0 : index
      %c0_13 = arith.constant 0 : index
      %21 = vector.load %arg8[%c0_12, %c0_13] : memref<9x512xf32, #tpu.memory_space<vmem>>, vector<9x512xf32>
      %22 = math.tanh %7 : vector<9x512xf32>
      %23 = arith.mulf %21, %22 : vector<9x512xf32>
      %24 = arith.addf %20, %23 : vector<9x512xf32>
      %c0_14 = arith.constant 0 : index
      %c0_15 = arith.constant 0 : index
      %25 = vector.load %arg7[%c0_14, %c0_15] : memref<9x512xf32, #tpu.memory_space<vmem>>, vector<9x512xf32>
      tpu.vector_store %arg7[%c0_14, %c0_15], %24 {strides = array<i32>} : memref<9x512xf32, #tpu.memory_space<vmem>>, vector<9x512xf32>,
    } else {
    }
    %c3_i32 = arith.constant 3 : i32
    %17 = arith.cmpi eq, %arg1, %c3_i32 : i32
    %18 = arith.extui %17 : i1 to i32
    %c0_i32_9 = arith.constant 0 : i32
    %19 = arith.cmpi ne, %18, %c0_i32_9 : i32
    scf.if %19 {
      %20 = arith.negf %7 : vector<9x512xf32>
      %21 = math.exp %20 : vector<9x512xf32>
      %cst_10 = arith.constant 1.000000e+00 : f32
      %22 = vector.broadcast %cst_10 : f32 to vector<9x512xf32>
      %23 = arith.addf %22, %21 : vector<9x512xf32>
      %24 = arith.divf %22, %23 : vector<9x512xf32>
      %c0_11 = arith.constant 0 : index
      %c0_12 = arith.constant 0 : index
      %25 = vector.load %arg7[%c0_11, %c0_12] : memref<9x512xf32, #tpu.memory_space<vmem>>, vector<9x512xf32>
      %26 = math.tanh %25 : vector<9x512xf32>
      %27 = arith.mulf %24, %26 : vector<9x512xf32>
      %c0_13 = arith.constant 0 : index
      %c0_14 = arith.constant 0 : index
      %28 = vector.load %arg6[%c0_13, %c0_14] : memref<9x512xf32, #tpu.memory_space<vmem>>, vector<9x512xf32>
      tpu.vector_store %arg6[%c0_13, %c0_14], %27 {strides = array<i32>} : memref<9x512xf32, #tpu.memory_space<vmem>>, vector<9x512xf32>,
    } else {
    }
    return
  }
  func.func @transform_0(%arg0: i32, %arg1: i32) -> (i32, i32) {
    %c0_i32 = arith.constant 0 : i32
    %c0_i32_0 = arith.constant 0 : i32
    %c0_i32_1 = arith.constant 0 : i32
    return %c0_i32, %c0_i32_0 : i32, i32
  }
  func.func @transform_1(%arg0: i32, %arg1: i32) -> (i32, i32, i32) {
    %c2_i32 = arith.constant 2 : i32
    %0 = arith.muli %arg1, %c2_i32 : i32
    %1 = arith.addi %0, %arg0 : i32
    %c0_i32 = arith.constant 0 : i32
    %c0_i32_0 = arith.constant 0 : i32
    %c0_i32_1 = arith.constant 0 : i32
    return %1, %c0_i32, %c0_i32_0 : i32, i32, i32
  }
  func.func @transform_2(%arg0: i32, %arg1: i32) -> (i32, i32) {
    %c2_i32 = arith.constant 2 : i32
    %0 = arith.muli %arg1, %c2_i32 : i32
    %1 = arith.addi %0, %arg0 : i32
    %c0_i32 = arith.constant 0 : i32
    %c0_i32_0 = arith.constant 0 : i32
    return %c0_i32, %1 : i32, i32
  }
  func.func @transform_3(%arg0: i32, %arg1: i32) -> (i32, i32) {
    %c0_i32 = arith.constant 0 : i32
    %c0_i32_0 = arith.constant 0 : i32
    return %c0_i32, %arg0 : i32, i32
  }
  func.func @transform_4(%arg0: i32, %arg1: i32) -> (i32, i32) {
    %c0_i32 = arith.constant 0 : i32
    %c0_i32_0 = arith.constant 0 : i32
    return %c0_i32, %arg0 : i32, i32
  }
  func.func @transform_5(%arg0: i32, %arg1: i32) -> (i32, i32) {
    %c0_i32 = arith.constant 0 : i32
    %c0_i32_0 = arith.constant 0 : i32
    return %c0_i32, %arg0 : i32, i32
  }
}

module attributes {stable_mosaic.version = 11 : i64} {
  func.func @_mlp_kernel(%arg0: i32, %arg1: memref<9x1024xf32, #tpu.memory_space<vmem>>, %arg2: memref<1024x768xbf16, #tpu.memory_space<vmem>>, %arg3: memref<1x768xf32, #tpu.memory_space<vmem>>, %arg4: memref<768x512xbf16, #tpu.memory_space<vmem>>, %arg5: memref<1x512xf32, #tpu.memory_space<vmem>>, %arg6: memref<512x512xbf16, #tpu.memory_space<vmem>>, %arg7: memref<1x512xf32, #tpu.memory_space<vmem>>, %arg8: memref<9x512xf32, #tpu.memory_space<vmem>>) attributes {dimension_semantics = [#tpu.dimension_semantics<arbitrary>], iteration_bounds = array<i64: 1>, scalar_prefetch = 0 : i64, scratch_operands = 0 : i64, tpu.core_type = #tpu.core_type<tc>, window_params = [{pipeline_mode = #tpu.pipeline_mode<synchronous>, transform_indices = @transform_0, window_bounds = array<i64: 9, 1024>}, {pipeline_mode = #tpu.pipeline_mode<synchronous>, transform_indices = @transform_1, window_bounds = array<i64: 1024, 768>}, {pipeline_mode = #tpu.pipeline_mode<synchronous>, transform_indices = @transform_2, window_bounds = array<i64: 1, 768>}, {pipeline_mode = #tpu.pipeline_mode<synchronous>, transform_indices = @transform_3, window_bounds = array<i64: 768, 512>}, {pipeline_mode = #tpu.pipeline_mode<synchronous>, transform_indices = @transform_4, window_bounds = array<i64: 1, 512>}, {pipeline_mode = #tpu.pipeline_mode<synchronous>, transform_indices = @transform_5, window_bounds = array<i64: 512, 512>}, {pipeline_mode = #tpu.pipeline_mode<synchronous>, transform_indices = @transform_6, window_bounds = array<i64: 1, 512>}, {pipeline_mode = #tpu.pipeline_mode<synchronous>, transform_indices = @transform_7, window_bounds = array<i64: 9, 512>}]} {
    %c0 = arith.constant 0 : index
    %c0_0 = arith.constant 0 : index
    %0 = vector.load %arg1[%c0, %c0_0] : memref<9x1024xf32, #tpu.memory_space<vmem>>, vector<9x1024xf32>
    %1 = arith.truncf %0 : vector<9x1024xf32> to vector<9x1024xbf16>
    %c0_1 = arith.constant 0 : index
    %c0_2 = arith.constant 0 : index
    %2 = vector.load %arg2[%c0_1, %c0_2] : memref<1024x768xbf16, #tpu.memory_space<vmem>>, vector<1024x768xbf16>
    %cst = arith.constant dense<0.000000e+00> : vector<9x768xf32>
    %3 = tpu.matmul %1, %2, %cst {dimension_numbers = #tpu.dot_dimension_numbers<[1], [0], [0], [1], [0, 0, 1, 1], [], []>} : vector<9x1024xbf16>, vector<1024x768xbf16>, vector<9x768xf32> -> vector<9x768xf32>
    %c0_3 = arith.constant 0 : index
    %c0_4 = arith.constant 0 : index
    %4 = vector.load %arg3[%c0_3, %c0_4] : memref<1x768xf32, #tpu.memory_space<vmem>>, vector<1x768xf32>
    %5 = vector.broadcast %4 : vector<1x768xf32> to vector<9x768xf32>
    %6 = arith.addf %3, %5 : vector<9x768xf32>
    %cst_5 = arith.constant 0.000000e+00 : f32
    %7 = vector.broadcast %cst_5 : f32 to vector<9x768xf32>
    %8 = arith.maximumf %6, %7 : vector<9x768xf32>
    %9 = arith.truncf %8 : vector<9x768xf32> to vector<9x768xbf16>
    %c0_6 = arith.constant 0 : index
    %c0_7 = arith.constant 0 : index
    %10 = vector.load %arg4[%c0_6, %c0_7] : memref<768x512xbf16, #tpu.memory_space<vmem>>, vector<768x512xbf16>
    %cst_8 = arith.constant dense<0.000000e+00> : vector<9x512xf32>
    %11 = tpu.matmul %9, %10, %cst_8 {dimension_numbers = #tpu.dot_dimension_numbers<[1], [0], [0], [1], [0, 0, 1, 1], [], []>} : vector<9x768xbf16>, vector<768x512xbf16>, vector<9x512xf32> -> vector<9x512xf32>
    %c0_9 = arith.constant 0 : index
    %c0_10 = arith.constant 0 : index
    %12 = vector.load %arg5[%c0_9, %c0_10] : memref<1x512xf32, #tpu.memory_space<vmem>>, vector<1x512xf32>
    %13 = vector.broadcast %12 : vector<1x512xf32> to vector<9x512xf32>
    %14 = arith.addf %11, %13 : vector<9x512xf32>
    %cst_11 = arith.constant 0.000000e+00 : f32
    %15 = vector.broadcast %cst_11 : f32 to vector<9x512xf32>
    %16 = arith.maximumf %14, %15 : vector<9x512xf32>
    %17 = arith.truncf %16 : vector<9x512xf32> to vector<9x512xbf16>
    %c0_12 = arith.constant 0 : index
    %c0_13 = arith.constant 0 : index
    %18 = vector.load %arg6[%c0_12, %c0_13] : memref<512x512xbf16, #tpu.memory_space<vmem>>, vector<512x512xbf16>
    %cst_14 = arith.constant dense<0.000000e+00> : vector<9x512xf32>
    %19 = tpu.matmul %17, %18, %cst_14 {dimension_numbers = #tpu.dot_dimension_numbers<[1], [0], [0], [1], [0, 0, 1, 1], [], []>} : vector<9x512xbf16>, vector<512x512xbf16>, vector<9x512xf32> -> vector<9x512xf32>
    %c0_15 = arith.constant 0 : index
    %c0_16 = arith.constant 0 : index
    %20 = vector.load %arg7[%c0_15, %c0_16] : memref<1x512xf32, #tpu.memory_space<vmem>>, vector<1x512xf32>
    %21 = vector.broadcast %20 : vector<1x512xf32> to vector<9x512xf32>
    %22 = arith.addf %19, %21 : vector<9x512xf32>
    %c0_17 = arith.constant 0 : index
    %c0_18 = arith.constant 0 : index
    %23 = vector.load %arg8[%c0_17, %c0_18] : memref<9x512xf32, #tpu.memory_space<vmem>>, vector<9x512xf32>
    tpu.vector_store %arg8[%c0_17, %c0_18], %22 {strides = array<i32>} : memref<9x512xf32, #tpu.memory_space<vmem>>, vector<9x512xf32>,
    return
  }
  func.func @transform_0(%arg0: i32) -> (i32, i32) {
    %c0_i32 = arith.constant 0 : i32
    %c0_i32_0 = arith.constant 0 : i32
    %c0_i32_1 = arith.constant 0 : i32
    return %c0_i32, %c0_i32_0 : i32, i32
  }
  func.func @transform_1(%arg0: i32) -> (i32, i32) {
    %c0_i32 = arith.constant 0 : i32
    %c0_i32_0 = arith.constant 0 : i32
    %c0_i32_1 = arith.constant 0 : i32
    return %c0_i32, %c0_i32_0 : i32, i32
  }
  func.func @transform_2(%arg0: i32) -> (i32, i32) {
    %c0_i32 = arith.constant 0 : i32
    %c0_i32_0 = arith.constant 0 : i32
    %c0_i32_1 = arith.constant 0 : i32
    return %c0_i32, %c0_i32_0 : i32, i32
  }
  func.func @transform_3(%arg0: i32) -> (i32, i32) {
    %c0_i32 = arith.constant 0 : i32
    %c0_i32_0 = arith.constant 0 : i32
    %c0_i32_1 = arith.constant 0 : i32
    return %c0_i32, %c0_i32_0 : i32, i32
  }
  func.func @transform_4(%arg0: i32) -> (i32, i32) {
    %c0_i32 = arith.constant 0 : i32
    %c0_i32_0 = arith.constant 0 : i32
    %c0_i32_1 = arith.constant 0 : i32
    return %c0_i32, %c0_i32_0 : i32, i32
  }
  func.func @transform_5(%arg0: i32) -> (i32, i32) {
    %c0_i32 = arith.constant 0 : i32
    %c0_i32_0 = arith.constant 0 : i32
    %c0_i32_1 = arith.constant 0 : i32
    return %c0_i32, %c0_i32_0 : i32, i32
  }
  func.func @transform_6(%arg0: i32) -> (i32, i32) {
    %c0_i32 = arith.constant 0 : i32
    %c0_i32_0 = arith.constant 0 : i32
    %c0_i32_1 = arith.constant 0 : i32
    return %c0_i32, %c0_i32_0 : i32, i32
  }
  func.func @transform_7(%arg0: i32) -> (i32, i32) {
    %c0_i32 = arith.constant 0 : i32
    %c0_i32_0 = arith.constant 0 : i32
    %c0_i32_1 = arith.constant 0 : i32
    return %c0_i32, %c0_i32_0 : i32, i32
  }
}

</mosaic_0001>

<bundles_post_ra>
// kernel: tan_forward.3
= control target key start
LH: loop header
LB: loop body
LE: loop exit
PB: predicated region body
PF: predicated region fallthrough
CT: control target
= control target key end

     0   :  { %s6728_s0 = inlined_call_operand.vmem [shape: f32[9,1792], index: 0, kind: input, shape index: {}]   ;;  %s6729_s1 = inlined_call_operand.hbm [shape: bf16[8,1792,512], index: 1, kind: input, shape index: {}]   ;;  %s6730_s2 = inlined_call_operand.hbm [shape: f32[1,4096], index: 2, kind: input, shape index: {}]   ;;  %s6731_s3 = inlined_call_operand.vmem [shape: f32[9,1024], index: 3, kind: input, shape index: {}]   ;;  %s6732_s4 = inlined_call_operand.vmem [shape: f32[9,1024], index: 4, kind: output, shape index: {0}]   ;;  %s6733_s5 = inlined_call_operand.vmem [shape: f32[9,1024], index: 5, kind: output, shape index: {1}]  }
   0x1   :  { %6739 = sst [smem:[#allocation20_spill]] %s6729_s1 }
   0x2   :  { %6740 = sst [smem:[#allocation21_spill]] %s6732_s4 }
   0x3   :  { %6741 = sst [smem:[#allocation22_spill]] %s6733_s5 }
   0x4   :  { %11 = vsyncpa [#allocation4], 0 }
   0x5   :  { %13 = vsyncpa [#allocation4 + $0x1], 0 }
   0x6   :  { %14 = vsyncpa [#allocation6], 0 }
   0x7   :  { %16 = vsyncpa [#allocation6 + $0x1], 0  ;;  %s5797_s18 = smov 0   ;;  %s5799_s19 = smov 0  }
   0x8   :  { %s5801_s20 = smov 0   ;;  %s5803_s21 = smov 0  }
   0x9   :  { %s5805_s22 = smov 0   ;;  %s5807_s23 = smov 0  }
   0xa   :  { %s5809_s24 = smov 0   ;;  %s5811_s25 = smov 0  }
   0xb   :  { %s5813_s26 = smov 0   ;;  %s5815_s27 = smov 0  }
   0xc LB: > { %6742 = sst [smem:[#allocation12_spill]] %s5741_s22  ;;  %s4224_s28 = sadd.s32 4294967295, %s5761_s27   ;;  %s5761_s27 = sphi %s5815_s27, %s22_s27   ;;  %s5757_s26 = sphi %s5813_s26, %s6772_s26   ;;  %s5753_s25 = sphi %s5811_s25, %s6765_s25   ;;  %s5749_s24 = sphi %s5809_s24, %s6771_s24   ;;  %s5745_s23 = sphi %s5807_s23, %s6764_s23   ;;  %s5741_s22 = sphi %s5805_s22, %s6763_s22   ;;  %s5737_s21 = sphi %s5803_s21, %s6770_s21   ;;  %s5733_s20 = sphi %s5801_s20, %s6769_s20   ;;  %s5729_s19 = sphi %s5799_s19, %s6768_s19   ;;  %s5725_s18 = sphi %s5797_s18, %s6767_s18  }
   0xd   : > { %6743 = sst [smem:[#allocation13_spill]] %s5749_s24  ;;  %s31_s29 = sadd.s32 1, %s5753_s25 }
   0xe   : > { %6744 = sst [smem:[#allocation14_spill]] %s5753_s25  ;;  %p32_p0 = scmp.ge.s32.totalorder %s31_s29, 4 }
   0xf   : > { %s34_s30 = sadd.s32 1, %s5757_s26  ;;  %s4226_s6 = sshll.u32 %s5753_s25, 1 }
  0x10   : > { %s66_s7 = sadd.s32 1, %s5741_s22  ;;  %s6774_s29 = smov (%p32_p0, %s31_s29), 0 }
  0x11   : > { %6745 = sst [smem:[#allocation15_spill]] %s6774_s29  ;;  %s6776_s30 = smov (!%p32_p0, %s34_s30), %s5757_s26 }
  0x12   : > { %s5854_s8 = sadd.s32 %s5757_s26, %s4226_s6  ;;  %s4227_s9 = sshll.u32 %s6774_s29, 1 }
  0x13   : > { %p36_p1 = scmp.ge.s32.totalorder %s6776_s30, 2  ;;  %p73_p2 = scmp.ne.s32.totalorder %s5741_s22, %s5737_s21 }
  0x14   : > { %p74_p3 = scmp.eq.s32.totalorder %s5761_s27, 0  ;;  %p79_p4 = scmp.ne.s32.totalorder %s5737_s21, %s5733_s20 }
  0x15   : > { %s6778_s30 = smov (%p36_p1, %s6776_s30), 0  ;;  %p80_p6 = scmp.eq.s32.totalorder %s4224_s28, 0 }
  0x16   : > { %6746 = sst [smem:[#allocation16_spill]] %s6778_s30  ;;  %p5865_p5 = por %p74_p3, %p73_p2 }
  0x17   : > { %s62_s11 = sadd.s32 %s4227_s9, %s6778_s30  ;;  %s119_s12 = ssub.s32 %s5757_s26, %s6778_s30 }
  0x18   : > { %s63_s13 = ssub.s32 %s5854_s8, %s62_s11  ;;  %p5873_p7 = por %p80_p6, %p79_p4 }
  0x19   : > { %p64_p8 = scmp.eq.s32.totalorder %s63_s13, 0  ;;  %p120_p9 = scmp.eq.s32.totalorder %s119_s12, 0 }
  0x1a   : > { %s122_s15 = sadd.s32 1, %s5729_s19  ;;  %p129_p10 = scmp.ne.s32.totalorder %s5729_s19, %s5725_s18 }
  0x1b   : > { %s5881_s16 = scalar_select %p64_p8, %s5741_s22, %s66_s7  }
  0x1c   : > { %s5884_s17 = scalar_select %p120_p9, %s5729_s19, %s122_s15  }
  0x1d   : > { %6749 = sst [smem:[#allocation17_spill]] %s5881_s16  ;;  %p5888_p11 = por %p129_p10, %p74_p3 }
  0x1e   : > { %6750 = sst [smem:[#allocation18_spill]] %s5884_s17  ;;  %p159_p12 = scmp.eq.s32.totalorder %s4224_s28, 7 }
  0x1f   : > { %p4231_p0 = scmp.ge.s32.totalorder %s5761_s27, 8 }
  0x20   : > { %p5892_p13 = por %p159_p12, %p129_p10  ;;  %s5898_s7 = sand.u32 (!%p4231_p0), 1, %s5741_s22  }
  0x21   : > { %210 = sbr.rel (%p4231_p0) target bundleno = 74 (0x4a), region = 20  ;;  %s6754_s1 = sld [smem:[#allocation20_spill]] (!%p4231_p0) }
  0x22   : > { %s6752_s6 = scalar_select %p5892_p13, 1, 0 }
  0x23   : > { %s4735_s9 = smul.u32 (!%p4231_p0), 57344, %s5854_s8  ;;  %s4234_s29 = sshll.u32 (!%p4231_p0), %s5898_s7, 2 }
  0x24   : > { %6753 = sst [smem:[#allocation19_spill]] %s6752_s6  ;;  %s4734_s11 = smul.u32 (!%p4231_p0), 3584, %s5898_s7 }
  0x25   : > { %s215_s25 = scalar_lea.sflag (!%p4231_p0), [#allocation4], %s5898_s7  ;;  %s5763_s22 = smov (!%p4231_p0), [#allocation3]  }
  0x26   : > { %s218_s15 = scalar_lea.vmem [#allocation3], %s4734_s11  ;;  %s5639_s17 = sshll.u32 %s5763_s22, 4  ;;  %s5640_s17 = int_to_ptr.vmem [resolvable:$false] %s5639_s17 }
  0x27   : > { %s226_s28 = scalar_lea.hbm %s6754_s1, %s4735_s9  ;;  %s227_s30 = sshll.u32 %s218_s15, 4  ;;  %s228_s30 = int_to_ptr.vmem [resolvable:$true] %s227_s30 }
  0x28   : > { %s5635_s16 = scalar_lea.vmem %s228_s30, 57344  ;;  %s5641_s5 = scalar_lea.vmem %s5640_s17, 114688 }
  0x29   : > { %p5636_p1 = scmp.ne.s32.totalorder %s228_s30, %s5635_s16  ;;  %p5642_p4 = scmp.lt.s32.totalorder %s228_s30, %s5640_s17 }
  0x2a   : > { %p5643_p6 = scmp.lt.s32.totalorder %s5641_s5, %s5635_s16 }
  0x2b   : > { %p5637_p2 = pnand %p5636_p1, %p5865_p5 }
  0x2c   : > { %p5644_p8 = por %p5643_p6, %p5642_p4 }
  0x2d   : > { %p5638_p3 = pneg %p5637_p2 }
  0x2f   : > { %p5645_p9 = pnand %p5644_p8, %p5638_p3 }
  0x31   : > { %5648 = shalt.err (!%p5645_p9)
}
  0x32   : > { %s5764_s9 = smov 256   ;;  %s5765_s11 = smov 16  }
  0x33   : > { %4737 = dma.hbm_to_vmem [thread:$0]  (%p5865_p5), %s226_s28, 57344, %s228_s30, %s215_s25, %s5764_s9, %s5764_s9, %s5765_s11  }
  0x34   : > { %s4730_s12 = sshll.u32 %s5854_s8, 6  ;;  %s241_s1 = scalar_lea.vmem [#allocation5], %s4234_s29 }
  0x35   : > { %s249_s22 = scalar_lea.hbm %s6730_s2, %s4730_s12  ;;  %s251_s4 = sshll.u32 %s241_s1, 4  ;;  %s252_s4 = int_to_ptr.vmem [resolvable:$true] %s251_s4 }
  0x36   : > { %s238_s5 = scalar_lea.sflag [#allocation6], %s5898_s7  ;;  %s5661_s16 = scalar_lea.vmem %s252_s4, 64 }
  0x37   : > { %p5662_p10 = scmp.ne.s32.totalorder %s252_s4, %s5661_s16  ;;  %s5766_s17 = smov [#allocation5]  }
  0x38   : > { %s5665_s24 = sshll.u32 %s5766_s17, 4  ;;  %s5666_s24 = int_to_ptr.vmem [resolvable:$false] %s5665_s24 }
  0x39   : > { %p5663_p12 = pnand %p5662_p10, %p5865_p5  ;;  %s5667_s6 = scalar_lea.vmem %s5666_s24, 128 }
  0x3a   : > { %p5668_p1 = scmp.lt.s32.totalorder %s252_s4, %s5666_s24  ;;  %p5669_p2 = scmp.lt.s32.totalorder %s5667_s6, %s5661_s16 }
  0x3b   : > { %p5664_p0 = pneg %p5663_p12 }
  0x3c   : > { %p5670_p3 = por %p5669_p2, %p5668_p1 }
  0x3e   : > { %p5671_p4 = pnand %p5670_p3, %p5664_p0 }
  0x40   : > { %5674 = shalt.err (!%p5671_p4)
}
  0x41   : > { %4738 = dma.hbm_to_vmem [thread:$0]  (%p5865_p5), %s249_s22, 64, %s252_s4, %s238_s5  }
  0x42   : > { %257 = sbr.rel (!%p5888_p11) target bundleno = 74 (0x4a), region = 32  ;;  %s259_s1 = sand.u32 (%p5888_p11), 1, %s5729_s19  }
  0x43   : > { %s4731_s25 = sshll.u32 (%p5888_p11), %s5757_s26, 5  ;;  %s4238_s29 = sshll.u32 (%p5888_p11), %s259_s1, 6 }
  0x44   : > { %s264_s7 = scalar_lea.vmem (%p5888_p11), %s6731_s3, %s4731_s25  ;;  %s261_s24 = scalar_lea.vmem (%p5888_p11), [#allocation7], %s4238_s29 }
  0x45   : > { %v277_v0 = vld [vmem:[%s264_s7] sm:$0xff] (%p5888_p11)  ;;  %v279_v1 = vld [vmem:[%s264_s7 + $0x8] sm:$0xff] (%p5888_p11)  ;;  %v281_v2 = vld [vmem:[%s264_s7 + $0x10] sm:$0xff] (%p5888_p11) }
  0x46   : > { %278 = vst [vmem:[%s261_s24] sm:$0xff] (%p5888_p11), %v277_v0  ;;  %280 = vst [vmem:[%s261_s24 + $0x8] sm:$0xff] (%p5888_p11), %v279_v1  ;;  %v283_v3 = vld [vmem:[%s264_s7 + $0x18] sm:$0xff] (%p5888_p11)  ;;  %v285_v4 = vld [vmem:[%s264_s7 + $0x40] sm:$0xff] (%p5888_p11) }
  0x47   : > { %282 = vst [vmem:[%s261_s24 + $0x10] sm:$0xff] %v281_v2  ;;  %v287_v5 = vld [vmem:[%s264_s7 + $0x48] sm:$0xff]  ;;  %284 = vst [vmem:[%s261_s24 + $0x18] sm:$0xff] %v283_v3  ;;  %v289_v6 = vld [vmem:[%s264_s7 + $0x50] sm:$0xff] }
  0x48   : > { %286 = vst [vmem:[%s261_s24 + $0x20] sm:$0xff] %v285_v4  ;;  %288 = vst [vmem:[%s261_s24 + $0x28] sm:$0xff] %v287_v5  ;;  %v291_v7 = vld [vmem:[%s264_s7 + $0x58] sm:$0xff] }
  0x49   : > { %290 = vst [vmem:[%s261_s24 + $0x30] sm:$0xff] %v289_v6  ;;  %292 = vst [vmem:[%s261_s24 + $0x38] sm:$0xff] %v291_v7 }
  0x4a PF: > { %p4241_p5 = scmp.ge.s32.totalorder %s5761_s27, 1  ;;  %p297_p11 = scmp.lt.s32.totalorder %s5761_s27, 9 }
  0x4c   : > { %p298_p6 = pnand %p4241_p5, %p297_p11 }
  0x4d   : > { %s303_s4 = sand.u32 (!%p298_p6), 1, %s5737_s21  }
  0x4e   : > { %301 = sbr.rel (%p298_p6) target bundleno = 938 (0x3aa), region = 55  ;;  %s304_s20 = scalar_lea.sflag (!%p298_p6), [#allocation4], %s303_s4 }
  0x4f   : > { %s4736_s10 = smul.u32 (!%p298_p6), 3584, %s303_s4 }
  0x51   : > { %s5930_s6 = scalar_lea.vmem (!%p298_p6), [#allocation3], %s4736_s10 }
  0x53   : > { %5716 = dma.done.wait (%p5873_p7), %s304_s20, 57344  }
  0x54   : > { %5718 = vsyncadd (%p5873_p7), %s304_s20, 4294909952  ;;  %s4242_s28 = sshll.u32 %s303_s4, 2  ;;  %s313_s9 = scalar_lea.sflag [#allocation6], %s303_s4 }
  0x55   : > { %s5936_s11 = scalar_lea.vmem [#allocation5], %s4242_s28 }
  0x56   : > { %5720 = dma.done.wait (%p5873_p7), %s313_s9, 64  }
  0x57   : > { %5722 = vsyncadd (%p5873_p7), %s313_s9, 4294967232  ;;  %s322_s12 = sand.u32 1, %s5725_s18   ;;  %v4823_v8 = vld [vmem:[%s5930_s6 + $0xe4] ss:$16 sps:$4 sm:$0xff]   ;;  %v4827_v10 = vld [vmem:[%s5930_s6 + $0xe0] ss:$16 sps:$4 sm:$0xff]  }
  0x58   : > { %s5943_s13 = sshll.u32 %s322_s12, 6  ;;  %v4825_v9 = vld [vmem:[%s5930_s6 + $0x2e4] ss:$16 sps:$4 sm:$0xff]   ;;  %3122 = vmatprep.subr.bf16.mxu0 %v4823_v8  ;;  %v4828_v11 = vld [vmem:[%s5930_s6 + $0x2e0] ss:$16 sps:$4 sm:$0xff]   ;;  %v371_v54 = vld [vmem:[%s6728_s0 + $0x8] sm:$0xff] }
  0x59   : > { %3165 = vmatprep.subr.bf16.mxu1 %v4825_v9  ;;  %v4829_v12 = vld [vmem:[%s5930_s6 + $0xc4] ss:$16 sps:$4 sm:$0xff]   ;;  %3123 = vmatpush1.bf16.msra.mxu0 %v4827_v10  ;;  %v4833_v14 = vld [vmem:[%s5930_s6 + $0xc0] ss:$16 sps:$4 sm:$0xff]   ;;  %v385_v55 = vld [vmem:[%s6728_s0 + $0x78] sm:$0x1] }
  0x5a   : > { %3166 = vmatpush1.bf16.msra.mxu1 %v4828_v11  ;;  %v4831_v13 = vld [vmem:[%s5930_s6 + $0x2c4] ss:$16 sps:$4 sm:$0xff]   ;;  %3124 = vmatprep.subr.bf16.mxu0 %v4829_v12  ;;  %v4834_v15 = vld [vmem:[%s5930_s6 + $0x2c0] ss:$16 sps:$4 sm:$0xff]   ;;  %v373_v56 = vld [vmem:[%s6728_s0 + $0x18] sm:$0xff]  ;;  %v6006_v61 = vpack.c.bf16 %v385_v55, %v371_v54  ;;  %s6584_s20 = scalar_lea.vmem [#allocation9], %s5943_s13 }
  0x5b   : > { %3167 = vmatprep.subr.bf16.mxu1 %v4831_v13  ;;  %v4835_v16 = vld [vmem:[%s5930_s6 + $0xa4] ss:$16 sps:$4 sm:$0xff]   ;;  %v4839_v18 = vld [vmem:[%s5930_s6 + $0xa0] ss:$16 sps:$4 sm:$0xff]   ;;  %v387_v57 = vld [vmem:[%s6728_s0 + $0x88] sm:$0x1] }
  0x5c   : > { %v4837_v17 = vld [vmem:[%s5930_s6 + $0x2a4] ss:$16 sps:$4 sm:$0xff]   ;;  %v4840_v19 = vld [vmem:[%s5930_s6 + $0x2a0] ss:$16 sps:$4 sm:$0xff]   ;;  %v6008_v62 = vpack.c.bf16 %v387_v57, %v373_v56  ;;  %3154 = vmatprep.mubr.bf16.mxu0 %v6006_v61  ;;  %v391_v54 = vld [vmem:[%s6728_s0 + $0xa8] sm:$0x1] }
  0x5d   : > { %3125 = vmatpush1.bf16.msra.mxu0 %v4833_v14  ;;  %v4841_v20 = vld [vmem:[%s5930_s6 + $0x84] ss:$16 sps:$4 sm:$0xff]   ;;  %v4845_v22 = vld [vmem:[%s5930_s6 + $0x80] ss:$16 sps:$4 sm:$0xff]   ;;  %p4694_p7 = scmp.ne.s32.totalorder %s5745_s23, 0 }
  0x5e   : > { %3168 = vmatpush1.bf16.msra.mxu1 %v4834_v15  ;;  %3126 = vmatprep.subr.bf16.mxu0 %v4835_v16  ;;  %v4843_v21 = vld [vmem:[%s5930_s6 + $0x284] ss:$16 sps:$4 sm:$0xff]   ;;  %v4846_v23 = vld [vmem:[%s5930_s6 + $0x280] ss:$16 sps:$4 sm:$0xff]  }
  0x5f   : > { %3169 = vmatprep.subr.bf16.mxu1 %v4837_v17  ;;  %v4847_v24 = vld [vmem:[%s5930_s6 + $0x64] ss:$16 sps:$4 sm:$0xff]   ;;  %v4851_v26 = vld [vmem:[%s5930_s6 + $0x60] ss:$16 sps:$4 sm:$0xff]   ;;  %3197 = vmatprep.mubr.bf16.mxu1 %v6008_v62 }
  0x60   : > { %v4849_v25 = vld [vmem:[%s5930_s6 + $0x264] ss:$16 sps:$4 sm:$0xff]   ;;  %v4852_v27 = vld [vmem:[%s5930_s6 + $0x260] ss:$16 sps:$4 sm:$0xff]  }
  0x61   : > { %3127 = vmatpush1.bf16.msra.mxu0 %v4839_v18  ;;  %v4853_v28 = vld [vmem:[%s5930_s6 + $0x44] ss:$16 sps:$4 sm:$0xff]   ;;  %v4857_v30 = vld [vmem:[%s5930_s6 + $0x40] ss:$16 sps:$4 sm:$0xff]  }
  0x62   : > { %3170 = vmatpush1.bf16.msra.mxu1 %v4840_v19  ;;  %3128 = vmatprep.subr.bf16.mxu0 %v4841_v20  ;;  %v4855_v29 = vld [vmem:[%s5930_s6 + $0x244] ss:$16 sps:$4 sm:$0xff]   ;;  %v4858_v31 = vld [vmem:[%s5930_s6 + $0x240] ss:$16 sps:$4 sm:$0xff]  }
  0x63   : > { %3171 = vmatprep.subr.bf16.mxu1 %v4843_v21  ;;  %v4859_v32 = vld [vmem:[%s5930_s6 + $0x24] ss:$16 sps:$4 sm:$0xff]   ;;  %v4863_v34 = vld [vmem:[%s5930_s6 + $0x20] ss:$16 sps:$4 sm:$0xff]  }
  0x64   : > { %v4861_v33 = vld [vmem:[%s5930_s6 + $0x224] ss:$16 sps:$4 sm:$0xff]   ;;  %v4864_v35 = vld [vmem:[%s5930_s6 + $0x220] ss:$16 sps:$4 sm:$0xff]  }
  0x65   : > { %3129 = vmatpush1.bf16.msra.mxu0 %v4845_v22  ;;  %v4865_v36 = vld [vmem:[%s5930_s6 + $0x4] ss:$16 sps:$4 sm:$0xff]   ;;  %v4869_v38 = vld [vmem:[%s5930_s6] ss:$16 sps:$4 sm:$0xff]  }
  0x66   : > { %3172 = vmatpush1.bf16.msra.mxu1 %v4846_v23  ;;  %3130 = vmatprep.subr.bf16.mxu0 %v4847_v24  ;;  %v4867_v37 = vld [vmem:[%s5930_s6 + $0x204] ss:$16 sps:$4 sm:$0xff]   ;;  %v4870_v39 = vld [vmem:[%s5930_s6 + $0x200] ss:$16 sps:$4 sm:$0xff]  }
  0x67   : > { %3173 = vmatprep.subr.bf16.mxu1 %v4849_v25  ;;  %v4871_v40 = vld [vmem:[%s5930_s6 + $0x1e4] ss:$16 sps:$4 sm:$0xff]   ;;  %v4875_v42 = vld [vmem:[%s5930_s6 + $0x1e0] ss:$16 sps:$4 sm:$0xff]  }
  0x68   : > { %v4873_v41 = vld [vmem:[%s5930_s6 + $0x3e4] ss:$16 sps:$4 sm:$0xff]   ;;  %v4876_v43 = vld [vmem:[%s5930_s6 + $0x3e0] ss:$16 sps:$4 sm:$0xff]  }
  0x69   : > { %3131 = vmatpush1.bf16.msra.mxu0 %v4851_v26  ;;  %v4877_v44 = vld [vmem:[%s5930_s6 + $0x1c4] ss:$16 sps:$4 sm:$0xff]   ;;  %v4881_v46 = vld [vmem:[%s5930_s6 + $0x1c0] ss:$16 sps:$4 sm:$0xff]  }
  0x6a   : > { %3174 = vmatpush1.bf16.msra.mxu1 %v4852_v27  ;;  %3132 = vmatprep.subr.bf16.mxu0 %v4853_v28  ;;  %v4879_v45 = vld [vmem:[%s5930_s6 + $0x3c4] ss:$16 sps:$4 sm:$0xff]   ;;  %v4882_v47 = vld [vmem:[%s5930_s6 + $0x3c0] ss:$16 sps:$4 sm:$0xff]  }
  0x6b   : > { %3175 = vmatprep.subr.bf16.mxu1 %v4855_v29  ;;  %v4883_v48 = vld [vmem:[%s5930_s6 + $0x1a4] ss:$16 sps:$4 sm:$0xff]   ;;  %v4887_v50 = vld [vmem:[%s5930_s6 + $0x1a0] ss:$16 sps:$4 sm:$0xff]  }
  0x6c   : > { %v4885_v49 = vld [vmem:[%s5930_s6 + $0x3a4] ss:$16 sps:$4 sm:$0xff]   ;;  %v4888_v51 = vld [vmem:[%s5930_s6 + $0x3a0] ss:$16 sps:$4 sm:$0xff]  }
  0x6d   : > { %3133 = vmatpush1.bf16.msra.mxu0 %v4857_v30  ;;  %v4889_v52 = vld [vmem:[%s5930_s6 + $0x184] ss:$16 sps:$4 sm:$0xff]   ;;  %v4893_v58 = vld [vmem:[%s5930_s6 + $0x180] ss:$16 sps:$4 sm:$0xff]  }
  0x6e   : > { %3176 = vmatpush1.bf16.msra.mxu1 %v4858_v31  ;;  %3134 = vmatprep.subr.bf16.mxu0 %v4859_v32  ;;  %v4891_v53 = vld [vmem:[%s5930_s6 + $0x384] ss:$16 sps:$4 sm:$0xff]   ;;  %v4894_v59 = vld [vmem:[%s5930_s6 + $0x380] ss:$16 sps:$4 sm:$0xff]  }
  0x6f   : > { %3177 = vmatprep.subr.bf16.mxu1 %v4861_v33  ;;  %v4895_v60 = vld [vmem:[%s5930_s6 + $0x164] ss:$16 sps:$4 sm:$0xff]   ;;  %v4899_v0 = vld [vmem:[%s5930_s6 + $0x160] ss:$16 sps:$4 sm:$0xff]  }
  0x70   : > { %v4897_v63 = vld [vmem:[%s5930_s6 + $0x364] ss:$16 sps:$4 sm:$0xff]   ;;  %v4900_v1 = vld [vmem:[%s5930_s6 + $0x360] ss:$16 sps:$4 sm:$0xff]  }
  0x71   : > { %3135 = vmatpush1.bf16.msra.mxu0 %v4863_v34  ;;  %v4901_v2 = vld [vmem:[%s5930_s6 + $0x144] ss:$16 sps:$4 sm:$0xff]   ;;  %v4905_v4 = vld [vmem:[%s5930_s6 + $0x140] ss:$16 sps:$4 sm:$0xff]  }
  0x72   : > { %3178 = vmatpush1.bf16.msra.mxu1 %v4864_v35  ;;  %3136 = vmatprep.subr.bf16.mxu0 %v4865_v36  ;;  %v4903_v3 = vld [vmem:[%s5930_s6 + $0x344] ss:$16 sps:$4 sm:$0xff]   ;;  %v4906_v5 = vld [vmem:[%s5930_s6 + $0x340] ss:$16 sps:$4 sm:$0xff]  }
  0x73   : > { %3179 = vmatprep.subr.bf16.mxu1 %v4867_v37  ;;  %v4907_v6 = vld [vmem:[%s5930_s6 + $0x124] ss:$16 sps:$4 sm:$0xff]   ;;  %v4911_v8 = vld [vmem:[%s5930_s6 + $0x120] ss:$16 sps:$4 sm:$0xff]  }
  0x74   : > { %v4909_v7 = vld [vmem:[%s5930_s6 + $0x324] ss:$16 sps:$4 sm:$0xff]   ;;  %v4912_v9 = vld [vmem:[%s5930_s6 + $0x320] ss:$16 sps:$4 sm:$0xff]  }
  0x75   : > { %3137 = vmatpush1.bf16.msra.mxu0 %v4869_v38  ;;  %v4913_v10 = vld [vmem:[%s5930_s6 + $0x104] ss:$16 sps:$4 sm:$0xff]   ;;  %v4917_v12 = vld [vmem:[%s5930_s6 + $0x100] ss:$16 sps:$4 sm:$0xff]  }
  0x76   : > { %3180 = vmatpush1.bf16.msra.mxu1 %v4870_v39  ;;  %3138 = vmatprep.subr.bf16.mxu0 %v4871_v40  ;;  %v4915_v11 = vld [vmem:[%s5930_s6 + $0x304] ss:$16 sps:$4 sm:$0xff]   ;;  %v4918_v13 = vld [vmem:[%s5930_s6 + $0x300] ss:$16 sps:$4 sm:$0xff]  }
  0x77   : > { %3181 = vmatprep.subr.bf16.mxu1 %v4873_v41  ;;  %v370_v14 = vld [vmem:[%s6728_s0] sm:$0xff]  ;;  %v384_v15 = vld [vmem:[%s6728_s0 + $0x70] sm:$0x1] }
  0x78   : > { %v372_v16 = vld [vmem:[%s6728_s0 + $0x10] sm:$0xff]  ;;  %v386_v17 = vld [vmem:[%s6728_s0 + $0x80] sm:$0x1]  ;;  %v6041_v20 = vpack.c.bf16 %v384_v15, %v370_v14 }
  0x79   : > { %3139 = vmatpush2.bf16.msra.mxu0 %v4875_v42  ;;  %v4921_v18 = vld [vmem:[%s5930_s6 + $0x4e4] ss:$16 sps:$4 sm:$0xff]   ;;  %v6043_v21 = vpack.c.bf16 %v386_v17, %v372_v16  ;;  %v4919_v22 = vld [vmem:[%s5930_s6 + $0x4e0] ss:$16 sps:$4 sm:$0xff]  }
  0x7a   : > { %3182 = vmatpush2.bf16.msra.mxu1 %v4876_v43  ;;  %3140 = vmatprep.subr.bf16.mxu0 %v4877_v44  ;;  %v4924_v19 = vld [vmem:[%s5930_s6 + $0x6e4] ss:$16 sps:$4 sm:$0xff]   ;;  %v4922_v23 = vld [vmem:[%s5930_s6 + $0x6e0] ss:$16 sps:$4 sm:$0xff]  }
  0x7b   : > { %3183 = vmatprep.subr.bf16.mxu1 %v4879_v45  ;;  %v4927_v24 = vld [vmem:[%s5930_s6 + $0x4c4] ss:$16 sps:$4 sm:$0xff]   ;;  %v4925_v26 = vld [vmem:[%s5930_s6 + $0x4c0] ss:$16 sps:$4 sm:$0xff]  }
  0x7c   : > { %v4930_v25 = vld [vmem:[%s5930_s6 + $0x6c4] ss:$16 sps:$4 sm:$0xff]   ;;  %v4928_v27 = vld [vmem:[%s5930_s6 + $0x6c0] ss:$16 sps:$4 sm:$0xff]  }
  0x7d   : > { %3141 = vmatpush2.bf16.msra.mxu0 %v4881_v46  ;;  %v4933_v28 = vld [vmem:[%s5930_s6 + $0x4a4] ss:$16 sps:$4 sm:$0xff]   ;;  %v4931_v30 = vld [vmem:[%s5930_s6 + $0x4a0] ss:$16 sps:$4 sm:$0xff]  }
  0x7e   : > { %3184 = vmatpush2.bf16.msra.mxu1 %v4882_v47  ;;  %3142 = vmatprep.subr.bf16.mxu0 %v4883_v48  ;;  %v4936_v29 = vld [vmem:[%s5930_s6 + $0x6a4] ss:$16 sps:$4 sm:$0xff]   ;;  %v4934_v31 = vld [vmem:[%s5930_s6 + $0x6a0] ss:$16 sps:$4 sm:$0xff]   ;;  %v375_v48 = vld [vmem:[%s6728_s0 + $0x28] sm:$0xff] }
  0x7f   : > { %3185 = vmatprep.subr.bf16.mxu1 %v4885_v49  ;;  %v4939_v32 = vld [vmem:[%s5930_s6 + $0x484] ss:$16 sps:$4 sm:$0xff]   ;;  %v4937_v34 = vld [vmem:[%s5930_s6 + $0x480] ss:$16 sps:$4 sm:$0xff]   ;;  %v389_v49 = vld [vmem:[%s6728_s0 + $0x98] sm:$0x1] }
  0x80   : > { %v4942_v33 = vld [vmem:[%s5930_s6 + $0x684] ss:$16 sps:$4 sm:$0xff]   ;;  %v4940_v35 = vld [vmem:[%s5930_s6 + $0x680] ss:$16 sps:$4 sm:$0xff]  }
  0x81   : > { %3143 = vmatpush2.bf16.msra.mxu0 %v4887_v50  ;;  %v4945_v36 = vld [vmem:[%s5930_s6 + $0x464] ss:$16 sps:$4 sm:$0xff]   ;;  %v4943_v38 = vld [vmem:[%s5930_s6 + $0x460] ss:$16 sps:$4 sm:$0xff]   ;;  %v377_v50 = vld [vmem:[%s6728_s0 + $0x38] sm:$0xff] }
  0x82   : > { %3186 = vmatpush2.bf16.msra.mxu1 %v4888_v51  ;;  %3144 = vmatprep.subr.bf16.mxu0 %v4889_v52  ;;  %v4948_v37 = vld [vmem:[%s5930_s6 + $0x664] ss:$16 sps:$4 sm:$0xff]   ;;  %v4946_v39 = vld [vmem:[%s5930_s6 + $0x660] ss:$16 sps:$4 sm:$0xff]   ;;  %v6089_v55 = vpack.c.bf16 %v391_v54, %v377_v50  ;;  %v395_v50 = vld [vmem:[%s6728_s0 + $0xc8] sm:$0x1] }
  0x83   : > { %3187 = vmatprep.subr.bf16.mxu1 %v4891_v53  ;;  %v4951_v40 = vld [vmem:[%s5930_s6 + $0x444] ss:$16 sps:$4 sm:$0xff]   ;;  %v4949_v42 = vld [vmem:[%s5930_s6 + $0x440] ss:$16 sps:$4 sm:$0xff]   ;;  %v6084_v53 = vpack.c.bf16 %v389_v49, %v375_v48  ;;  %v381_v49 = vld [vmem:[%s6728_s0 + $0x58] sm:$0xff] }
  0x84   : > { %v4954_v41 = vld [vmem:[%s5930_s6 + $0x644] ss:$16 sps:$4 sm:$0xff]   ;;  %v4952_v43 = vld [vmem:[%s5930_s6 + $0x640] ss:$16 sps:$4 sm:$0xff]   ;;  %v6171_v54 = vpack.c.bf16 %v395_v50, %v381_v49 }
  0x85   : > { %3145 = vmatpush2.bf16.msra.mxu0 %v4893_v58  ;;  %v4957_v44 = vld [vmem:[%s5930_s6 + $0x424] ss:$16 sps:$4 sm:$0xff]   ;;  %v4955_v46 = vld [vmem:[%s5930_s6 + $0x420] ss:$16 sps:$4 sm:$0xff]  }
  0x86   : > { %3188 = vmatpush2.bf16.msra.mxu1 %v4894_v59  ;;  %3146 = vmatprep.subr.bf16.mxu0 %v4895_v60  ;;  %v4960_v45 = vld [vmem:[%s5930_s6 + $0x624] ss:$16 sps:$4 sm:$0xff]   ;;  %v4958_v47 = vld [vmem:[%s5930_s6 + $0x620] ss:$16 sps:$4 sm:$0xff]  }
  0x87   : > { %3189 = vmatprep.subr.bf16.mxu1 %v4897_v63  ;;  %v4963_v51 = vld [vmem:[%s5930_s6 + $0x404] ss:$16 sps:$4 sm:$0xff]   ;;  %v4961_v56 = vld [vmem:[%s5930_s6 + $0x400] ss:$16 sps:$4 sm:$0xff]  }
  0x88   : > { %v4966_v52 = vld [vmem:[%s5930_s6 + $0x604] ss:$16 sps:$4 sm:$0xff]   ;;  %v4964_v57 = vld [vmem:[%s5930_s6 + $0x600] ss:$16 sps:$4 sm:$0xff]  }
  0x89   : > { %3147 = vmatpush2.bf16.msra.mxu0 %v4899_v0  ;;  %v4969_v58 = vld [vmem:[%s5930_s6 + $0x5e4] ss:$16 sps:$4 sm:$0xff]   ;;  %v4967_v60 = vld [vmem:[%s5930_s6 + $0x5e0] ss:$16 sps:$4 sm:$0xff]  }
  0x8a   : > { %3190 = vmatpush2.bf16.msra.mxu1 %v4900_v1  ;;  %3148 = vmatprep.subr.bf16.mxu0 %v4901_v2  ;;  %v4972_v59 = vld [vmem:[%s5930_s6 + $0x7e4] ss:$16 sps:$4 sm:$0xff]   ;;  %v4970_v63 = vld [vmem:[%s5930_s6 + $0x7e0] ss:$16 sps:$4 sm:$0xff]  }
  0x8b   : > { %3191 = vmatprep.subr.bf16.mxu1 %v4903_v3  ;;  %v4975_v0 = vld [vmem:[%s5930_s6 + $0x5c4] ss:$16 sps:$4 sm:$0xff]   ;;  %v4973_v2 = vld [vmem:[%s5930_s6 + $0x5c0] ss:$16 sps:$4 sm:$0xff]  }
  0x8c   : > { %v4978_v1 = vld [vmem:[%s5930_s6 + $0x7c4] ss:$16 sps:$4 sm:$0xff]   ;;  %v4976_v3 = vld [vmem:[%s5930_s6 + $0x7c0] ss:$16 sps:$4 sm:$0xff]  }
  0x8d   : > { %3149 = vmatpush2.bf16.msra.mxu0 %v4905_v4  ;;  %v4981_v4 = vld [vmem:[%s5930_s6 + $0x5a4] ss:$16 sps:$4 sm:$0xff]   ;;  %v4991_v14 = vld [vmem:[%s5930_s6 + $0x560] ss:$16 sps:$4 sm:$0xff]  }
  0x8e   : > { %3192 = vmatpush2.bf16.msra.mxu1 %v4906_v5  ;;  %3150 = vmatprep.subr.bf16.mxu0 %v4907_v6  ;;  %v4984_v5 = vld [vmem:[%s5930_s6 + $0x7a4] ss:$16 sps:$4 sm:$0xff]   ;;  %v4979_v6 = vld [vmem:[%s5930_s6 + $0x5a0] ss:$16 sps:$4 sm:$0xff]  }
  0x8f   : > { %3193 = vmatprep.subr.bf16.mxu1 %v4909_v7  ;;  %v4982_v7 = vld [vmem:[%s5930_s6 + $0x7a0] ss:$16 sps:$4 sm:$0xff]   ;;  %v4999_v16 = vld [vmem:[%s5930_s6 + $0x544] ss:$16 sps:$4 sm:$0xff]  }
  0x90   : > { %v4994_v15 = vld [vmem:[%s5930_s6 + $0x760] ss:$16 sps:$4 sm:$0xff]   ;;  %v5002_v17 = vld [vmem:[%s5930_s6 + $0x744] ss:$16 sps:$4 sm:$0xff]  }
  0x91   : > { %3151 = vmatpush2.bf16.msra.mxu0 %v4911_v8  ;;  %v4987_v8 = vld [vmem:[%s5930_s6 + $0x584] ss:$16 sps:$4 sm:$0xff]   ;;  %v5105_v49 = vld [vmem:[%s5930_s6 + $0x900] ss:$16 sps:$4 sm:$0xff]  }
  0x92   : > { %3194 = vmatpush2.bf16.msra.mxu1 %v4912_v9  ;;  %3152 = vmatprep.subr.bf16.mxu0 %v4913_v10  ;;  %v4990_v9 = vld [vmem:[%s5930_s6 + $0x784] ss:$16 sps:$4 sm:$0xff]   ;;  %v4985_v10 = vld [vmem:[%s5930_s6 + $0x580] ss:$16 sps:$4 sm:$0xff]  }
  0x93   : > { %3195 = vmatprep.subr.bf16.mxu1 %v4915_v11  ;;  %v4988_v11 = vld [vmem:[%s5930_s6 + $0x780] ss:$16 sps:$4 sm:$0xff]  }
  0x94   : > { %v5108_v50 = vld [vmem:[%s5930_s6 + $0xb00] ss:$16 sps:$4 sm:$0xff]  }
  0x95   : > { %3153 = vmatpush2.bf16.msra.mxu0 %v4917_v12  ;;  %v4993_v12 = vld [vmem:[%s5930_s6 + $0x564] ss:$16 sps:$4 sm:$0xff]  }
  0x96   : > { %3196 = vmatpush2.bf16.msra.mxu1 %v4918_v13  ;;  %3208 = vmatprep.subr.bf16.mxu0 %v4921_v18  ;;  %v4996_v13 = vld [vmem:[%s5930_s6 + $0x764] ss:$16 sps:$4 sm:$0xff]   ;;  %v4997_v18 = vld [vmem:[%s5930_s6 + $0x540] ss:$16 sps:$4 sm:$0xff]  }
  0x97   : > { %3251 = vmatprep.subr.bf16.mxu1 %v4924_v19  ;;  %v5000_v19 = vld [vmem:[%s5930_s6 + $0x740] ss:$16 sps:$4 sm:$0xff]  }
  0x98   : > { %3155 = vmatmul.mubr.bf16.vlgmr.msra.gmra.mxu0 %v6041_v20 }
  0x99   : > { %3198 = vmatmul.mubr.bf16.vlgmr.msra.gmra.mxu1 %v6043_v21  ;;  %3209 = vmatpush1.bf16.msra.mxu0 %v4919_v22  ;;  %v5005_v22 = vld [vmem:[%s5930_s6 + $0x524] ss:$16 sps:$4 sm:$0xff]  }
  0x9a   : > { %3252 = vmatpush1.bf16.msra.mxu1 %v4922_v23  ;;  %3210 = vmatprep.subr.bf16.mxu0 %v4927_v24  ;;  %v5008_v23 = vld [vmem:[%s5930_s6 + $0x724] ss:$16 sps:$4 sm:$0xff]   ;;  %v5003_v24 = vld [vmem:[%s5930_s6 + $0x520] ss:$16 sps:$4 sm:$0xff]  }
  0x9b   : > { %3253 = vmatprep.subr.bf16.mxu1 %v4930_v25  ;;  %3240 = vmatprep.mubr.bf16.mxu0 %v6084_v53  ;;  %v5006_v25 = vld [vmem:[%s5930_s6 + $0x720] ss:$16 sps:$4 sm:$0xff]  }
  0x9c   : > { %3283 = vmatprep.mubr.bf16.mxu1 %v6089_v55 }
  0x9d   : > { %3211 = vmatpush1.bf16.msra.mxu0 %v4925_v26  ;;  %v5011_v26 = vld [vmem:[%s5930_s6 + $0x504] ss:$16 sps:$4 sm:$0xff]  }
  0x9e   : > { %3254 = vmatpush1.bf16.msra.mxu1 %v4928_v27  ;;  %3212 = vmatprep.subr.bf16.mxu0 %v4933_v28  ;;  %v5014_v27 = vld [vmem:[%s5930_s6 + $0x704] ss:$16 sps:$4 sm:$0xff]   ;;  %v5009_v28 = vld [vmem:[%s5930_s6 + $0x500] ss:$16 sps:$4 sm:$0xff]  }
  0x9f   : > { %3255 = vmatprep.subr.bf16.mxu1 %v4936_v29  ;;  %v5012_v29 = vld [vmem:[%s5930_s6 + $0x700] ss:$16 sps:$4 sm:$0xff]  }
  0xa1   : > { %3213 = vmatpush1.bf16.msra.mxu0 %v4931_v30  ;;  %v374_v30 = vld [vmem:[%s6728_s0 + $0x20] sm:$0xff] }
  0xa2   : > { %3256 = vmatpush1.bf16.msra.mxu1 %v4934_v31  ;;  %3214 = vmatprep.subr.bf16.mxu0 %v4939_v32  ;;  %v388_v31 = vld [vmem:[%s6728_s0 + $0x90] sm:$0x1] }
  0xa3   : > { %3257 = vmatprep.subr.bf16.mxu1 %v4942_v33  ;;  %v376_v32 = vld [vmem:[%s6728_s0 + $0x30] sm:$0xff]  ;;  %v390_v33 = vld [vmem:[%s6728_s0 + $0xa0] sm:$0x1] }
  0xa5   : > { %3215 = vmatpush1.bf16.msra.mxu0 %v4937_v34  ;;  %v5017_v34 = vld [vmem:[%s5930_s6 + $0x8e4] ss:$16 sps:$4 sm:$0xff]  }
  0xa6   : > { %3258 = vmatpush1.bf16.msra.mxu1 %v4940_v35  ;;  %3216 = vmatprep.subr.bf16.mxu0 %v4945_v36  ;;  %v5020_v35 = vld [vmem:[%s5930_s6 + $0xae4] ss:$16 sps:$4 sm:$0xff]   ;;  %v6141_v36 = vpack.c.bf16 %v388_v31, %v374_v30  ;;  %v5081_v30 = vld [vmem:[%s5930_s6 + $0x980] ss:$16 sps:$4 sm:$0xff]  }
  0xa7   : > { %3259 = vmatprep.subr.bf16.mxu1 %v4948_v37  ;;  %v6143_v37 = vpack.c.bf16 %v390_v33, %v376_v32  ;;  %v5084_v31 = vld [vmem:[%s5930_s6 + $0xb80] ss:$16 sps:$4 sm:$0xff]   ;;  %v5089_v32 = vld [vmem:[%s5930_s6 + $0x964] ss:$16 sps:$4 sm:$0xff]  }
  0xa8   : > { %v5092_v33 = vld [vmem:[%s5930_s6 + $0xb64] ss:$16 sps:$4 sm:$0xff]  }
  0xa9   : > { %3217 = vmatpush1.bf16.msra.mxu0 %v4943_v38  ;;  %v5015_v38 = vld [vmem:[%s5930_s6 + $0x8e0] ss:$16 sps:$4 sm:$0xff]  }
  0xaa   : > { %3260 = vmatpush1.bf16.msra.mxu1 %v4946_v39  ;;  %3218 = vmatprep.subr.bf16.mxu0 %v4951_v40  ;;  %v5018_v39 = vld [vmem:[%s5930_s6 + $0xae0] ss:$16 sps:$4 sm:$0xff]   ;;  %v5023_v40 = vld [vmem:[%s5930_s6 + $0x8c4] ss:$16 sps:$4 sm:$0xff]  }
  0xab   : > { %3261 = vmatprep.subr.bf16.mxu1 %v4954_v41  ;;  %v5026_v41 = vld [vmem:[%s5930_s6 + $0xac4] ss:$16 sps:$4 sm:$0xff]  }
  0xad   : > { %3219 = vmatpush1.bf16.msra.mxu0 %v4949_v42  ;;  %v5021_v42 = vld [vmem:[%s5930_s6 + $0x8c0] ss:$16 sps:$4 sm:$0xff]  }
  0xae   : > { %3262 = vmatpush1.bf16.msra.mxu1 %v4952_v43  ;;  %3220 = vmatprep.subr.bf16.mxu0 %v4957_v44  ;;  %v5024_v43 = vld [vmem:[%s5930_s6 + $0xac0] ss:$16 sps:$4 sm:$0xff]   ;;  %v5029_v44 = vld [vmem:[%s5930_s6 + $0x8a4] ss:$16 sps:$4 sm:$0xff]  }
  0xaf   : > { %3263 = vmatprep.subr.bf16.mxu1 %v4960_v45  ;;  %v5032_v45 = vld [vmem:[%s5930_s6 + $0xaa4] ss:$16 sps:$4 sm:$0xff]  }
  0xb1   : > { %3221 = vmatpush1.bf16.msra.mxu0 %v4955_v46  ;;  %v379_v46 = vld [vmem:[%s6728_s0 + $0x48] sm:$0xff] }
  0xb2   : > { %3264 = vmatpush1.bf16.msra.mxu1 %v4958_v47  ;;  %3222 = vmatprep.subr.bf16.mxu0 %v4963_v51  ;;  %v393_v47 = vld [vmem:[%s6728_s0 + $0xb8] sm:$0x1]  ;;  %v5027_v51 = vld [vmem:[%s5930_s6 + $0x8a0] ss:$16 sps:$4 sm:$0xff]  }
  0xb3   : > { %3265 = vmatprep.subr.bf16.mxu1 %v4966_v52  ;;  %v6161_v48 = vpack.c.bf16 %v393_v47, %v379_v46  ;;  %v5030_v52 = vld [vmem:[%s5930_s6 + $0xaa0] ss:$16 sps:$4 sm:$0xff]   ;;  %v5107_v46 = vld [vmem:[%s5930_s6 + $0x904] ss:$16 sps:$4 sm:$0xff]  }
  0xb4   : > { %v5110_v47 = vld [vmem:[%s5930_s6 + $0xb04] ss:$16 sps:$4 sm:$0xff]  }
  0xb5   : > { %3223 = vmatpush1.bf16.msra.mxu0 %v4961_v56  ;;  %v5035_v56 = vld [vmem:[%s5930_s6 + $0x884] ss:$16 sps:$4 sm:$0xff]  }
  0xb6   : > { %3266 = vmatpush1.bf16.msra.mxu1 %v4964_v57  ;;  %3224 = vmatprep.subr.bf16.mxu0 %v4969_v58  ;;  %v5038_v57 = vld [vmem:[%s5930_s6 + $0xa84] ss:$16 sps:$4 sm:$0xff]   ;;  %v5033_v58 = vld [vmem:[%s5930_s6 + $0x880] ss:$16 sps:$4 sm:$0xff]  }
  0xb7   : > { %3267 = vmatprep.subr.bf16.mxu1 %v4972_v59  ;;  %v5036_v59 = vld [vmem:[%s5930_s6 + $0xa80] ss:$16 sps:$4 sm:$0xff]  }
  0xb9   : > { %3225 = vmatpush2.bf16.msra.mxu0 %v4967_v60  ;;  %v5041_v60 = vld [vmem:[%s5930_s6 + $0x864] ss:$16 sps:$4 sm:$0xff]  }
  0xba   : > { %3268 = vmatpush2.bf16.msra.mxu1 %v4970_v63  ;;  %3226 = vmatprep.subr.bf16.mxu0 %v4975_v0  ;;  %v5044_v63 = vld [vmem:[%s5930_s6 + $0xa64] ss:$16 sps:$4 sm:$0xff]   ;;  %v5039_v0 = vld [vmem:[%s5930_s6 + $0x860] ss:$16 sps:$4 sm:$0xff]  }
  0xbb   : > { %3269 = vmatprep.subr.bf16.mxu1 %v4978_v1  ;;  %v5042_v1 = vld [vmem:[%s5930_s6 + $0xa60] ss:$16 sps:$4 sm:$0xff]  }
  0xbd   : > { %3227 = vmatpush2.bf16.msra.mxu0 %v4973_v2  ;;  %v5047_v2 = vld [vmem:[%s5930_s6 + $0x844] ss:$16 sps:$4 sm:$0xff]  }
  0xbe   : > { %3270 = vmatpush2.bf16.msra.mxu1 %v4976_v3  ;;  %3228 = vmatprep.subr.bf16.mxu0 %v4981_v4  ;;  %v5050_v3 = vld [vmem:[%s5930_s6 + $0xa44] ss:$16 sps:$4 sm:$0xff]   ;;  %v5045_v4 = vld [vmem:[%s5930_s6 + $0x840] ss:$16 sps:$4 sm:$0xff]  }
  0xbf   : > { %3271 = vmatprep.subr.bf16.mxu1 %v4984_v5  ;;  %v5048_v5 = vld [vmem:[%s5930_s6 + $0xa40] ss:$16 sps:$4 sm:$0xff]  }
  0xc1   : > { %3229 = vmatpush2.bf16.msra.mxu0 %v4979_v6  ;;  %v5053_v6 = vld [vmem:[%s5930_s6 + $0x824] ss:$16 sps:$4 sm:$0xff]  }
  0xc2   : > { %3272 = vmatpush2.bf16.msra.mxu1 %v4982_v7  ;;  %3230 = vmatprep.subr.bf16.mxu0 %v4987_v8  ;;  %v5056_v7 = vld [vmem:[%s5930_s6 + $0xa24] ss:$16 sps:$4 sm:$0xff]   ;;  %v5051_v8 = vld [vmem:[%s5930_s6 + $0x820] ss:$16 sps:$4 sm:$0xff]  }
  0xc3   : > { %3273 = vmatprep.subr.bf16.mxu1 %v4990_v9  ;;  %v5054_v9 = vld [vmem:[%s5930_s6 + $0xa20] ss:$16 sps:$4 sm:$0xff]  }
  0xc5   : > { %3231 = vmatpush2.bf16.msra.mxu0 %v4985_v10  ;;  %v5059_v10 = vld [vmem:[%s5930_s6 + $0x804] ss:$16 sps:$4 sm:$0xff]  }
  0xc6   : > { %3274 = vmatpush2.bf16.msra.mxu1 %v4988_v11  ;;  %3232 = vmatprep.subr.bf16.mxu0 %v4993_v12  ;;  %v5062_v11 = vld [vmem:[%s5930_s6 + $0xa04] ss:$16 sps:$4 sm:$0xff]   ;;  %v5057_v12 = vld [vmem:[%s5930_s6 + $0x800] ss:$16 sps:$4 sm:$0xff]  }
  0xc7   : > { %3275 = vmatprep.subr.bf16.mxu1 %v4996_v13  ;;  %v5060_v13 = vld [vmem:[%s5930_s6 + $0xa00] ss:$16 sps:$4 sm:$0xff]  }
  0xc9   : > { %3233 = vmatpush2.bf16.msra.mxu0 %v4991_v14  ;;  %v5065_v14 = vld [vmem:[%s5930_s6 + $0x9e4] ss:$16 sps:$4 sm:$0xff]  }
  0xca   : > { %3276 = vmatpush2.bf16.msra.mxu1 %v4994_v15  ;;  %3234 = vmatprep.subr.bf16.mxu0 %v4999_v16  ;;  %v5068_v15 = vld [vmem:[%s5930_s6 + $0xbe4] ss:$16 sps:$4 sm:$0xff]   ;;  %v5063_v16 = vld [vmem:[%s5930_s6 + $0x9e0] ss:$16 sps:$4 sm:$0xff]  }
  0xcb   : > { %3277 = vmatprep.subr.bf16.mxu1 %v5002_v17  ;;  %v5066_v17 = vld [vmem:[%s5930_s6 + $0xbe0] ss:$16 sps:$4 sm:$0xff]  }
  0xcd   : > { %3235 = vmatpush2.bf16.msra.mxu0 %v4997_v18  ;;  %v5071_v18 = vld [vmem:[%s5930_s6 + $0x9c4] ss:$16 sps:$4 sm:$0xff]  }
  0xce   : > { %3278 = vmatpush2.bf16.msra.mxu1 %v5000_v19  ;;  %3236 = vmatprep.subr.bf16.mxu0 %v5005_v22  ;;  %v5074_v19 = vld [vmem:[%s5930_s6 + $0xbc4] ss:$16 sps:$4 sm:$0xff]   ;;  %v5069_v22 = vld [vmem:[%s5930_s6 + $0x9c0] ss:$16 sps:$4 sm:$0xff]  }
  0xcf   : > { %3279 = vmatprep.subr.bf16.mxu1 %v5008_v23  ;;  %v5072_v23 = vld [vmem:[%s5930_s6 + $0xbc0] ss:$16 sps:$4 sm:$0xff]  }
  0xd1   : > { %3237 = vmatpush2.bf16.msra.mxu0 %v5003_v24  ;;  %v5077_v24 = vld [vmem:[%s5930_s6 + $0x9a4] ss:$16 sps:$4 sm:$0xff]  }
  0xd2   : > { %3280 = vmatpush2.bf16.msra.mxu1 %v5006_v25  ;;  %3238 = vmatprep.subr.bf16.mxu0 %v5011_v26  ;;  %v5080_v25 = vld [vmem:[%s5930_s6 + $0xba4] ss:$16 sps:$4 sm:$0xff]   ;;  %v5075_v26 = vld [vmem:[%s5930_s6 + $0x9a0] ss:$16 sps:$4 sm:$0xff]  }
  0xd3   : > { %3281 = vmatprep.subr.bf16.mxu1 %v5014_v27  ;;  %v5078_v27 = vld [vmem:[%s5930_s6 + $0xba0] ss:$16 sps:$4 sm:$0xff]  }
  0xd5   : > { %3239 = vmatpush2.bf16.msra.mxu0 %v5009_v28  ;;  %v5083_v28 = vld [vmem:[%s5930_s6 + $0x984] ss:$16 sps:$4 sm:$0xff]  }
  0xd6   : > { %3282 = vmatpush2.bf16.msra.mxu1 %v5012_v29  ;;  %3294 = vmatprep.subr.bf16.mxu0 %v5017_v34  ;;  %v5086_v29 = vld [vmem:[%s5930_s6 + $0xb84] ss:$16 sps:$4 sm:$0xff]   ;;  %v5087_v34 = vld [vmem:[%s5930_s6 + $0x960] ss:$16 sps:$4 sm:$0xff]  }
  0xd7   : > { %3337 = vmatprep.subr.bf16.mxu1 %v5020_v35  ;;  %v5090_v35 = vld [vmem:[%s5930_s6 + $0xb60] ss:$16 sps:$4 sm:$0xff]  }
  0xd8   : > { %3241 = vmatmul.mubr.bf16.vlgmr.msra.gmra.mxu0 %v6141_v36 }
  0xd9   : > { %3284 = vmatmul.mubr.bf16.vlgmr.msra.gmra.mxu1 %v6143_v37  ;;  %3295 = vmatpush1.bf16.msra.mxu0 %v5015_v38  ;;  %v5095_v38 = vld [vmem:[%s5930_s6 + $0x944] ss:$16 sps:$4 sm:$0xff]  }
  0xda   : > { %3338 = vmatpush1.bf16.msra.mxu1 %v5018_v39  ;;  %3296 = vmatprep.subr.bf16.mxu0 %v5023_v40  ;;  %v5098_v39 = vld [vmem:[%s5930_s6 + $0xb44] ss:$16 sps:$4 sm:$0xff]   ;;  %v5093_v40 = vld [vmem:[%s5930_s6 + $0x940] ss:$16 sps:$4 sm:$0xff]  }
  0xdb   : > { %3339 = vmatprep.subr.bf16.mxu1 %v5026_v41  ;;  %3326 = vmatprep.mubr.bf16.mxu0 %v6161_v48  ;;  %v5096_v41 = vld [vmem:[%s5930_s6 + $0xb40] ss:$16 sps:$4 sm:$0xff]  }
  0xdc   : > { %3369 = vmatprep.mubr.bf16.mxu1 %v6171_v54 }
  0xdd   : > { %3297 = vmatpush1.bf16.msra.mxu0 %v5021_v42  ;;  %v5101_v42 = vld [vmem:[%s5930_s6 + $0x924] ss:$16 sps:$4 sm:$0xff]  }
  0xde   : > { %3340 = vmatpush1.bf16.msra.mxu1 %v5024_v43  ;;  %3298 = vmatprep.subr.bf16.mxu0 %v5029_v44  ;;  %v5104_v43 = vld [vmem:[%s5930_s6 + $0xb24] ss:$16 sps:$4 sm:$0xff]   ;;  %v5099_v44 = vld [vmem:[%s5930_s6 + $0x920] ss:$16 sps:$4 sm:$0xff]  }
  0xdf   : > { %3341 = vmatprep.subr.bf16.mxu1 %v5032_v45  ;;  %v5102_v45 = vld [vmem:[%s5930_s6 + $0xb20] ss:$16 sps:$4 sm:$0xff]  }
  0xe1   : > { %3299 = vmatpush1.bf16.msra.mxu0 %v5027_v51  ;;  %v378_v51 = vld [vmem:[%s6728_s0 + $0x40] sm:$0xff] }
  0xe2   : > { %3342 = vmatpush1.bf16.msra.mxu1 %v5030_v52  ;;  %3300 = vmatprep.subr.bf16.mxu0 %v5035_v56  ;;  %v392_v52 = vld [vmem:[%s6728_s0 + $0xb0] sm:$0x1] }
  0xe3   : > { %3343 = vmatprep.subr.bf16.mxu1 %v5038_v57  ;;  %v380_v56 = vld [vmem:[%s6728_s0 + $0x50] sm:$0xff]  ;;  %v394_v57 = vld [vmem:[%s6728_s0 + $0xc0] sm:$0x1] }
  0xe5   : > { %3301 = vmatpush1.bf16.msra.mxu0 %v5033_v58  ;;  %v5113_v58 = vld [vmem:[%s5930_s6 + $0xce4] ss:$16 sps:$4 sm:$0xff]  }
  0xe6   : > { %3344 = vmatpush1.bf16.msra.mxu1 %v5036_v59  ;;  %3302 = vmatprep.subr.bf16.mxu0 %v5041_v60  ;;  %v5116_v59 = vld [vmem:[%s5930_s6 + $0xec] ss:$16 sps:$4 sm:$0xff]   ;;  %v5111_v60 = vld [vmem:[%s5930_s6 + $0xce0] ss:$16 sps:$4 sm:$0xff]  }
  0xe7   : > { %3345 = vmatprep.subr.bf16.mxu1 %v5044_v63  ;;  %v383_v63 = vld [vmem:[%s6728_s0 + $0x68] sm:$0xff] }
  0xe9   : > { %3303 = vmatpush1.bf16.msra.mxu0 %v5039_v0  ;;  %v6245_v0 = vpack.c.bf16 %v392_v52, %v378_v51  ;;  %v5177_v51 = vld [vmem:[%s5930_s6 + $0xd80] ss:$16 sps:$4 sm:$0xff]   ;;  %v5180_v52 = vld [vmem:[%s5930_s6 + $0x188] ss:$16 sps:$4 sm:$0xff]  }
  0xea   : > { %3346 = vmatpush1.bf16.msra.mxu1 %v5042_v1  ;;  %3304 = vmatprep.subr.bf16.mxu0 %v5047_v2  ;;  %v6247_v1 = vpack.c.bf16 %v394_v57, %v380_v56  ;;  %v397_v2 = vld [vmem:[%s6728_s0 + $0xd8] sm:$0x1]  ;;  %v5185_v56 = vld [vmem:[%s5930_s6 + $0xd64] ss:$16 sps:$4 sm:$0xff]   ;;  %v5188_v57 = vld [vmem:[%s5930_s6 + $0x16c] ss:$16 sps:$4 sm:$0xff]  }
  0xeb   : > { %3347 = vmatprep.subr.bf16.mxu1 %v5050_v3  ;;  %v5114_v3 = vld [vmem:[%s5930_s6 + $0xe8] ss:$16 sps:$4 sm:$0xff]  }
  0xed   : > { %3305 = vmatpush1.bf16.msra.mxu0 %v5045_v4  ;;  %v5119_v4 = vld [vmem:[%s5930_s6 + $0xcc4] ss:$16 sps:$4 sm:$0xff]  }
  0xee   : > { %3348 = vmatpush1.bf16.msra.mxu1 %v5048_v5  ;;  %3306 = vmatprep.subr.bf16.mxu0 %v5053_v6  ;;  %v5122_v5 = vld [vmem:[%s5930_s6 + $0xcc] ss:$16 sps:$4 sm:$0xff]   ;;  %v6255_v6 = vpack.c.bf16 %v397_v2, %v383_v63  ;;  %v5189_v2 = vld [vmem:[%s5930_s6 + $0xd40] ss:$16 sps:$4 sm:$0xff]  }
  0xef   : > { %3349 = vmatprep.subr.bf16.mxu1 %v5056_v7  ;;  %v5117_v7 = vld [vmem:[%s5930_s6 + $0xcc0] ss:$16 sps:$4 sm:$0xff]   ;;  %v5194_v63 = vld [vmem:[%s5930_s6 + $0x14c] ss:$16 sps:$4 sm:$0xff]  }
  0xf1   : > { %3307 = vmatpush1.bf16.msra.mxu0 %v5051_v8  ;;  %v5120_v8 = vld [vmem:[%s5930_s6 + $0xc8] ss:$16 sps:$4 sm:$0xff]  }
  0xf2   : > { %3350 = vmatpush1.bf16.msra.mxu1 %v5054_v9  ;;  %3308 = vmatprep.subr.bf16.mxu0 %v5059_v10  ;;  %v5125_v9 = vld [vmem:[%s5930_s6 + $0xca4] ss:$16 sps:$4 sm:$0xff]   ;;  %v5128_v10 = vld [vmem:[%s5930_s6 + $0xac] ss:$16 sps:$4 sm:$0xff]  }
  0xf3   : > { %3351 = vmatprep.subr.bf16.mxu1 %v5062_v11  ;;  %v5123_v11 = vld [vmem:[%s5930_s6 + $0xca0] ss:$16 sps:$4 sm:$0xff]  }
  0xf5   : > { %3309 = vmatpush1.bf16.msra.mxu0 %v5057_v12  ;;  %v5126_v12 = vld [vmem:[%s5930_s6 + $0xa8] ss:$16 sps:$4 sm:$0xff]  }
  0xf6   : > { %3352 = vmatpush1.bf16.msra.mxu1 %v5060_v13  ;;  %3310 = vmatprep.subr.bf16.mxu0 %v5065_v14  ;;  %v5131_v13 = vld [vmem:[%s5930_s6 + $0xc84] ss:$16 sps:$4 sm:$0xff]   ;;  %v5134_v14 = vld [vmem:[%s5930_s6 + $0x8c] ss:$16 sps:$4 sm:$0xff]  }
  0xf7   : > { %3353 = vmatprep.subr.bf16.mxu1 %v5068_v15  ;;  %v5129_v15 = vld [vmem:[%s5930_s6 + $0xc80] ss:$16 sps:$4 sm:$0xff]  }
  0xf9   : > { %3311 = vmatpush2.bf16.msra.mxu0 %v5063_v16  ;;  %v5132_v16 = vld [vmem:[%s5930_s6 + $0x88] ss:$16 sps:$4 sm:$0xff]  }
  0xfa   : > { %3354 = vmatpush2.bf16.msra.mxu1 %v5066_v17  ;;  %3312 = vmatprep.subr.bf16.mxu0 %v5071_v18  ;;  %v5140_v17 = vld [vmem:[%s5930_s6 + $0x6c] ss:$16 sps:$4 sm:$0xff]   ;;  %v5135_v18 = vld [vmem:[%s5930_s6 + $0xc60] ss:$16 sps:$4 sm:$0xff]  }
  0xfb   : > { %3355 = vmatprep.subr.bf16.mxu1 %v5074_v19  ;;  %v5138_v19 = vld [vmem:[%s5930_s6 + $0x68] ss:$16 sps:$4 sm:$0xff]  }
  0xfd   : > { %3313 = vmatpush2.bf16.msra.mxu0 %v5069_v22  ;;  %v5143_v22 = vld [vmem:[%s5930_s6 + $0xc44] ss:$16 sps:$4 sm:$0xff]  }
  0xfe   : > { %3356 = vmatpush2.bf16.msra.mxu1 %v5072_v23  ;;  %3314 = vmatprep.subr.bf16.mxu0 %v5077_v24  ;;  %v5146_v23 = vld [vmem:[%s5930_s6 + $0x4c] ss:$16 sps:$4 sm:$0xff]   ;;  %v5141_v24 = vld [vmem:[%s5930_s6 + $0xc40] ss:$16 sps:$4 sm:$0xff]  }
  0xff   : > { %3357 = vmatprep.subr.bf16.mxu1 %v5080_v25  ;;  %v5144_v25 = vld [vmem:[%s5930_s6 + $0x48] ss:$16 sps:$4 sm:$0xff]  }
 0x101   : > { %3315 = vmatpush2.bf16.msra.mxu0 %v5075_v26  ;;  %v5149_v26 = vld [vmem:[%s5930_s6 + $0xc24] ss:$16 sps:$4 sm:$0xff]  }
 0x102   : > { %3358 = vmatpush2.bf16.msra.mxu1 %v5078_v27  ;;  %3316 = vmatprep.subr.bf16.mxu0 %v5083_v28  ;;  %v5152_v27 = vld [vmem:[%s5930_s6 + $0x2c] ss:$16 sps:$4 sm:$0xff]   ;;  %v5147_v28 = vld [vmem:[%s5930_s6 + $0xc20] ss:$16 sps:$4 sm:$0xff]  }
 0x103   : > { %3359 = vmatprep.subr.bf16.mxu1 %v5086_v29  ;;  %v5150_v29 = vld [vmem:[%s5930_s6 + $0x28] ss:$16 sps:$4 sm:$0xff]  }
 0x105   : > { %3317 = vmatpush2.bf16.msra.mxu0 %v5081_v30  ;;  %v5155_v30 = vld [vmem:[%s5930_s6 + $0xc04] ss:$16 sps:$4 sm:$0xff]  }
 0x106   : > { %3360 = vmatpush2.bf16.msra.mxu1 %v5084_v31  ;;  %3318 = vmatprep.subr.bf16.mxu0 %v5089_v32  ;;  %v5158_v31 = vld [vmem:[%s5930_s6 + $0xc] ss:$16 sps:$4 sm:$0xff]   ;;  %v5153_v32 = vld [vmem:[%s5930_s6 + $0xc00] ss:$16 sps:$4 sm:$0xff]  }
 0x107   : > { %3361 = vmatprep.subr.bf16.mxu1 %v5092_v33  ;;  %v5156_v33 = vld [vmem:[%s5930_s6 + $0x8] ss:$16 sps:$4 sm:$0xff]  }
 0x109   : > { %3319 = vmatpush2.bf16.msra.mxu0 %v5087_v34  ;;  %v5161_v34 = vld [vmem:[%s5930_s6 + $0xde4] ss:$16 sps:$4 sm:$0xff]  }
 0x10a   : > { %3362 = vmatpush2.bf16.msra.mxu1 %v5090_v35  ;;  %3320 = vmatprep.subr.bf16.mxu0 %v5095_v38  ;;  %v5164_v35 = vld [vmem:[%s5930_s6 + $0x1ec] ss:$16 sps:$4 sm:$0xff]   ;;  %v5159_v38 = vld [vmem:[%s5930_s6 + $0xde0] ss:$16 sps:$4 sm:$0xff]  }
 0x10b   : > { %3363 = vmatprep.subr.bf16.mxu1 %v5098_v39  ;;  %v5162_v39 = vld [vmem:[%s5930_s6 + $0x1e8] ss:$16 sps:$4 sm:$0xff]  }
 0x10d   : > { %3321 = vmatpush2.bf16.msra.mxu0 %v5093_v40  ;;  %v5167_v40 = vld [vmem:[%s5930_s6 + $0xdc4] ss:$16 sps:$4 sm:$0xff]  }
 0x10e   : > { %3364 = vmatpush2.bf16.msra.mxu1 %v5096_v41  ;;  %3322 = vmatprep.subr.bf16.mxu0 %v5101_v42  ;;  %v5170_v41 = vld [vmem:[%s5930_s6 + $0x1cc] ss:$16 sps:$4 sm:$0xff]   ;;  %v5165_v42 = vld [vmem:[%s5930_s6 + $0xdc0] ss:$16 sps:$4 sm:$0xff]  }
 0x10f   : > { %3365 = vmatprep.subr.bf16.mxu1 %v5104_v43  ;;  %v5168_v43 = vld [vmem:[%s5930_s6 + $0x1c8] ss:$16 sps:$4 sm:$0xff]  }
 0x111   : > { %3323 = vmatpush2.bf16.msra.mxu0 %v5099_v44  ;;  %v5173_v44 = vld [vmem:[%s5930_s6 + $0xda4] ss:$16 sps:$4 sm:$0xff]  }
 0x112   : > { %3366 = vmatpush2.bf16.msra.mxu1 %v5102_v45  ;;  %3324 = vmatprep.subr.bf16.mxu0 %v5107_v46  ;;  %v5176_v45 = vld [vmem:[%s5930_s6 + $0x1ac] ss:$16 sps:$4 sm:$0xff]   ;;  %v5171_v46 = vld [vmem:[%s5930_s6 + $0xda0] ss:$16 sps:$4 sm:$0xff]  }
 0x113   : > { %3367 = vmatprep.subr.bf16.mxu1 %v5110_v47  ;;  %v5174_v47 = vld [vmem:[%s5930_s6 + $0x1a8] ss:$16 sps:$4 sm:$0xff]  }
 0x115   : > { %3325 = vmatpush2.bf16.msra.mxu0 %v5105_v49  ;;  %v5179_v49 = vld [vmem:[%s5930_s6 + $0xd84] ss:$16 sps:$4 sm:$0xff]  }
 0x116   : > { %3368 = vmatpush2.bf16.msra.mxu1 %v5108_v50  ;;  %3380 = vmatprep.subr.bf16.mxu0 %v5113_v58  ;;  %v5182_v50 = vld [vmem:[%s5930_s6 + $0x18c] ss:$16 sps:$4 sm:$0xff]   ;;  %v5183_v58 = vld [vmem:[%s5930_s6 + $0xd60] ss:$16 sps:$4 sm:$0xff]  }
 0x117   : > { %3423 = vmatprep.subr.bf16.mxu1 %v5116_v59  ;;  %v5186_v59 = vld [vmem:[%s5930_s6 + $0x168] ss:$16 sps:$4 sm:$0xff]  }
 0x118   : > { %3327 = vmatmul.mubr.bf16.vlgmr.msra.gmra.mxu0 %v6245_v0 }
 0x119   : > { %3370 = vmatmul.mubr.bf16.vlgmr.msra.gmra.mxu1 %v6247_v1  ;;  %3381 = vmatpush1.bf16.msra.mxu0 %v5111_v60  ;;  %v5191_v60 = vld [vmem:[%s5930_s6 + $0xd44] ss:$16 sps:$4 sm:$0xff]  }
 0x11a   : > { %3424 = vmatpush1.bf16.msra.mxu1 %v5114_v3  ;;  %3382 = vmatprep.subr.bf16.mxu0 %v5119_v4  ;;  %v5192_v3 = vld [vmem:[%s5930_s6 + $0x148] ss:$16 sps:$4 sm:$0xff]   ;;  %v5197_v4 = vld [vmem:[%s5930_s6 + $0xd24] ss:$16 sps:$4 sm:$0xff]  }
 0x11b   : > { %3425 = vmatprep.subr.bf16.mxu1 %v5122_v5  ;;  %3412 = vmatprep.mubr.bf16.mxu0 %v6255_v6  ;;  %v5200_v5 = vld [vmem:[%s5930_s6 + $0x12c] ss:$16 sps:$4 sm:$0xff]  }
 0x11c   : > { %3455 = vmatprep.mubr.bf16.mxu1 %v6006_v61  ;;  %v5137_v61 = vld [vmem:[%s5930_s6 + $0xc64] ss:$16 sps:$4 sm:$0xff]  }
 0x11d   : > { %3383 = vmatpush1.bf16.msra.mxu0 %v5117_v7  ;;  %v5195_v7 = vld [vmem:[%s5930_s6 + $0xd20] ss:$16 sps:$4 sm:$0xff]  }
 0x11e   : > { %3426 = vmatpush1.bf16.msra.mxu1 %v5120_v8  ;;  %3384 = vmatprep.subr.bf16.mxu0 %v5125_v9  ;;  %v5198_v8 = vld [vmem:[%s5930_s6 + $0x128] ss:$16 sps:$4 sm:$0xff]   ;;  %v5203_v9 = vld [vmem:[%s5930_s6 + $0xd04] ss:$16 sps:$4 sm:$0xff]  }
 0x11f   : > { %3427 = vmatprep.subr.bf16.mxu1 %v5128_v10  ;;  %v5206_v10 = vld [vmem:[%s5930_s6 + $0x10c] ss:$16 sps:$4 sm:$0xff]  }
 0x121   : > { %3385 = vmatpush1.bf16.msra.mxu0 %v5123_v11  ;;  %v5201_v11 = vld [vmem:[%s5930_s6 + $0xd00] ss:$16 sps:$4 sm:$0xff]  }
 0x122   : > { %3428 = vmatpush1.bf16.msra.mxu1 %v5126_v12  ;;  %3386 = vmatprep.subr.bf16.mxu0 %v5131_v13  ;;  %v5204_v12 = vld [vmem:[%s5930_s6 + $0x108] ss:$16 sps:$4 sm:$0xff]   ;;  %v382_v13 = vld [vmem:[%s6728_s0 + $0x60] sm:$0xff] }
 0x123   : > { %3429 = vmatprep.subr.bf16.mxu1 %v5134_v14  ;;  %v396_v14 = vld [vmem:[%s6728_s0 + $0xd0] sm:$0x1] }
 0x125   : > { %3387 = vmatpush1.bf16.msra.mxu0 %v5129_v15  ;;  %v5209_v15 = vld [vmem:[%s5930_s6 + $0x2ec] ss:$16 sps:$4 sm:$0xff]  }
 0x126   : > { %3430 = vmatpush1.bf16.msra.mxu1 %v5132_v16  ;;  %3388 = vmatprep.subr.bf16.mxu0 %v5137_v61  ;;  %v5212_v16 = vld [vmem:[%s5930_s6 + $0x4ec] ss:$16 sps:$4 sm:$0xff]   ;;  %v6327_v61 = vpack.c.bf16 %v396_v14, %v382_v13 }
 0x127   : > { %3431 = vmatprep.subr.bf16.mxu1 %v5140_v17  ;;  %v5207_v17 = vld [vmem:[%s5930_s6 + $0x2e8] ss:$16 sps:$4 sm:$0xff]   ;;  %v5287_v13 = vld [vmem:[%s5930_s6 + $0x34c] ss:$16 sps:$4 sm:$0xff]  }
 0x128   : > { %v5290_v14 = vld [vmem:[%s5930_s6 + $0x54c] ss:$16 sps:$4 sm:$0xff]  }
 0x129   : > { %3389 = vmatpush1.bf16.msra.mxu0 %v5135_v18  ;;  %v5210_v18 = vld [vmem:[%s5930_s6 + $0x4e8] ss:$16 sps:$4 sm:$0xff]  }
 0x12a   : > { %3432 = vmatpush1.bf16.msra.mxu1 %v5138_v19  ;;  %3390 = vmatprep.subr.bf16.mxu0 %v5143_v22  ;;  %v5215_v19 = vld [vmem:[%s5930_s6 + $0x2cc] ss:$16 sps:$4 sm:$0xff]  }
 0x12b   : > { %3433 = vmatprep.subr.bf16.mxu1 %v5146_v23  ;;  %v5218_v22 = vld [vmem:[%s5930_s6 + $0x4cc] ss:$16 sps:$4 sm:$0xff]   ;;  %v5213_v23 = vld [vmem:[%s5930_s6 + $0x2c8] ss:$16 sps:$4 sm:$0xff]  }
 0x12d   : > { %3391 = vmatpush1.bf16.msra.mxu0 %v5141_v24  ;;  %v5216_v24 = vld [vmem:[%s5930_s6 + $0x4c8] ss:$16 sps:$4 sm:$0xff]  }
 0x12e   : > { %3434 = vmatpush1.bf16.msra.mxu1 %v5144_v25  ;;  %3392 = vmatprep.subr.bf16.mxu0 %v5149_v26  ;;  %v5221_v25 = vld [vmem:[%s5930_s6 + $0x2ac] ss:$16 sps:$4 sm:$0xff]  }
 0x12f   : > { %3435 = vmatprep.subr.bf16.mxu1 %v5152_v27  ;;  %v5224_v26 = vld [vmem:[%s5930_s6 + $0x4ac] ss:$16 sps:$4 sm:$0xff]   ;;  %v5219_v27 = vld [vmem:[%s5930_s6 + $0x2a8] ss:$16 sps:$4 sm:$0xff]  }
 0x131   : > { %3393 = vmatpush1.bf16.msra.mxu0 %v5147_v28  ;;  %v5227_v28 = vld [vmem:[%s5930_s6 + $0x28c] ss:$16 sps:$4 sm:$0xff]  }
 0x132   : > { %3436 = vmatpush1.bf16.msra.mxu1 %v5150_v29  ;;  %3394 = vmatprep.subr.bf16.mxu0 %v5155_v30  ;;  %v5230_v29 = vld [vmem:[%s5930_s6 + $0x48c] ss:$16 sps:$4 sm:$0xff]   ;;  %v5225_v30 = vld [vmem:[%s5930_s6 + $0x288] ss:$16 sps:$4 sm:$0xff]  }
 0x133   : > { %3437 = vmatprep.subr.bf16.mxu1 %v5158_v31  ;;  %v5236_v31 = vld [vmem:[%s5930_s6 + $0x46c] ss:$16 sps:$4 sm:$0xff]  }
 0x135   : > { %3395 = vmatpush1.bf16.msra.mxu0 %v5153_v32  ;;  %v5231_v32 = vld [vmem:[%s5930_s6 + $0x268] ss:$16 sps:$4 sm:$0xff]  }
 0x136   : > { %3438 = vmatpush1.bf16.msra.mxu1 %v5156_v33  ;;  %3396 = vmatprep.subr.bf16.mxu0 %v5161_v34  ;;  %v5234_v33 = vld [vmem:[%s5930_s6 + $0x468] ss:$16 sps:$4 sm:$0xff]   ;;  %v5239_v34 = vld [vmem:[%s5930_s6 + $0x24c] ss:$16 sps:$4 sm:$0xff]  }
 0x137   : > { %3439 = vmatprep.subr.bf16.mxu1 %v5164_v35  ;;  %v5242_v35 = vld [vmem:[%s5930_s6 + $0x44c] ss:$16 sps:$4 sm:$0xff]  }
 0x139   : > { %3397 = vmatpush2.bf16.msra.mxu0 %v5159_v38  ;;  %v5237_v38 = vld [vmem:[%s5930_s6 + $0x248] ss:$16 sps:$4 sm:$0xff]  }
 0x13a   : > { %3440 = vmatpush2.bf16.msra.mxu1 %v5162_v39  ;;  %3398 = vmatprep.subr.bf16.mxu0 %v5167_v40  ;;  %v5240_v39 = vld [vmem:[%s5930_s6 + $0x448] ss:$16 sps:$4 sm:$0xff]   ;;  %v5245_v40 = vld [vmem:[%s5930_s6 + $0x22c] ss:$16 sps:$4 sm:$0xff]  }
 0x13b   : > { %3441 = vmatprep.subr.bf16.mxu1 %v5170_v41  ;;  %v5248_v41 = vld [vmem:[%s5930_s6 + $0x42c] ss:$16 sps:$4 sm:$0xff]  }
 0x13d   : > { %3399 = vmatpush2.bf16.msra.mxu0 %v5165_v42  ;;  %v5243_v42 = vld [vmem:[%s5930_s6 + $0x228] ss:$16 sps:$4 sm:$0xff]  }
 0x13e   : > { %3442 = vmatpush2.bf16.msra.mxu1 %v5168_v43  ;;  %3400 = vmatprep.subr.bf16.mxu0 %v5173_v44  ;;  %v5246_v43 = vld [vmem:[%s5930_s6 + $0x428] ss:$16 sps:$4 sm:$0xff]   ;;  %v5251_v44 = vld [vmem:[%s5930_s6 + $0x20c] ss:$16 sps:$4 sm:$0xff]  }
 0x13f   : > { %3443 = vmatprep.subr.bf16.mxu1 %v5176_v45  ;;  %v5254_v45 = vld [vmem:[%s5930_s6 + $0x40c] ss:$16 sps:$4 sm:$0xff]  }
 0x141   : > { %3401 = vmatpush2.bf16.msra.mxu0 %v5171_v46  ;;  %v5249_v46 = vld [vmem:[%s5930_s6 + $0x208] ss:$16 sps:$4 sm:$0xff]  }
 0x142   : > { %3444 = vmatpush2.bf16.msra.mxu1 %v5174_v47  ;;  %3402 = vmatprep.subr.bf16.mxu0 %v5179_v49  ;;  %v5252_v47 = vld [vmem:[%s5930_s6 + $0x408] ss:$16 sps:$4 sm:$0xff]   ;;  %v5257_v49 = vld [vmem:[%s5930_s6 + $0x3ec] ss:$16 sps:$4 sm:$0xff]  }
 0x143   : > { %3445 = vmatprep.subr.bf16.mxu1 %v5182_v50  ;;  %v5260_v50 = vld [vmem:[%s5930_s6 + $0x5ec] ss:$16 sps:$4 sm:$0xff]  }
 0x145   : > { %3403 = vmatpush2.bf16.msra.mxu0 %v5177_v51  ;;  %v5255_v51 = vld [vmem:[%s5930_s6 + $0x3e8] ss:$16 sps:$4 sm:$0xff]  }
 0x146   : > { %3446 = vmatpush2.bf16.msra.mxu1 %v5180_v52  ;;  %3404 = vmatprep.subr.bf16.mxu0 %v5185_v56  ;;  %v5258_v52 = vld [vmem:[%s5930_s6 + $0x5e8] ss:$16 sps:$4 sm:$0xff]   ;;  %v5263_v56 = vld [vmem:[%s5930_s6 + $0x3cc] ss:$16 sps:$4 sm:$0xff]  }
 0x147   : > { %3447 = vmatprep.subr.bf16.mxu1 %v5188_v57  ;;  %v5266_v57 = vld [vmem:[%s5930_s6 + $0x5cc] ss:$16 sps:$4 sm:$0xff]  }
 0x149   : > { %3405 = vmatpush2.bf16.msra.mxu0 %v5183_v58  ;;  %v5261_v58 = vld [vmem:[%s5930_s6 + $0x3c8] ss:$16 sps:$4 sm:$0xff]  }
 0x14a   : > { %3448 = vmatpush2.bf16.msra.mxu1 %v5186_v59  ;;  %3406 = vmatprep.subr.bf16.mxu0 %v5191_v60  ;;  %v5264_v59 = vld [vmem:[%s5930_s6 + $0x5c8] ss:$16 sps:$4 sm:$0xff]   ;;  %v5269_v60 = vld [vmem:[%s5930_s6 + $0x3ac] ss:$16 sps:$4 sm:$0xff]  }
 0x14b   : > { %3449 = vmatprep.subr.bf16.mxu1 %v5194_v63  ;;  %v5272_v63 = vld [vmem:[%s5930_s6 + $0x5ac] ss:$16 sps:$4 sm:$0xff]  }
 0x14d   : > { %3407 = vmatpush2.bf16.msra.mxu0 %v5189_v2  ;;  %v5267_v2 = vld [vmem:[%s5930_s6 + $0x3a8] ss:$16 sps:$4 sm:$0xff]  }
 0x14e   : > { %3450 = vmatpush2.bf16.msra.mxu1 %v5192_v3  ;;  %3408 = vmatprep.subr.bf16.mxu0 %v5197_v4  ;;  %v5270_v3 = vld [vmem:[%s5930_s6 + $0x5a8] ss:$16 sps:$4 sm:$0xff]   ;;  %v5275_v4 = vld [vmem:[%s5930_s6 + $0x38c] ss:$16 sps:$4 sm:$0xff]  }
 0x14f   : > { %3451 = vmatprep.subr.bf16.mxu1 %v5200_v5  ;;  %v5278_v5 = vld [vmem:[%s5930_s6 + $0x58c] ss:$16 sps:$4 sm:$0xff]  }
 0x151   : > { %3409 = vmatpush2.bf16.msra.mxu0 %v5195_v7  ;;  %v5273_v7 = vld [vmem:[%s5930_s6 + $0x388] ss:$16 sps:$4 sm:$0xff]  }
 0x152   : > { %3452 = vmatpush2.bf16.msra.mxu1 %v5198_v8  ;;  %3410 = vmatprep.subr.bf16.mxu0 %v5203_v9  ;;  %v5276_v8 = vld [vmem:[%s5930_s6 + $0x588] ss:$16 sps:$4 sm:$0xff]   ;;  %v5281_v9 = vld [vmem:[%s5930_s6 + $0x36c] ss:$16 sps:$4 sm:$0xff]  }
 0x153   : > { %3453 = vmatprep.subr.bf16.mxu1 %v5206_v10  ;;  %v5284_v10 = vld [vmem:[%s5930_s6 + $0x56c] ss:$16 sps:$4 sm:$0xff]  }
 0x155   : > { %3411 = vmatpush2.bf16.msra.mxu0 %v5201_v11  ;;  %v5279_v11 = vld [vmem:[%s5930_s6 + $0x368] ss:$16 sps:$4 sm:$0xff]  }
 0x156   : > { %3454 = vmatpush2.bf16.msra.mxu1 %v5204_v12  ;;  %3466 = vmatprep.subr.bf16.mxu0 %v5209_v15  ;;  %v5282_v12 = vld [vmem:[%s5930_s6 + $0x568] ss:$16 sps:$4 sm:$0xff]  }
 0x157   : > { %3509 = vmatprep.subr.bf16.mxu1 %v5212_v16  ;;  %v5285_v15 = vld [vmem:[%s5930_s6 + $0x348] ss:$16 sps:$4 sm:$0xff]  }
 0x158   : > { %3413 = vmatmul.mubr.bf16.vlgmr.msra.gmra.mxu0 %v6327_v61  ;;  %v5288_v16 = vld [vmem:[%s5930_s6 + $0x548] ss:$16 sps:$4 sm:$0xff]  }
 0x159   : > { %3456 = vmatmul.mubr.bf16.vlgmr.msra.gmra.mxu1 %v6041_v20  ;;  %3467 = vmatpush1.bf16.msra.mxu0 %v5207_v17  ;;  %v5222_v20 = vld [vmem:[%s5930_s6 + $0x4a8] ss:$16 sps:$4 sm:$0xff]   ;;  %v5293_v17 = vld [vmem:[%s5930_s6 + $0x32c] ss:$16 sps:$4 sm:$0xff]  }
 0x15a   : > { %3510 = vmatpush1.bf16.msra.mxu1 %v5210_v18  ;;  %3468 = vmatprep.subr.bf16.mxu0 %v5215_v19  ;;  %v5296_v18 = vld [vmem:[%s5930_s6 + $0x52c] ss:$16 sps:$4 sm:$0xff]   ;;  %v5291_v19 = vld [vmem:[%s5930_s6 + $0x328] ss:$16 sps:$4 sm:$0xff]  }
 0x15b   : > { %3511 = vmatprep.subr.bf16.mxu1 %v5218_v22  ;;  %3498 = vmatprep.mubr.bf16.mxu0 %v6008_v62  ;;  %v5228_v62 = vld [vmem:[%s5930_s6 + $0x488] ss:$16 sps:$4 sm:$0xff]  }
 0x15c   : > { %3541 = vmatprep.mubr.bf16.mxu1 %v6084_v53  ;;  %v5233_v53 = vld [vmem:[%s5930_s6 + $0x26c] ss:$16 sps:$4 sm:$0xff]   ;;  %v5294_v22 = vld [vmem:[%s5930_s6 + $0x528] ss:$16 sps:$4 sm:$0xff]  }
 0x15d   : > { %3469 = vmatpush1.bf16.msra.mxu0 %v5213_v23  ;;  %v5299_v23 = vld [vmem:[%s5930_s6 + $0x30c] ss:$16 sps:$4 sm:$0xff]  }
 0x15e   : > { %3512 = vmatpush1.bf16.msra.mxu1 %v5216_v24  ;;  %3470 = vmatprep.subr.bf16.mxu0 %v5221_v25  ;;  %v5302_v24 = vld [vmem:[%s5930_s6 + $0x50c] ss:$16 sps:$4 sm:$0xff]   ;;  %v5297_v25 = vld [vmem:[%s5930_s6 + $0x308] ss:$16 sps:$4 sm:$0xff]  }
 0x15f   : > { %3513 = vmatprep.subr.bf16.mxu1 %v5224_v26  ;;  %v5300_v26 = vld [vmem:[%s5930_s6 + $0x508] ss:$16 sps:$4 sm:$0xff]  }
 0x161   : > { %3471 = vmatpush1.bf16.msra.mxu0 %v5219_v27  ;;  %v5305_v27 = vld [vmem:[%s5930_s6 + $0x6ec] ss:$16 sps:$4 sm:$0xff]  }
 0x162   : > { %3514 = vmatpush1.bf16.msra.mxu1 %v5222_v20  ;;  %3472 = vmatprep.subr.bf16.mxu0 %v5227_v28  ;;  %v5308_v20 = vld [vmem:[%s5930_s6 + $0x8ec] ss:$16 sps:$4 sm:$0xff]   ;;  %v5303_v28 = vld [vmem:[%s5930_s6 + $0x6e8] ss:$16 sps:$4 sm:$0xff]  }
 0x163   : > { %3515 = vmatprep.subr.bf16.mxu1 %v5230_v29  ;;  %v5306_v29 = vld [vmem:[%s5930_s6 + $0x8e8] ss:$16 sps:$4 sm:$0xff]  }
 0x165   : > { %3473 = vmatpush1.bf16.msra.mxu0 %v5225_v30  ;;  %v5311_v30 = vld [vmem:[%s5930_s6 + $0x6cc] ss:$16 sps:$4 sm:$0xff]  }
 0x166   : > { %3516 = vmatpush1.bf16.msra.mxu1 %v5228_v62  ;;  %3474 = vmatprep.subr.bf16.mxu0 %v5233_v53  ;;  %v5314_v62 = vld [vmem:[%s5930_s6 + $0x8cc] ss:$16 sps:$4 sm:$0xff]   ;;  %v5309_v53 = vld [vmem:[%s5930_s6 + $0x6c8] ss:$16 sps:$4 sm:$0xff]  }
 0x167   : > { %3517 = vmatprep.subr.bf16.mxu1 %v5236_v31  ;;  %v5312_v31 = vld [vmem:[%s5930_s6 + $0x8c8] ss:$16 sps:$4 sm:$0xff]  }
 0x169   : > { %3475 = vmatpush1.bf16.msra.mxu0 %v5231_v32  ;;  %v5317_v32 = vld [vmem:[%s5930_s6 + $0x6ac] ss:$16 sps:$4 sm:$0xff]  }
 0x16a   : > { %3518 = vmatpush1.bf16.msra.mxu1 %v5234_v33  ;;  %3476 = vmatprep.subr.bf16.mxu0 %v5239_v34  ;;  %v5320_v33 = vld [vmem:[%s5930_s6 + $0x8ac] ss:$16 sps:$4 sm:$0xff]  }
 0x16b   : > { %3519 = vmatprep.subr.bf16.mxu1 %v5242_v35  ;;  %v5323_v34 = vld [vmem:[%s5930_s6 + $0x68c] ss:$16 sps:$4 sm:$0xff]  }
 0x16c   : > { %v5326_v35 = vld [vmem:[%s5930_s6 + $0x88c] ss:$16 sps:$4 sm:$0xff]  }
 0x16d   : > { %3477 = vmatpush1.bf16.msra.mxu0 %v5237_v38  ;;  %v5321_v38 = vld [vmem:[%s5930_s6 + $0x688] ss:$16 sps:$4 sm:$0xff]  }
 0x16e   : > { %3520 = vmatpush1.bf16.msra.mxu1 %v5240_v39  ;;  %3478 = vmatprep.subr.bf16.mxu0 %v5245_v40  ;;  %v5332_v39 = vld [vmem:[%s5930_s6 + $0x86c] ss:$16 sps:$4 sm:$0xff]   ;;  %v5327_v40 = vld [vmem:[%s5930_s6 + $0x668] ss:$16 sps:$4 sm:$0xff]  }
 0x16f   : > { %3521 = vmatprep.subr.bf16.mxu1 %v5248_v41  ;;  %v5330_v41 = vld [vmem:[%s5930_s6 + $0x868] ss:$16 sps:$4 sm:$0xff]  }
 0x171   : > { %3479 = vmatpush1.bf16.msra.mxu0 %v5243_v42  ;;  %v5335_v42 = vld [vmem:[%s5930_s6 + $0x64c] ss:$16 sps:$4 sm:$0xff]  }
 0x172   : > { %3522 = vmatpush1.bf16.msra.mxu1 %v5246_v43  ;;  %3480 = vmatprep.subr.bf16.mxu0 %v5251_v44  ;;  %v5338_v43 = vld [vmem:[%s5930_s6 + $0x84c] ss:$16 sps:$4 sm:$0xff]   ;;  %v5333_v44 = vld [vmem:[%s5930_s6 + $0x648] ss:$16 sps:$4 sm:$0xff]  }
 0x173   : > { %3523 = vmatprep.subr.bf16.mxu1 %v5254_v45  ;;  %v5336_v45 = vld [vmem:[%s5930_s6 + $0x848] ss:$16 sps:$4 sm:$0xff]  }
 0x175   : > { %3481 = vmatpush1.bf16.msra.mxu0 %v5249_v46  ;;  %v5341_v46 = vld [vmem:[%s5930_s6 + $0x62c] ss:$16 sps:$4 sm:$0xff]  }
 0x176   : > { %3524 = vmatpush1.bf16.msra.mxu1 %v5252_v47  ;;  %3482 = vmatprep.subr.bf16.mxu0 %v5257_v49  ;;  %v5344_v47 = vld [vmem:[%s5930_s6 + $0x82c] ss:$16 sps:$4 sm:$0xff]   ;;  %v5339_v49 = vld [vmem:[%s5930_s6 + $0x628] ss:$16 sps:$4 sm:$0xff]  }
 0x177   : > { %3525 = vmatprep.subr.bf16.mxu1 %v5260_v50  ;;  %v5342_v50 = vld [vmem:[%s5930_s6 + $0x828] ss:$16 sps:$4 sm:$0xff]  }
 0x179   : > { %3483 = vmatpush2.bf16.msra.mxu0 %v5255_v51  ;;  %v5347_v51 = vld [vmem:[%s5930_s6 + $0x60c] ss:$16 sps:$4 sm:$0xff]  }
 0x17a   : > { %3526 = vmatpush2.bf16.msra.mxu1 %v5258_v52  ;;  %3484 = vmatprep.subr.bf16.mxu0 %v5263_v56  ;;  %v5350_v52 = vld [vmem:[%s5930_s6 + $0x80c] ss:$16 sps:$4 sm:$0xff]   ;;  %v5345_v56 = vld [vmem:[%s5930_s6 + $0x608] ss:$16 sps:$4 sm:$0xff]  }
 0x17b   : > { %3527 = vmatprep.subr.bf16.mxu1 %v5266_v57  ;;  %v5348_v57 = vld [vmem:[%s5930_s6 + $0x808] ss:$16 sps:$4 sm:$0xff]  }
 0x17d   : > { %3485 = vmatpush2.bf16.msra.mxu0 %v5261_v58  ;;  %v5353_v58 = vld [vmem:[%s5930_s6 + $0x7ec] ss:$16 sps:$4 sm:$0xff]  }
 0x17e   : > { %3528 = vmatpush2.bf16.msra.mxu1 %v5264_v59  ;;  %3486 = vmatprep.subr.bf16.mxu0 %v5269_v60  ;;  %v5356_v59 = vld [vmem:[%s5930_s6 + $0x9ec] ss:$16 sps:$4 sm:$0xff]   ;;  %v5351_v60 = vld [vmem:[%s5930_s6 + $0x7e8] ss:$16 sps:$4 sm:$0xff]  }
 0x17f   : > { %3529 = vmatprep.subr.bf16.mxu1 %v5272_v63  ;;  %v5354_v63 = vld [vmem:[%s5930_s6 + $0x9e8] ss:$16 sps:$4 sm:$0xff]  }
 0x181   : > { %3487 = vmatpush2.bf16.msra.mxu0 %v5267_v2  ;;  %v5359_v2 = vld [vmem:[%s5930_s6 + $0x7cc] ss:$16 sps:$4 sm:$0xff]  }
 0x182   : > { %3530 = vmatpush2.bf16.msra.mxu1 %v5270_v3  ;;  %3488 = vmatprep.subr.bf16.mxu0 %v5275_v4  ;;  %v5362_v3 = vld [vmem:[%s5930_s6 + $0x9cc] ss:$16 sps:$4 sm:$0xff]   ;;  %v5357_v4 = vld [vmem:[%s5930_s6 + $0x7c8] ss:$16 sps:$4 sm:$0xff]  }
 0x183   : > { %3531 = vmatprep.subr.bf16.mxu1 %v5278_v5  ;;  %v5360_v5 = vld [vmem:[%s5930_s6 + $0x9c8] ss:$16 sps:$4 sm:$0xff]  }
 0x185   : > { %3489 = vmatpush2.bf16.msra.mxu0 %v5273_v7  ;;  %v5365_v7 = vld [vmem:[%s5930_s6 + $0x7ac] ss:$16 sps:$4 sm:$0xff]  }
 0x186   : > { %3532 = vmatpush2.bf16.msra.mxu1 %v5276_v8  ;;  %3490 = vmatprep.subr.bf16.mxu0 %v5281_v9  ;;  %v5368_v8 = vld [vmem:[%s5930_s6 + $0x9ac] ss:$16 sps:$4 sm:$0xff]   ;;  %v5363_v9 = vld [vmem:[%s5930_s6 + $0x7a8] ss:$16 sps:$4 sm:$0xff]  }
 0x187   : > { %3533 = vmatprep.subr.bf16.mxu1 %v5284_v10  ;;  %v5366_v10 = vld [vmem:[%s5930_s6 + $0x9a8] ss:$16 sps:$4 sm:$0xff]  }
 0x189   : > { %3491 = vmatpush2.bf16.msra.mxu0 %v5279_v11  ;;  %v5371_v11 = vld [vmem:[%s5930_s6 + $0x78c] ss:$16 sps:$4 sm:$0xff]  }
 0x18a   : > { %3534 = vmatpush2.bf16.msra.mxu1 %v5282_v12  ;;  %3492 = vmatprep.subr.bf16.mxu0 %v5287_v13  ;;  %v5374_v12 = vld [vmem:[%s5930_s6 + $0x98c] ss:$16 sps:$4 sm:$0xff]   ;;  %v5369_v13 = vld [vmem:[%s5930_s6 + $0x788] ss:$16 sps:$4 sm:$0xff]  }
 0x18b   : > { %3535 = vmatprep.subr.bf16.mxu1 %v5290_v14  ;;  %v5372_v14 = vld [vmem:[%s5930_s6 + $0x988] ss:$16 sps:$4 sm:$0xff]  }
 0x18d   : > { %3493 = vmatpush2.bf16.msra.mxu0 %v5285_v15  ;;  %v5377_v15 = vld [vmem:[%s5930_s6 + $0x76c] ss:$16 sps:$4 sm:$0xff]  }
 0x18e   : > { %3536 = vmatpush2.bf16.msra.mxu1 %v5288_v16  ;;  %3494 = vmatprep.subr.bf16.mxu0 %v5293_v17  ;;  %v5380_v16 = vld [vmem:[%s5930_s6 + $0x96c] ss:$16 sps:$4 sm:$0xff]   ;;  %v5375_v17 = vld [vmem:[%s5930_s6 + $0x768] ss:$16 sps:$4 sm:$0xff]  }
 0x18f   : > { %3537 = vmatprep.subr.bf16.mxu1 %v5296_v18  ;;  %v5378_v18 = vld [vmem:[%s5930_s6 + $0x968] ss:$16 sps:$4 sm:$0xff]  }
 0x191   : > { %3495 = vmatpush2.bf16.msra.mxu0 %v5291_v19  ;;  %v5383_v19 = vld [vmem:[%s5930_s6 + $0x74c] ss:$16 sps:$4 sm:$0xff]  }
 0x192   : > { %3538 = vmatpush2.bf16.msra.mxu1 %v5294_v22  ;;  %3496 = vmatprep.subr.bf16.mxu0 %v5299_v23  ;;  %v5386_v22 = vld [vmem:[%s5930_s6 + $0x94c] ss:$16 sps:$4 sm:$0xff]   ;;  %v5381_v23 = vld [vmem:[%s5930_s6 + $0x748] ss:$16 sps:$4 sm:$0xff]  }
 0x193   : > { %3539 = vmatprep.subr.bf16.mxu1 %v5302_v24  ;;  %v5384_v24 = vld [vmem:[%s5930_s6 + $0x948] ss:$16 sps:$4 sm:$0xff]  }
 0x195   : > { %3497 = vmatpush2.bf16.msra.mxu0 %v5297_v25  ;;  %v5389_v25 = vld [vmem:[%s5930_s6 + $0x72c] ss:$16 sps:$4 sm:$0xff]  }
 0x196   : > { %3540 = vmatpush2.bf16.msra.mxu1 %v5300_v26  ;;  %3552 = vmatprep.subr.bf16.mxu0 %v5305_v27  ;;  %v5392_v26 = vld [vmem:[%s5930_s6 + $0x92c] ss:$16 sps:$4 sm:$0xff]   ;;  %v5387_v27 = vld [vmem:[%s5930_s6 + $0x728] ss:$16 sps:$4 sm:$0xff]  }
 0x197   : > { %3595 = vmatprep.subr.bf16.mxu1 %v5308_v20  ;;  %v5390_v20 = vld [vmem:[%s5930_s6 + $0x928] ss:$16 sps:$4 sm:$0xff]  }
 0x198   : > { %3499 = vmatmul.mubr.bf16.vlgmr.msra.gmra.mxu0 %v6043_v21  ;;  %v5315_v21 = vld [vmem:[%s5930_s6 + $0x6a8] ss:$16 sps:$4 sm:$0xff]  }
 0x199   : > { %3542 = vmatmul.mubr.bf16.vlgmr.msra.gmra.mxu1 %v6141_v36  ;;  %3553 = vmatpush1.bf16.msra.mxu0 %v5303_v28  ;;  %v5318_v36 = vld [vmem:[%s5930_s6 + $0x8a8] ss:$16 sps:$4 sm:$0xff]   ;;  %v5395_v28 = vld [vmem:[%s5930_s6 + $0x70c] ss:$16 sps:$4 sm:$0xff]  }
 0x19a   : > { %3596 = vmatpush1.bf16.msra.mxu1 %v5306_v29  ;;  %3554 = vmatprep.subr.bf16.mxu0 %v5311_v30  ;;  %v5398_v29 = vld [vmem:[%s5930_s6 + $0x90c] ss:$16 sps:$4 sm:$0xff]   ;;  %v5393_v30 = vld [vmem:[%s5930_s6 + $0x708] ss:$16 sps:$4 sm:$0xff]  }
 0x19b   : > { %3597 = vmatprep.subr.bf16.mxu1 %v5314_v62  ;;  %3584 = vmatprep.mubr.bf16.mxu0 %v6089_v55  ;;  %v5324_v55 = vld [vmem:[%s5930_s6 + $0x888] ss:$16 sps:$4 sm:$0xff]  }
 0x19c   : > { %3627 = vmatprep.mubr.bf16.mxu1 %v6161_v48  ;;  %v5329_v48 = vld [vmem:[%s5930_s6 + $0x66c] ss:$16 sps:$4 sm:$0xff]   ;;  %v5396_v62 = vld [vmem:[%s5930_s6 + $0x908] ss:$16 sps:$4 sm:$0xff]  }
 0x19d   : > { %3555 = vmatpush1.bf16.msra.mxu0 %v5309_v53  ;;  %v5401_v53 = vld [vmem:[%s5930_s6 + $0xaec] ss:$16 sps:$4 sm:$0xff]  }
 0x19e   : > { %3598 = vmatpush1.bf16.msra.mxu1 %v5312_v31  ;;  %3556 = vmatprep.subr.bf16.mxu0 %v5317_v32  ;;  %v5404_v31 = vld [vmem:[%s5930_s6 + $0xcec] ss:$16 sps:$4 sm:$0xff]   ;;  %v5399_v32 = vld [vmem:[%s5930_s6 + $0xae8] ss:$16 sps:$4 sm:$0xff]  }
 0x19f   : > { %3599 = vmatprep.subr.bf16.mxu1 %v5320_v33  ;;  %v5402_v33 = vld [vmem:[%s5930_s6 + $0xce8] ss:$16 sps:$4 sm:$0xff]  }
 0x1a1   : > { %3557 = vmatpush1.bf16.msra.mxu0 %v5315_v21  ;;  %v5407_v21 = vld [vmem:[%s5930_s6 + $0xacc] ss:$16 sps:$4 sm:$0xff]  }
 0x1a2   : > { %3600 = vmatpush1.bf16.msra.mxu1 %v5318_v36  ;;  %3558 = vmatprep.subr.bf16.mxu0 %v5323_v34  ;;  %v5410_v36 = vld [vmem:[%s5930_s6 + $0xccc] ss:$16 sps:$4 sm:$0xff]   ;;  %v5405_v34 = vld [vmem:[%s5930_s6 + $0xac8] ss:$16 sps:$4 sm:$0xff]  }
 0x1a3   : > { %3601 = vmatprep.subr.bf16.mxu1 %v5326_v35  ;;  %v5408_v35 = vld [vmem:[%s5930_s6 + $0xcc8] ss:$16 sps:$4 sm:$0xff]  }
 0x1a5   : > { %3559 = vmatpush1.bf16.msra.mxu0 %v5321_v38  ;;  %v5413_v38 = vld [vmem:[%s5930_s6 + $0xaac] ss:$16 sps:$4 sm:$0xff]  }
 0x1a6   : > { %3602 = vmatpush1.bf16.msra.mxu1 %v5324_v55  ;;  %3560 = vmatprep.subr.bf16.mxu0 %v5329_v48  ;;  %v5416_v55 = vld [vmem:[%s5930_s6 + $0xcac] ss:$16 sps:$4 sm:$0xff]  }
 0x1a7   : > { %3603 = vmatprep.subr.bf16.mxu1 %v5332_v39  ;;  %v5419_v48 = vld [vmem:[%s5930_s6 + $0xa8c] ss:$16 sps:$4 sm:$0xff]  }
 0x1a8   : > { %v5422_v39 = vld [vmem:[%s5930_s6 + $0xc8c] ss:$16 sps:$4 sm:$0xff]  }
 0x1a9   : > { %3561 = vmatpush1.bf16.msra.mxu0 %v5327_v40  ;;  %v5417_v40 = vld [vmem:[%s5930_s6 + $0xa88] ss:$16 sps:$4 sm:$0xff]  }
 0x1aa   : > { %3604 = vmatpush1.bf16.msra.mxu1 %v5330_v41  ;;  %3562 = vmatprep.subr.bf16.mxu0 %v5335_v42  ;;  %v5428_v41 = vld [vmem:[%s5930_s6 + $0xc6c] ss:$16 sps:$4 sm:$0xff]   ;;  %v5423_v42 = vld [vmem:[%s5930_s6 + $0xa68] ss:$16 sps:$4 sm:$0xff]  }
 0x1ab   : > { %3605 = vmatprep.subr.bf16.mxu1 %v5338_v43  ;;  %v5426_v43 = vld [vmem:[%s5930_s6 + $0xc68] ss:$16 sps:$4 sm:$0xff]  }
 0x1ad   : > { %3563 = vmatpush1.bf16.msra.mxu0 %v5333_v44  ;;  %v5431_v44 = vld [vmem:[%s5930_s6 + $0xa4c] ss:$16 sps:$4 sm:$0xff]  }
 0x1ae   : > { %3606 = vmatpush1.bf16.msra.mxu1 %v5336_v45  ;;  %3564 = vmatprep.subr.bf16.mxu0 %v5341_v46  ;;  %v5434_v45 = vld [vmem:[%s5930_s6 + $0xc4c] ss:$16 sps:$4 sm:$0xff]   ;;  %v5429_v46 = vld [vmem:[%s5930_s6 + $0xa48] ss:$16 sps:$4 sm:$0xff]  }
 0x1af   : > { %3607 = vmatprep.subr.bf16.mxu1 %v5344_v47  ;;  %v5432_v47 = vld [vmem:[%s5930_s6 + $0xc48] ss:$16 sps:$4 sm:$0xff]  }
 0x1b1   : > { %3565 = vmatpush1.bf16.msra.mxu0 %v5339_v49  ;;  %v5437_v49 = vld [vmem:[%s5930_s6 + $0xa2c] ss:$16 sps:$4 sm:$0xff]  }
 0x1b2   : > { %3608 = vmatpush1.bf16.msra.mxu1 %v5342_v50  ;;  %3566 = vmatprep.subr.bf16.mxu0 %v5347_v51  ;;  %v5440_v50 = vld [vmem:[%s5930_s6 + $0xc2c] ss:$16 sps:$4 sm:$0xff]   ;;  %v5435_v51 = vld [vmem:[%s5930_s6 + $0xa28] ss:$16 sps:$4 sm:$0xff]  }
 0x1b3   : > { %3609 = vmatprep.subr.bf16.mxu1 %v5350_v52  ;;  %v5438_v52 = vld [vmem:[%s5930_s6 + $0xc28] ss:$16 sps:$4 sm:$0xff]  }
 0x1b5   : > { %3567 = vmatpush1.bf16.msra.mxu0 %v5345_v56  ;;  %v6495_v56 = vpop.f32.mrf.mxu0 }
 0x1b6   : > { %3610 = vmatpush1.bf16.msra.mxu1 %v5348_v57  ;;  %3568 = vmatprep.subr.bf16.mxu0 %v5353_v58  ;;  %v5443_v57 = vld [vmem:[%s5930_s6 + $0xa0c] ss:$16 sps:$4 sm:$0xff]  }
 0x1b7   : > { %3611 = vmatprep.subr.bf16.mxu1 %v5356_v59  ;;  %v5446_v58 = vld [vmem:[%s5930_s6 + $0xc0c] ss:$16 sps:$4 sm:$0xff]   ;;  %v5441_v59 = vld [vmem:[%s5930_s6 + $0xa08] ss:$16 sps:$4 sm:$0xff]  }
 0x1b9   : > { %3569 = vmatpush2.bf16.msra.mxu0 %v5351_v60  ;;  %v5444_v60 = vld [vmem:[%s5930_s6 + $0xc08] ss:$16 sps:$4 sm:$0xff]  }
 0x1ba   : > { %3612 = vmatpush2.bf16.msra.mxu1 %v5354_v63  ;;  %3570 = vmatprep.subr.bf16.mxu0 %v5359_v2  ;;  %v6501_v63 = vpop.f32.mrf.mxu0  ;;  %v5449_v2 = vld [vmem:[%s5930_s6 + $0xbec] ss:$16 sps:$4 sm:$0xff]  }
 0x1bb   : > { %3613 = vmatprep.subr.bf16.mxu1 %v5362_v3  ;;  %v5452_v3 = vld [vmem:[%s5930_s6 + $0xdec] ss:$16 sps:$4 sm:$0xff]  }
 0x1bd   : > { %3571 = vmatpush2.bf16.msra.mxu0 %v5357_v4  ;;  %v6505_v4 = vpop.f32.mrf.mxu1 }
 0x1be   : > { %3614 = vmatpush2.bf16.msra.mxu1 %v5360_v5  ;;  %3572 = vmatprep.subr.bf16.mxu0 %v5365_v7  ;;  %v5447_v5 = vld [vmem:[%s5930_s6 + $0xbe8] ss:$16 sps:$4 sm:$0xff]  }
 0x1bf   : > { %3615 = vmatprep.subr.bf16.mxu1 %v5368_v8  ;;  %v5450_v7 = vld [vmem:[%s5930_s6 + $0xde8] ss:$16 sps:$4 sm:$0xff]   ;;  %v6509_v8 = vpop.f32.mrf.mxu0 }
 0x1c1   : > { %3573 = vmatpush2.bf16.msra.mxu0 %v5363_v9  ;;  %v5455_v9 = vld [vmem:[%s5930_s6 + $0xbcc] ss:$16 sps:$4 sm:$0xff]  }
 0x1c2   : > { %3616 = vmatpush2.bf16.msra.mxu1 %v5366_v10  ;;  %3574 = vmatprep.subr.bf16.mxu0 %v5371_v11  ;;  %v5458_v10 = vld [vmem:[%s5930_s6 + $0xdcc] ss:$16 sps:$4 sm:$0xff]   ;;  %v862_v11 = vlaneseq }
 0x1c3   : > { %3617 = vmatprep.subr.bf16.mxu1 %v5374_v12  ;;  %v3201_v12 = vpop.f32.mrf.mxu1 }
 0x1c5   : > { %3575 = vmatpush2.bf16.msra.mxu0 %v5369_v13  ;;  %v5453_v13 = vld [vmem:[%s5930_s6 + $0xbc8] ss:$16 sps:$4 sm:$0xff]  }
 0x1c6   : > { %3618 = vmatpush2.bf16.msra.mxu1 %v5372_v14  ;;  %3576 = vmatprep.subr.bf16.mxu0 %v5377_v15  ;;  %v5456_v14 = vld [vmem:[%s5930_s6 + $0xdc8] ss:$16 sps:$4 sm:$0xff]   ;;  %v3162_v15 = vpop.f32.mrf.mxu0 }
 0x1c7   : > { %3619 = vmatprep.subr.bf16.mxu1 %v5380_v16  ;;  %v5461_v16 = vld [vmem:[%s5930_s6 + $0xbac] ss:$16 sps:$4 sm:$0xff]  }
 0x1c9   : > { %3577 = vmatpush2.bf16.msra.mxu0 %v5375_v17  ;;  %v5464_v17 = vld [vmem:[%s5930_s6 + $0xdac] ss:$16 sps:$4 sm:$0xff]  }
 0x1ca   : > { %3620 = vmatpush2.bf16.msra.mxu1 %v5378_v18  ;;  %3578 = vmatprep.subr.bf16.mxu0 %v5383_v19  ;;  %v6517_v18 = vshrl.u32 %v862_v11, 7  ;;  %v6519_v19 = vpop.f32.mrf.mxu1 }
 0x1cb   : > { %3621 = vmatprep.subr.bf16.mxu1 %v5386_v22  ;;  %v3242_v22 = vpop.f32.mrf.mxu0 }
 0x1cd   : > { %3579 = vmatpush2.bf16.msra.mxu0 %v5381_v23  ;;  %v5459_v23 = vld [vmem:[%s5930_s6 + $0xba8] ss:$16 sps:$4 sm:$0xff]  }
 0x1ce   : > { %3622 = vmatpush2.bf16.msra.mxu1 %v5384_v24  ;;  %3580 = vmatprep.subr.bf16.mxu0 %v5389_v25  ;;  %v5462_v24 = vld [vmem:[%s5930_s6 + $0xda8] ss:$16 sps:$4 sm:$0xff]   ;;  %v5467_v25 = vld [vmem:[%s5930_s6 + $0xb8c] ss:$16 sps:$4 sm:$0xff]  }
 0x1cf   : > { %3623 = vmatprep.subr.bf16.mxu1 %v5392_v26  ;;  %v5470_v26 = vld [vmem:[%s5930_s6 + $0xd8c] ss:$16 sps:$4 sm:$0xff]  }
 0x1d1   : > { %3581 = vmatpush2.bf16.msra.mxu0 %v5387_v27  ;;  %v864_v27 = vsub.s32 0, %v6517_v18 }
 0x1d2   : > { %3624 = vmatpush2.bf16.msra.mxu1 %v5390_v20  ;;  %3582 = vmatprep.subr.bf16.mxu0 %v5395_v28  ;;  %v6527_v20 = vld [vmem:[%s5936_s11] sm:$0xf]  ;;  %v3205_v28 = vpop.f32.mrf.mxu1  ;;  %s6581_s11 = scalar_lea.vmem [#allocation8], %s5943_s13 }
 0x1d3   : > { %3625 = vmatprep.subr.bf16.mxu1 %v5398_v29  ;;  %v3244_v29 = vpop.f32.mrf.mxu0 }
 0x1d5   : > { %3583 = vmatpush2.bf16.msra.mxu0 %v5393_v30  ;;  %v868_v30 = vsub.s32 1, %v6517_v18 }
 0x1d6   : > { %3626 = vmatpush2.bf16.msra.mxu1 %v5396_v62  ;;  %3638 = vmatprep.subr.bf16.mxu0 %v5401_v53  ;;  %v5465_v62 = vld [vmem:[%s5930_s6 + $0xb88] ss:$16 sps:$4 sm:$0xff]  }
 0x1d7   : > { %3681 = vmatprep.subr.bf16.mxu1 %v5404_v31  ;;  %v5468_v53 = vld [vmem:[%s5930_s6 + $0xd88] ss:$16 sps:$4 sm:$0xff]   ;;  %v3285_v31 = vpop.f32.mrf.mxu1 }
 0x1d8   : > { %3585 = vmatmul.mubr.bf16.vlgmr.msra.gmra.mxu0 %v6143_v37  ;;  %v5411_v37 = vld [vmem:[%s5930_s6 + $0xaa8] ss:$16 sps:$4 sm:$0xff]  }
 0x1d9   : > { %3628 = vmatmul.mubr.bf16.vlgmr.msra.gmra.mxu1 %v6245_v0  ;;  %3639 = vmatpush1.bf16.msra.mxu0 %v5399_v32  ;;  %v5414_v0 = vld [vmem:[%s5930_s6 + $0xca8] ss:$16 sps:$4 sm:$0xff]   ;;  %v5473_v32 = vld [vmem:[%s5930_s6 + $0xb6c] ss:$16 sps:$4 sm:$0xff]  }
 0x1da   : > { %3682 = vmatpush1.bf16.msra.mxu1 %v5402_v33  ;;  %3640 = vmatprep.subr.bf16.mxu0 %v5407_v21  ;;  %v5476_v33 = vld [vmem:[%s5930_s6 + $0xd6c] ss:$16 sps:$4 sm:$0xff]   ;;  %v865_v21 = vrot.slane %v6527_v20, %v864_v27 }
 0x1db   : > { %3683 = vmatprep.subr.bf16.mxu1 %v5410_v36  ;;  %3670 = vmatprep.mubr.bf16.mxu0 %v6171_v54  ;;  %v5420_v54 = vld [vmem:[%s5930_s6 + $0xc88] ss:$16 sps:$4 sm:$0xff]   ;;  %v3246_v36 = vpop.f32.mrf.mxu0 }
 0x1dc   : > { %3713 = vmatprep.mubr.bf16.mxu1 %v6255_v6  ;;  %v5425_v6 = vld [vmem:[%s5930_s6 + $0xa6c] ss:$16 sps:$4 sm:$0xff]  }
 0x1dd   : > { %3641 = vmatpush1.bf16.msra.mxu0 %v5405_v34  ;;  %v869_v34 = vrot.slane %v6527_v20, %v868_v30 }
 0x1de   : > { %3684 = vmatpush1.bf16.msra.mxu1 %v5408_v35  ;;  %3642 = vmatprep.subr.bf16.mxu0 %v5413_v38  ;;  %v5471_v35 = vld [vmem:[%s5930_s6 + $0xb68] ss:$16 sps:$4 sm:$0xff]  }
 0x1df   : > { %3685 = vmatprep.subr.bf16.mxu1 %v5416_v55  ;;  %v5474_v38 = vld [vmem:[%s5930_s6 + $0xd68] ss:$16 sps:$4 sm:$0xff]   ;;  %v3287_v55 = vpop.f32.mrf.mxu1 }
 0x1e1   : > { %3643 = vmatpush1.bf16.msra.mxu0 %v5411_v37  ;;  %v5479_v37 = vld [vmem:[%s5930_s6 + $0xb4c] ss:$16 sps:$4 sm:$0xff]  }
 0x1e2   : > { %3686 = vmatpush1.bf16.msra.mxu1 %v5414_v0  ;;  %3644 = vmatprep.subr.bf16.mxu0 %v5419_v48  ;;  %v5482_v0 = vld [vmem:[%s5930_s6 + $0xd4c] ss:$16 sps:$4 sm:$0xff]   ;;  %v3157_v48 = vadd.f32 %v6495_v56, %v865_v21 }
 0x1e3   : > { %3687 = vmatprep.subr.bf16.mxu1 %v5422_v39  ;;  %v3248_v39 = vpop.f32.mrf.mxu0 }
 0x1e5   : > { %3645 = vmatpush1.bf16.msra.mxu0 %v5417_v40  ;;  %v3159_v40 = vadd.f32 %v6501_v63, %v869_v34 }
 0x1e6   : > { %3688 = vmatpush1.bf16.msra.mxu1 %v5420_v54  ;;  %3646 = vmatprep.subr.bf16.mxu0 %v5425_v6  ;;  %v5477_v54 = vld [vmem:[%s5930_s6 + $0xb48] ss:$16 sps:$4 sm:$0xff]  }
 0x1e7   : > { %3689 = vmatprep.subr.bf16.mxu1 %v5428_v41  ;;  %v5480_v6 = vld [vmem:[%s5930_s6 + $0xd48] ss:$16 sps:$4 sm:$0xff]   ;;  %v3289_v41 = vpop.f32.mrf.mxu1 }
 0x1e9   : > { %3647 = vmatpush1.bf16.msra.mxu0 %v5423_v42  ;;  %v3328_v42 = vpop.f32.mrf.mxu0  ;;  %v3291_v56 = vpop.f32.mrf.mxu1 }
 0x1ea   : > { %3690 = vmatpush1.bf16.msra.mxu1 %v5426_v43  ;;  %3648 = vmatprep.subr.bf16.mxu0 %v5431_v44  ;;  %v5485_v43 = vld [vmem:[%s5930_s6 + $0xb2c] ss:$16 sps:$4 sm:$0xff]  }
 0x1eb   : > { %3691 = vmatprep.subr.bf16.mxu1 %v5434_v45  ;;  %v5488_v44 = vld [vmem:[%s5930_s6 + $0xd2c] ss:$16 sps:$4 sm:$0xff]   ;;  %v3200_v45 = vadd.f32 %v6505_v4, %v3157_v48 }
 0x1ed   : > { %3649 = vmatpush1.bf16.msra.mxu0 %v5429_v46  ;;  %v3161_v46 = vadd.f32 %v6509_v8, %v865_v21  ;;  %v5492_v8 = vld [vmem:[%s5930_s6 + $0xd08] ss:$16 sps:$4 sm:$0xff]  }
 0x1ee   : > { %3692 = vmatpush1.bf16.msra.mxu1 %v5432_v47  ;;  %3650 = vmatprep.subr.bf16.mxu0 %v5437_v49  ;;  %v3202_v47 = vadd.f32 %v3201_v12, %v3159_v40  ;;  %v3163_v49 = vadd.f32 %v3162_v15, %v869_v34  ;;  %v876_v40 = vsub.s32 3, %v6517_v18 }
 0x1ef   : > { %3693 = vmatprep.subr.bf16.mxu1 %v5440_v50  ;;  %v3243_v50 = vadd.f32 %v3242_v22, %v3200_v45 }
 0x1f0   : > { %v3245_v63 = vadd.f32 %v3244_v29, %v3202_v47 }
 0x1f1   : > { %3651 = vmatpush1.bf16.msra.mxu0 %v5435_v51  ;;  %v5483_v51 = vld [vmem:[%s5930_s6 + $0xb28] ss:$16 sps:$4 sm:$0xff]   ;;  %v3286_v4 = vadd.f32 %v3285_v31, %v3243_v50 }
 0x1f2   : > { %3694 = vmatpush1.bf16.msra.mxu1 %v5438_v52  ;;  %3652 = vmatprep.subr.bf16.mxu0 %v5443_v57  ;;  %v5486_v52 = vld [vmem:[%s5930_s6 + $0xd28] ss:$16 sps:$4 sm:$0xff]   ;;  %v3330_v57 = vpop.f32.mrf.mxu0 }
 0x1f3   : > { %3695 = vmatprep.subr.bf16.mxu1 %v5446_v58  ;;  %v5491_v58 = vld [vmem:[%s5930_s6 + $0xb0c] ss:$16 sps:$4 sm:$0xff]   ;;  %v3329_v12 = vadd.f32 %v3328_v42, %v3286_v4  ;;  %v877_v42 = vrot.slane %v6527_v20, %v876_v40 }
 0x1f5   : > { %3653 = vmatpush1.bf16.msra.mxu0 %v5441_v59  ;;  %v5494_v59 = vld [vmem:[%s5930_s6 + $0xd0c] ss:$16 sps:$4 sm:$0xff]  }
 0x1f6   : > { %3696 = vmatpush1.bf16.msra.mxu1 %v5444_v60  ;;  %3654 = vmatprep.subr.bf16.mxu0 %v5449_v2  ;;  %v3204_v60 = vadd.f32 %v6519_v19, %v3161_v46  ;;  %v3371_v2 = vpop.f32.mrf.mxu1 }
 0x1f7   : > { %3697 = vmatprep.subr.bf16.mxu1 %v5452_v3  ;;  %v3206_v3 = vadd.f32 %v3205_v28, %v3163_v49  ;;  %v3372_v19 = vadd.f32 %v3371_v2, %v3329_v12 }
 0x1f9   : > { %3655 = vmatpush2.bf16.msra.mxu0 %v5447_v5  ;;  %v3247_v5 = vadd.f32 %v3246_v36, %v3204_v60  ;;  %v3249_v11 = vadd.f32 %v3248_v39, %v3206_v3 }
 0x1fa   : > { %3698 = vmatpush2.bf16.msra.mxu1 %v5450_v7  ;;  %3656 = vmatprep.subr.bf16.mxu0 %v5455_v9  ;;  %v5489_v7 = vld [vmem:[%s5930_s6 + $0xb08] ss:$16 sps:$4 sm:$0xff]   ;;  %v3332_v9 = vpop.f32.mrf.mxu0  ;;  %s6578_s6 = scalar_lea.vmem [#allocation7], %s5943_s13 }
 0x1fb   : > { %3699 = vmatprep.subr.bf16.mxu1 %v5458_v10  ;;  %v3288_v10 = vadd.f32 %v3287_v55, %v3245_v63 }
 0x1fd   : > { %3657 = vmatpush2.bf16.msra.mxu0 %v5453_v13  ;;  %v3373_v13 = vpop.f32.mrf.mxu1  ;;  %v3331_v15 = vadd.f32 %v3330_v57, %v3288_v10 }
 0x1fe   : > { %3700 = vmatpush2.bf16.msra.mxu1 %v5456_v14  ;;  %3658 = vmatprep.subr.bf16.mxu0 %v5461_v16  ;;  %v3290_v14 = vadd.f32 %v3289_v41, %v3247_v5  ;;  %v3334_v16 = vpop.f32.mrf.mxu0 }
 0x1ff   : > { %3701 = vmatprep.subr.bf16.mxu1 %v5464_v17  ;;  %v3292_v17 = vadd.f32 %v3291_v56, %v3249_v11 }
 0x200   : > { %v3333_v22 = vadd.f32 %v3332_v9, %v3290_v14 }
 0x201   : > { %3659 = vmatpush2.bf16.msra.mxu0 %v5459_v23  ;;  %v3375_v23 = vpop.f32.mrf.mxu1 }
 0x202   : > { %3702 = vmatpush2.bf16.msra.mxu1 %v5462_v24  ;;  %3660 = vmatprep.subr.bf16.mxu0 %v5467_v25  ;;  %v3374_v25 = vadd.f32 %v3373_v13, %v3331_v15  ;;  %v3376_v29 = vadd.f32 %v3375_v23, %v3333_v22 }
 0x203   : > { %3703 = vmatprep.subr.bf16.mxu1 %v5470_v26  ;;  %v3335_v26 = vadd.f32 %v3334_v16, %v3292_v17 }
 0x205   : > { %3661 = vmatpush2.bf16.msra.mxu0 %v5465_v62  ;;  %v3377_v62 = vpop.f32.mrf.mxu1 }
 0x206   : > { %3704 = vmatpush2.bf16.msra.mxu1 %v5468_v53  ;;  %3662 = vmatprep.subr.bf16.mxu0 %v5473_v32  ;;  %v3378_v31 = vadd.f32 %v3377_v62, %v3335_v26 }
 0x207   : > { %3705 = vmatprep.subr.bf16.mxu1 %v5476_v33 }
 0x209   : > { %3663 = vmatpush2.bf16.msra.mxu0 %v5471_v35 }
 0x20a   : > { %3706 = vmatpush2.bf16.msra.mxu1 %v5474_v38  ;;  %3664 = vmatprep.subr.bf16.mxu0 %v5479_v37 }
 0x20b   : > { %3707 = vmatprep.subr.bf16.mxu1 %v5482_v0  ;;  %v872_v0 = vsub.s32 2, %v6517_v18 }
 0x20d   : > { %3665 = vmatpush2.bf16.msra.mxu0 %v5477_v54  ;;  %v873_v54 = vrot.slane %v6527_v20, %v872_v0 }
 0x20e   : > { %3708 = vmatpush2.bf16.msra.mxu1 %v5480_v6  ;;  %3666 = vmatprep.subr.bf16.mxu0 %v5485_v43 }
 0x20f   : > { %3709 = vmatprep.subr.bf16.mxu1 %v5488_v44 }
 0x211   : > { %3667 = vmatpush2.bf16.msra.mxu0 %v5483_v51 }
 0x212   : > { %3710 = vmatpush2.bf16.msra.mxu1 %v5486_v52  ;;  %3668 = vmatprep.subr.bf16.mxu0 %v5491_v58 }
 0x213   : > { %3711 = vmatprep.subr.bf16.mxu1 %v5494_v59 }
 0x215   : > { %3669 = vmatpush2.bf16.msra.mxu0 %v5489_v7 }
 0x216   : > { %3712 = vmatpush2.bf16.msra.mxu1 %v5492_v8 }
 0x218   : > { %v3414_v24 = vpop.f32.mrf.mxu0  ;;  %3671 = vmatmul.mubr.bf16.vlgmr.msra.gmra.mxu0 %v6247_v1 }
 0x219   : > { %3714 = vmatmul.mubr.bf16.vlgmr.msra.gmra.mxu1 %v6327_v61  ;;  %v6557_v27 = vadd.f32 %v3414_v24, %v3372_v19  ;;  %v3457_v36 = vpop.f32.mrf.mxu1 }
 0x21a   : > { %v3416_v28 = vpop.f32.mrf.mxu0  ;;  %v3458_v45 = vadd.f32 %v3457_v36, %v873_v54 }
 0x21b   : > { %v6559_v30 = vadd.f32 %v3416_v28, %v3374_v25  ;;  %v3459_v1 = vpop.f32.mrf.mxu1 }
 0x21c   : > { %v3418_v53 = vpop.f32.mrf.mxu0  ;;  %v3460_v46 = vadd.f32 %v3459_v1, %v877_v42 }
 0x21d   : > { %v6561_v32 = vadd.f32 %v3418_v53, %v3376_v29  ;;  %v3461_v34 = vpop.f32.mrf.mxu1 }
 0x21e   : > { %v3420_v33 = vpop.f32.mrf.mxu0  ;;  %v3462_v51 = vadd.f32 %v3461_v34, %v873_v54 }
 0x21f   : > { %v6563_v21 = vadd.f32 %v3420_v33, %v3378_v31  ;;  %v3463_v61 = vpop.f32.mrf.mxu1 }
 0x220   : > { %v3464_v56 = vadd.f32 %v3463_v61, %v877_v42 }
 0x258   : > { %v3500_v35 = vpop.f32.mrf.mxu0 }
 0x259   : > { %v3543_v38 = vpop.f32.mrf.mxu1  ;;  %v3501_v47 = vadd.f32 %v3500_v35, %v3458_v45 }
 0x25a   : > { %v3502_v55 = vpop.f32.mrf.mxu0 }
 0x25b   : > { %v3545_v37 = vpop.f32.mrf.mxu1  ;;  %v3503_v52 = vadd.f32 %v3502_v55, %v3460_v46  ;;  %v3544_v57 = vadd.f32 %v3543_v38, %v3501_v47 }
 0x25c   : > { %v3504_v48 = vpop.f32.mrf.mxu0 }
 0x25d   : > { %v3547_v39 = vpop.f32.mrf.mxu1  ;;  %v3505_v58 = vadd.f32 %v3504_v48, %v3462_v51  ;;  %v3546_v60 = vadd.f32 %v3545_v37, %v3503_v52 }
 0x25e   : > { %v3506_v6 = vpop.f32.mrf.mxu0 }
 0x25f   : > { %v3549_v41 = vpop.f32.mrf.mxu1  ;;  %v3507_v63 = vadd.f32 %v3506_v6, %v3464_v56  ;;  %v3548_v3 = vadd.f32 %v3547_v39, %v3505_v58 }
 0x261   : > { %v3550_v7 = vadd.f32 %v3549_v41, %v3507_v63 }
 0x298   : > { %v3586_v43 = vpop.f32.mrf.mxu0 }
 0x299   : > { %v3629_v44 = vpop.f32.mrf.mxu1  ;;  %v3587_v2 = vadd.f32 %v3586_v43, %v3544_v57 }
 0x29a   : > { %v3588_v49 = vpop.f32.mrf.mxu0 }
 0x29b   : > { %v3631_v50 = vpop.f32.mrf.mxu1  ;;  %v3589_v4 = vadd.f32 %v3588_v49, %v3546_v60  ;;  %v3630_v8 = vadd.f32 %v3629_v44, %v3587_v2 }
 0x29c   : > { %v3590_v59 = vpop.f32.mrf.mxu0 }
 0x29d   : > { %v3633_v18 = vpop.f32.mrf.mxu1  ;;  %v3591_v9 = vadd.f32 %v3590_v59, %v3548_v3  ;;  %v3632_v12 = vadd.f32 %v3631_v50, %v3589_v4 }
 0x29e   : > { %v3592_v20 = vpop.f32.mrf.mxu0 }
 0x29f   : > { %v3635_v5 = vpop.f32.mrf.mxu1  ;;  %v3593_v13 = vadd.f32 %v3592_v20, %v3550_v7  ;;  %v3634_v17 = vadd.f32 %v3633_v18, %v3591_v9 }
 0x2a1   : > { %v3636_v25 = vadd.f32 %v3635_v5, %v3593_v13 }
 0x2d8   : > { %v3672_v10 = vpop.f32.mrf.mxu0 }
 0x2d9   : > { %v3715_v11 = vpop.f32.mrf.mxu1  ;;  %v3673_v14 = vadd.f32 %v3672_v10, %v3630_v8 }
 0x2da   : > { %v3674_v15 = vpop.f32.mrf.mxu0 }
 0x2db   : > { %v3717_v16 = vpop.f32.mrf.mxu1  ;;  %v6569_v19 = vadd.f32 %v3715_v11, %v3673_v14  ;;  %v3675_v22 = vadd.f32 %v3674_v15, %v3632_v12 }
 0x2dc   : > { %v3676_v23 = vpop.f32.mrf.mxu0 }
 0x2dd   : > { %v3719_v24 = vpop.f32.mrf.mxu1  ;;  %v6571_v26 = vadd.f32 %v3717_v16, %v3675_v22  ;;  %v3677_v28 = vadd.f32 %v3676_v23, %v3634_v17  ;;  %3727 = sbr.rel (%p4694_p7) target bundleno = 778 (0x30a), region = 71 }
 0x2de   : > { %v3678_v29 = vpop.f32.mrf.mxu0 }
 0x2df   : > { %v6573_v62 = vadd.f32 %v3719_v24, %v3677_v28  ;;  %v3679_v53 = vadd.f32 %v3678_v29, %v3636_v25  ;;  %v3721_v31 = vpop.f32.mrf.mxu1 }
 0x2e1   : > { %v6575_v33 = vadd.f32 %v3721_v31, %v3679_v53 }
 0x2e2   : > { %v4695_v36 = vmul.f32 -1.442695, %v6557_v27  ;;  %v4696_v1 = vmul.f32 -1.442695, %v6559_v30  ;;  %v4697_v34 = vmul.f32 -1.442695, %v6569_v19 }
 0x2e3   : > { %v4698_v61 = vmul.f32 -1.442695, %v6571_v26  ;;  %v4699_v35 = vmul.f32 -1.442695, %v6561_v32  ;;  %v4700_v38 = vmul.f32 -1.442695, %v6563_v21 }
 0x2e4   : > { %5495 = vpow2.f32 %v4695_v36  ;;  %v4701_v55 = vmul.f32 -1.442695, %v6573_v62  ;;  %v4702_v37 = vmul.f32 -1.442695, %v6575_v33 }
 0x2e5   : > { %5497 = vpow2.f32 %v4696_v1 }
 0x2e6   : > { %5499 = vpow2.f32 %v4697_v34 }
 0x2e7   : > { %5501 = vpow2.f32 %v4698_v61 }
 0x2e8   : > { %5503 = vpow2.f32 %v4699_v35 }
 0x2e9   : > { %5505 = vpow2.f32 %v4700_v38 }
 0x2ea   : > { %5507 = vpow2.f32 %v4701_v55 }
 0x2eb   : > { %5509 = vpow2.f32 %v4702_v37 }
 0x2f1   : > { %v5496_v0 = vpop.eup %5495 }
 0x2f2   : > { %v5498_v48 = vpop.eup %5497  ;;  %v3752_v39 = vadd.f32 1.0, %v5496_v0 }
 0x2f3   : > { %v5500_v40 = vpop.eup %5499  ;;  %v3753_v54 = vadd.f32 1.0, %v5498_v48 }
 0x2f4   : > { %v5502_v6 = vpop.eup %5501  ;;  %5511 = vrcp.f32 %v3752_v39  ;;  %v3754_v41 = vadd.f32 1.0, %v5500_v40 }
 0x2f5   : > { %v5504_v42 = vpop.eup %5503  ;;  %5513 = vrcp.f32 %v3753_v54  ;;  %v3755_v43 = vadd.f32 1.0, %v5502_v6 }
 0x2f6   : > { %v5506_v44 = vpop.eup %5505  ;;  %5515 = vrcp.f32 %v3754_v41  ;;  %v3756_v45 = vadd.f32 1.0, %v5504_v42 }
 0x2f7   : > { %v5508_v46 = vpop.eup %5507  ;;  %5517 = vrcp.f32 %v3755_v43  ;;  %v3757_v47 = vadd.f32 1.0, %v5506_v44 }
 0x2f8   : > { %v5510_v49 = vpop.eup %5509  ;;  %5519 = vrcp.f32 %v3756_v45  ;;  %v3758_v50 = vadd.f32 1.0, %v5508_v46 }
 0x2f9   : > { %5521 = vrcp.f32 %v3757_v47  ;;  %v3759_v51 = vadd.f32 1.0, %v5510_v49 }
 0x2fa   : > { %5523 = vrcp.f32 %v3758_v50 }
 0x2fb   : > { %5525 = vrcp.f32 %v3759_v51 }
 0x301   : > { %v5512_v52 = vpop.eup %5511 }
 0x302   : > { %v5514_v56 = vpop.eup %5513  ;;  %3776 = vst [vmem:[#allocation2 + $0x30] sm:$0xff] %v5512_v52 }
 0x303   : > { %v5516_v57 = vpop.eup %5515  ;;  %3777 = vst [vmem:[#allocation2] sm:$0xff] %v5514_v56 }
 0x304   : > { %v5518_v58 = vpop.eup %5517  ;;  %3778 = vst [vmem:[#allocation2 + $0x18] sm:$0xff] %v5516_v57 }
 0x305   : > { %v5520_v59 = vpop.eup %5519  ;;  %3779 = vst [vmem:[#allocation2 + $0x10] sm:$0xff] %v5518_v58 }
 0x306   : > { %v5522_v18 = vpop.eup %5521  ;;  %3780 = vst [vmem:[#allocation2 + $0x8] sm:$0x1] %v5520_v59 }
 0x307   : > { %v5524_v60 = vpop.eup %5523  ;;  %3781 = vst [vmem:[#allocation2 + $0x20] sm:$0x1] %v5522_v18 }
 0x308   : > { %v5526_v63 = vpop.eup %5525  ;;  %3782 = vst [vmem:[#allocation2 + $0x28] sm:$0x1] %v5524_v60 }
 0x309   : > { %3783 = vst [vmem:[#allocation2 + $0x38] sm:$0x1] %v5526_v63 }
 0x30a PF: > { %p4703_p8 = scmp.ne.s32.totalorder %s5745_s23, 1 }
 0x30c   : > { %3787 = sbr.rel (%p4703_p8) target bundleno = 827 (0x33b), region = 75 }
 0x311   : > { %v4704_v2 = vmul.f32 -1.442695, %v6557_v27  ;;  %v4705_v3 = vmul.f32 -1.442695, %v6559_v30  ;;  %v4706_v4 = vmul.f32 -1.442695, %v6569_v19 }
 0x312   : > { %v4707_v20 = vmul.f32 -1.442695, %v6571_v26  ;;  %v4708_v5 = vmul.f32 -1.442695, %v6561_v32  ;;  %v4709_v7 = vmul.f32 -1.442695, %v6563_v21 }
 0x313   : > { %5527 = vpow2.f32 %v4704_v2  ;;  %v4710_v8 = vmul.f32 -1.442695, %v6573_v62  ;;  %v4711_v9 = vmul.f32 -1.442695, %v6575_v33  ;;  %v3836_v36 = vld [vmem:[%s6578_s6] sm:$0xff]  ;;  %v3837_v1 = vld [vmem:[%s6578_s6 + $0x8] sm:$0xff] }
 0x314   : > { %5529 = vpow2.f32 %v4705_v3  ;;  %v3838_v61 = vld [vmem:[%s6578_s6 + $0x10] sm:$0xff]  ;;  %v3839_v55 = vld [vmem:[%s6578_s6 + $0x18] sm:$0xff]  ;;  %v3840_v48 = vld [vmem:[%s6578_s6 + $0x20] sm:$0x1] }
 0x315   : > { %5531 = vpow2.f32 %v4706_v4  ;;  %v3841_v54 = vld [vmem:[%s6578_s6 + $0x28] sm:$0x1]  ;;  %v3842_v42 = vld [vmem:[%s6578_s6 + $0x30] sm:$0x1]  ;;  %v3843_v45 = vld [vmem:[%s6578_s6 + $0x38] sm:$0x1] }
 0x316   : > { %5533 = vpow2.f32 %v4707_v20 }
 0x317   : > { %5535 = vpow2.f32 %v4708_v5 }
 0x318   : > { %5537 = vpow2.f32 %v4709_v7 }
 0x319   : > { %5539 = vpow2.f32 %v4710_v8 }
 0x31a   : > { %5541 = vpow2.f32 %v4711_v9 }
 0x320   : > { %v5528_v10 = vpop.eup %5527 }
 0x321   : > { %v5530_v11 = vpop.eup %5529  ;;  %v3812_v12 = vadd.f32 1.0, %v5528_v10 }
 0x322   : > { %v5532_v13 = vpop.eup %5531  ;;  %v3813_v14 = vadd.f32 1.0, %v5530_v11 }
 0x323   : > { %v5534_v15 = vpop.eup %5533  ;;  %5543 = vrcp.f32 %v3812_v12  ;;  %v3814_v16 = vadd.f32 1.0, %v5532_v13 }
 0x324   : > { %v5536_v17 = vpop.eup %5535  ;;  %5545 = vrcp.f32 %v3813_v14  ;;  %v3815_v22 = vadd.f32 1.0, %v5534_v15 }
 0x325   : > { %v5538_v23 = vpop.eup %5537  ;;  %5547 = vrcp.f32 %v3814_v16  ;;  %v3816_v24 = vadd.f32 1.0, %v5536_v17 }
 0x326   : > { %v5540_v25 = vpop.eup %5539  ;;  %5549 = vrcp.f32 %v3815_v22  ;;  %v3817_v28 = vadd.f32 1.0, %v5538_v23 }
 0x327   : > { %v5542_v29 = vpop.eup %5541  ;;  %5551 = vrcp.f32 %v3816_v24  ;;  %v3818_v53 = vadd.f32 1.0, %v5540_v25 }
 0x328   : > { %5553 = vrcp.f32 %v3817_v28  ;;  %v3819_v31 = vadd.f32 1.0, %v5542_v29 }
 0x329   : > { %5555 = vrcp.f32 %v3818_v53 }
 0x32a   : > { %5557 = vrcp.f32 %v3819_v31 }
 0x330   : > { %v5544_v34 = vpop.eup %5543 }
 0x331   : > { %v5546_v35 = vpop.eup %5545  ;;  %v3844_v38 = vmul.f32 %v5544_v34, %v3836_v36 }
 0x332   : > { %v5548_v37 = vpop.eup %5547  ;;  %v3845_v0 = vmul.f32 %v5546_v35, %v3837_v1 }
 0x333   : > { %v5550_v39 = vpop.eup %5549  ;;  %3852 = vst [vmem:[%s6584_s20] sm:$0xff] %v3844_v38  ;;  %v3846_v40 = vmul.f32 %v5548_v37, %v3838_v61 }
 0x334   : > { %v5552_v6 = vpop.eup %5551  ;;  %3853 = vst [vmem:[%s6584_s20 + $0x8] sm:$0xff] %v3845_v0  ;;  %v3847_v41 = vmul.f32 %v5550_v39, %v3839_v55 }
 0x335   : > { %v5554_v43 = vpop.eup %5553  ;;  %3854 = vst [vmem:[%s6584_s20 + $0x10] sm:$0xff] %v3846_v40  ;;  %v3848_v44 = vmul.f32 %v5552_v6, %v3840_v48 }
 0x336   : > { %v5556_v46 = vpop.eup %5555  ;;  %3855 = vst [vmem:[%s6584_s20 + $0x18] sm:$0xff] %v3847_v41  ;;  %v3849_v47 = vmul.f32 %v5554_v43, %v3841_v54 }
 0x337   : > { %v5558_v49 = vpop.eup %5557  ;;  %3856 = vst [vmem:[%s6584_s20 + $0x20] sm:$0x1] %v3848_v44  ;;  %v3850_v50 = vmul.f32 %v5556_v46, %v3842_v42 }
 0x338   : > { %3857 = vst [vmem:[%s6584_s20 + $0x28] sm:$0x1] %v3849_v47  ;;  %v3851_v51 = vmul.f32 %v5558_v49, %v3843_v45 }
 0x339   : > { %3858 = vst [vmem:[%s6584_s20 + $0x30] sm:$0x1] %v3850_v50 }
 0x33a   : > { %3859 = vst [vmem:[%s6584_s20 + $0x38] sm:$0x1] %v3851_v51 }
 0x33b PF: > { %p4712_p9 = scmp.ne.s32.totalorder %s5745_s23, 2 }
 0x33d   : > { %3863 = sbr.rel (%p4712_p9) target bundleno = 860 (0x35c), region = 79 }
 0x342   : > { %5559 = vtanh.f32 %v6557_v27  ;;  %v3872_v52 = vld [vmem:[#allocation2 + $0x30] sm:$0xff]  ;;  %v3873_v56 = vld [vmem:[#allocation2] sm:$0xff]  ;;  %v3864_v58 = vld [vmem:[%s6584_s20] sm:$0xff] }
 0x343   : > { %5561 = vtanh.f32 %v6559_v30  ;;  %v3874_v59 = vld [vmem:[#allocation2 + $0x18] sm:$0xff]  ;;  %v3865_v63 = vld [vmem:[%s6584_s20 + $0x8] sm:$0xff]  ;;  %v3876_v5 = vld [vmem:[#allocation2 + $0x8] sm:$0x1] }
 0x344   : > { %5563 = vtanh.f32 %v6569_v19  ;;  %v3875_v2 = vld [vmem:[#allocation2 + $0x10] sm:$0xff]  ;;  %v3866_v20 = vld [vmem:[%s6584_s20 + $0x10] sm:$0xff]  ;;  %v3867_v10 = vld [vmem:[%s6584_s20 + $0x18] sm:$0xff] }
 0x345   : > { %5565 = vtanh.f32 %v6571_v26  ;;  %v3877_v11 = vld [vmem:[#allocation2 + $0x20] sm:$0x1]  ;;  %v3868_v15 = vld [vmem:[%s6584_s20 + $0x20] sm:$0x1]  ;;  %v3869_v24 = vld [vmem:[%s6584_s20 + $0x28] sm:$0x1] }
 0x346   : > { %5567 = vtanh.f32 %v6561_v32  ;;  %v3878_v16 = vld [vmem:[#allocation2 + $0x28] sm:$0x1]  ;;  %v3879_v25 = vld [vmem:[#allocation2 + $0x38] sm:$0x1]  ;;  %v3871_v61 = vld [vmem:[%s6584_s20 + $0x38] sm:$0x1] }
 0x347   : > { %5569 = vtanh.f32 %v6563_v21  ;;  %v3870_v31 = vld [vmem:[%s6584_s20 + $0x30] sm:$0x1] }
 0x348   : > { %5571 = vtanh.f32 %v6573_v62 }
 0x349   : > { %5573 = vtanh.f32 %v6575_v33 }
 0x34f   : > { %v5560_v57 = vpop.eup %5559 }
 0x350   : > { %v5562_v18 = vpop.eup %5561  ;;  %v3888_v60 = vmul.f32 %v5560_v57, %v3872_v52 }
 0x351   : > { %v5564_v3 = vpop.eup %5563  ;;  %v3889_v4 = vmul.f32 %v5562_v18, %v3873_v56 }
 0x352   : > { %v5566_v7 = vpop.eup %5565  ;;  %v3896_v8 = vadd.f32 %v3888_v60, %v3864_v58  ;;  %v3890_v9 = vmul.f32 %v5564_v3, %v3874_v59 }
 0x353   : > { %v5568_v12 = vpop.eup %5567  ;;  %v3897_v13 = vadd.f32 %v3889_v4, %v3865_v63  ;;  %v3891_v14 = vmul.f32 %v5566_v7, %v3875_v2 }
 0x354   : > { %v5570_v17 = vpop.eup %5569  ;;  %3904 = vst [vmem:[%s6584_s20] sm:$0xff] %v3896_v8  ;;  %v3898_v22 = vadd.f32 %v3890_v9, %v3866_v20  ;;  %v3892_v23 = vmul.f32 %v5568_v12, %v3876_v5 }
 0x355   : > { %v5572_v28 = vpop.eup %5571  ;;  %3905 = vst [vmem:[%s6584_s20 + $0x8] sm:$0xff] %v3897_v13  ;;  %v3899_v29 = vadd.f32 %v3891_v14, %v3867_v10  ;;  %v3893_v53 = vmul.f32 %v5570_v17, %v3877_v11 }
 0x356   : > { %v5574_v36 = vpop.eup %5573  ;;  %3906 = vst [vmem:[%s6584_s20 + $0x10] sm:$0xff] %v3898_v22  ;;  %v3900_v1 = vadd.f32 %v3892_v23, %v3868_v15  ;;  %v3894_v34 = vmul.f32 %v5572_v28, %v3878_v16 }
 0x357   : > { %3907 = vst [vmem:[%s6584_s20 + $0x18] sm:$0xff] %v3899_v29  ;;  %v3901_v35 = vadd.f32 %v3893_v53, %v3869_v24  ;;  %v3895_v38 = vmul.f32 %v5574_v36, %v3879_v25 }
 0x358   : > { %3908 = vst [vmem:[%s6584_s20 + $0x20] sm:$0x1] %v3900_v1  ;;  %v3902_v55 = vadd.f32 %v3894_v34, %v3870_v31 }
 0x359   : > { %3909 = vst [vmem:[%s6584_s20 + $0x28] sm:$0x1] %v3901_v35  ;;  %v3903_v37 = vadd.f32 %v3895_v38, %v3871_v61 }
 0x35a   : > { %3910 = vst [vmem:[%s6584_s20 + $0x30] sm:$0x1] %v3902_v55 }
 0x35b   : > { %3911 = vst [vmem:[%s6584_s20 + $0x38] sm:$0x1] %v3903_v37 }
 0x35c PF: > { %p4713_p10 = scmp.ne.s32.totalorder %s5745_s23, 3 }
 0x35e   : > { %3915 = sbr.rel (%p4713_p10) target bundleno = 914 (0x392), region = 83 }
 0x363   : > { %v4714_v0 = vmul.f32 -1.442695, %v6557_v27  ;;  %v4715_v48 = vmul.f32 -1.442695, %v6559_v30  ;;  %v4716_v39 = vmul.f32 -1.442695, %v6569_v19 }
 0x364   : > { %v4717_v40 = vmul.f32 -1.442695, %v6571_v26  ;;  %v4718_v54 = vmul.f32 -1.442695, %v6561_v32  ;;  %v4719_v6 = vmul.f32 -1.442695, %v6563_v21 }
 0x365   : > { %5575 = vpow2.f32 %v4714_v0  ;;  %v4720_v41 = vmul.f32 -1.442695, %v6573_v62  ;;  %v3964_v27 = vld [vmem:[%s6584_s20] sm:$0xff]  ;;  %v4721_v30 = vmul.f32 -1.442695, %v6575_v33  ;;  %v3965_v19 = vld [vmem:[%s6584_s20 + $0x8] sm:$0xff] }
 0x366   : > { %5577 = vpow2.f32 %v4715_v48  ;;  %v3966_v42 = vld [vmem:[%s6584_s20 + $0x10] sm:$0xff]  ;;  %v3967_v44 = vld [vmem:[%s6584_s20 + $0x18] sm:$0xff]  ;;  %v3968_v33 = vld [vmem:[%s6584_s20 + $0x20] sm:$0x1] }
 0x367   : > { %5579 = vpow2.f32 %v4716_v39  ;;  %v3969_v49 = vld [vmem:[%s6584_s20 + $0x28] sm:$0x1]  ;;  %v3970_v52 = vld [vmem:[%s6584_s20 + $0x30] sm:$0x1]  ;;  %v3971_v58 = vld [vmem:[%s6584_s20 + $0x38] sm:$0x1] }
 0x368   : > { %5581 = vpow2.f32 %v4717_v40 }
 0x369   : > { %5583 = vpow2.f32 %v4718_v54 }
 0x36a   : > { %5585 = vpow2.f32 %v4719_v6 }
 0x36b   : > { %5587 = vpow2.f32 %v4720_v41 }
 0x36c   : > { %5589 = vtanh.f32 %v3964_v27 }
 0x36d   : > { %5591 = vpow2.f32 %v4721_v30 }
 0x36e   : > { %5593 = vtanh.f32 %v3965_v19 }
 0x36f   : > { %5595 = vtanh.f32 %v3966_v42 }
 0x372   : > { %v5576_v26 = vpop.eup %5575 }
 0x373   : > { %v5578_v32 = vpop.eup %5577  ;;  %v3940_v43 = vadd.f32 1.0, %v5576_v26 }
 0x374   : > { %v3941_v21 = vadd.f32 1.0, %v5578_v32  ;;  %v5580_v62 = vpop.eup %5579 }
 0x375   : > { %5597 = vrcp.f32 %v3940_v43  ;;  %v3942_v45 = vadd.f32 1.0, %v5580_v62  ;;  %v5582_v46 = vpop.eup %5581 }
 0x376   : > { %5599 = vrcp.f32 %v3941_v21  ;;  %v3943_v47 = vadd.f32 1.0, %v5582_v46  ;;  %v5584_v50 = vpop.eup %5583 }
 0x377   : > { %5601 = vtanh.f32 %v3967_v44  ;;  %v3944_v51 = vadd.f32 1.0, %v5584_v50  ;;  %v5586_v56 = vpop.eup %5585 }
 0x378   : > { %5603 = vrcp.f32 %v3942_v45  ;;  %v3945_v57 = vadd.f32 1.0, %v5586_v56  ;;  %v5588_v59 = vpop.eup %5587 }
 0x379   : > { %5605 = vtanh.f32 %v3968_v33  ;;  %v5590_v18 = vpop.eup %5589  ;;  %v3946_v60 = vadd.f32 1.0, %v5588_v59 }
 0x37a   : > { %5607 = vrcp.f32 %v3943_v47  ;;  %v5592_v63 = vpop.eup %5591 }
 0x37b   : > { %5609 = vtanh.f32 %v3969_v49  ;;  %v5594_v2 = vpop.eup %5593  ;;  %v3947_v3 = vadd.f32 1.0, %v5592_v63 }
 0x37c   : > { %5611 = vrcp.f32 %v3944_v51  ;;  %v5596_v4 = vpop.eup %5595 }
 0x37d   : > { %5613 = vtanh.f32 %v3970_v52 }
 0x37e   : > { %5615 = vrcp.f32 %v3945_v57 }
 0x37f   : > { %5617 = vtanh.f32 %v3971_v58 }
 0x380   : > { %5619 = vrcp.f32 %v3946_v60 }
 0x381   : > { %5621 = vrcp.f32 %v3947_v3 }
 0x382   : > { %v5598_v20 = vpop.eup %5597 }
 0x383   : > { %v5600_v5 = vpop.eup %5599  ;;  %v3980_v7 = vmul.f32 %v5598_v20, %v5590_v18 }
 0x384   : > { %v5602_v8 = vpop.eup %5601  ;;  %v3981_v9 = vmul.f32 %v5600_v5, %v5594_v2 }
 0x385   : > { %v5604_v10 = vpop.eup %5603  ;;  %3988 = vst [vmem:[%s6581_s11] sm:$0xff] %v3980_v7 }
 0x386   : > { %v5606_v11 = vpop.eup %5605  ;;  %3989 = vst [vmem:[%s6581_s11 + $0x8] sm:$0xff] %v3981_v9  ;;  %v3982_v12 = vmul.f32 %v5604_v10, %v5596_v4 }
 0x387   : > { %v5608_v13 = vpop.eup %5607 }
 0x388   : > { %v5610_v14 = vpop.eup %5609  ;;  %3990 = vst [vmem:[%s6581_s11 + $0x10] sm:$0xff] %v3982_v12  ;;  %v3983_v15 = vmul.f32 %v5608_v13, %v5602_v8 }
 0x389   : > { %v5612_v16 = vpop.eup %5611 }
 0x38a   : > { %v5614_v17 = vpop.eup %5613  ;;  %3991 = vst [vmem:[%s6581_s11 + $0x18] sm:$0xff] %v3983_v15  ;;  %v3984_v22 = vmul.f32 %v5612_v16, %v5606_v11 }
 0x38b   : > { %v5616_v23 = vpop.eup %5615 }
 0x38c   : > { %v5618_v24 = vpop.eup %5617  ;;  %3992 = vst [vmem:[%s6581_s11 + $0x20] sm:$0x1] %v3984_v22  ;;  %v3985_v25 = vmul.f32 %v5616_v23, %v5610_v14 }
 0x38d   : > { %v5620_v28 = vpop.eup %5619 }
 0x38e   : > { %3993 = vst [vmem:[%s6581_s11 + $0x28] sm:$0x1] %v3985_v25  ;;  %v3986_v29 = vmul.f32 %v5620_v28, %v5614_v17  ;;  %v5622_v53 = vpop.eup %5621 }
 0x38f   : > { %v3987_v31 = vmul.f32 %v5622_v53, %v5618_v24 }
 0x390   : > { %3994 = vst [vmem:[%s6581_s11 + $0x30] sm:$0x1] %v3986_v29 }
 0x391   : > { %3995 = vst [vmem:[%s6581_s11 + $0x38] sm:$0x1] %v3987_v31 }
 0x392 PF: > { %4006 = sbr.rel (!%p5892_p13) target bundleno = 926 (0x39e), region = 87  ;;  %s6756_s13 = sld [smem:[#allocation13_spill]] (%p5892_p13)  ;;  %v4022_v36 = vld [vmem:[%s6581_s11] sm:$0xff] (%p5892_p13)  ;;  %v4024_v1 = vld [vmem:[%s6581_s11 + $0x8] sm:$0xff] (%p5892_p13)  ;;  %v4026_v34 = vld [vmem:[%s6581_s11 + $0x10] sm:$0xff] (%p5892_p13) }
 0x393   : > { %s6757_s18 = sld [smem:[#allocation21_spill]] (%p5892_p13)  ;;  %v4028_v61 = vld [vmem:[%s6581_s11 + $0x18] sm:$0xff] (%p5892_p13)  ;;  %v4030_v35 = vld [vmem:[%s6581_s11 + $0x20] sm:$0xff] (%p5892_p13) }
 0x395   : > { %v4032_v38 = vld [vmem:[%s6581_s11 + $0x28] sm:$0xff] (%p5892_p13) }
 0x397   : > { %v4034_v55 = vld [vmem:[%s6581_s11 + $0x30] sm:$0xff] }
 0x398   : > { %s4732_s28 = sshll.u32 %s6756_s13, 5  ;;  %v4036_v37 = vld [vmem:[%s6581_s11 + $0x38] sm:$0xff] }
 0x399   : > { %s4009_s14 = scalar_lea.vmem %s6757_s18, %s4732_s28 }
 0x39a   : > { %4023 = vst [vmem:[%s4009_s14] sm:$0xff] %v4022_v36  ;;  %4025 = vst [vmem:[%s4009_s14 + $0x8] sm:$0xff] %v4024_v1 }
 0x39b   : > { %4027 = vst [vmem:[%s4009_s14 + $0x10] sm:$0xff] %v4026_v34  ;;  %4029 = vst [vmem:[%s4009_s14 + $0x18] sm:$0xff] %v4028_v61 }
 0x39c   : > { %4031 = vst [vmem:[%s4009_s14 + $0x40] sm:$0xff] %v4030_v35  ;;  %4033 = vst [vmem:[%s4009_s14 + $0x48] sm:$0xff] %v4032_v38 }
 0x39d   : > { %4035 = vst [vmem:[%s4009_s14 + $0x50] sm:$0xff] %v4034_v55  ;;  %4037 = vst [vmem:[%s4009_s14 + $0x58] sm:$0xff] %v4036_v37 }
 0x39e PF: > { %4043 = sbr.rel (!%p5892_p13) target bundleno = 938 (0x3aa), region = 110  ;;  %s6759_s22 = sld [smem:[#allocation13_spill]] (%p5892_p13)  ;;  %v4059_v0 = vld [vmem:[%s6584_s20] sm:$0xff] (%p5892_p13)  ;;  %v4061_v48 = vld [vmem:[%s6584_s20 + $0x8] sm:$0xff] (%p5892_p13)  ;;  %v4063_v39 = vld [vmem:[%s6584_s20 + $0x10] sm:$0xff] (%p5892_p13) }
 0x39f   : > { %s6760_s1 = sld [smem:[#allocation22_spill]] (%p5892_p13)  ;;  %v4065_v40 = vld [vmem:[%s6584_s20 + $0x18] sm:$0xff] (%p5892_p13)  ;;  %v4067_v54 = vld [vmem:[%s6584_s20 + $0x20] sm:$0xff] (%p5892_p13)  ;;  %v4069_v6 = vld [vmem:[%s6584_s20 + $0x28] sm:$0xff] (%p5892_p13) }
 0x3a0   : > { %v4071_v41 = vld [vmem:[%s6584_s20 + $0x30] sm:$0xff] (%p5892_p13)  ;;  %v4073_v27 = vld [vmem:[%s6584_s20 + $0x38] sm:$0xff] (%p5892_p13) }
 0x3a4   : > { %s4733_s5 = sshll.u32 %s6759_s22, 5 }
 0x3a5   : > { %s4046_s25 = scalar_lea.vmem %s6760_s1, %s4733_s5 }
 0x3a6   : > { %4060 = vst [vmem:[%s4046_s25] sm:$0xff] %v4059_v0  ;;  %4062 = vst [vmem:[%s4046_s25 + $0x8] sm:$0xff] %v4061_v48 }
 0x3a7   : > { %4064 = vst [vmem:[%s4046_s25 + $0x10] sm:$0xff] %v4063_v39  ;;  %4066 = vst [vmem:[%s4046_s25 + $0x18] sm:$0xff] %v4065_v40 }
 0x3a8   : > { %4068 = vst [vmem:[%s4046_s25 + $0x40] sm:$0xff] %v4067_v54  ;;  %4070 = vst [vmem:[%s4046_s25 + $0x48] sm:$0xff] %v4069_v6 }
 0x3a9   : > { %4072 = vst [vmem:[%s4046_s25 + $0x50] sm:$0xff] %v4071_v41  ;;  %4074 = vst [vmem:[%s4046_s25 + $0x58] sm:$0xff] %v4073_v27 }
 0x3aa PF: > { %s22_s27 = sadd.s32 1, %s5761_s27   ;;  %s6761_s29 = sld [smem:[#allocation18_spill]] }
 0x3ab   : > { %p19_p13 = scmp.ge.s32.totalorder %s22_s27, 10   ;;  %s6762_s30 = sld [smem:[#allocation12_spill]] }
 0x3ac   : > { %s6763_s22 = sld [smem:[#allocation17_spill]]  ;;  %s6767_s18 = smov %s5729_s19 }
 0x3ad   : > { %s6764_s23 = sld [smem:[#allocation14_spill]]  ;;  %s6769_s20 = smov %s5737_s21 }
 0x3ae   : > { %s6765_s25 = sld [smem:[#allocation15_spill]]  ;;  %s6771_s24 = smov %s5757_s26 }
 0x3af   : > { %s6766_s8 = sld [smem:[#allocation16_spill]] }
 0x3b0   : > { %s6768_s19 = smov %s6761_s29 }
 0x3b1   : > { %s6770_s21 = smov %s6762_s30  ;;  %21 = sbr.rel (!%p19_p13) target bundleno = 12 (0xc), region = 194 }
 0x3b5   : > { %s6772_s26 = smov %s6766_s8 }
 0x3b6   :  { %4097 = vsyncpa [#allocation4], 1 }
 0x3b7   :  { %4099 = vsyncpa [#allocation4 + $0x1], 1 }
 0x3b8   :  { %4100 = vsyncpa [#allocation6], 1 }
 0x3b9   :  { %4102 = vsyncpa [#allocation6 + $0x1], 1 }

// kernel: tan_forward.4
= control target key start
LH: loop header
LB: loop body
LE: loop exit
PB: predicated region body
PF: predicated region fallthrough
CT: control target
= control target key end

     0   :  { %s6253_s18 = smov 0   ;;  %s6255_s19 = smov 0   ;;  %s7204_s0 = inlined_call_operand.vmem [shape: f32[9,2048], index: 0, kind: input, shape index: {}]   ;;  %s7205_s1 = inlined_call_operand.vmem [shape: bf16[8,2048,512], index: 1, kind: input, shape index: {}]   ;;  %s7206_s2 = inlined_call_operand.vmem [shape: f32[1,4096], index: 2, kind: input, shape index: {}]   ;;  %s7207_s3 = inlined_call_operand.vmem [shape: f32[9,1024], index: 3, kind: input, shape index: {}]   ;;  %s7208_s4 = inlined_call_operand.vmem [shape: f32[9,1024], index: 4, kind: output, shape index: {0}]   ;;  %s7209_s5 = inlined_call_operand.vmem [shape: f32[9,1024], index: 5, kind: output, shape index: {1}]  }
   0x1   :  { %s6257_s20 = smov 0   ;;  %s6259_s21 = smov 0  }
   0x2   :  { %s6261_s22 = smov 0   ;;  %s6263_s23 = smov 0  }
   0x3   :  { %s6265_s24 = smov 0  }
   0x4 LB: > { %s25_s25 = sadd.s32 1, %s6213_s22  ;;  %s28_s26 = sadd.s32 1, %s6217_s23  ;;  %s6221_s24 = sphi %s6265_s24, %s16_s24   ;;  %s6217_s23 = sphi %s6263_s23, %s7216_s23   ;;  %s6213_s22 = sphi %s6261_s22, %s7215_s22   ;;  %s6209_s21 = sphi %s6259_s21, %s7214_s21   ;;  %s6205_s20 = sphi %s6257_s20, %s7213_s20   ;;  %s6201_s19 = sphi %s6255_s19, %s7212_s19   ;;  %s6197_s18 = sphi %s6253_s18, %s7211_s18  }
   0x5   : > { %p26_p0 = scmp.ge.s32.totalorder %s25_s25, 4  ;;  %s4643_s27 = sadd.s32 4294967295, %s6221_s24  }
   0x6   : > { %p123_p1 = scmp.ne.s32.totalorder %s6201_s19, %s6197_s18  ;;  %p124_p2 = scmp.eq.s32.totalorder %s6221_s24, 0 }
   0x7   : > { %s7218_s25 = smov (%p26_p0, %s25_s25), 0  ;;  %s7220_s26 = smov (!%p26_p0, %s28_s26), %s6217_s23 }
   0x8   : > { %p153_p3 = scmp.eq.s32.totalorder %s4643_s27, 7  ;;  %p30_p4 = scmp.ge.s32.totalorder %s7220_s26, 2 }
   0x9   : > { %p125_p5 = por %p124_p2, %p123_p1  ;;  %s116_s30 = sadd.s32 1, %s6201_s19 }
   0xa   : > { %p6297_p6 = por %p153_p3, %p123_p1  ;;  %s7222_s26 = smov (%p30_p4, %s7220_s26), 0 }
   0xb   : > { %s113_s29 = ssub.s32 %s6217_s23, %s7222_s26  ;;  %p4650_p8 = scmp.ge.s32.totalorder %s6221_s24, 8 }
   0xc   : > { %p114_p7 = scmp.eq.s32.totalorder %s113_s29, 0 }
   0xd   : > { %204 = sbr.rel (%p4650_p8) target bundleno = 26 (0x1a), region = 20 }
   0xe   : > { %s6307_s6 = scalar_select %p114_p7, %s6201_s19, %s116_s30  }
  0x12   : > { %231 = sbr.rel (!%p125_p5) target bundleno = 26 (0x1a), region = 32  ;;  %s233_s7 = sand.u32 (%p125_p5), 1, %s6201_s19  }
  0x13   : > { %s5211_s8 = sshll.u32 (%p125_p5), %s6217_s23, 5  ;;  %s4651_s9 = sshll.u32 (%p125_p5), %s233_s7, 6 }
  0x14   : > { %s238_s12 = scalar_lea.vmem (%p125_p5), %s7207_s3, %s5211_s8  ;;  %s235_s13 = scalar_lea.vmem (%p125_p5), [#allocation3], %s4651_s9 }
  0x15   : > { %v251_v0 = vld [vmem:[%s238_s12] sm:$0xff] (%p125_p5)  ;;  %v253_v1 = vld [vmem:[%s238_s12 + $0x8] sm:$0xff] (%p125_p5)  ;;  %v255_v2 = vld [vmem:[%s238_s12 + $0x10] sm:$0xff] (%p125_p5) }
  0x16   : > { %252 = vst [vmem:[%s235_s13] sm:$0xff] (%p125_p5), %v251_v0  ;;  %254 = vst [vmem:[%s235_s13 + $0x8] sm:$0xff] (%p125_p5), %v253_v1  ;;  %v257_v3 = vld [vmem:[%s238_s12 + $0x18] sm:$0xff] (%p125_p5)  ;;  %v259_v4 = vld [vmem:[%s238_s12 + $0x40] sm:$0xff] (%p125_p5) }
  0x17   : > { %256 = vst [vmem:[%s235_s13 + $0x10] sm:$0xff] %v255_v2  ;;  %v261_v5 = vld [vmem:[%s238_s12 + $0x48] sm:$0xff]  ;;  %258 = vst [vmem:[%s235_s13 + $0x18] sm:$0xff] %v257_v3  ;;  %v263_v6 = vld [vmem:[%s238_s12 + $0x50] sm:$0xff] }
  0x18   : > { %260 = vst [vmem:[%s235_s13 + $0x20] sm:$0xff] %v259_v4  ;;  %262 = vst [vmem:[%s235_s13 + $0x28] sm:$0xff] %v261_v5  ;;  %v265_v7 = vld [vmem:[%s238_s12 + $0x58] sm:$0xff] }
  0x19   : > { %264 = vst [vmem:[%s235_s13 + $0x30] sm:$0xff] %v263_v6  ;;  %266 = vst [vmem:[%s235_s13 + $0x38] sm:$0xff] %v265_v7 }
  0x1a PF: > { %p4654_p9 = scmp.ge.s32.totalorder %s6221_s24, 1  ;;  %p271_p10 = scmp.lt.s32.totalorder %s6221_s24, 9 }
  0x1c   : > { %p272_p11 = pnand %p4654_p9, %p271_p10 }
  0x1d   : > { %s278_s14 = sand.u32 (!%p272_p11), 1, %s6197_s18   ;;  %s4658_s15 = sshll.u32 (!%p272_p11), %s6205_s20, 1 }
  0x1e   : > { %275 = sbr.rel (%p272_p11) target bundleno = 944 (0x3b0), region = 55  ;;  %s6328_s8 = sshll.u32 (!%p272_p11), %s278_s14, 6 }
  0x1f   : > { %s6331_s9 = sadd.s32 (!%p272_p11), %s6209_s21, %s4658_s15  ;;  %s7066_s14 = scalar_lea.vmem (!%p272_p11), [#allocation4], %s6328_s8 }
  0x20   : > { %p323_p12 = scmp.lt.s32.totalorder (!%p272_p11), %s6331_s9, 7  ;;  %s7069_s16 = scalar_lea.vmem (!%p272_p11), [#allocation5], %s6328_s8 }
  0x21   : > { %p5175_p0 = scmp.ne.s32.totalorder (!%p272_p11), %s6205_s20, 0 }
  0x23   : > { %v343_v8 = vld [vmem:[%s7204_s0 + $0x8] sm:$0xff]  ;;  %v345_v10 = vld [vmem:[%s7204_s0 + $0x18] sm:$0xff]  ;;  %s324_s11 = scalar_select %p323_p12, %s6331_s9, 7 }
  0x24   : > { %v359_v9 = vld [vmem:[%s7204_s0 + $0x88] sm:$0x1]  ;;  %v361_v12 = vld [vmem:[%s7204_s0 + $0x98] sm:$0x1] }
  0x25   : > { %v6333_v11 = vpack.c.bf16 %v359_v9, %v343_v8  ;;  %v6338_v13 = vpack.c.bf16 %v361_v12, %v345_v10  ;;  %s5212_s12 = sshll.u32 %s324_s11, 12  ;;  %s4662_s11 = sshll.u32 %s6331_s9, 2 }
  0x26   : > { %s6347_s15 = scalar_lea.vmem %s7205_s1, %s5212_s12  ;;  %p333_p13 = scmp.lt.s32.totalorder %s4662_s11, 31 }
  0x27   : > { %3516 = vmatprep.mubr.bf16.mxu0 %v6333_v11  ;;  %3559 = vmatprep.mubr.bf16.mxu1 %v6338_v13  ;;  %v5271_v14 = vld [vmem:[%s6347_s15 + $0xe4] ss:$16 sps:$4 sm:$0xff]   ;;  %v5275_v16 = vld [vmem:[%s6347_s15 + $0xe0] ss:$16 sps:$4 sm:$0xff]  }
  0x28   : > { %v5273_v15 = vld [vmem:[%s6347_s15 + $0x2e4] ss:$16 sps:$4 sm:$0xff]   ;;  %3484 = vmatprep.subr.bf16.mxu0 %v5271_v14  ;;  %v5276_v17 = vld [vmem:[%s6347_s15 + $0x2e0] ss:$16 sps:$4 sm:$0xff]   ;;  %s7224_s11 = smov (!%p333_p13, %s4662_s11), 31 }
  0x29   : > { %3527 = vmatprep.subr.bf16.mxu1 %v5273_v15  ;;  %v5277_v18 = vld [vmem:[%s6347_s15 + $0xc4] ss:$16 sps:$4 sm:$0xff]   ;;  %3485 = vmatpush1.bf16.msra.mxu0 %v5275_v16  ;;  %v5281_v20 = vld [vmem:[%s6347_s15 + $0xc0] ss:$16 sps:$4 sm:$0xff]   ;;  %s335_s13 = scalar_lea.vmem %s7206_s2, %s7224_s11 }
  0x2a   : > { %3528 = vmatpush1.bf16.msra.mxu1 %v5276_v17  ;;  %v5279_v19 = vld [vmem:[%s6347_s15 + $0x2c4] ss:$16 sps:$4 sm:$0xff]   ;;  %3486 = vmatprep.subr.bf16.mxu0 %v5277_v18  ;;  %v5282_v21 = vld [vmem:[%s6347_s15 + $0x2c0] ss:$16 sps:$4 sm:$0xff]  }
  0x2b   : > { %3529 = vmatprep.subr.bf16.mxu1 %v5279_v19  ;;  %v5283_v22 = vld [vmem:[%s6347_s15 + $0xa4] ss:$16 sps:$4 sm:$0xff]   ;;  %v5287_v24 = vld [vmem:[%s6347_s15 + $0xa0] ss:$16 sps:$4 sm:$0xff]  }
  0x2c   : > { %v5285_v23 = vld [vmem:[%s6347_s15 + $0x2a4] ss:$16 sps:$4 sm:$0xff]   ;;  %v5288_v25 = vld [vmem:[%s6347_s15 + $0x2a0] ss:$16 sps:$4 sm:$0xff]  }
  0x2d   : > { %3487 = vmatpush1.bf16.msra.mxu0 %v5281_v20  ;;  %v5289_v26 = vld [vmem:[%s6347_s15 + $0x84] ss:$16 sps:$4 sm:$0xff]   ;;  %v5293_v28 = vld [vmem:[%s6347_s15 + $0x80] ss:$16 sps:$4 sm:$0xff]  }
  0x2e   : > { %3530 = vmatpush1.bf16.msra.mxu1 %v5282_v21  ;;  %3488 = vmatprep.subr.bf16.mxu0 %v5283_v22  ;;  %v5291_v27 = vld [vmem:[%s6347_s15 + $0x284] ss:$16 sps:$4 sm:$0xff]   ;;  %v5294_v29 = vld [vmem:[%s6347_s15 + $0x280] ss:$16 sps:$4 sm:$0xff]   ;;  %v347_v22 = vld [vmem:[%s7204_s0 + $0x28] sm:$0xff] }
  0x2f   : > { %3531 = vmatprep.subr.bf16.mxu1 %v5285_v23  ;;  %v5295_v30 = vld [vmem:[%s6347_s15 + $0x64] ss:$16 sps:$4 sm:$0xff]   ;;  %v5299_v32 = vld [vmem:[%s6347_s15 + $0x60] ss:$16 sps:$4 sm:$0xff]   ;;  %v363_v23 = vld [vmem:[%s7204_s0 + $0xa8] sm:$0x1] }
  0x30   : > { %v5297_v31 = vld [vmem:[%s6347_s15 + $0x264] ss:$16 sps:$4 sm:$0xff]   ;;  %v5300_v33 = vld [vmem:[%s6347_s15 + $0x260] ss:$16 sps:$4 sm:$0xff]  }
  0x31   : > { %3489 = vmatpush1.bf16.msra.mxu0 %v5287_v24  ;;  %v5301_v34 = vld [vmem:[%s6347_s15 + $0x44] ss:$16 sps:$4 sm:$0xff]   ;;  %v5305_v36 = vld [vmem:[%s6347_s15 + $0x40] ss:$16 sps:$4 sm:$0xff]  }
  0x32   : > { %3532 = vmatpush1.bf16.msra.mxu1 %v5288_v25  ;;  %3490 = vmatprep.subr.bf16.mxu0 %v5289_v26  ;;  %v5303_v35 = vld [vmem:[%s6347_s15 + $0x244] ss:$16 sps:$4 sm:$0xff]   ;;  %v5306_v37 = vld [vmem:[%s6347_s15 + $0x240] ss:$16 sps:$4 sm:$0xff]  }
  0x33   : > { %3533 = vmatprep.subr.bf16.mxu1 %v5291_v27  ;;  %v5307_v38 = vld [vmem:[%s6347_s15 + $0x24] ss:$16 sps:$4 sm:$0xff]   ;;  %v5311_v40 = vld [vmem:[%s6347_s15 + $0x20] ss:$16 sps:$4 sm:$0xff]  }
  0x34   : > { %v5309_v39 = vld [vmem:[%s6347_s15 + $0x224] ss:$16 sps:$4 sm:$0xff]   ;;  %v5312_v41 = vld [vmem:[%s6347_s15 + $0x220] ss:$16 sps:$4 sm:$0xff]  }
  0x35   : > { %3491 = vmatpush1.bf16.msra.mxu0 %v5293_v28  ;;  %v5313_v42 = vld [vmem:[%s6347_s15 + $0x4] ss:$16 sps:$4 sm:$0xff]   ;;  %v5317_v44 = vld [vmem:[%s6347_s15] ss:$16 sps:$4 sm:$0xff]  }
  0x36   : > { %3534 = vmatpush1.bf16.msra.mxu1 %v5294_v29  ;;  %3492 = vmatprep.subr.bf16.mxu0 %v5295_v30  ;;  %v5315_v43 = vld [vmem:[%s6347_s15 + $0x204] ss:$16 sps:$4 sm:$0xff]   ;;  %v5318_v45 = vld [vmem:[%s6347_s15 + $0x200] ss:$16 sps:$4 sm:$0xff]   ;;  %v6441_v30 = vpack.c.bf16 %v363_v23, %v347_v22 }
  0x37   : > { %3535 = vmatprep.subr.bf16.mxu1 %v5297_v31  ;;  %v5319_v46 = vld [vmem:[%s6347_s15 + $0x1e4] ss:$16 sps:$4 sm:$0xff]   ;;  %v5323_v48 = vld [vmem:[%s6347_s15 + $0x1e0] ss:$16 sps:$4 sm:$0xff]  }
  0x38   : > { %v5321_v47 = vld [vmem:[%s6347_s15 + $0x3e4] ss:$16 sps:$4 sm:$0xff]   ;;  %v5324_v49 = vld [vmem:[%s6347_s15 + $0x3e0] ss:$16 sps:$4 sm:$0xff]  }
  0x39   : > { %3493 = vmatpush1.bf16.msra.mxu0 %v5299_v32  ;;  %v5325_v50 = vld [vmem:[%s6347_s15 + $0x1c4] ss:$16 sps:$4 sm:$0xff]   ;;  %v5329_v52 = vld [vmem:[%s6347_s15 + $0x1c0] ss:$16 sps:$4 sm:$0xff]  }
  0x3a   : > { %3536 = vmatpush1.bf16.msra.mxu1 %v5300_v33  ;;  %3494 = vmatprep.subr.bf16.mxu0 %v5301_v34  ;;  %v5327_v51 = vld [vmem:[%s6347_s15 + $0x3c4] ss:$16 sps:$4 sm:$0xff]   ;;  %v5330_v53 = vld [vmem:[%s6347_s15 + $0x3c0] ss:$16 sps:$4 sm:$0xff]  }
  0x3b   : > { %3537 = vmatprep.subr.bf16.mxu1 %v5303_v35  ;;  %v5331_v54 = vld [vmem:[%s6347_s15 + $0x1a4] ss:$16 sps:$4 sm:$0xff]   ;;  %v5335_v56 = vld [vmem:[%s6347_s15 + $0x1a0] ss:$16 sps:$4 sm:$0xff]  }
  0x3c   : > { %v5333_v55 = vld [vmem:[%s6347_s15 + $0x3a4] ss:$16 sps:$4 sm:$0xff]   ;;  %v5336_v57 = vld [vmem:[%s6347_s15 + $0x3a0] ss:$16 sps:$4 sm:$0xff]  }
  0x3d   : > { %3495 = vmatpush1.bf16.msra.mxu0 %v5305_v36  ;;  %v5337_v58 = vld [vmem:[%s6347_s15 + $0x184] ss:$16 sps:$4 sm:$0xff]   ;;  %v5341_v60 = vld [vmem:[%s6347_s15 + $0x180] ss:$16 sps:$4 sm:$0xff]  }
  0x3e   : > { %3538 = vmatpush1.bf16.msra.mxu1 %v5306_v37  ;;  %3496 = vmatprep.subr.bf16.mxu0 %v5307_v38  ;;  %v5339_v59 = vld [vmem:[%s6347_s15 + $0x384] ss:$16 sps:$4 sm:$0xff]   ;;  %v5342_v61 = vld [vmem:[%s6347_s15 + $0x380] ss:$16 sps:$4 sm:$0xff]  }
  0x3f   : > { %3539 = vmatprep.subr.bf16.mxu1 %v5309_v39  ;;  %v5343_v62 = vld [vmem:[%s6347_s15 + $0x164] ss:$16 sps:$4 sm:$0xff]   ;;  %v5347_v0 = vld [vmem:[%s6347_s15 + $0x160] ss:$16 sps:$4 sm:$0xff]  }
  0x40   : > { %v5345_v63 = vld [vmem:[%s6347_s15 + $0x364] ss:$16 sps:$4 sm:$0xff]   ;;  %v5348_v1 = vld [vmem:[%s6347_s15 + $0x360] ss:$16 sps:$4 sm:$0xff]  }
  0x41   : > { %3497 = vmatpush1.bf16.msra.mxu0 %v5311_v40  ;;  %v5349_v2 = vld [vmem:[%s6347_s15 + $0x144] ss:$16 sps:$4 sm:$0xff]   ;;  %v5353_v4 = vld [vmem:[%s6347_s15 + $0x140] ss:$16 sps:$4 sm:$0xff]  }
  0x42   : > { %3540 = vmatpush1.bf16.msra.mxu1 %v5312_v41  ;;  %3498 = vmatprep.subr.bf16.mxu0 %v5313_v42  ;;  %v5351_v3 = vld [vmem:[%s6347_s15 + $0x344] ss:$16 sps:$4 sm:$0xff]   ;;  %v5354_v5 = vld [vmem:[%s6347_s15 + $0x340] ss:$16 sps:$4 sm:$0xff]  }
  0x43   : > { %3541 = vmatprep.subr.bf16.mxu1 %v5315_v43  ;;  %v5355_v6 = vld [vmem:[%s6347_s15 + $0x124] ss:$16 sps:$4 sm:$0xff]   ;;  %v5359_v8 = vld [vmem:[%s6347_s15 + $0x120] ss:$16 sps:$4 sm:$0xff]  }
  0x44   : > { %v5357_v7 = vld [vmem:[%s6347_s15 + $0x324] ss:$16 sps:$4 sm:$0xff]   ;;  %v5360_v9 = vld [vmem:[%s6347_s15 + $0x320] ss:$16 sps:$4 sm:$0xff]  }
  0x45   : > { %3499 = vmatpush1.bf16.msra.mxu0 %v5317_v44  ;;  %v5361_v10 = vld [vmem:[%s6347_s15 + $0x104] ss:$16 sps:$4 sm:$0xff]   ;;  %v358_v15 = vld [vmem:[%s7204_s0 + $0x80] sm:$0x1]  ;;  %v360_v17 = vld [vmem:[%s7204_s0 + $0x90] sm:$0x1] }
  0x46   : > { %3542 = vmatpush1.bf16.msra.mxu1 %v5318_v45  ;;  %3500 = vmatprep.subr.bf16.mxu0 %v5319_v46  ;;  %v5363_v12 = vld [vmem:[%s6347_s15 + $0x304] ss:$16 sps:$4 sm:$0xff]   ;;  %v5365_v18 = vld [vmem:[%s6347_s15 + $0x100] ss:$16 sps:$4 sm:$0xff]  }
  0x47   : > { %3543 = vmatprep.subr.bf16.mxu1 %v5321_v47  ;;  %v342_v14 = vld [vmem:[%s7204_s0] sm:$0xff]  ;;  %v344_v16 = vld [vmem:[%s7204_s0 + $0x10] sm:$0xff] }
  0x48   : > { %v5366_v19 = vld [vmem:[%s6347_s15 + $0x300] ss:$16 sps:$4 sm:$0xff]   ;;  %v5369_v20 = vld [vmem:[%s6347_s15 + $0x4e4] ss:$16 sps:$4 sm:$0xff]   ;;  %v6433_v24 = vpack.c.bf16 %v358_v15, %v342_v14  ;;  %v6435_v25 = vpack.c.bf16 %v360_v17, %v344_v16 }
  0x49   : > { %3501 = vmatpush2.bf16.msra.mxu0 %v5323_v48  ;;  %v5372_v21 = vld [vmem:[%s6347_s15 + $0x6e4] ss:$16 sps:$4 sm:$0xff]   ;;  %v5367_v26 = vld [vmem:[%s6347_s15 + $0x4e0] ss:$16 sps:$4 sm:$0xff]   ;;  %v349_v48 = vld [vmem:[%s7204_s0 + $0x38] sm:$0xff] }
  0x4a   : > { %3544 = vmatpush2.bf16.msra.mxu1 %v5324_v49  ;;  %3502 = vmatprep.subr.bf16.mxu0 %v5325_v50  ;;  %v5370_v27 = vld [vmem:[%s6347_s15 + $0x6e0] ss:$16 sps:$4 sm:$0xff]   ;;  %v5375_v28 = vld [vmem:[%s6347_s15 + $0x4c4] ss:$16 sps:$4 sm:$0xff]  }
  0x4b   : > { %3545 = vmatprep.subr.bf16.mxu1 %v5327_v51  ;;  %v5378_v29 = vld [vmem:[%s6347_s15 + $0x6c4] ss:$16 sps:$4 sm:$0xff]   ;;  %v5373_v31 = vld [vmem:[%s6347_s15 + $0x4c0] ss:$16 sps:$4 sm:$0xff]  }
  0x4c   : > { %v5376_v32 = vld [vmem:[%s6347_s15 + $0x6c0] ss:$16 sps:$4 sm:$0xff]   ;;  %v5381_v33 = vld [vmem:[%s6347_s15 + $0x4a4] ss:$16 sps:$4 sm:$0xff]  }
  0x4d   : > { %3503 = vmatpush2.bf16.msra.mxu0 %v5329_v52  ;;  %v5384_v34 = vld [vmem:[%s6347_s15 + $0x6a4] ss:$16 sps:$4 sm:$0xff]   ;;  %v5379_v35 = vld [vmem:[%s6347_s15 + $0x4a0] ss:$16 sps:$4 sm:$0xff]   ;;  %v365_v52 = vld [vmem:[%s7204_s0 + $0xb8] sm:$0x1] }
  0x4e   : > { %3546 = vmatpush2.bf16.msra.mxu1 %v5330_v53  ;;  %3504 = vmatprep.subr.bf16.mxu0 %v5331_v54  ;;  %v5382_v36 = vld [vmem:[%s6347_s15 + $0x6a0] ss:$16 sps:$4 sm:$0xff]   ;;  %v5387_v37 = vld [vmem:[%s6347_s15 + $0x484] ss:$16 sps:$4 sm:$0xff]   ;;  %v6472_v53 = vpack.c.bf16 %v365_v52, %v349_v48  ;;  %v369_v48 = vld [vmem:[%s7204_s0 + $0xd8] sm:$0x1] }
  0x4f   : > { %3547 = vmatprep.subr.bf16.mxu1 %v5333_v55  ;;  %v5390_v38 = vld [vmem:[%s6347_s15 + $0x684] ss:$16 sps:$4 sm:$0xff]   ;;  %v5385_v39 = vld [vmem:[%s6347_s15 + $0x480] ss:$16 sps:$4 sm:$0xff]  }
  0x50   : > { %v5388_v40 = vld [vmem:[%s6347_s15 + $0x680] ss:$16 sps:$4 sm:$0xff]   ;;  %v5393_v41 = vld [vmem:[%s6347_s15 + $0x464] ss:$16 sps:$4 sm:$0xff]  }
  0x51   : > { %3505 = vmatpush2.bf16.msra.mxu0 %v5335_v56  ;;  %v5396_v42 = vld [vmem:[%s6347_s15 + $0x664] ss:$16 sps:$4 sm:$0xff]   ;;  %v5391_v43 = vld [vmem:[%s6347_s15 + $0x460] ss:$16 sps:$4 sm:$0xff]  }
  0x52   : > { %3548 = vmatpush2.bf16.msra.mxu1 %v5336_v57  ;;  %3506 = vmatprep.subr.bf16.mxu0 %v5337_v58  ;;  %v5394_v44 = vld [vmem:[%s6347_s15 + $0x660] ss:$16 sps:$4 sm:$0xff]   ;;  %v5399_v45 = vld [vmem:[%s6347_s15 + $0x444] ss:$16 sps:$4 sm:$0xff]  }
  0x53   : > { %3549 = vmatprep.subr.bf16.mxu1 %v5339_v59  ;;  %v5402_v46 = vld [vmem:[%s6347_s15 + $0x644] ss:$16 sps:$4 sm:$0xff]   ;;  %v5397_v47 = vld [vmem:[%s6347_s15 + $0x440] ss:$16 sps:$4 sm:$0xff]  }
  0x54   : > { %v5400_v49 = vld [vmem:[%s6347_s15 + $0x640] ss:$16 sps:$4 sm:$0xff]   ;;  %v5405_v50 = vld [vmem:[%s6347_s15 + $0x424] ss:$16 sps:$4 sm:$0xff]  }
  0x55   : > { %3507 = vmatpush2.bf16.msra.mxu0 %v5341_v60  ;;  %v5408_v51 = vld [vmem:[%s6347_s15 + $0x624] ss:$16 sps:$4 sm:$0xff]   ;;  %v5403_v54 = vld [vmem:[%s6347_s15 + $0x420] ss:$16 sps:$4 sm:$0xff]  }
  0x56   : > { %3550 = vmatpush2.bf16.msra.mxu1 %v5342_v61  ;;  %3508 = vmatprep.subr.bf16.mxu0 %v5343_v62  ;;  %v5406_v55 = vld [vmem:[%s6347_s15 + $0x620] ss:$16 sps:$4 sm:$0xff]   ;;  %v5411_v56 = vld [vmem:[%s6347_s15 + $0x404] ss:$16 sps:$4 sm:$0xff]  }
  0x57   : > { %3551 = vmatprep.subr.bf16.mxu1 %v5345_v63  ;;  %v5414_v57 = vld [vmem:[%s6347_s15 + $0x604] ss:$16 sps:$4 sm:$0xff]   ;;  %v5409_v58 = vld [vmem:[%s6347_s15 + $0x400] ss:$16 sps:$4 sm:$0xff]  }
  0x58   : > { %v5412_v59 = vld [vmem:[%s6347_s15 + $0x600] ss:$16 sps:$4 sm:$0xff]   ;;  %v5417_v60 = vld [vmem:[%s6347_s15 + $0x5e4] ss:$16 sps:$4 sm:$0xff]  }
  0x59   : > { %3509 = vmatpush2.bf16.msra.mxu0 %v5347_v0  ;;  %v5420_v61 = vld [vmem:[%s6347_s15 + $0x7e4] ss:$16 sps:$4 sm:$0xff]   ;;  %v5415_v62 = vld [vmem:[%s6347_s15 + $0x5e0] ss:$16 sps:$4 sm:$0xff]  }
  0x5a   : > { %3552 = vmatpush2.bf16.msra.mxu1 %v5348_v1  ;;  %3510 = vmatprep.subr.bf16.mxu0 %v5349_v2  ;;  %v5418_v63 = vld [vmem:[%s6347_s15 + $0x7e0] ss:$16 sps:$4 sm:$0xff]   ;;  %v5423_v0 = vld [vmem:[%s6347_s15 + $0x5c4] ss:$16 sps:$4 sm:$0xff]  }
  0x5b   : > { %3553 = vmatprep.subr.bf16.mxu1 %v5351_v3  ;;  %v5426_v1 = vld [vmem:[%s6347_s15 + $0x7c4] ss:$16 sps:$4 sm:$0xff]   ;;  %v5421_v2 = vld [vmem:[%s6347_s15 + $0x5c0] ss:$16 sps:$4 sm:$0xff]  }
  0x5c   : > { %v5424_v3 = vld [vmem:[%s6347_s15 + $0x7c0] ss:$16 sps:$4 sm:$0xff]   ;;  %v5441_v14 = vld [vmem:[%s6347_s15 + $0x564] ss:$16 sps:$4 sm:$0xff]  }
  0x5d   : > { %3511 = vmatpush2.bf16.msra.mxu0 %v5353_v4  ;;  %v5429_v4 = vld [vmem:[%s6347_s15 + $0x5a4] ss:$16 sps:$4 sm:$0xff]   ;;  %v5439_v16 = vld [vmem:[%s6347_s15 + $0x560] ss:$16 sps:$4 sm:$0xff]  }
  0x5e   : > { %3554 = vmatpush2.bf16.msra.mxu1 %v5354_v5  ;;  %3512 = vmatprep.subr.bf16.mxu0 %v5355_v6  ;;  %v5432_v5 = vld [vmem:[%s6347_s15 + $0x7a4] ss:$16 sps:$4 sm:$0xff]   ;;  %v5427_v6 = vld [vmem:[%s6347_s15 + $0x5a0] ss:$16 sps:$4 sm:$0xff]  }
  0x5f   : > { %3555 = vmatprep.subr.bf16.mxu1 %v5357_v7  ;;  %v5430_v7 = vld [vmem:[%s6347_s15 + $0x7a0] ss:$16 sps:$4 sm:$0xff]   ;;  %v5444_v15 = vld [vmem:[%s6347_s15 + $0x764] ss:$16 sps:$4 sm:$0xff]  }
  0x60   : > { %v5442_v17 = vld [vmem:[%s6347_s15 + $0x760] ss:$16 sps:$4 sm:$0xff]   ;;  %v5453_v22 = vld [vmem:[%s6347_s15 + $0x524] ss:$16 sps:$4 sm:$0xff]  }
  0x61   : > { %3513 = vmatpush2.bf16.msra.mxu0 %v5359_v8  ;;  %v5435_v8 = vld [vmem:[%s6347_s15 + $0x584] ss:$16 sps:$4 sm:$0xff]   ;;  %v5472_v52 = vld [vmem:[%s6347_s15 + $0xac0] ss:$16 sps:$4 sm:$0xff]  }
  0x62   : > { %3556 = vmatpush2.bf16.msra.mxu1 %v5360_v9  ;;  %3514 = vmatprep.subr.bf16.mxu0 %v5361_v10  ;;  %v5438_v9 = vld [vmem:[%s6347_s15 + $0x784] ss:$16 sps:$4 sm:$0xff]   ;;  %v5433_v10 = vld [vmem:[%s6347_s15 + $0x580] ss:$16 sps:$4 sm:$0xff]  }
  0x63   : > { %3557 = vmatprep.subr.bf16.mxu1 %v5363_v12  ;;  %v5436_v12 = vld [vmem:[%s6347_s15 + $0x780] ss:$16 sps:$4 sm:$0xff]   ;;  %v5456_v23 = vld [vmem:[%s6347_s15 + $0x724] ss:$16 sps:$4 sm:$0xff]  }
  0x65   : > { %3515 = vmatpush2.bf16.msra.mxu0 %v5365_v18  ;;  %v5447_v18 = vld [vmem:[%s6347_s15 + $0x544] ss:$16 sps:$4 sm:$0xff]  }
  0x66   : > { %3558 = vmatpush2.bf16.msra.mxu1 %v5366_v19  ;;  %3570 = vmatprep.subr.bf16.mxu0 %v5369_v20  ;;  %v5450_v19 = vld [vmem:[%s6347_s15 + $0x744] ss:$16 sps:$4 sm:$0xff]   ;;  %v5445_v20 = vld [vmem:[%s6347_s15 + $0x540] ss:$16 sps:$4 sm:$0xff]  }
  0x67   : > { %3613 = vmatprep.subr.bf16.mxu1 %v5372_v21  ;;  %v5448_v21 = vld [vmem:[%s6347_s15 + $0x740] ss:$16 sps:$4 sm:$0xff]  }
  0x68   : > { %3517 = vmatmul.mubr.bf16.vlgmr.msra.gmra.mxu0 %v6433_v24 }
  0x69   : > { %3560 = vmatmul.mubr.bf16.vlgmr.msra.gmra.mxu1 %v6435_v25  ;;  %3571 = vmatpush1.bf16.msra.mxu0 %v5367_v26  ;;  %v5451_v26 = vld [vmem:[%s6347_s15 + $0x520] ss:$16 sps:$4 sm:$0xff]  }
  0x6a   : > { %3614 = vmatpush1.bf16.msra.mxu1 %v5370_v27  ;;  %3572 = vmatprep.subr.bf16.mxu0 %v5375_v28  ;;  %v5454_v27 = vld [vmem:[%s6347_s15 + $0x720] ss:$16 sps:$4 sm:$0xff]   ;;  %v5459_v28 = vld [vmem:[%s6347_s15 + $0x504] ss:$16 sps:$4 sm:$0xff]  }
  0x6b   : > { %3615 = vmatprep.subr.bf16.mxu1 %v5378_v29  ;;  %3602 = vmatprep.mubr.bf16.mxu0 %v6441_v30  ;;  %v5462_v29 = vld [vmem:[%s6347_s15 + $0x704] ss:$16 sps:$4 sm:$0xff]  }
  0x6c   : > { %3645 = vmatprep.mubr.bf16.mxu1 %v6472_v53 }
  0x6d   : > { %3573 = vmatpush1.bf16.msra.mxu0 %v5373_v31  ;;  %v5457_v31 = vld [vmem:[%s6347_s15 + $0x500] ss:$16 sps:$4 sm:$0xff]  }
  0x6e   : > { %3616 = vmatpush1.bf16.msra.mxu1 %v5376_v32  ;;  %3574 = vmatprep.subr.bf16.mxu0 %v5381_v33  ;;  %v5460_v32 = vld [vmem:[%s6347_s15 + $0x700] ss:$16 sps:$4 sm:$0xff]  }
  0x6f   : > { %3617 = vmatprep.subr.bf16.mxu1 %v5384_v34  ;;  %v346_v33 = vld [vmem:[%s7204_s0 + $0x20] sm:$0xff] }
  0x70   : > { %v362_v34 = vld [vmem:[%s7204_s0 + $0xa0] sm:$0x1] }
  0x71   : > { %3575 = vmatpush1.bf16.msra.mxu0 %v5379_v35  ;;  %v348_v35 = vld [vmem:[%s7204_s0 + $0x30] sm:$0xff] }
  0x72   : > { %3618 = vmatpush1.bf16.msra.mxu1 %v5382_v36  ;;  %3576 = vmatprep.subr.bf16.mxu0 %v5387_v37  ;;  %v364_v36 = vld [vmem:[%s7204_s0 + $0xb0] sm:$0x1]  ;;  %v5465_v37 = vld [vmem:[%s6347_s15 + $0x8e4] ss:$16 sps:$4 sm:$0xff]  }
  0x73   : > { %3619 = vmatprep.subr.bf16.mxu1 %v5390_v38  ;;  %v5468_v38 = vld [vmem:[%s6347_s15 + $0xae4] ss:$16 sps:$4 sm:$0xff]  }
  0x75   : > { %3577 = vmatpush1.bf16.msra.mxu0 %v5385_v39  ;;  %v6527_v39 = vpack.c.bf16 %v362_v34, %v346_v33  ;;  %v5529_v33 = vld [vmem:[%s6347_s15 + $0x980] ss:$16 sps:$4 sm:$0xff]  }
  0x76   : > { %3620 = vmatpush1.bf16.msra.mxu1 %v5388_v40  ;;  %3578 = vmatprep.subr.bf16.mxu0 %v5393_v41  ;;  %v6529_v40 = vpack.c.bf16 %v364_v36, %v348_v35  ;;  %v5463_v41 = vld [vmem:[%s6347_s15 + $0x8e0] ss:$16 sps:$4 sm:$0xff]   ;;  %v5537_v35 = vld [vmem:[%s6347_s15 + $0x964] ss:$16 sps:$4 sm:$0xff]  }
  0x77   : > { %3621 = vmatprep.subr.bf16.mxu1 %v5396_v42  ;;  %v5466_v42 = vld [vmem:[%s6347_s15 + $0xae0] ss:$16 sps:$4 sm:$0xff]   ;;  %v5540_v36 = vld [vmem:[%s6347_s15 + $0xb64] ss:$16 sps:$4 sm:$0xff]  }
  0x78   : > { %v5532_v34 = vld [vmem:[%s6347_s15 + $0xb80] ss:$16 sps:$4 sm:$0xff]  }
  0x79   : > { %3579 = vmatpush1.bf16.msra.mxu0 %v5391_v43  ;;  %v5471_v43 = vld [vmem:[%s6347_s15 + $0x8c4] ss:$16 sps:$4 sm:$0xff]  }
  0x7a   : > { %3622 = vmatpush1.bf16.msra.mxu1 %v5394_v44  ;;  %3580 = vmatprep.subr.bf16.mxu0 %v5399_v45  ;;  %v5474_v44 = vld [vmem:[%s6347_s15 + $0xac4] ss:$16 sps:$4 sm:$0xff]   ;;  %v351_v45 = vld [vmem:[%s7204_s0 + $0x48] sm:$0xff] }
  0x7b   : > { %3623 = vmatprep.subr.bf16.mxu1 %v5402_v46  ;;  %v367_v46 = vld [vmem:[%s7204_s0 + $0xc8] sm:$0x1] }
  0x7d   : > { %3581 = vmatpush1.bf16.msra.mxu0 %v5397_v47  ;;  %v353_v47 = vld [vmem:[%s7204_s0 + $0x58] sm:$0xff] }
  0x7e   : > { %3624 = vmatpush1.bf16.msra.mxu1 %v5400_v49  ;;  %3582 = vmatprep.subr.bf16.mxu0 %v5405_v50  ;;  %v5469_v49 = vld [vmem:[%s6347_s15 + $0x8c0] ss:$16 sps:$4 sm:$0xff]   ;;  %v6550_v50 = vpack.c.bf16 %v367_v46, %v351_v45  ;;  %v5549_v45 = vld [vmem:[%s6347_s15 + $0x924] ss:$16 sps:$4 sm:$0xff]  }
  0x7f   : > { %3625 = vmatprep.subr.bf16.mxu1 %v5408_v51  ;;  %v6552_v51 = vpack.c.bf16 %v369_v48, %v353_v47  ;;  %v5552_v46 = vld [vmem:[%s6347_s15 + $0xb24] ss:$16 sps:$4 sm:$0xff]   ;;  %v5547_v47 = vld [vmem:[%s6347_s15 + $0x920] ss:$16 sps:$4 sm:$0xff]  }
  0x80   : > { %v5550_v48 = vld [vmem:[%s6347_s15 + $0xb20] ss:$16 sps:$4 sm:$0xff]  }
  0x81   : > { %3583 = vmatpush1.bf16.msra.mxu0 %v5403_v54  ;;  %v5477_v54 = vld [vmem:[%s6347_s15 + $0x8a4] ss:$16 sps:$4 sm:$0xff]  }
  0x82   : > { %3626 = vmatpush1.bf16.msra.mxu1 %v5406_v55  ;;  %3584 = vmatprep.subr.bf16.mxu0 %v5411_v56  ;;  %v5480_v55 = vld [vmem:[%s6347_s15 + $0xaa4] ss:$16 sps:$4 sm:$0xff]   ;;  %v5475_v56 = vld [vmem:[%s6347_s15 + $0x8a0] ss:$16 sps:$4 sm:$0xff]  }
  0x83   : > { %3627 = vmatprep.subr.bf16.mxu1 %v5414_v57  ;;  %v5478_v57 = vld [vmem:[%s6347_s15 + $0xaa0] ss:$16 sps:$4 sm:$0xff]  }
  0x85   : > { %3585 = vmatpush1.bf16.msra.mxu0 %v5409_v58  ;;  %v5483_v58 = vld [vmem:[%s6347_s15 + $0x884] ss:$16 sps:$4 sm:$0xff]  }
  0x86   : > { %3628 = vmatpush1.bf16.msra.mxu1 %v5412_v59  ;;  %3586 = vmatprep.subr.bf16.mxu0 %v5417_v60  ;;  %v5486_v59 = vld [vmem:[%s6347_s15 + $0xa84] ss:$16 sps:$4 sm:$0xff]   ;;  %v5481_v60 = vld [vmem:[%s6347_s15 + $0x880] ss:$16 sps:$4 sm:$0xff]  }
  0x87   : > { %3629 = vmatprep.subr.bf16.mxu1 %v5420_v61  ;;  %v5484_v61 = vld [vmem:[%s6347_s15 + $0xa80] ss:$16 sps:$4 sm:$0xff]  }
  0x89   : > { %3587 = vmatpush2.bf16.msra.mxu0 %v5415_v62  ;;  %v5489_v62 = vld [vmem:[%s6347_s15 + $0x864] ss:$16 sps:$4 sm:$0xff]  }
  0x8a   : > { %3630 = vmatpush2.bf16.msra.mxu1 %v5418_v63  ;;  %3588 = vmatprep.subr.bf16.mxu0 %v5423_v0  ;;  %v5492_v63 = vld [vmem:[%s6347_s15 + $0xa64] ss:$16 sps:$4 sm:$0xff]   ;;  %v5487_v0 = vld [vmem:[%s6347_s15 + $0x860] ss:$16 sps:$4 sm:$0xff]  }
  0x8b   : > { %3631 = vmatprep.subr.bf16.mxu1 %v5426_v1  ;;  %v5490_v1 = vld [vmem:[%s6347_s15 + $0xa60] ss:$16 sps:$4 sm:$0xff]  }
  0x8d   : > { %3589 = vmatpush2.bf16.msra.mxu0 %v5421_v2  ;;  %v5495_v2 = vld [vmem:[%s6347_s15 + $0x844] ss:$16 sps:$4 sm:$0xff]  }
  0x8e   : > { %3632 = vmatpush2.bf16.msra.mxu1 %v5424_v3  ;;  %3590 = vmatprep.subr.bf16.mxu0 %v5429_v4  ;;  %v5498_v3 = vld [vmem:[%s6347_s15 + $0xa44] ss:$16 sps:$4 sm:$0xff]   ;;  %v5493_v4 = vld [vmem:[%s6347_s15 + $0x840] ss:$16 sps:$4 sm:$0xff]  }
  0x8f   : > { %3633 = vmatprep.subr.bf16.mxu1 %v5432_v5  ;;  %v5496_v5 = vld [vmem:[%s6347_s15 + $0xa40] ss:$16 sps:$4 sm:$0xff]  }
  0x91   : > { %3591 = vmatpush2.bf16.msra.mxu0 %v5427_v6  ;;  %v5501_v6 = vld [vmem:[%s6347_s15 + $0x824] ss:$16 sps:$4 sm:$0xff]  }
  0x92   : > { %3634 = vmatpush2.bf16.msra.mxu1 %v5430_v7  ;;  %3592 = vmatprep.subr.bf16.mxu0 %v5435_v8  ;;  %v5504_v7 = vld [vmem:[%s6347_s15 + $0xa24] ss:$16 sps:$4 sm:$0xff]   ;;  %v5499_v8 = vld [vmem:[%s6347_s15 + $0x820] ss:$16 sps:$4 sm:$0xff]  }
  0x93   : > { %3635 = vmatprep.subr.bf16.mxu1 %v5438_v9  ;;  %v5502_v9 = vld [vmem:[%s6347_s15 + $0xa20] ss:$16 sps:$4 sm:$0xff]  }
  0x95   : > { %3593 = vmatpush2.bf16.msra.mxu0 %v5433_v10  ;;  %v5507_v10 = vld [vmem:[%s6347_s15 + $0x804] ss:$16 sps:$4 sm:$0xff]  }
  0x96   : > { %3636 = vmatpush2.bf16.msra.mxu1 %v5436_v12  ;;  %3594 = vmatprep.subr.bf16.mxu0 %v5441_v14  ;;  %v5510_v12 = vld [vmem:[%s6347_s15 + $0xa04] ss:$16 sps:$4 sm:$0xff]   ;;  %v5505_v14 = vld [vmem:[%s6347_s15 + $0x800] ss:$16 sps:$4 sm:$0xff]  }
  0x97   : > { %3637 = vmatprep.subr.bf16.mxu1 %v5444_v15  ;;  %v5508_v15 = vld [vmem:[%s6347_s15 + $0xa00] ss:$16 sps:$4 sm:$0xff]  }
  0x99   : > { %3595 = vmatpush2.bf16.msra.mxu0 %v5439_v16  ;;  %v5513_v16 = vld [vmem:[%s6347_s15 + $0x9e4] ss:$16 sps:$4 sm:$0xff]  }
  0x9a   : > { %3638 = vmatpush2.bf16.msra.mxu1 %v5442_v17  ;;  %3596 = vmatprep.subr.bf16.mxu0 %v5447_v18  ;;  %v5516_v17 = vld [vmem:[%s6347_s15 + $0xbe4] ss:$16 sps:$4 sm:$0xff]   ;;  %v5511_v18 = vld [vmem:[%s6347_s15 + $0x9e0] ss:$16 sps:$4 sm:$0xff]  }
  0x9b   : > { %3639 = vmatprep.subr.bf16.mxu1 %v5450_v19  ;;  %v5514_v19 = vld [vmem:[%s6347_s15 + $0xbe0] ss:$16 sps:$4 sm:$0xff]  }
  0x9d   : > { %3597 = vmatpush2.bf16.msra.mxu0 %v5445_v20  ;;  %v5519_v20 = vld [vmem:[%s6347_s15 + $0x9c4] ss:$16 sps:$4 sm:$0xff]  }
  0x9e   : > { %3640 = vmatpush2.bf16.msra.mxu1 %v5448_v21  ;;  %3598 = vmatprep.subr.bf16.mxu0 %v5453_v22  ;;  %v5522_v21 = vld [vmem:[%s6347_s15 + $0xbc4] ss:$16 sps:$4 sm:$0xff]   ;;  %v5517_v22 = vld [vmem:[%s6347_s15 + $0x9c0] ss:$16 sps:$4 sm:$0xff]  }
  0x9f   : > { %3641 = vmatprep.subr.bf16.mxu1 %v5456_v23  ;;  %v5520_v23 = vld [vmem:[%s6347_s15 + $0xbc0] ss:$16 sps:$4 sm:$0xff]  }
  0xa1   : > { %3599 = vmatpush2.bf16.msra.mxu0 %v5451_v26  ;;  %v5525_v26 = vld [vmem:[%s6347_s15 + $0x9a4] ss:$16 sps:$4 sm:$0xff]  }
  0xa2   : > { %3642 = vmatpush2.bf16.msra.mxu1 %v5454_v27  ;;  %3600 = vmatprep.subr.bf16.mxu0 %v5459_v28  ;;  %v5528_v27 = vld [vmem:[%s6347_s15 + $0xba4] ss:$16 sps:$4 sm:$0xff]   ;;  %v5523_v28 = vld [vmem:[%s6347_s15 + $0x9a0] ss:$16 sps:$4 sm:$0xff]  }
  0xa3   : > { %3643 = vmatprep.subr.bf16.mxu1 %v5462_v29  ;;  %v5526_v29 = vld [vmem:[%s6347_s15 + $0xba0] ss:$16 sps:$4 sm:$0xff]  }
  0xa5   : > { %3601 = vmatpush2.bf16.msra.mxu0 %v5457_v31  ;;  %v5531_v31 = vld [vmem:[%s6347_s15 + $0x984] ss:$16 sps:$4 sm:$0xff]  }
  0xa6   : > { %3644 = vmatpush2.bf16.msra.mxu1 %v5460_v32  ;;  %3656 = vmatprep.subr.bf16.mxu0 %v5465_v37  ;;  %v5534_v32 = vld [vmem:[%s6347_s15 + $0xb84] ss:$16 sps:$4 sm:$0xff]   ;;  %v5535_v37 = vld [vmem:[%s6347_s15 + $0x960] ss:$16 sps:$4 sm:$0xff]  }
  0xa7   : > { %3699 = vmatprep.subr.bf16.mxu1 %v5468_v38  ;;  %v5538_v38 = vld [vmem:[%s6347_s15 + $0xb60] ss:$16 sps:$4 sm:$0xff]  }
  0xa8   : > { %3603 = vmatmul.mubr.bf16.vlgmr.msra.gmra.mxu0 %v6527_v39 }
  0xa9   : > { %3646 = vmatmul.mubr.bf16.vlgmr.msra.gmra.mxu1 %v6529_v40  ;;  %3657 = vmatpush1.bf16.msra.mxu0 %v5463_v41  ;;  %v5543_v41 = vld [vmem:[%s6347_s15 + $0x944] ss:$16 sps:$4 sm:$0xff]  }
  0xaa   : > { %3700 = vmatpush1.bf16.msra.mxu1 %v5466_v42  ;;  %3658 = vmatprep.subr.bf16.mxu0 %v5471_v43  ;;  %v5546_v42 = vld [vmem:[%s6347_s15 + $0xb44] ss:$16 sps:$4 sm:$0xff]   ;;  %v5541_v43 = vld [vmem:[%s6347_s15 + $0x940] ss:$16 sps:$4 sm:$0xff]  }
  0xab   : > { %3701 = vmatprep.subr.bf16.mxu1 %v5474_v44  ;;  %3688 = vmatprep.mubr.bf16.mxu0 %v6550_v50  ;;  %v5544_v44 = vld [vmem:[%s6347_s15 + $0xb40] ss:$16 sps:$4 sm:$0xff]  }
  0xac   : > { %3731 = vmatprep.mubr.bf16.mxu1 %v6552_v51 }
  0xad   : > { %3659 = vmatpush1.bf16.msra.mxu0 %v5469_v49  ;;  %v5555_v49 = vld [vmem:[%s6347_s15 + $0x904] ss:$16 sps:$4 sm:$0xff]  }
  0xae   : > { %3702 = vmatpush1.bf16.msra.mxu1 %v5472_v52  ;;  %3660 = vmatprep.subr.bf16.mxu0 %v5477_v54  ;;  %v5558_v52 = vld [vmem:[%s6347_s15 + $0xb04] ss:$16 sps:$4 sm:$0xff]   ;;  %v5553_v54 = vld [vmem:[%s6347_s15 + $0x900] ss:$16 sps:$4 sm:$0xff]  }
  0xaf   : > { %3703 = vmatprep.subr.bf16.mxu1 %v5480_v55  ;;  %v5556_v55 = vld [vmem:[%s6347_s15 + $0xb00] ss:$16 sps:$4 sm:$0xff]  }
  0xb1   : > { %3661 = vmatpush1.bf16.msra.mxu0 %v5475_v56  ;;  %v350_v56 = vld [vmem:[%s7204_s0 + $0x40] sm:$0xff] }
  0xb2   : > { %3704 = vmatpush1.bf16.msra.mxu1 %v5478_v57  ;;  %3662 = vmatprep.subr.bf16.mxu0 %v5483_v58  ;;  %v366_v57 = vld [vmem:[%s7204_s0 + $0xc0] sm:$0x1]  ;;  %v352_v58 = vld [vmem:[%s7204_s0 + $0x50] sm:$0xff] }
  0xb3   : > { %3705 = vmatprep.subr.bf16.mxu1 %v5486_v59  ;;  %v368_v59 = vld [vmem:[%s7204_s0 + $0xd0] sm:$0x1] }
  0xb5   : > { %3663 = vmatpush1.bf16.msra.mxu0 %v5481_v60  ;;  %v5561_v60 = vld [vmem:[%s6347_s15 + $0xce4] ss:$16 sps:$4 sm:$0xff]  }
  0xb6   : > { %3706 = vmatpush1.bf16.msra.mxu1 %v5484_v61  ;;  %3664 = vmatprep.subr.bf16.mxu0 %v5489_v62  ;;  %v5564_v61 = vld [vmem:[%s6347_s15 + $0xee4] ss:$16 sps:$4 sm:$0xff]   ;;  %v355_v62 = vld [vmem:[%s7204_s0 + $0x68] sm:$0xff] }
  0xb7   : > { %3707 = vmatprep.subr.bf16.mxu1 %v5492_v63  ;;  %v371_v63 = vld [vmem:[%s7204_s0 + $0xe8] sm:$0x1] }
  0xb9   : > { %3665 = vmatpush1.bf16.msra.mxu0 %v5487_v0  ;;  %v357_v0 = vld [vmem:[%s7204_s0 + $0x78] sm:$0xff] }
  0xba   : > { %3708 = vmatpush1.bf16.msra.mxu1 %v5490_v1  ;;  %3666 = vmatprep.subr.bf16.mxu0 %v5495_v2  ;;  %v6636_v1 = vpack.c.bf16 %v366_v57, %v350_v56  ;;  %v6638_v2 = vpack.c.bf16 %v368_v59, %v352_v58  ;;  %v5619_v56 = vld [vmem:[%s6347_s15 + $0xda0] ss:$16 sps:$4 sm:$0xff]   ;;  %v5627_v58 = vld [vmem:[%s6347_s15 + $0xd84] ss:$16 sps:$4 sm:$0xff]  }
  0xbb   : > { %3709 = vmatprep.subr.bf16.mxu1 %v5498_v3  ;;  %v373_v3 = vld [vmem:[%s7204_s0 + $0xf8] sm:$0x1]  ;;  %v5622_v57 = vld [vmem:[%s6347_s15 + $0xfa0] ss:$16 sps:$4 sm:$0xff]   ;;  %v5630_v59 = vld [vmem:[%s6347_s15 + $0xf84] ss:$16 sps:$4 sm:$0xff]  }
  0xbd   : > { %3667 = vmatpush1.bf16.msra.mxu0 %v5493_v4  ;;  %v5559_v4 = vld [vmem:[%s6347_s15 + $0xce0] ss:$16 sps:$4 sm:$0xff]  }
  0xbe   : > { %3710 = vmatpush1.bf16.msra.mxu1 %v5496_v5  ;;  %3668 = vmatprep.subr.bf16.mxu0 %v5501_v6  ;;  %v5562_v5 = vld [vmem:[%s6347_s15 + $0xee0] ss:$16 sps:$4 sm:$0xff]   ;;  %v5567_v6 = vld [vmem:[%s6347_s15 + $0xcc4] ss:$16 sps:$4 sm:$0xff]  }
  0xbf   : > { %3711 = vmatprep.subr.bf16.mxu1 %v5504_v7  ;;  %v5570_v7 = vld [vmem:[%s6347_s15 + $0xec4] ss:$16 sps:$4 sm:$0xff]  }
  0xc1   : > { %3669 = vmatpush1.bf16.msra.mxu0 %v5499_v8  ;;  %v6647_v8 = vpack.c.bf16 %v371_v63, %v355_v62  ;;  %v5633_v62 = vld [vmem:[%s6347_s15 + $0xd64] ss:$16 sps:$4 sm:$0xff]  }
  0xc2   : > { %3712 = vmatpush1.bf16.msra.mxu1 %v5502_v9  ;;  %3670 = vmatprep.subr.bf16.mxu0 %v5507_v10  ;;  %v6649_v9 = vpack.c.bf16 %v373_v3, %v357_v0  ;;  %v5565_v10 = vld [vmem:[%s6347_s15 + $0xcc0] ss:$16 sps:$4 sm:$0xff]   ;;  %v5636_v63 = vld [vmem:[%s6347_s15 + $0xf64] ss:$16 sps:$4 sm:$0xff]  }
  0xc3   : > { %3713 = vmatprep.subr.bf16.mxu1 %v5510_v12  ;;  %v5568_v12 = vld [vmem:[%s6347_s15 + $0xec0] ss:$16 sps:$4 sm:$0xff]  }
  0xc4   : > { %v5631_v0 = vld [vmem:[%s6347_s15 + $0xd60] ss:$16 sps:$4 sm:$0xff]  }
  0xc5   : > { %3671 = vmatpush1.bf16.msra.mxu0 %v5505_v14  ;;  %v5573_v14 = vld [vmem:[%s6347_s15 + $0xca4] ss:$16 sps:$4 sm:$0xff]   ;;  %v5634_v3 = vld [vmem:[%s6347_s15 + $0xf60] ss:$16 sps:$4 sm:$0xff]  }
  0xc6   : > { %3714 = vmatpush1.bf16.msra.mxu1 %v5508_v15  ;;  %3672 = vmatprep.subr.bf16.mxu0 %v5513_v16  ;;  %v5576_v15 = vld [vmem:[%s6347_s15 + $0xea4] ss:$16 sps:$4 sm:$0xff]   ;;  %v5571_v16 = vld [vmem:[%s6347_s15 + $0xca0] ss:$16 sps:$4 sm:$0xff]  }
  0xc7   : > { %3715 = vmatprep.subr.bf16.mxu1 %v5516_v17  ;;  %v5574_v17 = vld [vmem:[%s6347_s15 + $0xea0] ss:$16 sps:$4 sm:$0xff]  }
  0xc9   : > { %3673 = vmatpush2.bf16.msra.mxu0 %v5511_v18  ;;  %v5579_v18 = vld [vmem:[%s6347_s15 + $0xc84] ss:$16 sps:$4 sm:$0xff]  }
  0xca   : > { %3716 = vmatpush2.bf16.msra.mxu1 %v5514_v19  ;;  %3674 = vmatprep.subr.bf16.mxu0 %v5519_v20  ;;  %v5582_v19 = vld [vmem:[%s6347_s15 + $0xe84] ss:$16 sps:$4 sm:$0xff]   ;;  %v5577_v20 = vld [vmem:[%s6347_s15 + $0xc80] ss:$16 sps:$4 sm:$0xff]  }
  0xcb   : > { %3717 = vmatprep.subr.bf16.mxu1 %v5522_v21  ;;  %v5580_v21 = vld [vmem:[%s6347_s15 + $0xe80] ss:$16 sps:$4 sm:$0xff]  }
  0xcd   : > { %3675 = vmatpush2.bf16.msra.mxu0 %v5517_v22  ;;  %v5585_v22 = vld [vmem:[%s6347_s15 + $0xc64] ss:$16 sps:$4 sm:$0xff]  }
  0xce   : > { %3718 = vmatpush2.bf16.msra.mxu1 %v5520_v23  ;;  %3676 = vmatprep.subr.bf16.mxu0 %v5525_v26  ;;  %v5588_v23 = vld [vmem:[%s6347_s15 + $0xe64] ss:$16 sps:$4 sm:$0xff]   ;;  %v5583_v26 = vld [vmem:[%s6347_s15 + $0xc60] ss:$16 sps:$4 sm:$0xff]  }
  0xcf   : > { %3719 = vmatprep.subr.bf16.mxu1 %v5528_v27  ;;  %v5586_v27 = vld [vmem:[%s6347_s15 + $0xe60] ss:$16 sps:$4 sm:$0xff]  }
  0xd1   : > { %3677 = vmatpush2.bf16.msra.mxu0 %v5523_v28  ;;  %v5591_v28 = vld [vmem:[%s6347_s15 + $0xc44] ss:$16 sps:$4 sm:$0xff]  }
  0xd2   : > { %3720 = vmatpush2.bf16.msra.mxu1 %v5526_v29  ;;  %3678 = vmatprep.subr.bf16.mxu0 %v5531_v31  ;;  %v5594_v29 = vld [vmem:[%s6347_s15 + $0xe44] ss:$16 sps:$4 sm:$0xff]   ;;  %v5589_v31 = vld [vmem:[%s6347_s15 + $0xc40] ss:$16 sps:$4 sm:$0xff]  }
  0xd3   : > { %3721 = vmatprep.subr.bf16.mxu1 %v5534_v32  ;;  %v5592_v32 = vld [vmem:[%s6347_s15 + $0xe40] ss:$16 sps:$4 sm:$0xff]  }
  0xd5   : > { %3679 = vmatpush2.bf16.msra.mxu0 %v5529_v33  ;;  %v5597_v33 = vld [vmem:[%s6347_s15 + $0xc24] ss:$16 sps:$4 sm:$0xff]  }
  0xd6   : > { %3722 = vmatpush2.bf16.msra.mxu1 %v5532_v34  ;;  %3680 = vmatprep.subr.bf16.mxu0 %v5537_v35  ;;  %v5600_v34 = vld [vmem:[%s6347_s15 + $0xe24] ss:$16 sps:$4 sm:$0xff]   ;;  %v5595_v35 = vld [vmem:[%s6347_s15 + $0xc20] ss:$16 sps:$4 sm:$0xff]  }
  0xd7   : > { %3723 = vmatprep.subr.bf16.mxu1 %v5540_v36  ;;  %v5598_v36 = vld [vmem:[%s6347_s15 + $0xe20] ss:$16 sps:$4 sm:$0xff]  }
  0xd9   : > { %3681 = vmatpush2.bf16.msra.mxu0 %v5535_v37  ;;  %v5603_v37 = vld [vmem:[%s6347_s15 + $0xc04] ss:$16 sps:$4 sm:$0xff]  }
  0xda   : > { %3724 = vmatpush2.bf16.msra.mxu1 %v5538_v38  ;;  %3682 = vmatprep.subr.bf16.mxu0 %v5543_v41  ;;  %v5606_v38 = vld [vmem:[%s6347_s15 + $0xe04] ss:$16 sps:$4 sm:$0xff]   ;;  %v5601_v41 = vld [vmem:[%s6347_s15 + $0xc00] ss:$16 sps:$4 sm:$0xff]  }
  0xdb   : > { %3725 = vmatprep.subr.bf16.mxu1 %v5546_v42  ;;  %v5604_v42 = vld [vmem:[%s6347_s15 + $0xe00] ss:$16 sps:$4 sm:$0xff]  }
  0xdd   : > { %3683 = vmatpush2.bf16.msra.mxu0 %v5541_v43  ;;  %v5609_v43 = vld [vmem:[%s6347_s15 + $0xde4] ss:$16 sps:$4 sm:$0xff]  }
  0xde   : > { %3726 = vmatpush2.bf16.msra.mxu1 %v5544_v44  ;;  %3684 = vmatprep.subr.bf16.mxu0 %v5549_v45  ;;  %v5612_v44 = vld [vmem:[%s6347_s15 + $0xfe4] ss:$16 sps:$4 sm:$0xff]   ;;  %v5607_v45 = vld [vmem:[%s6347_s15 + $0xde0] ss:$16 sps:$4 sm:$0xff]  }
  0xdf   : > { %3727 = vmatprep.subr.bf16.mxu1 %v5552_v46  ;;  %v5610_v46 = vld [vmem:[%s6347_s15 + $0xfe0] ss:$16 sps:$4 sm:$0xff]  }
  0xe1   : > { %3685 = vmatpush2.bf16.msra.mxu0 %v5547_v47  ;;  %v5615_v47 = vld [vmem:[%s6347_s15 + $0xdc4] ss:$16 sps:$4 sm:$0xff]  }
  0xe2   : > { %3728 = vmatpush2.bf16.msra.mxu1 %v5550_v48  ;;  %3686 = vmatprep.subr.bf16.mxu0 %v5555_v49  ;;  %v5618_v48 = vld [vmem:[%s6347_s15 + $0xfc4] ss:$16 sps:$4 sm:$0xff]   ;;  %v5613_v49 = vld [vmem:[%s6347_s15 + $0xdc0] ss:$16 sps:$4 sm:$0xff]  }
  0xe3   : > { %3729 = vmatprep.subr.bf16.mxu1 %v5558_v52  ;;  %v5616_v52 = vld [vmem:[%s6347_s15 + $0xfc0] ss:$16 sps:$4 sm:$0xff]  }
  0xe5   : > { %3687 = vmatpush2.bf16.msra.mxu0 %v5553_v54  ;;  %v5621_v54 = vld [vmem:[%s6347_s15 + $0xda4] ss:$16 sps:$4 sm:$0xff]  }
  0xe6   : > { %3730 = vmatpush2.bf16.msra.mxu1 %v5556_v55  ;;  %3742 = vmatprep.subr.bf16.mxu0 %v5561_v60  ;;  %v5624_v55 = vld [vmem:[%s6347_s15 + $0xfa4] ss:$16 sps:$4 sm:$0xff]   ;;  %v5625_v60 = vld [vmem:[%s6347_s15 + $0xd80] ss:$16 sps:$4 sm:$0xff]  }
  0xe7   : > { %3785 = vmatprep.subr.bf16.mxu1 %v5564_v61  ;;  %v5628_v61 = vld [vmem:[%s6347_s15 + $0xf80] ss:$16 sps:$4 sm:$0xff]  }
  0xe8   : > { %3689 = vmatmul.mubr.bf16.vlgmr.msra.gmra.mxu0 %v6636_v1 }
  0xe9   : > { %3732 = vmatmul.mubr.bf16.vlgmr.msra.gmra.mxu1 %v6638_v2  ;;  %3743 = vmatpush1.bf16.msra.mxu0 %v5559_v4  ;;  %v5639_v4 = vld [vmem:[%s6347_s15 + $0xd44] ss:$16 sps:$4 sm:$0xff]  }
  0xea   : > { %3786 = vmatpush1.bf16.msra.mxu1 %v5562_v5  ;;  %3744 = vmatprep.subr.bf16.mxu0 %v5567_v6  ;;  %v5642_v5 = vld [vmem:[%s6347_s15 + $0xf44] ss:$16 sps:$4 sm:$0xff]   ;;  %v5637_v6 = vld [vmem:[%s6347_s15 + $0xd40] ss:$16 sps:$4 sm:$0xff]  }
  0xeb   : > { %3787 = vmatprep.subr.bf16.mxu1 %v5570_v7  ;;  %3774 = vmatprep.mubr.bf16.mxu0 %v6647_v8  ;;  %v5640_v7 = vld [vmem:[%s6347_s15 + $0xf40] ss:$16 sps:$4 sm:$0xff]  }
  0xec   : > { %3817 = vmatprep.mubr.bf16.mxu1 %v6649_v9 }
  0xed   : > { %3745 = vmatpush1.bf16.msra.mxu0 %v5565_v10  ;;  %v5645_v10 = vld [vmem:[%s6347_s15 + $0xd24] ss:$16 sps:$4 sm:$0xff]  }
  0xee   : > { %3788 = vmatpush1.bf16.msra.mxu1 %v5568_v12  ;;  %3746 = vmatprep.subr.bf16.mxu0 %v5573_v14  ;;  %v5648_v12 = vld [vmem:[%s6347_s15 + $0xf24] ss:$16 sps:$4 sm:$0xff]   ;;  %v5643_v14 = vld [vmem:[%s6347_s15 + $0xd20] ss:$16 sps:$4 sm:$0xff]  }
  0xef   : > { %3789 = vmatprep.subr.bf16.mxu1 %v5576_v15  ;;  %v5646_v15 = vld [vmem:[%s6347_s15 + $0xf20] ss:$16 sps:$4 sm:$0xff]  }
  0xf1   : > { %3747 = vmatpush1.bf16.msra.mxu0 %v5571_v16  ;;  %v5651_v16 = vld [vmem:[%s6347_s15 + $0xd04] ss:$16 sps:$4 sm:$0xff]  }
  0xf2   : > { %3790 = vmatpush1.bf16.msra.mxu1 %v5574_v17  ;;  %3748 = vmatprep.subr.bf16.mxu0 %v5579_v18  ;;  %v5654_v17 = vld [vmem:[%s6347_s15 + $0xf04] ss:$16 sps:$4 sm:$0xff]   ;;  %v5649_v18 = vld [vmem:[%s6347_s15 + $0xd00] ss:$16 sps:$4 sm:$0xff]  }
  0xf3   : > { %3791 = vmatprep.subr.bf16.mxu1 %v5582_v19  ;;  %v5652_v19 = vld [vmem:[%s6347_s15 + $0xf00] ss:$16 sps:$4 sm:$0xff]  }
  0xf5   : > { %3749 = vmatpush1.bf16.msra.mxu0 %v5577_v20  ;;  %v354_v20 = vld [vmem:[%s7204_s0 + $0x60] sm:$0xff] }
  0xf6   : > { %3792 = vmatpush1.bf16.msra.mxu1 %v5580_v21  ;;  %3750 = vmatprep.subr.bf16.mxu0 %v5585_v22  ;;  %v370_v21 = vld [vmem:[%s7204_s0 + $0xe0] sm:$0x1]  ;;  %v356_v22 = vld [vmem:[%s7204_s0 + $0x70] sm:$0xff] }
  0xf7   : > { %3793 = vmatprep.subr.bf16.mxu1 %v5588_v23  ;;  %v372_v23 = vld [vmem:[%s7204_s0 + $0xf0] sm:$0x1] }
  0xf9   : > { %3751 = vmatpush1.bf16.msra.mxu0 %v5583_v26  ;;  %v5657_v26 = vld [vmem:[%s6347_s15 + $0xec] ss:$16 sps:$4 sm:$0xff]  }
  0xfa   : > { %3794 = vmatpush1.bf16.msra.mxu1 %v5586_v27  ;;  %3752 = vmatprep.subr.bf16.mxu0 %v5591_v28  ;;  %v5660_v27 = vld [vmem:[%s6347_s15 + $0x2ec] ss:$16 sps:$4 sm:$0xff]   ;;  %v6727_v28 = vpack.c.bf16 %v370_v21, %v354_v20  ;;  %v5721_v20 = vld [vmem:[%s6347_s15 + $0x188] ss:$16 sps:$4 sm:$0xff]  }
  0xfb   : > { %3795 = vmatprep.subr.bf16.mxu1 %v5594_v29  ;;  %v6729_v29 = vpack.c.bf16 %v372_v23, %v356_v22  ;;  %v5724_v21 = vld [vmem:[%s6347_s15 + $0x388] ss:$16 sps:$4 sm:$0xff]   ;;  %v5729_v22 = vld [vmem:[%s6347_s15 + $0x16c] ss:$16 sps:$4 sm:$0xff]  }
  0xfc   : > { %v5732_v23 = vld [vmem:[%s6347_s15 + $0x36c] ss:$16 sps:$4 sm:$0xff]  }
  0xfd   : > { %3753 = vmatpush1.bf16.msra.mxu0 %v5589_v31  ;;  %v5655_v31 = vld [vmem:[%s6347_s15 + $0xe8] ss:$16 sps:$4 sm:$0xff]  }
  0xfe   : > { %3796 = vmatpush1.bf16.msra.mxu1 %v5592_v32  ;;  %3754 = vmatprep.subr.bf16.mxu0 %v5597_v33  ;;  %v5658_v32 = vld [vmem:[%s6347_s15 + $0x2e8] ss:$16 sps:$4 sm:$0xff]   ;;  %v5663_v33 = vld [vmem:[%s6347_s15 + $0xcc] ss:$16 sps:$4 sm:$0xff]  }
  0xff   : > { %3797 = vmatprep.subr.bf16.mxu1 %v5600_v34  ;;  %v5666_v34 = vld [vmem:[%s6347_s15 + $0x2cc] ss:$16 sps:$4 sm:$0xff]  }
 0x101   : > { %3755 = vmatpush1.bf16.msra.mxu0 %v5595_v35  ;;  %v5661_v35 = vld [vmem:[%s6347_s15 + $0xc8] ss:$16 sps:$4 sm:$0xff]  }
 0x102   : > { %3798 = vmatpush1.bf16.msra.mxu1 %v5598_v36  ;;  %3756 = vmatprep.subr.bf16.mxu0 %v5603_v37  ;;  %v5664_v36 = vld [vmem:[%s6347_s15 + $0x2c8] ss:$16 sps:$4 sm:$0xff]   ;;  %v5669_v37 = vld [vmem:[%s6347_s15 + $0xac] ss:$16 sps:$4 sm:$0xff]  }
 0x103   : > { %3799 = vmatprep.subr.bf16.mxu1 %v5606_v38  ;;  %v5672_v38 = vld [vmem:[%s6347_s15 + $0x2ac] ss:$16 sps:$4 sm:$0xff]  }
 0x105   : > { %3757 = vmatpush1.bf16.msra.mxu0 %v5601_v41  ;;  %v5667_v41 = vld [vmem:[%s6347_s15 + $0xa8] ss:$16 sps:$4 sm:$0xff]  }
 0x106   : > { %3800 = vmatpush1.bf16.msra.mxu1 %v5604_v42  ;;  %3758 = vmatprep.subr.bf16.mxu0 %v5609_v43  ;;  %v5670_v42 = vld [vmem:[%s6347_s15 + $0x2a8] ss:$16 sps:$4 sm:$0xff]   ;;  %v5675_v43 = vld [vmem:[%s6347_s15 + $0x8c] ss:$16 sps:$4 sm:$0xff]  }
 0x107   : > { %3801 = vmatprep.subr.bf16.mxu1 %v5612_v44  ;;  %v5678_v44 = vld [vmem:[%s6347_s15 + $0x28c] ss:$16 sps:$4 sm:$0xff]  }
 0x109   : > { %3759 = vmatpush2.bf16.msra.mxu0 %v5607_v45  ;;  %v5673_v45 = vld [vmem:[%s6347_s15 + $0x88] ss:$16 sps:$4 sm:$0xff]  }
 0x10a   : > { %3802 = vmatpush2.bf16.msra.mxu1 %v5610_v46  ;;  %3760 = vmatprep.subr.bf16.mxu0 %v5615_v47  ;;  %v5684_v46 = vld [vmem:[%s6347_s15 + $0x26c] ss:$16 sps:$4 sm:$0xff]   ;;  %v5679_v47 = vld [vmem:[%s6347_s15 + $0x68] ss:$16 sps:$4 sm:$0xff]  }
 0x10b   : > { %3803 = vmatprep.subr.bf16.mxu1 %v5618_v48  ;;  %v5682_v48 = vld [vmem:[%s6347_s15 + $0x268] ss:$16 sps:$4 sm:$0xff]  }
 0x10d   : > { %3761 = vmatpush2.bf16.msra.mxu0 %v5613_v49  ;;  %v5687_v49 = vld [vmem:[%s6347_s15 + $0x4c] ss:$16 sps:$4 sm:$0xff]  }
 0x10e   : > { %3804 = vmatpush2.bf16.msra.mxu1 %v5616_v52  ;;  %3762 = vmatprep.subr.bf16.mxu0 %v5621_v54  ;;  %v5690_v52 = vld [vmem:[%s6347_s15 + $0x24c] ss:$16 sps:$4 sm:$0xff]   ;;  %v5685_v54 = vld [vmem:[%s6347_s15 + $0x48] ss:$16 sps:$4 sm:$0xff]  }
 0x10f   : > { %3805 = vmatprep.subr.bf16.mxu1 %v5624_v55  ;;  %v5688_v55 = vld [vmem:[%s6347_s15 + $0x248] ss:$16 sps:$4 sm:$0xff]  }
 0x111   : > { %3763 = vmatpush2.bf16.msra.mxu0 %v5619_v56  ;;  %v5693_v56 = vld [vmem:[%s6347_s15 + $0x2c] ss:$16 sps:$4 sm:$0xff]  }
 0x112   : > { %3806 = vmatpush2.bf16.msra.mxu1 %v5622_v57  ;;  %3764 = vmatprep.subr.bf16.mxu0 %v5627_v58  ;;  %v5696_v57 = vld [vmem:[%s6347_s15 + $0x22c] ss:$16 sps:$4 sm:$0xff]   ;;  %v5691_v58 = vld [vmem:[%s6347_s15 + $0x28] ss:$16 sps:$4 sm:$0xff]  }
 0x113   : > { %3807 = vmatprep.subr.bf16.mxu1 %v5630_v59  ;;  %v5694_v59 = vld [vmem:[%s6347_s15 + $0x228] ss:$16 sps:$4 sm:$0xff]  }
 0x115   : > { %3765 = vmatpush2.bf16.msra.mxu0 %v5625_v60  ;;  %v5699_v60 = vld [vmem:[%s6347_s15 + $0xc] ss:$16 sps:$4 sm:$0xff]  }
 0x116   : > { %3808 = vmatpush2.bf16.msra.mxu1 %v5628_v61  ;;  %3766 = vmatprep.subr.bf16.mxu0 %v5633_v62  ;;  %v5702_v61 = vld [vmem:[%s6347_s15 + $0x20c] ss:$16 sps:$4 sm:$0xff]   ;;  %v5697_v62 = vld [vmem:[%s6347_s15 + $0x8] ss:$16 sps:$4 sm:$0xff]  }
 0x117   : > { %3809 = vmatprep.subr.bf16.mxu1 %v5636_v63  ;;  %v5700_v63 = vld [vmem:[%s6347_s15 + $0x208] ss:$16 sps:$4 sm:$0xff]  }
 0x119   : > { %3767 = vmatpush2.bf16.msra.mxu0 %v5631_v0  ;;  %v5705_v0 = vld [vmem:[%s6347_s15 + $0x1ec] ss:$16 sps:$4 sm:$0xff]  }
 0x11a   : > { %3810 = vmatpush2.bf16.msra.mxu1 %v5634_v3  ;;  %3768 = vmatprep.subr.bf16.mxu0 %v5639_v4  ;;  %v5708_v3 = vld [vmem:[%s6347_s15 + $0x3ec] ss:$16 sps:$4 sm:$0xff]   ;;  %v5703_v4 = vld [vmem:[%s6347_s15 + $0x1e8] ss:$16 sps:$4 sm:$0xff]  }
 0x11b   : > { %3811 = vmatprep.subr.bf16.mxu1 %v5642_v5  ;;  %v5706_v5 = vld [vmem:[%s6347_s15 + $0x3e8] ss:$16 sps:$4 sm:$0xff]  }
 0x11d   : > { %3769 = vmatpush2.bf16.msra.mxu0 %v5637_v6  ;;  %v5711_v6 = vld [vmem:[%s6347_s15 + $0x1cc] ss:$16 sps:$4 sm:$0xff]  }
 0x11e   : > { %3812 = vmatpush2.bf16.msra.mxu1 %v5640_v7  ;;  %3770 = vmatprep.subr.bf16.mxu0 %v5645_v10  ;;  %v5714_v7 = vld [vmem:[%s6347_s15 + $0x3cc] ss:$16 sps:$4 sm:$0xff]   ;;  %v5709_v10 = vld [vmem:[%s6347_s15 + $0x1c8] ss:$16 sps:$4 sm:$0xff]  }
 0x11f   : > { %3813 = vmatprep.subr.bf16.mxu1 %v5648_v12  ;;  %v5712_v12 = vld [vmem:[%s6347_s15 + $0x3c8] ss:$16 sps:$4 sm:$0xff]  }
 0x121   : > { %3771 = vmatpush2.bf16.msra.mxu0 %v5643_v14  ;;  %v5717_v14 = vld [vmem:[%s6347_s15 + $0x1ac] ss:$16 sps:$4 sm:$0xff]  }
 0x122   : > { %3814 = vmatpush2.bf16.msra.mxu1 %v5646_v15  ;;  %3772 = vmatprep.subr.bf16.mxu0 %v5651_v16  ;;  %v5720_v15 = vld [vmem:[%s6347_s15 + $0x3ac] ss:$16 sps:$4 sm:$0xff]   ;;  %v5715_v16 = vld [vmem:[%s6347_s15 + $0x1a8] ss:$16 sps:$4 sm:$0xff]  }
 0x123   : > { %3815 = vmatprep.subr.bf16.mxu1 %v5654_v17  ;;  %v5718_v17 = vld [vmem:[%s6347_s15 + $0x3a8] ss:$16 sps:$4 sm:$0xff]  }
 0x125   : > { %3773 = vmatpush2.bf16.msra.mxu0 %v5649_v18  ;;  %v5723_v18 = vld [vmem:[%s6347_s15 + $0x18c] ss:$16 sps:$4 sm:$0xff]  }
 0x126   : > { %3816 = vmatpush2.bf16.msra.mxu1 %v5652_v19  ;;  %3828 = vmatprep.subr.bf16.mxu0 %v5657_v26  ;;  %v5726_v19 = vld [vmem:[%s6347_s15 + $0x38c] ss:$16 sps:$4 sm:$0xff]   ;;  %v5727_v26 = vld [vmem:[%s6347_s15 + $0x168] ss:$16 sps:$4 sm:$0xff]  }
 0x127   : > { %3871 = vmatprep.subr.bf16.mxu1 %v5660_v27  ;;  %v5730_v27 = vld [vmem:[%s6347_s15 + $0x368] ss:$16 sps:$4 sm:$0xff]  }
 0x128   : > { %3775 = vmatmul.mubr.bf16.vlgmr.msra.gmra.mxu0 %v6727_v28 }
 0x129   : > { %3818 = vmatmul.mubr.bf16.vlgmr.msra.gmra.mxu1 %v6729_v29  ;;  %3829 = vmatpush1.bf16.msra.mxu0 %v5655_v31  ;;  %v5735_v31 = vld [vmem:[%s6347_s15 + $0x14c] ss:$16 sps:$4 sm:$0xff]  }
 0x12a   : > { %3872 = vmatpush1.bf16.msra.mxu1 %v5658_v32  ;;  %3830 = vmatprep.subr.bf16.mxu0 %v5663_v33  ;;  %v5738_v32 = vld [vmem:[%s6347_s15 + $0x34c] ss:$16 sps:$4 sm:$0xff]   ;;  %v5733_v33 = vld [vmem:[%s6347_s15 + $0x148] ss:$16 sps:$4 sm:$0xff]  }
 0x12b   : > { %3873 = vmatprep.subr.bf16.mxu1 %v5666_v34  ;;  %3860 = vmatprep.mubr.bf16.mxu0 %v6333_v11  ;;  %v5676_v11 = vld [vmem:[%s6347_s15 + $0x288] ss:$16 sps:$4 sm:$0xff]  }
 0x12c   : > { %3903 = vmatprep.mubr.bf16.mxu1 %v6338_v13  ;;  %v5681_v13 = vld [vmem:[%s6347_s15 + $0x6c] ss:$16 sps:$4 sm:$0xff]   ;;  %v5736_v34 = vld [vmem:[%s6347_s15 + $0x348] ss:$16 sps:$4 sm:$0xff]  }
 0x12d   : > { %3831 = vmatpush1.bf16.msra.mxu0 %v5661_v35  ;;  %v5741_v35 = vld [vmem:[%s6347_s15 + $0x12c] ss:$16 sps:$4 sm:$0xff]  }
 0x12e   : > { %3874 = vmatpush1.bf16.msra.mxu1 %v5664_v36  ;;  %3832 = vmatprep.subr.bf16.mxu0 %v5669_v37  ;;  %v5744_v36 = vld [vmem:[%s6347_s15 + $0x32c] ss:$16 sps:$4 sm:$0xff]   ;;  %v5739_v37 = vld [vmem:[%s6347_s15 + $0x128] ss:$16 sps:$4 sm:$0xff]  }
 0x12f   : > { %3875 = vmatprep.subr.bf16.mxu1 %v5672_v38  ;;  %v5742_v38 = vld [vmem:[%s6347_s15 + $0x328] ss:$16 sps:$4 sm:$0xff]  }
 0x131   : > { %3833 = vmatpush1.bf16.msra.mxu0 %v5667_v41  ;;  %v5747_v41 = vld [vmem:[%s6347_s15 + $0x10c] ss:$16 sps:$4 sm:$0xff]  }
 0x132   : > { %3876 = vmatpush1.bf16.msra.mxu1 %v5670_v42  ;;  %3834 = vmatprep.subr.bf16.mxu0 %v5675_v43  ;;  %v5750_v42 = vld [vmem:[%s6347_s15 + $0x30c] ss:$16 sps:$4 sm:$0xff]   ;;  %v5745_v43 = vld [vmem:[%s6347_s15 + $0x108] ss:$16 sps:$4 sm:$0xff]  }
 0x133   : > { %3877 = vmatprep.subr.bf16.mxu1 %v5678_v44  ;;  %v5748_v44 = vld [vmem:[%s6347_s15 + $0x308] ss:$16 sps:$4 sm:$0xff]  }
 0x135   : > { %3835 = vmatpush1.bf16.msra.mxu0 %v5673_v45  ;;  %v5753_v45 = vld [vmem:[%s6347_s15 + $0x4ec] ss:$16 sps:$4 sm:$0xff]  }
 0x136   : > { %3878 = vmatpush1.bf16.msra.mxu1 %v5676_v11  ;;  %3836 = vmatprep.subr.bf16.mxu0 %v5681_v13  ;;  %v5756_v11 = vld [vmem:[%s6347_s15 + $0x6ec] ss:$16 sps:$4 sm:$0xff]   ;;  %v5751_v13 = vld [vmem:[%s6347_s15 + $0x4e8] ss:$16 sps:$4 sm:$0xff]  }
 0x137   : > { %3879 = vmatprep.subr.bf16.mxu1 %v5684_v46  ;;  %v5754_v46 = vld [vmem:[%s6347_s15 + $0x6e8] ss:$16 sps:$4 sm:$0xff]  }
 0x139   : > { %3837 = vmatpush1.bf16.msra.mxu0 %v5679_v47  ;;  %v5759_v47 = vld [vmem:[%s6347_s15 + $0x4cc] ss:$16 sps:$4 sm:$0xff]  }
 0x13a   : > { %3880 = vmatpush1.bf16.msra.mxu1 %v5682_v48  ;;  %3838 = vmatprep.subr.bf16.mxu0 %v5687_v49  ;;  %v5762_v48 = vld [vmem:[%s6347_s15 + $0x6cc] ss:$16 sps:$4 sm:$0xff]   ;;  %v5757_v49 = vld [vmem:[%s6347_s15 + $0x4c8] ss:$16 sps:$4 sm:$0xff]  }
 0x13b   : > { %3881 = vmatprep.subr.bf16.mxu1 %v5690_v52  ;;  %v5760_v52 = vld [vmem:[%s6347_s15 + $0x6c8] ss:$16 sps:$4 sm:$0xff]  }
 0x13d   : > { %3839 = vmatpush1.bf16.msra.mxu0 %v5685_v54  ;;  %v5765_v54 = vld [vmem:[%s6347_s15 + $0x4ac] ss:$16 sps:$4 sm:$0xff]  }
 0x13e   : > { %3882 = vmatpush1.bf16.msra.mxu1 %v5688_v55  ;;  %3840 = vmatprep.subr.bf16.mxu0 %v5693_v56  ;;  %v5768_v55 = vld [vmem:[%s6347_s15 + $0x6ac] ss:$16 sps:$4 sm:$0xff]   ;;  %v5763_v56 = vld [vmem:[%s6347_s15 + $0x4a8] ss:$16 sps:$4 sm:$0xff]  }
 0x13f   : > { %3883 = vmatprep.subr.bf16.mxu1 %v5696_v57  ;;  %v5766_v57 = vld [vmem:[%s6347_s15 + $0x6a8] ss:$16 sps:$4 sm:$0xff]  }
 0x141   : > { %3841 = vmatpush1.bf16.msra.mxu0 %v5691_v58  ;;  %v5769_v58 = vld [vmem:[%s6347_s15 + $0x488] ss:$16 sps:$4 sm:$0xff]  }
 0x142   : > { %3884 = vmatpush1.bf16.msra.mxu1 %v5694_v59  ;;  %3842 = vmatprep.subr.bf16.mxu0 %v5699_v60  ;;  %v5772_v59 = vld [vmem:[%s6347_s15 + $0x688] ss:$16 sps:$4 sm:$0xff]  }
 0x143   : > { %3885 = vmatprep.subr.bf16.mxu1 %v5702_v61  ;;  %v5775_v60 = vld [vmem:[%s6347_s15 + $0x468] ss:$16 sps:$4 sm:$0xff]  }
 0x144   : > { %v5778_v61 = vld [vmem:[%s6347_s15 + $0x668] ss:$16 sps:$4 sm:$0xff]  }
 0x145   : > { %3843 = vmatpush1.bf16.msra.mxu0 %v5697_v62  ;;  %v5783_v62 = vld [vmem:[%s6347_s15 + $0x44c] ss:$16 sps:$4 sm:$0xff]  }
 0x146   : > { %3886 = vmatpush1.bf16.msra.mxu1 %v5700_v63  ;;  %3844 = vmatprep.subr.bf16.mxu0 %v5705_v0  ;;  %v5786_v63 = vld [vmem:[%s6347_s15 + $0x64c] ss:$16 sps:$4 sm:$0xff]   ;;  %v5781_v0 = vld [vmem:[%s6347_s15 + $0x448] ss:$16 sps:$4 sm:$0xff]  }
 0x147   : > { %3887 = vmatprep.subr.bf16.mxu1 %v5708_v3  ;;  %v5784_v3 = vld [vmem:[%s6347_s15 + $0x648] ss:$16 sps:$4 sm:$0xff]  }
 0x149   : > { %3845 = vmatpush2.bf16.msra.mxu0 %v5703_v4  ;;  %v5789_v4 = vld [vmem:[%s6347_s15 + $0x42c] ss:$16 sps:$4 sm:$0xff]  }
 0x14a   : > { %3888 = vmatpush2.bf16.msra.mxu1 %v5706_v5  ;;  %3846 = vmatprep.subr.bf16.mxu0 %v5711_v6  ;;  %v5792_v5 = vld [vmem:[%s6347_s15 + $0x62c] ss:$16 sps:$4 sm:$0xff]   ;;  %v5787_v6 = vld [vmem:[%s6347_s15 + $0x428] ss:$16 sps:$4 sm:$0xff]  }
 0x14b   : > { %3889 = vmatprep.subr.bf16.mxu1 %v5714_v7  ;;  %v5790_v7 = vld [vmem:[%s6347_s15 + $0x628] ss:$16 sps:$4 sm:$0xff]  }
 0x14d   : > { %3847 = vmatpush2.bf16.msra.mxu0 %v5709_v10  ;;  %v5795_v10 = vld [vmem:[%s6347_s15 + $0x40c] ss:$16 sps:$4 sm:$0xff]  }
 0x14e   : > { %3890 = vmatpush2.bf16.msra.mxu1 %v5712_v12  ;;  %3848 = vmatprep.subr.bf16.mxu0 %v5717_v14  ;;  %v5798_v12 = vld [vmem:[%s6347_s15 + $0x60c] ss:$16 sps:$4 sm:$0xff]   ;;  %v5793_v14 = vld [vmem:[%s6347_s15 + $0x408] ss:$16 sps:$4 sm:$0xff]  }
 0x14f   : > { %3891 = vmatprep.subr.bf16.mxu1 %v5720_v15  ;;  %v5796_v15 = vld [vmem:[%s6347_s15 + $0x608] ss:$16 sps:$4 sm:$0xff]  }
 0x151   : > { %3849 = vmatpush2.bf16.msra.mxu0 %v5715_v16  ;;  %v5801_v16 = vld [vmem:[%s6347_s15 + $0x5ec] ss:$16 sps:$4 sm:$0xff]  }
 0x152   : > { %3892 = vmatpush2.bf16.msra.mxu1 %v5718_v17  ;;  %3850 = vmatprep.subr.bf16.mxu0 %v5723_v18  ;;  %v5804_v17 = vld [vmem:[%s6347_s15 + $0x7ec] ss:$16 sps:$4 sm:$0xff]   ;;  %v5799_v18 = vld [vmem:[%s6347_s15 + $0x5e8] ss:$16 sps:$4 sm:$0xff]  }
 0x153   : > { %3893 = vmatprep.subr.bf16.mxu1 %v5726_v19  ;;  %v5802_v19 = vld [vmem:[%s6347_s15 + $0x7e8] ss:$16 sps:$4 sm:$0xff]  }
 0x155   : > { %3851 = vmatpush2.bf16.msra.mxu0 %v5721_v20  ;;  %v5807_v20 = vld [vmem:[%s6347_s15 + $0x5cc] ss:$16 sps:$4 sm:$0xff]  }
 0x156   : > { %3894 = vmatpush2.bf16.msra.mxu1 %v5724_v21  ;;  %3852 = vmatprep.subr.bf16.mxu0 %v5729_v22  ;;  %v5810_v21 = vld [vmem:[%s6347_s15 + $0x7cc] ss:$16 sps:$4 sm:$0xff]   ;;  %v5805_v22 = vld [vmem:[%s6347_s15 + $0x5c8] ss:$16 sps:$4 sm:$0xff]  }
 0x157   : > { %3895 = vmatprep.subr.bf16.mxu1 %v5732_v23  ;;  %v5808_v23 = vld [vmem:[%s6347_s15 + $0x7c8] ss:$16 sps:$4 sm:$0xff]  }
 0x159   : > { %3853 = vmatpush2.bf16.msra.mxu0 %v5727_v26  ;;  %v5813_v26 = vld [vmem:[%s6347_s15 + $0x5ac] ss:$16 sps:$4 sm:$0xff]  }
 0x15a   : > { %3896 = vmatpush2.bf16.msra.mxu1 %v5730_v27  ;;  %3854 = vmatprep.subr.bf16.mxu0 %v5735_v31  ;;  %v5816_v27 = vld [vmem:[%s6347_s15 + $0x7ac] ss:$16 sps:$4 sm:$0xff]   ;;  %v5811_v31 = vld [vmem:[%s6347_s15 + $0x5a8] ss:$16 sps:$4 sm:$0xff]  }
 0x15b   : > { %3897 = vmatprep.subr.bf16.mxu1 %v5738_v32  ;;  %v5814_v32 = vld [vmem:[%s6347_s15 + $0x7a8] ss:$16 sps:$4 sm:$0xff]  }
 0x15d   : > { %3855 = vmatpush2.bf16.msra.mxu0 %v5733_v33  ;;  %v5819_v33 = vld [vmem:[%s6347_s15 + $0x58c] ss:$16 sps:$4 sm:$0xff]  }
 0x15e   : > { %3898 = vmatpush2.bf16.msra.mxu1 %v5736_v34  ;;  %3856 = vmatprep.subr.bf16.mxu0 %v5741_v35  ;;  %v5822_v34 = vld [vmem:[%s6347_s15 + $0x78c] ss:$16 sps:$4 sm:$0xff]   ;;  %v5817_v35 = vld [vmem:[%s6347_s15 + $0x588] ss:$16 sps:$4 sm:$0xff]  }
 0x15f   : > { %3899 = vmatprep.subr.bf16.mxu1 %v5744_v36  ;;  %v5820_v36 = vld [vmem:[%s6347_s15 + $0x788] ss:$16 sps:$4 sm:$0xff]  }
 0x161   : > { %3857 = vmatpush2.bf16.msra.mxu0 %v5739_v37  ;;  %v5825_v37 = vld [vmem:[%s6347_s15 + $0x56c] ss:$16 sps:$4 sm:$0xff]  }
 0x162   : > { %3900 = vmatpush2.bf16.msra.mxu1 %v5742_v38  ;;  %3858 = vmatprep.subr.bf16.mxu0 %v5747_v41  ;;  %v5828_v38 = vld [vmem:[%s6347_s15 + $0x76c] ss:$16 sps:$4 sm:$0xff]   ;;  %v5823_v41 = vld [vmem:[%s6347_s15 + $0x568] ss:$16 sps:$4 sm:$0xff]  }
 0x163   : > { %3901 = vmatprep.subr.bf16.mxu1 %v5750_v42  ;;  %v5826_v42 = vld [vmem:[%s6347_s15 + $0x768] ss:$16 sps:$4 sm:$0xff]  }
 0x165   : > { %3859 = vmatpush2.bf16.msra.mxu0 %v5745_v43  ;;  %v5831_v43 = vld [vmem:[%s6347_s15 + $0x54c] ss:$16 sps:$4 sm:$0xff]  }
 0x166   : > { %3902 = vmatpush2.bf16.msra.mxu1 %v5748_v44  ;;  %3914 = vmatprep.subr.bf16.mxu0 %v5753_v45  ;;  %v5834_v44 = vld [vmem:[%s6347_s15 + $0x74c] ss:$16 sps:$4 sm:$0xff]   ;;  %v5829_v45 = vld [vmem:[%s6347_s15 + $0x548] ss:$16 sps:$4 sm:$0xff]  }
 0x167   : > { %3957 = vmatprep.subr.bf16.mxu1 %v5756_v11  ;;  %v5832_v11 = vld [vmem:[%s6347_s15 + $0x748] ss:$16 sps:$4 sm:$0xff]  }
 0x168   : > { %3861 = vmatmul.mubr.bf16.vlgmr.msra.gmra.mxu0 %v6433_v24  ;;  %v5771_v24 = vld [vmem:[%s6347_s15 + $0x48c] ss:$16 sps:$4 sm:$0xff]  }
 0x169   : > { %3904 = vmatmul.mubr.bf16.vlgmr.msra.gmra.mxu1 %v6435_v25  ;;  %3915 = vmatpush1.bf16.msra.mxu0 %v5751_v13  ;;  %v5774_v25 = vld [vmem:[%s6347_s15 + $0x68c] ss:$16 sps:$4 sm:$0xff]  }
 0x16a   : > { %3958 = vmatpush1.bf16.msra.mxu1 %v5754_v46  ;;  %3916 = vmatprep.subr.bf16.mxu0 %v5759_v47  ;;  %v5837_v13 = vld [vmem:[%s6347_s15 + $0x52c] ss:$16 sps:$4 sm:$0xff]   ;;  %v5835_v47 = vld [vmem:[%s6347_s15 + $0x528] ss:$16 sps:$4 sm:$0xff]  }
 0x16b   : > { %3959 = vmatprep.subr.bf16.mxu1 %v5762_v48  ;;  %3946 = vmatprep.mubr.bf16.mxu0 %v6441_v30  ;;  %v5777_v30 = vld [vmem:[%s6347_s15 + $0x46c] ss:$16 sps:$4 sm:$0xff]   ;;  %v5838_v48 = vld [vmem:[%s6347_s15 + $0x728] ss:$16 sps:$4 sm:$0xff]  }
 0x16c   : > { %3989 = vmatprep.mubr.bf16.mxu1 %v6472_v53  ;;  %v5780_v53 = vld [vmem:[%s6347_s15 + $0x66c] ss:$16 sps:$4 sm:$0xff]  }
 0x16d   : > { %3917 = vmatpush1.bf16.msra.mxu0 %v5757_v49  ;;  %v5840_v46 = vld [vmem:[%s6347_s15 + $0x72c] ss:$16 sps:$4 sm:$0xff]  }
 0x16e   : > { %3960 = vmatpush1.bf16.msra.mxu1 %v5760_v52  ;;  %3918 = vmatprep.subr.bf16.mxu0 %v5765_v54  ;;  %v5843_v49 = vld [vmem:[%s6347_s15 + $0x50c] ss:$16 sps:$4 sm:$0xff]   ;;  %v5841_v54 = vld [vmem:[%s6347_s15 + $0x508] ss:$16 sps:$4 sm:$0xff]  }
 0x16f   : > { %3961 = vmatprep.subr.bf16.mxu1 %v5768_v55  ;;  %v5846_v52 = vld [vmem:[%s6347_s15 + $0x70c] ss:$16 sps:$4 sm:$0xff]   ;;  %v5844_v55 = vld [vmem:[%s6347_s15 + $0x708] ss:$16 sps:$4 sm:$0xff]  }
 0x171   : > { %3919 = vmatpush1.bf16.msra.mxu0 %v5763_v56  ;;  %v5849_v56 = vld [vmem:[%s6347_s15 + $0x8ec] ss:$16 sps:$4 sm:$0xff]  }
 0x172   : > { %3962 = vmatpush1.bf16.msra.mxu1 %v5766_v57  ;;  %3920 = vmatprep.subr.bf16.mxu0 %v5771_v24  ;;  %v5852_v57 = vld [vmem:[%s6347_s15 + $0xaec] ss:$16 sps:$4 sm:$0xff]   ;;  %v5847_v24 = vld [vmem:[%s6347_s15 + $0x8e8] ss:$16 sps:$4 sm:$0xff]  }
 0x173   : > { %3963 = vmatprep.subr.bf16.mxu1 %v5774_v25  ;;  %v5850_v25 = vld [vmem:[%s6347_s15 + $0xae8] ss:$16 sps:$4 sm:$0xff]  }
 0x175   : > { %3921 = vmatpush1.bf16.msra.mxu0 %v5769_v58  ;;  %v5855_v58 = vld [vmem:[%s6347_s15 + $0x8cc] ss:$16 sps:$4 sm:$0xff]  }
 0x176   : > { %3964 = vmatpush1.bf16.msra.mxu1 %v5772_v59  ;;  %3922 = vmatprep.subr.bf16.mxu0 %v5777_v30  ;;  %v5858_v59 = vld [vmem:[%s6347_s15 + $0xacc] ss:$16 sps:$4 sm:$0xff]   ;;  %v5853_v30 = vld [vmem:[%s6347_s15 + $0x8c8] ss:$16 sps:$4 sm:$0xff]  }
 0x177   : > { %3965 = vmatprep.subr.bf16.mxu1 %v5780_v53  ;;  %v5856_v53 = vld [vmem:[%s6347_s15 + $0xac8] ss:$16 sps:$4 sm:$0xff]  }
 0x179   : > { %3923 = vmatpush1.bf16.msra.mxu0 %v5775_v60  ;;  %v5861_v60 = vld [vmem:[%s6347_s15 + $0x8ac] ss:$16 sps:$4 sm:$0xff]  }
 0x17a   : > { %3966 = vmatpush1.bf16.msra.mxu1 %v5778_v61  ;;  %3924 = vmatprep.subr.bf16.mxu0 %v5783_v62  ;;  %v5864_v61 = vld [vmem:[%s6347_s15 + $0xaac] ss:$16 sps:$4 sm:$0xff]  }
 0x17b   : > { %3967 = vmatprep.subr.bf16.mxu1 %v5786_v63  ;;  %v5867_v62 = vld [vmem:[%s6347_s15 + $0x88c] ss:$16 sps:$4 sm:$0xff]  }
 0x17c   : > { %v5870_v63 = vld [vmem:[%s6347_s15 + $0xa8c] ss:$16 sps:$4 sm:$0xff]  }
 0x17d   : > { %3925 = vmatpush1.bf16.msra.mxu0 %v5781_v0  ;;  %v5865_v0 = vld [vmem:[%s6347_s15 + $0x888] ss:$16 sps:$4 sm:$0xff]  }
 0x17e   : > { %3968 = vmatpush1.bf16.msra.mxu1 %v5784_v3  ;;  %3926 = vmatprep.subr.bf16.mxu0 %v5789_v4  ;;  %v5876_v3 = vld [vmem:[%s6347_s15 + $0xa6c] ss:$16 sps:$4 sm:$0xff]   ;;  %v5871_v4 = vld [vmem:[%s6347_s15 + $0x868] ss:$16 sps:$4 sm:$0xff]  }
 0x17f   : > { %3969 = vmatprep.subr.bf16.mxu1 %v5792_v5  ;;  %v5874_v5 = vld [vmem:[%s6347_s15 + $0xa68] ss:$16 sps:$4 sm:$0xff]  }
 0x181   : > { %3927 = vmatpush1.bf16.msra.mxu0 %v5787_v6  ;;  %v5879_v6 = vld [vmem:[%s6347_s15 + $0x84c] ss:$16 sps:$4 sm:$0xff]  }
 0x182   : > { %3970 = vmatpush1.bf16.msra.mxu1 %v5790_v7  ;;  %3928 = vmatprep.subr.bf16.mxu0 %v5795_v10  ;;  %v5882_v7 = vld [vmem:[%s6347_s15 + $0xa4c] ss:$16 sps:$4 sm:$0xff]   ;;  %v5877_v10 = vld [vmem:[%s6347_s15 + $0x848] ss:$16 sps:$4 sm:$0xff]  }
 0x183   : > { %3971 = vmatprep.subr.bf16.mxu1 %v5798_v12  ;;  %v5880_v12 = vld [vmem:[%s6347_s15 + $0xa48] ss:$16 sps:$4 sm:$0xff]  }
 0x185   : > { %3929 = vmatpush1.bf16.msra.mxu0 %v5793_v14  ;;  %v5885_v14 = vld [vmem:[%s6347_s15 + $0x82c] ss:$16 sps:$4 sm:$0xff]  }
 0x186   : > { %3972 = vmatpush1.bf16.msra.mxu1 %v5796_v15  ;;  %3930 = vmatprep.subr.bf16.mxu0 %v5801_v16  ;;  %v5888_v15 = vld [vmem:[%s6347_s15 + $0xa2c] ss:$16 sps:$4 sm:$0xff]   ;;  %v5883_v16 = vld [vmem:[%s6347_s15 + $0x828] ss:$16 sps:$4 sm:$0xff]  }
 0x187   : > { %3973 = vmatprep.subr.bf16.mxu1 %v5804_v17  ;;  %v5886_v17 = vld [vmem:[%s6347_s15 + $0xa28] ss:$16 sps:$4 sm:$0xff]  }
 0x189   : > { %3931 = vmatpush2.bf16.msra.mxu0 %v5799_v18  ;;  %v6897_v18 = vpop.f32.mrf.mxu0 }
 0x18a   : > { %3974 = vmatpush2.bf16.msra.mxu1 %v5802_v19  ;;  %3932 = vmatprep.subr.bf16.mxu0 %v5807_v20  ;;  %v6899_v19 = vpop.f32.mrf.mxu1  ;;  %v5891_v20 = vld [vmem:[%s6347_s15 + $0x80c] ss:$16 sps:$4 sm:$0xff]  }
 0x18b   : > { %3975 = vmatprep.subr.bf16.mxu1 %v5810_v21  ;;  %v5894_v21 = vld [vmem:[%s6347_s15 + $0xa0c] ss:$16 sps:$4 sm:$0xff]  }
 0x18d   : > { %3933 = vmatpush2.bf16.msra.mxu0 %v5805_v22  ;;  %v5889_v22 = vld [vmem:[%s6347_s15 + $0x808] ss:$16 sps:$4 sm:$0xff]  }
 0x18e   : > { %3976 = vmatpush2.bf16.msra.mxu1 %v5808_v23  ;;  %3934 = vmatprep.subr.bf16.mxu0 %v5813_v26  ;;  %v5892_v23 = vld [vmem:[%s6347_s15 + $0xa08] ss:$16 sps:$4 sm:$0xff]   ;;  %v6906_v26 = vpop.f32.mrf.mxu0 }
 0x18f   : > { %3977 = vmatprep.subr.bf16.mxu1 %v5816_v27  ;;  %v6908_v27 = vpop.f32.mrf.mxu1 }
 0x191   : > { %3935 = vmatpush2.bf16.msra.mxu0 %v5811_v31  ;;  %v5897_v31 = vld [vmem:[%s6347_s15 + $0x9ec] ss:$16 sps:$4 sm:$0xff]  }
 0x192   : > { %3978 = vmatpush2.bf16.msra.mxu1 %v5814_v32  ;;  %3936 = vmatprep.subr.bf16.mxu0 %v5819_v33  ;;  %v5900_v32 = vld [vmem:[%s6347_s15 + $0xbec] ss:$16 sps:$4 sm:$0xff]   ;;  %v5895_v33 = vld [vmem:[%s6347_s15 + $0x9e8] ss:$16 sps:$4 sm:$0xff]  }
 0x193   : > { %3979 = vmatprep.subr.bf16.mxu1 %v5822_v34  ;;  %v5898_v34 = vld [vmem:[%s6347_s15 + $0xbe8] ss:$16 sps:$4 sm:$0xff]  }
 0x195   : > { %3937 = vmatpush2.bf16.msra.mxu0 %v5817_v35  ;;  %v6914_v35 = vpop.f32.mrf.mxu0 }
 0x196   : > { %3980 = vmatpush2.bf16.msra.mxu1 %v5820_v36  ;;  %3938 = vmatprep.subr.bf16.mxu0 %v5825_v37  ;;  %v6916_v36 = vpop.f32.mrf.mxu1  ;;  %v5903_v37 = vld [vmem:[%s6347_s15 + $0x9cc] ss:$16 sps:$4 sm:$0xff]  }
 0x197   : > { %3981 = vmatprep.subr.bf16.mxu1 %v5828_v38  ;;  %v5906_v38 = vld [vmem:[%s6347_s15 + $0xbcc] ss:$16 sps:$4 sm:$0xff]  }
 0x199   : > { %3939 = vmatpush2.bf16.msra.mxu0 %v5823_v41  ;;  %v904_v41 = vlaneseq }
 0x19a   : > { %3982 = vmatpush2.bf16.msra.mxu1 %v5826_v42  ;;  %3940 = vmatprep.subr.bf16.mxu0 %v5831_v43  ;;  %v5901_v42 = vld [vmem:[%s6347_s15 + $0x9c8] ss:$16 sps:$4 sm:$0xff]  }
 0x19b   : > { %3983 = vmatprep.subr.bf16.mxu1 %v5834_v44  ;;  %v5904_v43 = vld [vmem:[%s6347_s15 + $0xbc8] ss:$16 sps:$4 sm:$0xff]   ;;  %v3524_v44 = vpop.f32.mrf.mxu0 }
 0x19d   : > { %3941 = vmatpush2.bf16.msra.mxu0 %v5829_v45  ;;  %v6922_v45 = vpop.f32.mrf.mxu1 }
 0x19e   : > { %3984 = vmatpush2.bf16.msra.mxu1 %v5832_v11  ;;  %3942 = vmatprep.subr.bf16.mxu0 %v5837_v13  ;;  %v5909_v11 = vld [vmem:[%s6347_s15 + $0x9ac] ss:$16 sps:$4 sm:$0xff]  }
 0x19f   : > { %3985 = vmatprep.subr.bf16.mxu1 %v5840_v46  ;;  %v5912_v13 = vld [vmem:[%s6347_s15 + $0xbac] ss:$16 sps:$4 sm:$0xff]   ;;  %v6926_v46 = vshrl.u32 %v904_v41, 7  ;;  %v5937_v41 = vld [vmem:[%s6347_s15 + $0x908] ss:$16 sps:$4 sm:$0xff]  }
 0x1a1   : > { %3943 = vmatpush2.bf16.msra.mxu0 %v5835_v47  ;;  %v3604_v47 = vpop.f32.mrf.mxu0 }
 0x1a2   : > { %3986 = vmatpush2.bf16.msra.mxu1 %v5838_v48  ;;  %3944 = vmatprep.subr.bf16.mxu0 %v5843_v49  ;;  %v6928_v48 = vpop.f32.mrf.mxu1  ;;  %v5907_v49 = vld [vmem:[%s6347_s15 + $0x9a8] ss:$16 sps:$4 sm:$0xff]  }
 0x1a3   : > { %3987 = vmatprep.subr.bf16.mxu1 %v5846_v52  ;;  %v5910_v52 = vld [vmem:[%s6347_s15 + $0xba8] ss:$16 sps:$4 sm:$0xff]  }
 0x1a5   : > { %3945 = vmatpush2.bf16.msra.mxu0 %v5841_v54  ;;  %v5915_v54 = vld [vmem:[%s6347_s15 + $0x98c] ss:$16 sps:$4 sm:$0xff]  }
 0x1a6   : > { %3988 = vmatpush2.bf16.msra.mxu1 %v5844_v55  ;;  %4000 = vmatprep.subr.bf16.mxu0 %v5849_v56  ;;  %v5918_v55 = vld [vmem:[%s6347_s15 + $0xb8c] ss:$16 sps:$4 sm:$0xff]   ;;  %v906_v56 = vsub.s32 0, %v6926_v46 }
 0x1a7   : > { %4043 = vmatprep.subr.bf16.mxu1 %v5852_v57  ;;  %v6938_v57 = vld [vmem:[%s335_s13] sm:$0xf] }
 0x1a8   : > { %3947 = vmatmul.mubr.bf16.vlgmr.msra.gmra.mxu0 %v6527_v39  ;;  %v5859_v39 = vld [vmem:[%s6347_s15 + $0x8a8] ss:$16 sps:$4 sm:$0xff]  }
 0x1a9   : > { %3990 = vmatmul.mubr.bf16.vlgmr.msra.gmra.mxu1 %v6529_v40  ;;  %4001 = vmatpush1.bf16.msra.mxu0 %v5847_v24  ;;  %v5862_v40 = vld [vmem:[%s6347_s15 + $0xaa8] ss:$16 sps:$4 sm:$0xff]   ;;  %v3606_v24 = vpop.f32.mrf.mxu0 }
 0x1aa   : > { %4044 = vmatpush1.bf16.msra.mxu1 %v5850_v25  ;;  %4002 = vmatprep.subr.bf16.mxu0 %v5855_v58  ;;  %v6940_v25 = vpop.f32.mrf.mxu1  ;;  %v910_v58 = vsub.s32 1, %v6926_v46 }
 0x1ab   : > { %4045 = vmatprep.subr.bf16.mxu1 %v5858_v59  ;;  %4032 = vmatprep.mubr.bf16.mxu0 %v6550_v50  ;;  %v5868_v50 = vld [vmem:[%s6347_s15 + $0xa88] ss:$16 sps:$4 sm:$0xff]  }
 0x1ac   : > { %4075 = vmatprep.mubr.bf16.mxu1 %v6552_v51  ;;  %v5873_v51 = vld [vmem:[%s6347_s15 + $0x86c] ss:$16 sps:$4 sm:$0xff]   ;;  %v5913_v59 = vld [vmem:[%s6347_s15 + $0x988] ss:$16 sps:$4 sm:$0xff]  }
 0x1ad   : > { %4003 = vmatpush1.bf16.msra.mxu0 %v5853_v30  ;;  %v5916_v30 = vld [vmem:[%s6347_s15 + $0xb88] ss:$16 sps:$4 sm:$0xff]  }
 0x1ae   : > { %4046 = vmatpush1.bf16.msra.mxu1 %v5856_v53  ;;  %4004 = vmatprep.subr.bf16.mxu0 %v5861_v60  ;;  %v5921_v53 = vld [vmem:[%s6347_s15 + $0x96c] ss:$16 sps:$4 sm:$0xff]  }
 0x1af   : > { %4047 = vmatprep.subr.bf16.mxu1 %v5864_v61  ;;  %v5924_v60 = vld [vmem:[%s6347_s15 + $0xb6c] ss:$16 sps:$4 sm:$0xff]   ;;  %v907_v61 = vrot.slane %v6938_v57, %v906_v56 }
 0x1b1   : > { %4005 = vmatpush1.bf16.msra.mxu0 %v5859_v39  ;;  %v3608_v39 = vpop.f32.mrf.mxu0 }
 0x1b2   : > { %4048 = vmatpush1.bf16.msra.mxu1 %v5862_v40  ;;  %4006 = vmatprep.subr.bf16.mxu0 %v5867_v62  ;;  %v3651_v40 = vpop.f32.mrf.mxu1  ;;  %v911_v62 = vrot.slane %v6938_v57, %v910_v58  ;;  %v5954_v58 = vld [vmem:[%s6347_s15 + $0xecc] ss:$16 sps:$4 sm:$0xff]  }
 0x1b3   : > { %4049 = vmatprep.subr.bf16.mxu1 %v5870_v63  ;;  %v5919_v63 = vld [vmem:[%s6347_s15 + $0x968] ss:$16 sps:$4 sm:$0xff]  }
 0x1b5   : > { %4007 = vmatpush1.bf16.msra.mxu0 %v5865_v0  ;;  %v5922_v0 = vld [vmem:[%s6347_s15 + $0xb68] ss:$16 sps:$4 sm:$0xff]  }
 0x1b6   : > { %4050 = vmatpush1.bf16.msra.mxu1 %v5868_v50  ;;  %4008 = vmatprep.subr.bf16.mxu0 %v5873_v51  ;;  %v5927_v50 = vld [vmem:[%s6347_s15 + $0x94c] ss:$16 sps:$4 sm:$0xff]  }
 0x1b7   : > { %4051 = vmatprep.subr.bf16.mxu1 %v5876_v3  ;;  %v5930_v51 = vld [vmem:[%s6347_s15 + $0xb4c] ss:$16 sps:$4 sm:$0xff]   ;;  %v3519_v3 = vadd.f32 %v6897_v18, %v907_v61  ;;  %v3523_v18 = vadd.f32 %v6914_v35, %v907_v61 }
 0x1b9   : > { %4009 = vmatpush1.bf16.msra.mxu0 %v5871_v4  ;;  %v3610_v4 = vpop.f32.mrf.mxu0 }
 0x1ba   : > { %4052 = vmatpush1.bf16.msra.mxu1 %v5874_v5  ;;  %4010 = vmatprep.subr.bf16.mxu0 %v5879_v6  ;;  %v3653_v5 = vpop.f32.mrf.mxu1  ;;  %v3521_v6 = vadd.f32 %v6906_v26, %v911_v62  ;;  %v5934_v26 = vld [vmem:[%s6347_s15 + $0xb28] ss:$16 sps:$4 sm:$0xff]  }
 0x1bb   : > { %4053 = vmatprep.subr.bf16.mxu1 %v5882_v7  ;;  %v5925_v7 = vld [vmem:[%s6347_s15 + $0x948] ss:$16 sps:$4 sm:$0xff]  }
 0x1bd   : > { %4011 = vmatpush1.bf16.msra.mxu0 %v5877_v10  ;;  %v5928_v10 = vld [vmem:[%s6347_s15 + $0xb48] ss:$16 sps:$4 sm:$0xff]  }
 0x1be   : > { %4054 = vmatpush1.bf16.msra.mxu1 %v5880_v12  ;;  %4012 = vmatprep.subr.bf16.mxu0 %v5885_v14  ;;  %v3690_v12 = vpop.f32.mrf.mxu0  ;;  %v3733_v14 = vpop.f32.mrf.mxu1 }
 0x1bf   : > { %4055 = vmatprep.subr.bf16.mxu1 %v5888_v15  ;;  %v5933_v15 = vld [vmem:[%s6347_s15 + $0x92c] ss:$16 sps:$4 sm:$0xff]  }
 0x1c1   : > { %4013 = vmatpush1.bf16.msra.mxu0 %v5883_v16  ;;  %v5936_v16 = vld [vmem:[%s6347_s15 + $0xb2c] ss:$16 sps:$4 sm:$0xff]  }
 0x1c2   : > { %4056 = vmatpush1.bf16.msra.mxu1 %v5886_v17  ;;  %4014 = vmatprep.subr.bf16.mxu0 %v5891_v20  ;;  %v3562_v17 = vadd.f32 %v6899_v19, %v3519_v3  ;;  %v3564_v20 = vadd.f32 %v6908_v27, %v3521_v6  ;;  %v5942_v19 = vld [vmem:[%s6347_s15 + $0xb0c] ss:$16 sps:$4 sm:$0xff]  }
 0x1c3   : > { %4057 = vmatprep.subr.bf16.mxu1 %v5894_v21  ;;  %v3525_v21 = vadd.f32 %v3524_v44, %v911_v62  ;;  %v5949_v62 = vld [vmem:[%s6347_s15 + $0xcc8] ss:$16 sps:$4 sm:$0xff]   ;;  %v5960_v3 = vld [vmem:[%s6347_s15 + $0xeac] ss:$16 sps:$4 sm:$0xff]  }
 0x1c4   : > { %v3607_v35 = vadd.f32 %v3606_v24, %v3564_v20  ;;  %v5951_v24 = vld [vmem:[%s6347_s15 + $0xccc] ss:$16 sps:$4 sm:$0xff]  }
 0x1c5   : > { %4015 = vmatpush1.bf16.msra.mxu0 %v5889_v22  ;;  %v3605_v22 = vadd.f32 %v3604_v47, %v3562_v17  ;;  %v3568_v27 = vadd.f32 %v6922_v45, %v3525_v21 }
 0x1c6   : > { %4058 = vmatpush1.bf16.msra.mxu1 %v5892_v23  ;;  %4016 = vmatprep.subr.bf16.mxu0 %v5897_v31  ;;  %v5931_v23 = vld [vmem:[%s6347_s15 + $0x928] ss:$16 sps:$4 sm:$0xff]   ;;  %v3692_v31 = vpop.f32.mrf.mxu0 }
 0x1c7   : > { %4059 = vmatprep.subr.bf16.mxu1 %v5900_v32  ;;  %v3735_v32 = vpop.f32.mrf.mxu1  ;;  %v3611_v45 = vadd.f32 %v3610_v4, %v3568_v27  ;;  %v5976_v27 = vld [vmem:[%s6347_s15 + $0xe48] ss:$16 sps:$4 sm:$0xff]  }
 0x1c9   : > { %4017 = vmatpush2.bf16.msra.mxu0 %v5895_v33  ;;  %v5939_v33 = vld [vmem:[%s6347_s15 + $0x90c] ss:$16 sps:$4 sm:$0xff]   ;;  %v3737_v44 = vpop.f32.mrf.mxu1 }
 0x1ca   : > { %4060 = vmatpush2.bf16.msra.mxu1 %v5898_v34  ;;  %4018 = vmatprep.subr.bf16.mxu0 %v5903_v37  ;;  %v3566_v34 = vadd.f32 %v6916_v36, %v3523_v18  ;;  %v3648_v37 = vadd.f32 %v6928_v48, %v3605_v22  ;;  %v5948_v36 = vld [vmem:[%s6347_s15 + $0xeec] ss:$16 sps:$4 sm:$0xff]   ;;  %v5961_v22 = vld [vmem:[%s6347_s15 + $0xc88] ss:$16 sps:$4 sm:$0xff]  }
 0x1cb   : > { %4061 = vmatprep.subr.bf16.mxu1 %v5906_v38  ;;  %v3739_v56 = vpop.f32.mrf.mxu1 }
 0x1cc   : > { %v3609_v38 = vadd.f32 %v3608_v39, %v3566_v34  ;;  %v3691_v47 = vadd.f32 %v3690_v12, %v3648_v37  ;;  %v5978_v34 = vld [vmem:[%s6347_s15 + $0xe4c] ss:$16 sps:$4 sm:$0xff]  }
 0x1cd   : > { %4019 = vmatpush2.bf16.msra.mxu0 %v5901_v42  ;;  %v5940_v42 = vld [vmem:[%s6347_s15 + $0xb08] ss:$16 sps:$4 sm:$0xff]   ;;  %v5981_v37 = vld [vmem:[%s6347_s15 + $0xc2c] ss:$16 sps:$4 sm:$0xff]  }
 0x1ce   : > { %4062 = vmatpush2.bf16.msra.mxu1 %v5904_v43  ;;  %4020 = vmatprep.subr.bf16.mxu0 %v5909_v11  ;;  %v3694_v43 = vpop.f32.mrf.mxu0  ;;  %v5945_v11 = vld [vmem:[%s6347_s15 + $0xcec] ss:$16 sps:$4 sm:$0xff]   ;;  %v3652_v48 = vadd.f32 %v3651_v40, %v3609_v38 }
 0x1cf   : > { %4063 = vmatprep.subr.bf16.mxu1 %v5912_v13  ;;  %v3650_v13 = vadd.f32 %v6940_v25, %v3607_v35  ;;  %v5973_v35 = vld [vmem:[%s6347_s15 + $0xc48] ss:$16 sps:$4 sm:$0xff]   ;;  %v5984_v38 = vld [vmem:[%s6347_s15 + $0xe2c] ss:$16 sps:$4 sm:$0xff]  }
 0x1d1   : > { %4021 = vmatpush2.bf16.msra.mxu0 %v5907_v49  ;;  %v3693_v49 = vadd.f32 %v3692_v31, %v3650_v13  ;;  %v5972_v31 = vld [vmem:[%s6347_s15 + $0xe6c] ss:$16 sps:$4 sm:$0xff]  }
 0x1d2   : > { %4064 = vmatpush2.bf16.msra.mxu1 %v5910_v52  ;;  %4022 = vmatprep.subr.bf16.mxu0 %v5915_v54  ;;  %v5943_v52 = vld [vmem:[%s6347_s15 + $0xce8] ss:$16 sps:$4 sm:$0xff]   ;;  %v5993_v13 = vld [vmem:[%s6347_s15 + $0xdec] ss:$16 sps:$4 sm:$0xff]  }
 0x1d3   : > { %4065 = vmatprep.subr.bf16.mxu1 %v5918_v55  ;;  %v5946_v54 = vld [vmem:[%s6347_s15 + $0xee8] ss:$16 sps:$4 sm:$0xff]   ;;  %v3696_v55 = vpop.f32.mrf.mxu0  ;;  %v3736_v61 = vadd.f32 %v3735_v32, %v3693_v49  ;;  %v5999_v49 = vld [vmem:[%s6347_s15 + $0xdcc] ss:$16 sps:$4 sm:$0xff]  }
 0x1d4   : > { %v5967_v32 = vld [vmem:[%s6347_s15 + $0xc68] ss:$16 sps:$4 sm:$0xff]  }
 0x1d5   : > { %4023 = vmatpush2.bf16.msra.mxu0 %v5913_v59  ;;  %v3654_v59 = vadd.f32 %v3653_v5, %v3611_v45  ;;  %v5996_v45 = vld [vmem:[%s6347_s15 + $0xfec] ss:$16 sps:$4 sm:$0xff]  }
 0x1d6   : > { %4066 = vmatpush2.bf16.msra.mxu1 %v5916_v30  ;;  %4024 = vmatprep.subr.bf16.mxu0 %v5921_v53  ;;  %v3734_v30 = vadd.f32 %v3733_v14, %v3691_v47  ;;  %v3695_v53 = vadd.f32 %v3694_v43, %v3652_v48  ;;  %v5955_v14 = vld [vmem:[%s6347_s15 + $0xca8] ss:$16 sps:$4 sm:$0xff]   ;;  %v5987_v43 = vld [vmem:[%s6347_s15 + $0xc0c] ss:$16 sps:$4 sm:$0xff]  }
 0x1d7   : > { %4067 = vmatprep.subr.bf16.mxu1 %v5924_v60  ;;  %v3697_v39 = vadd.f32 %v3696_v55, %v3654_v59  ;;  %v5991_v47 = vld [vmem:[%s6347_s15 + $0xde8] ss:$16 sps:$4 sm:$0xff]  }
 0x1d8   : > { %v3738_v4 = vadd.f32 %v3737_v44, %v3695_v53  ;;  %v5990_v44 = vld [vmem:[%s6347_s15 + $0xe0c] ss:$16 sps:$4 sm:$0xff]   ;;  %v5994_v48 = vld [vmem:[%s6347_s15 + $0xfe8] ss:$16 sps:$4 sm:$0xff]  }
 0x1d9   : > { %4025 = vmatpush2.bf16.msra.mxu0 %v5919_v63  ;;  %v5952_v63 = vld [vmem:[%s6347_s15 + $0xec8] ss:$16 sps:$4 sm:$0xff]   ;;  %v6014_v53 = vld [vmem:[%s6347_s15 + $0xf8c] ss:$16 sps:$4 sm:$0xff]  }
 0x1da   : > { %4068 = vmatpush2.bf16.msra.mxu1 %v5922_v0  ;;  %4026 = vmatprep.subr.bf16.mxu0 %v5927_v50  ;;  %v6000_v55 = vld [vmem:[%s6347_s15 + $0xfc8] ss:$16 sps:$4 sm:$0xff]  }
 0x1db   : > { %4069 = vmatprep.subr.bf16.mxu1 %v5930_v51  ;;  %v5957_v51 = vld [vmem:[%s6347_s15 + $0xcac] ss:$16 sps:$4 sm:$0xff]   ;;  %v6006_v59 = vld [vmem:[%s6347_s15 + $0xfa8] ss:$16 sps:$4 sm:$0xff]  }
 0x1dd   : > { %4027 = vmatpush2.bf16.msra.mxu0 %v5925_v7  ;;  %v3740_v7 = vadd.f32 %v3739_v56, %v3697_v39  ;;  %v6005_v56 = vld [vmem:[%s6347_s15 + $0xdac] ss:$16 sps:$4 sm:$0xff]  }
 0x1de   : > { %4070 = vmatpush2.bf16.msra.mxu1 %v5928_v10  ;;  %4028 = vmatprep.subr.bf16.mxu0 %v5933_v15  ;;  %v5958_v15 = vld [vmem:[%s6347_s15 + $0xea8] ss:$16 sps:$4 sm:$0xff]   ;;  %v6020_v39 = vld [vmem:[%s6347_s15 + $0xf6c] ss:$16 sps:$4 sm:$0xff]  }
 0x1df   : > { %4071 = vmatprep.subr.bf16.mxu1 %v5936_v16 }
 0x1e1   : > { %4029 = vmatpush2.bf16.msra.mxu0 %v5931_v23  ;;  %v5964_v23 = vld [vmem:[%s6347_s15 + $0xe88] ss:$16 sps:$4 sm:$0xff]  }
 0x1e2   : > { %4072 = vmatpush2.bf16.msra.mxu1 %v5934_v26  ;;  %4030 = vmatprep.subr.bf16.mxu0 %v5939_v33  ;;  %v5969_v26 = vld [vmem:[%s6347_s15 + $0xc6c] ss:$16 sps:$4 sm:$0xff]   ;;  %v5970_v33 = vld [vmem:[%s6347_s15 + $0xe68] ss:$16 sps:$4 sm:$0xff]  }
 0x1e3   : > { %4073 = vmatprep.subr.bf16.mxu1 %v5942_v19  ;;  %v5975_v19 = vld [vmem:[%s6347_s15 + $0xc4c] ss:$16 sps:$4 sm:$0xff]  }
 0x1e5   : > { %4031 = vmatpush2.bf16.msra.mxu0 %v5937_v41  ;;  %v5979_v41 = vld [vmem:[%s6347_s15 + $0xc28] ss:$16 sps:$4 sm:$0xff]  }
 0x1e6   : > { %4074 = vmatpush2.bf16.msra.mxu1 %v5940_v42  ;;  %4086 = vmatprep.subr.bf16.mxu0 %v5945_v11  ;;  %v5982_v42 = vld [vmem:[%s6347_s15 + $0xe28] ss:$16 sps:$4 sm:$0xff]  }
 0x1e7   : > { %4129 = vmatprep.subr.bf16.mxu1 %v5948_v36  ;;  %v5985_v11 = vld [vmem:[%s6347_s15 + $0xc08] ss:$16 sps:$4 sm:$0xff]  }
 0x1e8   : > { %v3776_v25 = vpop.f32.mrf.mxu0  ;;  %4033 = vmatmul.mubr.bf16.vlgmr.msra.gmra.mxu0 %v6636_v1  ;;  %v5988_v36 = vld [vmem:[%s6347_s15 + $0xe08] ss:$16 sps:$4 sm:$0xff]  }
 0x1e9   : > { %v3819_v60 = vpop.f32.mrf.mxu1  ;;  %4076 = vmatmul.mubr.bf16.vlgmr.msra.gmra.mxu1 %v6638_v2  ;;  %v3777_v40 = vadd.f32 %v3776_v25, %v3734_v30  ;;  %4087 = vmatpush1.bf16.msra.mxu0 %v5943_v52  ;;  %v6002_v52 = vld [vmem:[%s6347_s15 + $0xfcc] ss:$16 sps:$4 sm:$0xff]   ;;  %v6009_v25 = vld [vmem:[%s6347_s15 + $0xd88] ss:$16 sps:$4 sm:$0xff]  }
 0x1ea   : > { %4130 = vmatpush1.bf16.msra.mxu1 %v5946_v54  ;;  %v3778_v0 = vpop.f32.mrf.mxu0  ;;  %4088 = vmatprep.subr.bf16.mxu0 %v5951_v24  ;;  %v5997_v54 = vld [vmem:[%s6347_s15 + $0xdc8] ss:$16 sps:$4 sm:$0xff]   ;;  %v6008_v24 = vld [vmem:[%s6347_s15 + $0xfac] ss:$16 sps:$4 sm:$0xff]  }
 0x1eb   : > { %v3821_v50 = vpop.f32.mrf.mxu1  ;;  %4131 = vmatprep.subr.bf16.mxu1 %v5954_v58  ;;  %v6984_v5 = vadd.f32 %v3819_v60, %v3777_v40  ;;  %v3779_v1 = vadd.f32 %v3778_v0, %v3736_v61  ;;  %4118 = vmatprep.mubr.bf16.mxu0 %v6647_v8  ;;  %v5963_v8 = vld [vmem:[%s6347_s15 + $0xc8c] ss:$16 sps:$4 sm:$0xff]   ;;  %v6003_v58 = vld [vmem:[%s6347_s15 + $0xda8] ss:$16 sps:$4 sm:$0xff]  }
 0x1ec   : > { %4161 = vmatprep.mubr.bf16.mxu1 %v6649_v9  ;;  %v3780_v2 = vpop.f32.mrf.mxu0  ;;  %v5966_v9 = vld [vmem:[%s6347_s15 + $0xe8c] ss:$16 sps:$4 sm:$0xff]   ;;  %v6012_v60 = vld [vmem:[%s6347_s15 + $0xf88] ss:$16 sps:$4 sm:$0xff]  }
 0x1ed   : > { %v3823_v6 = vpop.f32.mrf.mxu1  ;;  %v6988_v10 = vadd.f32 %v3821_v50, %v3779_v1  ;;  %v3781_v12 = vadd.f32 %v3780_v2, %v3738_v4  ;;  %4089 = vmatpush1.bf16.msra.mxu0 %v5949_v62  ;;  %v6011_v30 = vld [vmem:[%s6347_s15 + $0xd8c] ss:$16 sps:$4 sm:$0xff]   ;;  %v6015_v40 = vld [vmem:[%s6347_s15 + $0xd68] ss:$16 sps:$4 sm:$0xff]  }
 0x1ee   : > { %4132 = vmatpush1.bf16.msra.mxu1 %v5952_v63  ;;  %v3782_v16 = vpop.f32.mrf.mxu0  ;;  %4090 = vmatprep.subr.bf16.mxu0 %v5957_v51  ;;  %v6017_v61 = vld [vmem:[%s6347_s15 + $0xd6c] ss:$16 sps:$4 sm:$0xff]   ;;  %v6018_v62 = vld [vmem:[%s6347_s15 + $0xf68] ss:$16 sps:$4 sm:$0xff]  }
 0x1ef   : > { %4133 = vmatprep.subr.bf16.mxu1 %v5960_v3  ;;  %v6994_v17 = vadd.f32 %v3823_v6, %v3781_v12  ;;  %v3783_v18 = vadd.f32 %v3782_v16, %v3740_v7  ;;  %v3825_v20 = vpop.f32.mrf.mxu1  ;;  %v6023_v63 = vld [vmem:[%s6347_s15 + $0xd4c] ss:$16 sps:$4 sm:$0xff]   ;;  %v6021_v50 = vld [vmem:[%s6347_s15 + $0xd48] ss:$16 sps:$4 sm:$0xff]  }
 0x1f0   : > { %v6026_v0 = vld [vmem:[%s6347_s15 + $0xf4c] ss:$16 sps:$4 sm:$0xff]   ;;  %v6024_v51 = vld [vmem:[%s6347_s15 + $0xf48] ss:$16 sps:$4 sm:$0xff]  }
 0x1f1   : > { %v6996_v21 = vadd.f32 %v3825_v20, %v3783_v18  ;;  %4091 = vmatpush1.bf16.msra.mxu0 %v5955_v14  ;;  %v6029_v3 = vld [vmem:[%s6347_s15 + $0xd2c] ss:$16 sps:$4 sm:$0xff]   ;;  %v6027_v1 = vld [vmem:[%s6347_s15 + $0xd28] ss:$16 sps:$4 sm:$0xff]  }
 0x1f2   : > { %4134 = vmatpush1.bf16.msra.mxu1 %v5958_v15  ;;  %4092 = vmatprep.subr.bf16.mxu0 %v5963_v8  ;;  %v6032_v4 = vld [vmem:[%s6347_s15 + $0xf2c] ss:$16 sps:$4 sm:$0xff]   ;;  %v6030_v2 = vld [vmem:[%s6347_s15 + $0xf28] ss:$16 sps:$4 sm:$0xff]  }
 0x1f3   : > { %4135 = vmatprep.subr.bf16.mxu1 %v5966_v9  ;;  %v6035_v6 = vld [vmem:[%s6347_s15 + $0xd0c] ss:$16 sps:$4 sm:$0xff]   ;;  %v6033_v12 = vld [vmem:[%s6347_s15 + $0xd08] ss:$16 sps:$4 sm:$0xff]  }
 0x1f4   : > { %v6038_v7 = vld [vmem:[%s6347_s15 + $0xf0c] ss:$16 sps:$4 sm:$0xff]   ;;  %v6036_v14 = vld [vmem:[%s6347_s15 + $0xf08] ss:$16 sps:$4 sm:$0xff]   ;;  %s7063_s15 = scalar_lea.vmem [#allocation3], %s6328_s8 }
 0x1f5   : > { %4093 = vmatpush1.bf16.msra.mxu0 %v5961_v22 }
 0x1f6   : > { %4136 = vmatpush1.bf16.msra.mxu1 %v5964_v23  ;;  %4094 = vmatprep.subr.bf16.mxu0 %v5969_v26 }
 0x1f7   : > { %4137 = vmatprep.subr.bf16.mxu1 %v5972_v31 }
 0x1f9   : > { %4095 = vmatpush1.bf16.msra.mxu0 %v5967_v32  ;;  %v914_v32 = vsub.s32 2, %v6926_v46 }
 0x1fa   : > { %4138 = vmatpush1.bf16.msra.mxu1 %v5970_v33  ;;  %4096 = vmatprep.subr.bf16.mxu0 %v5975_v19 }
 0x1fb   : > { %4139 = vmatprep.subr.bf16.mxu1 %v5978_v34  ;;  %v918_v34 = vsub.s32 3, %v6926_v46 }
 0x1fd   : > { %4097 = vmatpush1.bf16.msra.mxu0 %v5973_v35 }
 0x1fe   : > { %4140 = vmatpush1.bf16.msra.mxu1 %v5976_v27  ;;  %4098 = vmatprep.subr.bf16.mxu0 %v5981_v37  ;;  %v919_v27 = vrot.slane %v6938_v57, %v918_v34 }
 0x1ff   : > { %4141 = vmatprep.subr.bf16.mxu1 %v5984_v38 }
 0x201   : > { %4099 = vmatpush1.bf16.msra.mxu0 %v5979_v41 }
 0x202   : > { %4142 = vmatpush1.bf16.msra.mxu1 %v5982_v42  ;;  %4100 = vmatprep.subr.bf16.mxu0 %v5987_v43 }
 0x203   : > { %4143 = vmatprep.subr.bf16.mxu1 %v5990_v44 }
 0x205   : > { %4101 = vmatpush1.bf16.msra.mxu0 %v5985_v11 }
 0x206   : > { %4144 = vmatpush1.bf16.msra.mxu1 %v5988_v36  ;;  %4102 = vmatprep.subr.bf16.mxu0 %v5993_v13 }
 0x207   : > { %4145 = vmatprep.subr.bf16.mxu1 %v5996_v45 }
 0x209   : > { %4103 = vmatpush2.bf16.msra.mxu0 %v5991_v47 }
 0x20a   : > { %4146 = vmatpush2.bf16.msra.mxu1 %v5994_v48  ;;  %4104 = vmatprep.subr.bf16.mxu0 %v5999_v49 }
 0x20b   : > { %4147 = vmatprep.subr.bf16.mxu1 %v6002_v52 }
 0x20d   : > { %4105 = vmatpush2.bf16.msra.mxu0 %v5997_v54 }
 0x20e   : > { %4148 = vmatpush2.bf16.msra.mxu1 %v6000_v55  ;;  %4106 = vmatprep.subr.bf16.mxu0 %v6005_v56 }
 0x20f   : > { %4149 = vmatprep.subr.bf16.mxu1 %v6008_v24 }
 0x211   : > { %4107 = vmatpush2.bf16.msra.mxu0 %v6003_v58 }
 0x212   : > { %4150 = vmatpush2.bf16.msra.mxu1 %v6006_v59  ;;  %4108 = vmatprep.subr.bf16.mxu0 %v6011_v30 }
 0x213   : > { %4151 = vmatprep.subr.bf16.mxu1 %v6014_v53 }
 0x215   : > { %4109 = vmatpush2.bf16.msra.mxu0 %v6009_v25 }
 0x216   : > { %4152 = vmatpush2.bf16.msra.mxu1 %v6012_v60  ;;  %4110 = vmatprep.subr.bf16.mxu0 %v6017_v61 }
 0x217   : > { %4153 = vmatprep.subr.bf16.mxu1 %v6020_v39 }
 0x219   : > { %4111 = vmatpush2.bf16.msra.mxu0 %v6015_v40 }
 0x21a   : > { %4154 = vmatpush2.bf16.msra.mxu1 %v6018_v62  ;;  %4112 = vmatprep.subr.bf16.mxu0 %v6023_v63 }
 0x21b   : > { %4155 = vmatprep.subr.bf16.mxu1 %v6026_v0 }
 0x21d   : > { %4113 = vmatpush2.bf16.msra.mxu0 %v6021_v50 }
 0x21e   : > { %4156 = vmatpush2.bf16.msra.mxu1 %v6024_v51  ;;  %4114 = vmatprep.subr.bf16.mxu0 %v6029_v3 }
 0x21f   : > { %4157 = vmatprep.subr.bf16.mxu1 %v6032_v4 }
 0x221   : > { %4115 = vmatpush2.bf16.msra.mxu0 %v6027_v1 }
 0x222   : > { %4158 = vmatpush2.bf16.msra.mxu1 %v6030_v2  ;;  %4116 = vmatprep.subr.bf16.mxu0 %v6035_v6 }
 0x223   : > { %4159 = vmatprep.subr.bf16.mxu1 %v6038_v7 }
 0x225   : > { %4117 = vmatpush2.bf16.msra.mxu0 %v6033_v12 }
 0x226   : > { %4160 = vmatpush2.bf16.msra.mxu1 %v6036_v14 }
 0x228   : > { %4119 = vmatmul.mubr.bf16.vlgmr.msra.gmra.mxu0 %v6727_v28  ;;  %v3862_v15 = vpop.f32.mrf.mxu0  ;;  %v915_v28 = vrot.slane %v6938_v57, %v914_v32 }
 0x229   : > { %4162 = vmatmul.mubr.bf16.vlgmr.msra.gmra.mxu1 %v6729_v29  ;;  %v3905_v16 = vpop.f32.mrf.mxu1 }
 0x22a   : > { %v3864_v8 = vpop.f32.mrf.mxu0  ;;  %v3863_v37 = vadd.f32 %v3862_v15, %v915_v28 }
 0x22b   : > { %v3907_v9 = vpop.f32.mrf.mxu1  ;;  %v3865_v42 = vadd.f32 %v3864_v8, %v919_v27 }
 0x22c   : > { %v3866_v18 = vpop.f32.mrf.mxu0  ;;  %v3906_v11 = vadd.f32 %v3905_v16, %v3863_v37 }
 0x22d   : > { %v3909_v20 = vpop.f32.mrf.mxu1  ;;  %v3867_v36 = vadd.f32 %v3866_v18, %v915_v28  ;;  %v3908_v13 = vadd.f32 %v3907_v9, %v3865_v42 }
 0x22e   : > { %v3868_v22 = vpop.f32.mrf.mxu0 }
 0x22f   : > { %v3911_v23 = vpop.f32.mrf.mxu1  ;;  %v3869_v45 = vadd.f32 %v3868_v22, %v919_v27  ;;  %v3910_v46 = vadd.f32 %v3909_v20, %v3867_v36 }
 0x231   : > { %v3912_v54 = vadd.f32 %v3911_v23, %v3869_v45 }
 0x268   : > { %v3948_v26 = vpop.f32.mrf.mxu0 }
 0x269   : > { %v3991_v31 = vpop.f32.mrf.mxu1  ;;  %v3949_v47 = vadd.f32 %v3948_v26, %v3906_v11 }
 0x26a   : > { %v3950_v33 = vpop.f32.mrf.mxu0 }
 0x26b   : > { %v3993_v19 = vpop.f32.mrf.mxu1  ;;  %v3951_v52 = vadd.f32 %v3950_v33, %v3908_v13  ;;  %v3992_v55 = vadd.f32 %v3991_v31, %v3949_v47 }
 0x26c   : > { %v3952_v35 = vpop.f32.mrf.mxu0 }
 0x26d   : > { %v3995_v29 = vpop.f32.mrf.mxu1  ;;  %v3953_v56 = vadd.f32 %v3952_v35, %v3910_v46  ;;  %v3994_v58 = vadd.f32 %v3993_v19, %v3951_v52 }
 0x26e   : > { %v3954_v38 = vpop.f32.mrf.mxu0 }
 0x26f   : > { %v3997_v41 = vpop.f32.mrf.mxu1  ;;  %v3955_v59 = vadd.f32 %v3954_v38, %v3912_v54  ;;  %v3996_v53 = vadd.f32 %v3995_v29, %v3953_v56 }
 0x271   : > { %v3998_v39 = vadd.f32 %v3997_v41, %v3955_v59 }
 0x2a8   : > { %v4034_v43 = vpop.f32.mrf.mxu0 }
 0x2a9   : > { %v4077_v44 = vpop.f32.mrf.mxu1  ;;  %v4035_v30 = vadd.f32 %v4034_v43, %v3992_v55 }
 0x2aa   : > { %v4036_v48 = vpop.f32.mrf.mxu0 }
 0x2ab   : > { %v4079_v49 = vpop.f32.mrf.mxu1  ;;  %v4037_v25 = vadd.f32 %v4036_v48, %v3994_v58  ;;  %v4078_v40 = vadd.f32 %v4077_v44, %v4035_v30 }
 0x2ac   : > { %v4038_v24 = vpop.f32.mrf.mxu0 }
 0x2ad   : > { %v4081_v57 = vpop.f32.mrf.mxu1  ;;  %v4039_v62 = vadd.f32 %v4038_v24, %v3996_v53  ;;  %v4080_v50 = vadd.f32 %v4079_v49, %v4037_v25 }
 0x2ae   : > { %v4040_v60 = vpop.f32.mrf.mxu0 }
 0x2af   : > { %v4083_v61 = vpop.f32.mrf.mxu1  ;;  %v4041_v51 = vadd.f32 %v4040_v60, %v3998_v39  ;;  %v4082_v2 = vadd.f32 %v4081_v57, %v4039_v62 }
 0x2b1   : > { %v4084_v15 = vadd.f32 %v4083_v61, %v4041_v51 }
 0x2e8   : > { %v4120_v63 = vpop.f32.mrf.mxu0 }
 0x2e9   : > { %v4163_v0 = vpop.f32.mrf.mxu1  ;;  %v4121_v3 = vadd.f32 %v4120_v63, %v4078_v40 }
 0x2ea   : > { %v4122_v4 = vpop.f32.mrf.mxu0 }
 0x2eb   : > { %v4165_v1 = vpop.f32.mrf.mxu1  ;;  %v7054_v6 = vadd.f32 %v4163_v0, %v4121_v3  ;;  %v4123_v7 = vadd.f32 %v4122_v4, %v4080_v50 }
 0x2ec   : > { %v4124_v12 = vpop.f32.mrf.mxu0 }
 0x2ed   : > { %v4167_v14 = vpop.f32.mrf.mxu1  ;;  %v7056_v16 = vadd.f32 %v4165_v1, %v4123_v7  ;;  %v4125_v8 = vadd.f32 %v4124_v12, %v4082_v2  ;;  %4175 = sbr.rel (%p5175_p0) target bundleno = 794 (0x31a), region = 63 }
 0x2ee   : > { %v4126_v9 = vpop.f32.mrf.mxu0 }
 0x2ef   : > { %v7058_v18 = vadd.f32 %v4167_v14, %v4125_v8  ;;  %v4127_v20 = vadd.f32 %v4126_v9, %v4084_v15  ;;  %v4169_v22 = vpop.f32.mrf.mxu1 }
 0x2f1   : > { %v7060_v23 = vadd.f32 %v4169_v22, %v4127_v20 }
 0x2f2   : > { %v5176_v26 = vmul.f32 -1.442695, %v6984_v5  ;;  %v5177_v31 = vmul.f32 -1.442695, %v6988_v10  ;;  %v5178_v32 = vmul.f32 -1.442695, %v7054_v6 }
 0x2f3   : > { %v5179_v33 = vmul.f32 -1.442695, %v7056_v16  ;;  %v5180_v19 = vmul.f32 -1.442695, %v6994_v17  ;;  %v5181_v34 = vmul.f32 -1.442695, %v6996_v21 }
 0x2f4   : > { %6039 = vpow2.f32 %v5176_v26  ;;  %v5182_v28 = vmul.f32 -1.442695, %v7058_v18  ;;  %v5183_v35 = vmul.f32 -1.442695, %v7060_v23 }
 0x2f5   : > { %6041 = vpow2.f32 %v5177_v31 }
 0x2f6   : > { %6043 = vpow2.f32 %v5178_v32 }
 0x2f7   : > { %6045 = vpow2.f32 %v5179_v33 }
 0x2f8   : > { %6047 = vpow2.f32 %v5180_v19 }
 0x2f9   : > { %6049 = vpow2.f32 %v5181_v34 }
 0x2fa   : > { %6051 = vpow2.f32 %v5182_v28 }
 0x2fb   : > { %6053 = vpow2.f32 %v5183_v35 }
 0x301   : > { %v6040_v29 = vpop.eup %6039 }
 0x302   : > { %v6042_v27 = vpop.eup %6041  ;;  %v4200_v37 = vadd.f32 1.0, %v6040_v29 }
 0x303   : > { %v6044_v38 = vpop.eup %6043  ;;  %v4201_v41 = vadd.f32 1.0, %v6042_v27 }
 0x304   : > { %v6046_v42 = vpop.eup %6045  ;;  %6055 = vrcp.f32 %v4200_v37  ;;  %v4202_v43 = vadd.f32 1.0, %v6044_v38 }
 0x305   : > { %v6048_v44 = vpop.eup %6047  ;;  %6057 = vrcp.f32 %v4201_v41  ;;  %v4203_v11 = vadd.f32 1.0, %v6046_v42 }
 0x306   : > { %v6050_v36 = vpop.eup %6049  ;;  %6059 = vrcp.f32 %v4202_v43  ;;  %v4204_v13 = vadd.f32 1.0, %v6048_v44 }
 0x307   : > { %v6052_v45 = vpop.eup %6051  ;;  %6061 = vrcp.f32 %v4203_v11  ;;  %v4205_v47 = vadd.f32 1.0, %v6050_v36 }
 0x308   : > { %v6054_v48 = vpop.eup %6053  ;;  %6063 = vrcp.f32 %v4204_v13  ;;  %v4206_v49 = vadd.f32 1.0, %v6052_v45 }
 0x309   : > { %6065 = vrcp.f32 %v4205_v47  ;;  %v4207_v46 = vadd.f32 1.0, %v6054_v48 }
 0x30a   : > { %6067 = vrcp.f32 %v4206_v49 }
 0x30b   : > { %6069 = vrcp.f32 %v4207_v46 }
 0x311   : > { %v6056_v52 = vpop.eup %6055 }
 0x312   : > { %v6058_v54 = vpop.eup %6057  ;;  %4224 = vst [vmem:[#allocation2 + $0x30] sm:$0xff] %v6056_v52 }
 0x313   : > { %v6060_v55 = vpop.eup %6059  ;;  %4225 = vst [vmem:[#allocation2] sm:$0xff] %v6058_v54 }
 0x314   : > { %v6062_v56 = vpop.eup %6061  ;;  %4226 = vst [vmem:[#allocation2 + $0x18] sm:$0xff] %v6060_v55 }
 0x315   : > { %v6064_v24 = vpop.eup %6063  ;;  %4227 = vst [vmem:[#allocation2 + $0x10] sm:$0xff] %v6062_v56 }
 0x316   : > { %v6066_v57 = vpop.eup %6065  ;;  %4228 = vst [vmem:[#allocation2 + $0x8] sm:$0x1] %v6064_v24 }
 0x317   : > { %v6068_v58 = vpop.eup %6067  ;;  %4229 = vst [vmem:[#allocation2 + $0x20] sm:$0x1] %v6066_v57 }
 0x318   : > { %v6070_v59 = vpop.eup %6069  ;;  %4230 = vst [vmem:[#allocation2 + $0x28] sm:$0x1] %v6068_v58 }
 0x319   : > { %4231 = vst [vmem:[#allocation2 + $0x38] sm:$0x1] %v6070_v59 }
 0x31a PF: > { %p5184_p1 = scmp.ne.s32.totalorder %s6205_s20, 1 }
 0x31c   : > { %4235 = sbr.rel (%p5184_p1) target bundleno = 843 (0x34b), region = 67 }
 0x321   : > { %v5185_v30 = vmul.f32 -1.442695, %v6984_v5  ;;  %v5186_v53 = vmul.f32 -1.442695, %v6988_v10  ;;  %v5187_v25 = vmul.f32 -1.442695, %v7054_v6 }
 0x322   : > { %v5188_v60 = vmul.f32 -1.442695, %v7056_v16  ;;  %v5189_v61 = vmul.f32 -1.442695, %v6994_v17  ;;  %v5190_v39 = vmul.f32 -1.442695, %v6996_v21 }
 0x323   : > { %6071 = vpow2.f32 %v5185_v30  ;;  %v5191_v40 = vmul.f32 -1.442695, %v7058_v18  ;;  %v5192_v62 = vmul.f32 -1.442695, %v7060_v23  ;;  %v4284_v26 = vld [vmem:[%s7063_s15] sm:$0xff]  ;;  %v4285_v31 = vld [vmem:[%s7063_s15 + $0x8] sm:$0xff] }
 0x324   : > { %6073 = vpow2.f32 %v5186_v53  ;;  %v4286_v33 = vld [vmem:[%s7063_s15 + $0x10] sm:$0xff]  ;;  %v4287_v28 = vld [vmem:[%s7063_s15 + $0x18] sm:$0xff]  ;;  %v4288_v27 = vld [vmem:[%s7063_s15 + $0x20] sm:$0x1] }
 0x325   : > { %6075 = vpow2.f32 %v5187_v25  ;;  %v4289_v41 = vld [vmem:[%s7063_s15 + $0x28] sm:$0x1]  ;;  %v4290_v44 = vld [vmem:[%s7063_s15 + $0x30] sm:$0x1]  ;;  %v4291_v13 = vld [vmem:[%s7063_s15 + $0x38] sm:$0x1] }
 0x326   : > { %6077 = vpow2.f32 %v5188_v60 }
 0x327   : > { %6079 = vpow2.f32 %v5189_v61 }
 0x328   : > { %6081 = vpow2.f32 %v5190_v39 }
 0x329   : > { %6083 = vpow2.f32 %v5191_v40 }
 0x32a   : > { %6085 = vpow2.f32 %v5192_v62 }
 0x330   : > { %v6072_v63 = vpop.eup %6071 }
 0x331   : > { %v6074_v0 = vpop.eup %6073  ;;  %v4260_v50 = vadd.f32 1.0, %v6072_v63 }
 0x332   : > { %v6076_v51 = vpop.eup %6075  ;;  %v4261_v3 = vadd.f32 1.0, %v6074_v0 }
 0x333   : > { %v6078_v4 = vpop.eup %6077  ;;  %6087 = vrcp.f32 %v4260_v50  ;;  %v4262_v1 = vadd.f32 1.0, %v6076_v51 }
 0x334   : > { %v6080_v2 = vpop.eup %6079  ;;  %6089 = vrcp.f32 %v4261_v3  ;;  %v4263_v7 = vadd.f32 1.0, %v6078_v4 }
 0x335   : > { %v6082_v12 = vpop.eup %6081  ;;  %6091 = vrcp.f32 %v4262_v1  ;;  %v4264_v14 = vadd.f32 1.0, %v6080_v2 }
 0x336   : > { %v6084_v15 = vpop.eup %6083  ;;  %6093 = vrcp.f32 %v4263_v7  ;;  %v4265_v8 = vadd.f32 1.0, %v6082_v12 }
 0x337   : > { %v6086_v9 = vpop.eup %6085  ;;  %6095 = vrcp.f32 %v4264_v14  ;;  %v4266_v20 = vadd.f32 1.0, %v6084_v15 }
 0x338   : > { %6097 = vrcp.f32 %v4265_v8  ;;  %v4267_v22 = vadd.f32 1.0, %v6086_v9 }
 0x339   : > { %6099 = vrcp.f32 %v4266_v20 }
 0x33a   : > { %6101 = vrcp.f32 %v4267_v22 }
 0x340   : > { %v6088_v32 = vpop.eup %6087 }
 0x341   : > { %v6090_v19 = vpop.eup %6089  ;;  %v4292_v34 = vmul.f32 %v6088_v32, %v4284_v26 }
 0x342   : > { %v6092_v35 = vpop.eup %6091  ;;  %v4293_v29 = vmul.f32 %v6090_v19, %v4285_v31 }
 0x343   : > { %v6094_v37 = vpop.eup %6093  ;;  %4300 = vst [vmem:[%s7069_s16] sm:$0xff] %v4292_v34  ;;  %v4294_v38 = vmul.f32 %v6092_v35, %v4286_v33 }
 0x344   : > { %v6096_v42 = vpop.eup %6095  ;;  %4301 = vst [vmem:[%s7069_s16 + $0x8] sm:$0xff] %v4293_v29  ;;  %v4295_v43 = vmul.f32 %v6094_v37, %v4287_v28 }
 0x345   : > { %v6098_v11 = vpop.eup %6097  ;;  %4302 = vst [vmem:[%s7069_s16 + $0x10] sm:$0xff] %v4294_v38  ;;  %v4296_v36 = vmul.f32 %v6096_v42, %v4288_v27 }
 0x346   : > { %v6100_v45 = vpop.eup %6099  ;;  %4303 = vst [vmem:[%s7069_s16 + $0x18] sm:$0xff] %v4295_v43  ;;  %v4297_v47 = vmul.f32 %v6098_v11, %v4289_v41 }
 0x347   : > { %v6102_v48 = vpop.eup %6101  ;;  %4304 = vst [vmem:[%s7069_s16 + $0x20] sm:$0x1] %v4296_v36  ;;  %v4298_v49 = vmul.f32 %v6100_v45, %v4290_v44 }
 0x348   : > { %4305 = vst [vmem:[%s7069_s16 + $0x28] sm:$0x1] %v4297_v47  ;;  %v4299_v46 = vmul.f32 %v6102_v48, %v4291_v13 }
 0x349   : > { %4306 = vst [vmem:[%s7069_s16 + $0x30] sm:$0x1] %v4298_v49 }
 0x34a   : > { %4307 = vst [vmem:[%s7069_s16 + $0x38] sm:$0x1] %v4299_v46 }
 0x34b PF: > { %p5193_p2 = scmp.ne.s32.totalorder %s6205_s20, 2 }
 0x34d   : > { %4311 = sbr.rel (%p5193_p2) target bundleno = 876 (0x36c), region = 71 }
 0x352   : > { %6103 = vtanh.f32 %v6984_v5  ;;  %v4320_v52 = vld [vmem:[#allocation2 + $0x30] sm:$0xff]  ;;  %v4321_v54 = vld [vmem:[#allocation2] sm:$0xff]  ;;  %v4322_v24 = vld [vmem:[#allocation2 + $0x18] sm:$0xff] }
 0x353   : > { %6105 = vtanh.f32 %v6988_v10  ;;  %v4312_v56 = vld [vmem:[%s7069_s16] sm:$0xff]  ;;  %v4313_v59 = vld [vmem:[%s7069_s16 + $0x8] sm:$0xff]  ;;  %v4323_v30 = vld [vmem:[#allocation2 + $0x10] sm:$0xff] }
 0x354   : > { %6107 = vtanh.f32 %v7054_v6  ;;  %v4314_v60 = vld [vmem:[%s7069_s16 + $0x10] sm:$0xff]  ;;  %v4324_v61 = vld [vmem:[#allocation2 + $0x8] sm:$0x1]  ;;  %v4315_v63 = vld [vmem:[%s7069_s16 + $0x18] sm:$0xff] }
 0x355   : > { %6109 = vtanh.f32 %v7056_v16  ;;  %v4325_v0 = vld [vmem:[#allocation2 + $0x20] sm:$0x1]  ;;  %v4326_v1 = vld [vmem:[#allocation2 + $0x28] sm:$0x1]  ;;  %v4327_v15 = vld [vmem:[#allocation2 + $0x38] sm:$0x1] }
 0x356   : > { %6111 = vtanh.f32 %v6994_v17  ;;  %v4316_v4 = vld [vmem:[%s7069_s16 + $0x20] sm:$0x1]  ;;  %v4317_v14 = vld [vmem:[%s7069_s16 + $0x28] sm:$0x1]  ;;  %v4318_v22 = vld [vmem:[%s7069_s16 + $0x30] sm:$0x1] }
 0x357   : > { %6113 = vtanh.f32 %v6996_v21  ;;  %v4319_v33 = vld [vmem:[%s7069_s16 + $0x38] sm:$0x1] }
 0x358   : > { %6115 = vtanh.f32 %v7058_v18 }
 0x359   : > { %6117 = vtanh.f32 %v7060_v23 }
 0x35f   : > { %v6104_v55 = vpop.eup %6103 }
 0x360   : > { %v6106_v57 = vpop.eup %6105  ;;  %v4336_v58 = vmul.f32 %v6104_v55, %v4320_v52 }
 0x361   : > { %v6108_v53 = vpop.eup %6107  ;;  %v4337_v25 = vmul.f32 %v6106_v57, %v4321_v54 }
 0x362   : > { %v6110_v39 = vpop.eup %6109  ;;  %v4344_v40 = vadd.f32 %v4336_v58, %v4312_v56  ;;  %v4338_v62 = vmul.f32 %v6108_v53, %v4322_v24 }
 0x363   : > { %v6112_v50 = vpop.eup %6111  ;;  %v4345_v51 = vadd.f32 %v4337_v25, %v4313_v59  ;;  %v4339_v3 = vmul.f32 %v6110_v39, %v4323_v30 }
 0x364   : > { %v6114_v2 = vpop.eup %6113  ;;  %4352 = vst [vmem:[%s7069_s16] sm:$0xff] %v4344_v40  ;;  %v4346_v7 = vadd.f32 %v4338_v62, %v4314_v60  ;;  %v4340_v12 = vmul.f32 %v6112_v50, %v4324_v61 }
 0x365   : > { %v6116_v8 = vpop.eup %6115  ;;  %4353 = vst [vmem:[%s7069_s16 + $0x8] sm:$0xff] %v4345_v51  ;;  %v4347_v9 = vadd.f32 %v4339_v3, %v4315_v63  ;;  %v4341_v20 = vmul.f32 %v6114_v2, %v4325_v0 }
 0x366   : > { %v6118_v26 = vpop.eup %6117  ;;  %4354 = vst [vmem:[%s7069_s16 + $0x10] sm:$0xff] %v4346_v7  ;;  %v4348_v31 = vadd.f32 %v4340_v12, %v4316_v4  ;;  %v4342_v32 = vmul.f32 %v6116_v8, %v4326_v1 }
 0x367   : > { %4355 = vst [vmem:[%s7069_s16 + $0x18] sm:$0xff] %v4347_v9  ;;  %v4349_v19 = vadd.f32 %v4341_v20, %v4317_v14  ;;  %v4343_v34 = vmul.f32 %v6118_v26, %v4327_v15 }
 0x368   : > { %4356 = vst [vmem:[%s7069_s16 + $0x20] sm:$0x1] %v4348_v31  ;;  %v4350_v28 = vadd.f32 %v4342_v32, %v4318_v22 }
 0x369   : > { %4357 = vst [vmem:[%s7069_s16 + $0x28] sm:$0x1] %v4349_v19  ;;  %v4351_v35 = vadd.f32 %v4343_v34, %v4319_v33 }
 0x36a   : > { %4358 = vst [vmem:[%s7069_s16 + $0x30] sm:$0x1] %v4350_v28 }
 0x36b   : > { %4359 = vst [vmem:[%s7069_s16 + $0x38] sm:$0x1] %v4351_v35 }
 0x36c PF: > { %p5194_p3 = scmp.ne.s32.totalorder %s6205_s20, 3 }
 0x36e   : > { %4363 = sbr.rel (%p5194_p3) target bundleno = 930 (0x3a2), region = 75 }
 0x373   : > { %v5195_v29 = vmul.f32 -1.442695, %v6984_v5  ;;  %v5196_v27 = vmul.f32 -1.442695, %v6988_v10  ;;  %v5197_v37 = vmul.f32 -1.442695, %v7054_v6 }
 0x374   : > { %v5198_v38 = vmul.f32 -1.442695, %v7056_v16  ;;  %v5199_v41 = vmul.f32 -1.442695, %v6994_v17  ;;  %v5200_v42 = vmul.f32 -1.442695, %v6996_v21 }
 0x375   : > { %6119 = vpow2.f32 %v5195_v29  ;;  %v5201_v43 = vmul.f32 -1.442695, %v7058_v18  ;;  %v4412_v5 = vld [vmem:[%s7069_s16] sm:$0xff]  ;;  %v5202_v10 = vmul.f32 -1.442695, %v7060_v23  ;;  %v4413_v6 = vld [vmem:[%s7069_s16 + $0x8] sm:$0xff] }
 0x376   : > { %6121 = vpow2.f32 %v5196_v27  ;;  %v4414_v44 = vld [vmem:[%s7069_s16 + $0x10] sm:$0xff]  ;;  %v4415_v36 = vld [vmem:[%s7069_s16 + $0x18] sm:$0xff]  ;;  %v4416_v23 = vld [vmem:[%s7069_s16 + $0x20] sm:$0x1] }
 0x377   : > { %6123 = vpow2.f32 %v5197_v37  ;;  %v4417_v48 = vld [vmem:[%s7069_s16 + $0x28] sm:$0x1]  ;;  %v4418_v52 = vld [vmem:[%s7069_s16 + $0x30] sm:$0x1]  ;;  %v4419_v56 = vld [vmem:[%s7069_s16 + $0x38] sm:$0x1] }
 0x378   : > { %6125 = vpow2.f32 %v5198_v38 }
 0x379   : > { %6127 = vpow2.f32 %v5199_v41 }
 0x37a   : > { %6129 = vpow2.f32 %v5200_v42 }
 0x37b   : > { %6131 = vpow2.f32 %v5201_v43 }
 0x37c   : > { %6133 = vtanh.f32 %v4412_v5 }
 0x37d   : > { %6135 = vpow2.f32 %v5202_v10 }
 0x37e   : > { %6137 = vtanh.f32 %v4413_v6 }
 0x37f   : > { %6139 = vtanh.f32 %v4414_v44 }
 0x382   : > { %v6120_v16 = vpop.eup %6119 }
 0x383   : > { %v6122_v17 = vpop.eup %6121  ;;  %v4388_v11 = vadd.f32 1.0, %v6120_v16 }
 0x384   : > { %v4389_v21 = vadd.f32 1.0, %v6122_v17  ;;  %v6124_v18 = vpop.eup %6123 }
 0x385   : > { %6141 = vrcp.f32 %v4388_v11  ;;  %v4390_v13 = vadd.f32 1.0, %v6124_v18  ;;  %v6126_v45 = vpop.eup %6125 }
 0x386   : > { %6143 = vrcp.f32 %v4389_v21  ;;  %v4391_v47 = vadd.f32 1.0, %v6126_v45  ;;  %v6128_v49 = vpop.eup %6127 }
 0x387   : > { %6145 = vtanh.f32 %v4415_v36  ;;  %v4392_v46 = vadd.f32 1.0, %v6128_v49  ;;  %v6130_v54 = vpop.eup %6129 }
 0x388   : > { %6147 = vrcp.f32 %v4390_v13  ;;  %v4393_v55 = vadd.f32 1.0, %v6130_v54  ;;  %v6132_v24 = vpop.eup %6131 }
 0x389   : > { %6149 = vtanh.f32 %v4416_v23  ;;  %v6134_v57 = vpop.eup %6133  ;;  %v4394_v58 = vadd.f32 1.0, %v6132_v24 }
 0x38a   : > { %6151 = vrcp.f32 %v4391_v47  ;;  %v6136_v59 = vpop.eup %6135 }
 0x38b   : > { %6153 = vtanh.f32 %v4417_v48  ;;  %v6138_v30 = vpop.eup %6137  ;;  %v4395_v53 = vadd.f32 1.0, %v6136_v59 }
 0x38c   : > { %6155 = vrcp.f32 %v4392_v46  ;;  %v6140_v25 = vpop.eup %6139 }
 0x38d   : > { %6157 = vtanh.f32 %v4418_v52 }
 0x38e   : > { %6159 = vrcp.f32 %v4393_v55 }
 0x38f   : > { %6161 = vtanh.f32 %v4419_v56 }
 0x390   : > { %6163 = vrcp.f32 %v4394_v58 }
 0x391   : > { %6165 = vrcp.f32 %v4395_v53 }
 0x392   : > { %v6142_v60 = vpop.eup %6141 }
 0x393   : > { %v6144_v61 = vpop.eup %6143  ;;  %v4428_v39 = vmul.f32 %v6142_v60, %v6134_v57 }
 0x394   : > { %v6146_v40 = vpop.eup %6145  ;;  %v4429_v62 = vmul.f32 %v6144_v61, %v6138_v30 }
 0x395   : > { %v6148_v63 = vpop.eup %6147  ;;  %4436 = vst [vmem:[%s7066_s14] sm:$0xff] %v4428_v39 }
 0x396   : > { %v6150_v0 = vpop.eup %6149  ;;  %4437 = vst [vmem:[%s7066_s14 + $0x8] sm:$0xff] %v4429_v62  ;;  %v4430_v50 = vmul.f32 %v6148_v63, %v6140_v25 }
 0x397   : > { %v6152_v51 = vpop.eup %6151 }
 0x398   : > { %v6154_v3 = vpop.eup %6153  ;;  %4438 = vst [vmem:[%s7066_s14 + $0x10] sm:$0xff] %v4430_v50  ;;  %v4431_v4 = vmul.f32 %v6152_v51, %v6146_v40 }
 0x399   : > { %v6156_v1 = vpop.eup %6155 }
 0x39a   : > { %v6158_v2 = vpop.eup %6157  ;;  %4439 = vst [vmem:[%s7066_s14 + $0x18] sm:$0xff] %v4431_v4  ;;  %v4432_v7 = vmul.f32 %v6156_v1, %v6150_v0 }
 0x39b   : > { %v6160_v12 = vpop.eup %6159 }
 0x39c   : > { %v6162_v14 = vpop.eup %6161  ;;  %4440 = vst [vmem:[%s7066_s14 + $0x20] sm:$0x1] %v4432_v7  ;;  %v4433_v15 = vmul.f32 %v6160_v12, %v6154_v3 }
 0x39d   : > { %v6164_v8 = vpop.eup %6163 }
 0x39e   : > { %4441 = vst [vmem:[%s7066_s14 + $0x28] sm:$0x1] %v4433_v15  ;;  %v4434_v9 = vmul.f32 %v6164_v8, %v6158_v2  ;;  %v6166_v20 = vpop.eup %6165 }
 0x39f   : > { %v4435_v22 = vmul.f32 %v6166_v20, %v6162_v14 }
 0x3a0   : > { %4442 = vst [vmem:[%s7066_s14 + $0x30] sm:$0x1] %v4434_v9 }
 0x3a1   : > { %4443 = vst [vmem:[%s7066_s14 + $0x38] sm:$0x1] %v4435_v22 }
 0x3a2 PF: > { %4454 = sbr.rel (!%p6297_p6) target bundleno = 938 (0x3aa), region = 79  ;;  %s5213_s20 = sshll.u32 (%p6297_p6), %s6209_s21, 5  ;;  %v4470_v26 = vld [vmem:[%s7066_s14] sm:$0xff] (%p6297_p6)  ;;  %v4472_v31 = vld [vmem:[%s7066_s14 + $0x8] sm:$0xff] (%p6297_p6)  ;;  %v4474_v32 = vld [vmem:[%s7066_s14 + $0x10] sm:$0xff] (%p6297_p6) }
 0x3a3   : > { %s4457_s27 = scalar_lea.vmem (%p6297_p6), %s7208_s4, %s5213_s20  ;;  %v4476_v33 = vld [vmem:[%s7066_s14 + $0x18] sm:$0xff] (%p6297_p6)  ;;  %v4478_v19 = vld [vmem:[%s7066_s14 + $0x20] sm:$0xff] (%p6297_p6) }
 0x3a4   : > { %4471 = vst [vmem:[%s4457_s27] sm:$0xff] (%p6297_p6), %v4470_v26  ;;  %4473 = vst [vmem:[%s4457_s27 + $0x8] sm:$0xff] (%p6297_p6), %v4472_v31 }
 0x3a5   : > { %v4480_v34 = vld [vmem:[%s7066_s14 + $0x28] sm:$0xff] (%p6297_p6)  ;;  %4475 = vst [vmem:[%s4457_s27 + $0x10] sm:$0xff] (%p6297_p6), %v4474_v32  ;;  %4477 = vst [vmem:[%s4457_s27 + $0x18] sm:$0xff] (%p6297_p6), %v4476_v33 }
 0x3a6   : > { %4479 = vst [vmem:[%s4457_s27 + $0x40] sm:$0xff] (%p6297_p6), %v4478_v19  ;;  %4481 = vst [vmem:[%s4457_s27 + $0x48] sm:$0xff] (%p6297_p6), %v4480_v34 }
 0x3a7   : > { %v4482_v28 = vld [vmem:[%s7066_s14 + $0x30] sm:$0xff] }
 0x3a8   : > { %v4484_v35 = vld [vmem:[%s7066_s14 + $0x38] sm:$0xff]  ;;  %4483 = vst [vmem:[%s4457_s27 + $0x50] sm:$0xff] %v4482_v28 }
 0x3a9   : > { %4485 = vst [vmem:[%s4457_s27 + $0x58] sm:$0xff] %v4484_v35 }
 0x3aa PF: > { %4491 = sbr.rel (!%p6297_p6) target bundleno = 944 (0x3b0), region = 102  ;;  %s5214_s29 = sshll.u32 (%p6297_p6), %s6209_s21, 5  ;;  %v4507_v29 = vld [vmem:[%s7069_s16] sm:$0xff] (%p6297_p6)  ;;  %v4509_v27 = vld [vmem:[%s7069_s16 + $0x8] sm:$0xff] (%p6297_p6)  ;;  %v4511_v37 = vld [vmem:[%s7069_s16 + $0x10] sm:$0xff] (%p6297_p6) }
 0x3ab   : > { %s4494_s18 = scalar_lea.vmem (%p6297_p6), %s7209_s5, %s5214_s29  ;;  %v4513_v38 = vld [vmem:[%s7069_s16 + $0x18] sm:$0xff] (%p6297_p6)  ;;  %v4515_v41 = vld [vmem:[%s7069_s16 + $0x20] sm:$0xff] (%p6297_p6)  ;;  %v4517_v42 = vld [vmem:[%s7069_s16 + $0x28] sm:$0xff] (%p6297_p6) }
 0x3ac   : > { %4508 = vst [vmem:[%s4494_s18] sm:$0xff] (%p6297_p6), %v4507_v29  ;;  %4510 = vst [vmem:[%s4494_s18 + $0x8] sm:$0xff] (%p6297_p6), %v4509_v27  ;;  %v4519_v43 = vld [vmem:[%s7069_s16 + $0x30] sm:$0xff] (%p6297_p6)  ;;  %v4521_v5 = vld [vmem:[%s7069_s16 + $0x38] sm:$0xff] (%p6297_p6) }
 0x3ad   : > { %4512 = vst [vmem:[%s4494_s18 + $0x10] sm:$0xff] (%p6297_p6), %v4511_v37  ;;  %4514 = vst [vmem:[%s4494_s18 + $0x18] sm:$0xff] (%p6297_p6), %v4513_v38 }
 0x3ae   : > { %4516 = vst [vmem:[%s4494_s18 + $0x40] sm:$0xff] (%p6297_p6), %v4515_v41  ;;  %4518 = vst [vmem:[%s4494_s18 + $0x48] sm:$0xff] (%p6297_p6), %v4517_v42 }
 0x3af   : > { %4520 = vst [vmem:[%s4494_s18 + $0x50] sm:$0xff] %v4519_v43  ;;  %4522 = vst [vmem:[%s4494_s18 + $0x58] sm:$0xff] %v4521_v5 }
 0x3b0 PF: > { %s16_s24 = sadd.s32 1, %s6221_s24   ;;  %s7211_s18 = smov %s6201_s19 }
 0x3b1   : > { %p13_p4 = scmp.ge.s32.totalorder %s16_s24, 10   ;;  %s7212_s19 = smov %s6307_s6 }
 0x3b2   : > { %s7213_s20 = smov %s6213_s22  ;;  %s7214_s21 = smov %s6217_s23 }
 0x3b3   : > { %s7215_s22 = smov %s7218_s25  ;;  %s7216_s23 = smov %s7222_s26 }
 0x3b4   :  { %15 = sbr.rel (!%p13_p4) target bundleno = 4 (0x4), region = 174 }

// kernel: tan_forward.5
= control target key start
LH: loop header
LB: loop body
LE: loop exit
PB: predicated region body
PF: predicated region fallthrough
CT: control target
= control target key end

     0   :  { %s9467_s1 = inlined_call_operand.vmem [shape: bf16[1024,768], index: 1, kind: input, shape index: {}]   ;;  %s9468_s0 = inlined_call_operand.vmem [shape: f32[9,1024], index: 0, kind: input, shape index: {}]   ;;  %s9469_s2 = inlined_call_operand.vmem [shape: f32[1,768], index: 2, kind: input, shape index: {}]   ;;  %s9470_s3 = inlined_call_operand.vmem [shape: bf16[768,512], index: 3, kind: input, shape index: {}]   ;;  %s9471_s5 = inlined_call_operand.vmem [shape: bf16[512,512], index: 5, kind: input, shape index: {}]   ;;  %s9472_s4 = inlined_call_operand.vmem [shape: f32[1,512], index: 4, kind: input, shape index: {}]   ;;  %s9473_s6 = inlined_call_operand.vmem [shape: f32[1,512], index: 6, kind: input, shape index: {}]   ;;  %s9474_s7 = inlined_call_operand.vmem [shape: f32[9,512], index: 7, kind: output, shape index: {}]  }
   0x1   :  { %v6042_v0 = vld [vmem:[%s9467_s1 + $0x154] ss:$24 sps:$4 sm:$0xff]   ;;  %v6046_v2 = vld [vmem:[%s9467_s1 + $0x150] ss:$24 sps:$4 sm:$0xff]   ;;  %v6048_v4 = vld [vmem:[%s9467_s1 + $0x124] ss:$24 sps:$4 sm:$0xff]  }
   0x2   :  { %v6044_v1 = vld [vmem:[%s9467_s1 + $0x454] ss:$24 sps:$4 sm:$0xff]   ;;  %2386 = vmatprep.subr.bf16.mxu0 %v6042_v0  ;;  %v6047_v3 = vld [vmem:[%s9467_s1 + $0x450] ss:$24 sps:$4 sm:$0xff]   ;;  %v6050_v5 = vld [vmem:[%s9467_s1 + $0x424] ss:$24 sps:$4 sm:$0xff]  }
   0x3   :  { %2429 = vmatprep.subr.bf16.mxu1 %v6044_v1  ;;  %2387 = vmatpush1.bf16.msra.mxu0 %v6046_v2  ;;  %v6052_v6 = vld [vmem:[%s9467_s1 + $0x120] ss:$24 sps:$4 sm:$0xff]   ;;  %v6054_v8 = vld [vmem:[%s9467_s1 + $0xf4] ss:$24 sps:$4 sm:$0xff]   ;;  %v6058_v10 = vld [vmem:[%s9467_s1 + $0xf0] ss:$24 sps:$4 sm:$0xff]  }
   0x4   :  { %2430 = vmatpush1.bf16.msra.mxu1 %v6047_v3  ;;  %2388 = vmatprep.subr.bf16.mxu0 %v6048_v4  ;;  %v6053_v7 = vld [vmem:[%s9467_s1 + $0x420] ss:$24 sps:$4 sm:$0xff]   ;;  %v6056_v9 = vld [vmem:[%s9467_s1 + $0x3f4] ss:$24 sps:$4 sm:$0xff]   ;;  %v6059_v11 = vld [vmem:[%s9467_s1 + $0x3f0] ss:$24 sps:$4 sm:$0xff]  }
   0x5   :  { %2431 = vmatprep.subr.bf16.mxu1 %v6050_v5  ;;  %v6060_v12 = vld [vmem:[%s9467_s1 + $0xc4] ss:$24 sps:$4 sm:$0xff]   ;;  %v6064_v14 = vld [vmem:[%s9467_s1 + $0xc0] ss:$24 sps:$4 sm:$0xff]   ;;  %v6066_v16 = vld [vmem:[%s9467_s1 + $0x94] ss:$24 sps:$4 sm:$0xff]  }
   0x6   :  { %v6062_v13 = vld [vmem:[%s9467_s1 + $0x3c4] ss:$24 sps:$4 sm:$0xff]   ;;  %v6065_v15 = vld [vmem:[%s9467_s1 + $0x3c0] ss:$24 sps:$4 sm:$0xff]   ;;  %v6068_v17 = vld [vmem:[%s9467_s1 + $0x394] ss:$24 sps:$4 sm:$0xff]  }
   0x7   :  { %2389 = vmatpush1.bf16.msra.mxu0 %v6052_v6  ;;  %v6070_v18 = vld [vmem:[%s9467_s1 + $0x90] ss:$24 sps:$4 sm:$0xff]   ;;  %v6072_v20 = vld [vmem:[%s9467_s1 + $0x64] ss:$24 sps:$4 sm:$0xff]   ;;  %v6076_v22 = vld [vmem:[%s9467_s1 + $0x60] ss:$24 sps:$4 sm:$0xff]  }
   0x8   :  { %2432 = vmatpush1.bf16.msra.mxu1 %v6053_v7  ;;  %2390 = vmatprep.subr.bf16.mxu0 %v6054_v8  ;;  %v6071_v19 = vld [vmem:[%s9467_s1 + $0x390] ss:$24 sps:$4 sm:$0xff]   ;;  %v6074_v21 = vld [vmem:[%s9467_s1 + $0x364] ss:$24 sps:$4 sm:$0xff]   ;;  %v6077_v23 = vld [vmem:[%s9467_s1 + $0x360] ss:$24 sps:$4 sm:$0xff]  }
   0x9   :  { %2433 = vmatprep.subr.bf16.mxu1 %v6056_v9  ;;  %v6078_v24 = vld [vmem:[%s9467_s1 + $0x34] ss:$24 sps:$4 sm:$0xff]   ;;  %v6082_v26 = vld [vmem:[%s9467_s1 + $0x30] ss:$24 sps:$4 sm:$0xff]   ;;  %v6084_v28 = vld [vmem:[%s9467_s1 + $0x4] ss:$24 sps:$4 sm:$0xff]  }
   0xa   :  { %v6080_v25 = vld [vmem:[%s9467_s1 + $0x334] ss:$24 sps:$4 sm:$0xff]   ;;  %v6083_v27 = vld [vmem:[%s9467_s1 + $0x330] ss:$24 sps:$4 sm:$0xff]   ;;  %v6086_v29 = vld [vmem:[%s9467_s1 + $0x304] ss:$24 sps:$4 sm:$0xff]  }
   0xb   :  { %2391 = vmatpush1.bf16.msra.mxu0 %v6058_v10  ;;  %v6088_v30 = vld [vmem:[%s9467_s1] ss:$24 sps:$4 sm:$0xff]   ;;  %v6090_v32 = vld [vmem:[%s9467_s1 + $0x2d4] ss:$24 sps:$4 sm:$0xff]   ;;  %v6094_v34 = vld [vmem:[%s9467_s1 + $0x2d0] ss:$24 sps:$4 sm:$0xff]  }
   0xc   :  { %2434 = vmatpush1.bf16.msra.mxu1 %v6059_v11  ;;  %2392 = vmatprep.subr.bf16.mxu0 %v6060_v12  ;;  %v6089_v31 = vld [vmem:[%s9467_s1 + $0x300] ss:$24 sps:$4 sm:$0xff]   ;;  %v6092_v33 = vld [vmem:[%s9467_s1 + $0x5d4] ss:$24 sps:$4 sm:$0xff]   ;;  %v6095_v35 = vld [vmem:[%s9467_s1 + $0x5d0] ss:$24 sps:$4 sm:$0xff]  }
   0xd   :  { %2435 = vmatprep.subr.bf16.mxu1 %v6062_v13  ;;  %v6096_v36 = vld [vmem:[%s9467_s1 + $0x2a4] ss:$24 sps:$4 sm:$0xff]   ;;  %v6100_v38 = vld [vmem:[%s9467_s1 + $0x2a0] ss:$24 sps:$4 sm:$0xff]   ;;  %v6102_v40 = vld [vmem:[%s9467_s1 + $0x274] ss:$24 sps:$4 sm:$0xff]  }
   0xe   :  { %v6098_v37 = vld [vmem:[%s9467_s1 + $0x5a4] ss:$24 sps:$4 sm:$0xff]   ;;  %v6101_v39 = vld [vmem:[%s9467_s1 + $0x5a0] ss:$24 sps:$4 sm:$0xff]   ;;  %v6104_v41 = vld [vmem:[%s9467_s1 + $0x574] ss:$24 sps:$4 sm:$0xff]  }
   0xf   :  { %2393 = vmatpush1.bf16.msra.mxu0 %v6064_v14  ;;  %v6106_v42 = vld [vmem:[%s9467_s1 + $0x270] ss:$24 sps:$4 sm:$0xff]   ;;  %v6108_v44 = vld [vmem:[%s9467_s1 + $0x244] ss:$24 sps:$4 sm:$0xff]   ;;  %v37_v49 = vld [vmem:[%s9468_s0 + $0x58] sm:$0x1] }
  0x10   :  { %2436 = vmatpush1.bf16.msra.mxu1 %v6065_v15  ;;  %2394 = vmatprep.subr.bf16.mxu0 %v6066_v16  ;;  %v6107_v43 = vld [vmem:[%s9467_s1 + $0x570] ss:$24 sps:$4 sm:$0xff]   ;;  %v6110_v45 = vld [vmem:[%s9467_s1 + $0x544] ss:$24 sps:$4 sm:$0xff]   ;;  %v6112_v50 = vld [vmem:[%s9467_s1 + $0x240] ss:$24 sps:$4 sm:$0xff]  }
  0x11   :  { %2437 = vmatprep.subr.bf16.mxu1 %v6068_v17  ;;  %v27_v46 = vld [vmem:[%s9468_s0 + $0x8] sm:$0xff]  ;;  %v29_v48 = vld [vmem:[%s9468_s0 + $0x18] sm:$0xff]  ;;  %v26_v6 = vld [vmem:[%s9468_s0] sm:$0xff] }
  0x12   :  { %v35_v47 = vld [vmem:[%s9468_s0 + $0x48] sm:$0x1]  ;;  %v6113_v51 = vld [vmem:[%s9467_s1 + $0x540] ss:$24 sps:$4 sm:$0xff]   ;;  %v6114_v52 = vld [vmem:[%s9467_s1 + $0x214] ss:$24 sps:$4 sm:$0xff]   ;;  %v7300_v54 = vpack.c.bf16 %v37_v49, %v29_v48 }
  0x13   :  { %2395 = vmatpush1.bf16.msra.mxu0 %v6070_v18  ;;  %v7298_v53 = vpack.c.bf16 %v35_v47, %v27_v46  ;;  %v6116_v55 = vld [vmem:[%s9467_s1 + $0x514] ss:$24 sps:$4 sm:$0xff]   ;;  %v6118_v56 = vld [vmem:[%s9467_s1 + $0x210] ss:$24 sps:$4 sm:$0xff]   ;;  %v6120_v58 = vld [vmem:[%s9467_s1 + $0x1e4] ss:$24 sps:$4 sm:$0xff]  }
  0x14   :  { %2438 = vmatpush1.bf16.msra.mxu1 %v6071_v19  ;;  %2396 = vmatprep.subr.bf16.mxu0 %v6072_v20  ;;  %v6119_v57 = vld [vmem:[%s9467_s1 + $0x510] ss:$24 sps:$4 sm:$0xff]   ;;  %v6122_v59 = vld [vmem:[%s9467_s1 + $0x4e4] ss:$24 sps:$4 sm:$0xff]   ;;  %v6124_v60 = vld [vmem:[%s9467_s1 + $0x1e0] ss:$24 sps:$4 sm:$0xff]  }
  0x15   :  { %2439 = vmatprep.subr.bf16.mxu1 %v6074_v21  ;;  %2418 = vmatprep.mubr.bf16.mxu0 %v7298_v53  ;;  %v6125_v61 = vld [vmem:[%s9467_s1 + $0x4e0] ss:$24 sps:$4 sm:$0xff]   ;;  %v6126_v62 = vld [vmem:[%s9467_s1 + $0x1b4] ss:$24 sps:$4 sm:$0xff]   ;;  %v6130_v0 = vld [vmem:[%s9467_s1 + $0x1b0] ss:$24 sps:$4 sm:$0xff]  }
  0x16   :  { %2461 = vmatprep.mubr.bf16.mxu1 %v7300_v54  ;;  %v6128_v63 = vld [vmem:[%s9467_s1 + $0x4b4] ss:$24 sps:$4 sm:$0xff]   ;;  %v6131_v1 = vld [vmem:[%s9467_s1 + $0x4b0] ss:$24 sps:$4 sm:$0xff]   ;;  %v6132_v2 = vld [vmem:[%s9467_s1 + $0x184] ss:$24 sps:$4 sm:$0xff]  }
  0x17   :  { %2397 = vmatpush1.bf16.msra.mxu0 %v6076_v22  ;;  %v6134_v3 = vld [vmem:[%s9467_s1 + $0x484] ss:$24 sps:$4 sm:$0xff]   ;;  %v6136_v4 = vld [vmem:[%s9467_s1 + $0x180] ss:$24 sps:$4 sm:$0xff]   ;;  %v28_v8 = vld [vmem:[%s9468_s0 + $0x10] sm:$0xff] }
  0x18   :  { %2440 = vmatpush1.bf16.msra.mxu1 %v6077_v23  ;;  %2398 = vmatprep.subr.bf16.mxu0 %v6078_v24  ;;  %v6137_v5 = vld [vmem:[%s9467_s1 + $0x480] ss:$24 sps:$4 sm:$0xff]   ;;  %v36_v9 = vld [vmem:[%s9468_s0 + $0x50] sm:$0x1]  ;;  %v6140_v10 = vld [vmem:[%s9467_s1 + $0x754] ss:$24 sps:$4 sm:$0xff]  }
  0x19   :  { %2441 = vmatprep.subr.bf16.mxu1 %v6080_v25  ;;  %v34_v7 = vld [vmem:[%s9468_s0 + $0x40] sm:$0x1]  ;;  %v6143_v11 = vld [vmem:[%s9467_s1 + $0xa54] ss:$24 sps:$4 sm:$0xff]   ;;  %v7369_v13 = vpack.c.bf16 %v36_v9, %v28_v8  ;;  %v6138_v14 = vld [vmem:[%s9467_s1 + $0x750] ss:$24 sps:$4 sm:$0xff]  }
  0x1a   :  { %v7367_v12 = vpack.c.bf16 %v34_v7, %v26_v6  ;;  %v6141_v15 = vld [vmem:[%s9467_s1 + $0xa50] ss:$24 sps:$4 sm:$0xff]   ;;  %v6146_v16 = vld [vmem:[%s9467_s1 + $0x724] ss:$24 sps:$4 sm:$0xff]   ;;  %v6144_v18 = vld [vmem:[%s9467_s1 + $0x720] ss:$24 sps:$4 sm:$0xff]  }
  0x1b   :  { %2399 = vmatpush1.bf16.msra.mxu0 %v6082_v26  ;;  %v6149_v17 = vld [vmem:[%s9467_s1 + $0xa24] ss:$24 sps:$4 sm:$0xff]   ;;  %v6147_v19 = vld [vmem:[%s9467_s1 + $0xa20] ss:$24 sps:$4 sm:$0xff]   ;;  %v6152_v20 = vld [vmem:[%s9467_s1 + $0x6f4] ss:$24 sps:$4 sm:$0xff]  }
  0x1c   :  { %2442 = vmatpush1.bf16.msra.mxu1 %v6083_v27  ;;  %2400 = vmatprep.subr.bf16.mxu0 %v6084_v28  ;;  %v6155_v21 = vld [vmem:[%s9467_s1 + $0x9f4] ss:$24 sps:$4 sm:$0xff]   ;;  %v6150_v22 = vld [vmem:[%s9467_s1 + $0x6f0] ss:$24 sps:$4 sm:$0xff]   ;;  %v6158_v24 = vld [vmem:[%s9467_s1 + $0x6c4] ss:$24 sps:$4 sm:$0xff]  }
  0x1d   :  { %2443 = vmatprep.subr.bf16.mxu1 %v6086_v29  ;;  %v6153_v23 = vld [vmem:[%s9467_s1 + $0x9f0] ss:$24 sps:$4 sm:$0xff]   ;;  %v6161_v25 = vld [vmem:[%s9467_s1 + $0x9c4] ss:$24 sps:$4 sm:$0xff]   ;;  %v6156_v26 = vld [vmem:[%s9467_s1 + $0x6c0] ss:$24 sps:$4 sm:$0xff]  }
  0x1e   :  { %v6159_v27 = vld [vmem:[%s9467_s1 + $0x9c0] ss:$24 sps:$4 sm:$0xff]   ;;  %v6164_v28 = vld [vmem:[%s9467_s1 + $0x694] ss:$24 sps:$4 sm:$0xff]   ;;  %v6210_v6 = vld [vmem:[%s9467_s1 + $0x810] ss:$24 sps:$4 sm:$0xff]  }
  0x1f   :  { %2401 = vmatpush1.bf16.msra.mxu0 %v6088_v30  ;;  %v6167_v29 = vld [vmem:[%s9467_s1 + $0x994] ss:$24 sps:$4 sm:$0xff]   ;;  %v6162_v30 = vld [vmem:[%s9467_s1 + $0x690] ss:$24 sps:$4 sm:$0xff]   ;;  %v41_v46 = vld [vmem:[%s9468_s0 + $0x78] sm:$0x1] }
  0x20   :  { %2444 = vmatpush1.bf16.msra.mxu1 %v6089_v31  ;;  %2402 = vmatprep.subr.bf16.mxu0 %v6090_v32  ;;  %v6165_v31 = vld [vmem:[%s9467_s1 + $0x990] ss:$24 sps:$4 sm:$0xff]   ;;  %v6170_v32 = vld [vmem:[%s9467_s1 + $0x664] ss:$24 sps:$4 sm:$0xff]   ;;  %v6180_v48 = vld [vmem:[%s9467_s1 + $0x600] ss:$24 sps:$4 sm:$0xff]  }
  0x21   :  { %2445 = vmatprep.subr.bf16.mxu1 %v6092_v33  ;;  %v6173_v33 = vld [vmem:[%s9467_s1 + $0x964] ss:$24 sps:$4 sm:$0xff]   ;;  %v6183_v49 = vld [vmem:[%s9467_s1 + $0x900] ss:$24 sps:$4 sm:$0xff]   ;;  %v6213_v7 = vld [vmem:[%s9467_s1 + $0xb10] ss:$24 sps:$4 sm:$0xff]  }
  0x22   :  { %v6218_v8 = vld [vmem:[%s9467_s1 + $0x7e4] ss:$24 sps:$4 sm:$0xff]  }
  0x23   :  { %2403 = vmatpush2.bf16.msra.mxu0 %v6094_v34  ;;  %v6168_v34 = vld [vmem:[%s9467_s1 + $0x660] ss:$24 sps:$4 sm:$0xff]   ;;  %v6221_v9 = vld [vmem:[%s9467_s1 + $0xae4] ss:$24 sps:$4 sm:$0xff]  }
  0x24   :  { %2446 = vmatpush2.bf16.msra.mxu1 %v6095_v35  ;;  %2404 = vmatprep.subr.bf16.mxu0 %v6096_v36  ;;  %v6171_v35 = vld [vmem:[%s9467_s1 + $0x960] ss:$24 sps:$4 sm:$0xff]   ;;  %v6176_v36 = vld [vmem:[%s9467_s1 + $0x634] ss:$24 sps:$4 sm:$0xff]  }
  0x25   :  { %2447 = vmatprep.subr.bf16.mxu1 %v6098_v37  ;;  %v6179_v37 = vld [vmem:[%s9467_s1 + $0x934] ss:$24 sps:$4 sm:$0xff]  }
  0x27   :  { %2405 = vmatpush2.bf16.msra.mxu0 %v6100_v38  ;;  %v6174_v38 = vld [vmem:[%s9467_s1 + $0x630] ss:$24 sps:$4 sm:$0xff]  }
  0x28   :  { %2448 = vmatpush2.bf16.msra.mxu1 %v6101_v39  ;;  %2406 = vmatprep.subr.bf16.mxu0 %v6102_v40  ;;  %v6177_v39 = vld [vmem:[%s9467_s1 + $0x930] ss:$24 sps:$4 sm:$0xff]  }
  0x29   :  { %2449 = vmatprep.subr.bf16.mxu1 %v6104_v41  ;;  %v31_v40 = vld [vmem:[%s9468_s0 + $0x28] sm:$0xff] }
  0x2a   :  { %v39_v41 = vld [vmem:[%s9468_s0 + $0x68] sm:$0x1] }
  0x2b   :  { %2407 = vmatpush2.bf16.msra.mxu0 %v6106_v42  ;;  %v33_v42 = vld [vmem:[%s9468_s0 + $0x38] sm:$0xff] }
  0x2c   :  { %2450 = vmatpush2.bf16.msra.mxu1 %v6107_v43  ;;  %2408 = vmatprep.subr.bf16.mxu0 %v6108_v44  ;;  %v6182_v43 = vld [vmem:[%s9467_s1 + $0x604] ss:$24 sps:$4 sm:$0xff]   ;;  %v7471_v47 = vpack.c.bf16 %v41_v46, %v33_v42  ;;  %v6252_v42 = vld [vmem:[%s9467_s1 + $0xc8] ss:$24 sps:$4 sm:$0xff]  }
  0x2d   :  { %2451 = vmatprep.subr.bf16.mxu1 %v6110_v45  ;;  %v6185_v44 = vld [vmem:[%s9467_s1 + $0x904] ss:$24 sps:$4 sm:$0xff]   ;;  %v7466_v45 = vpack.c.bf16 %v39_v41, %v31_v40 }
  0x2e   :  { %v6254_v40 = vld [vmem:[%s9467_s1 + $0xcc] ss:$24 sps:$4 sm:$0xff]   ;;  %v6263_v46 = vld [vmem:[%s9467_s1 + $0x39c] ss:$24 sps:$4 sm:$0xff]  }
  0x2f   :  { %2409 = vmatpush2.bf16.msra.mxu0 %v6112_v50  ;;  %v6188_v50 = vld [vmem:[%s9467_s1 + $0x8d4] ss:$24 sps:$4 sm:$0xff]  }
  0x30   :  { %2452 = vmatpush2.bf16.msra.mxu1 %v6113_v51  ;;  %2410 = vmatprep.subr.bf16.mxu0 %v6114_v52  ;;  %v6191_v51 = vld [vmem:[%s9467_s1 + $0xbd4] ss:$24 sps:$4 sm:$0xff]   ;;  %v6186_v52 = vld [vmem:[%s9467_s1 + $0x8d0] ss:$24 sps:$4 sm:$0xff]  }
  0x31   :  { %2453 = vmatprep.subr.bf16.mxu1 %v6116_v55  ;;  %v6189_v55 = vld [vmem:[%s9467_s1 + $0xbd0] ss:$24 sps:$4 sm:$0xff]   ;;  %v6257_v41 = vld [vmem:[%s9467_s1 + $0x3cc] ss:$24 sps:$4 sm:$0xff]  }
  0x33   :  { %2411 = vmatpush2.bf16.msra.mxu0 %v6118_v56  ;;  %v6194_v56 = vld [vmem:[%s9467_s1 + $0x8a4] ss:$24 sps:$4 sm:$0xff]  }
  0x34   :  { %2454 = vmatpush2.bf16.msra.mxu1 %v6119_v57  ;;  %2412 = vmatprep.subr.bf16.mxu0 %v6120_v58  ;;  %v6197_v57 = vld [vmem:[%s9467_s1 + $0xba4] ss:$24 sps:$4 sm:$0xff]   ;;  %v6192_v58 = vld [vmem:[%s9467_s1 + $0x8a0] ss:$24 sps:$4 sm:$0xff]  }
  0x35   :  { %2455 = vmatprep.subr.bf16.mxu1 %v6122_v59  ;;  %v6195_v59 = vld [vmem:[%s9467_s1 + $0xba0] ss:$24 sps:$4 sm:$0xff]  }
  0x37   :  { %2413 = vmatpush2.bf16.msra.mxu0 %v6124_v60  ;;  %v6200_v60 = vld [vmem:[%s9467_s1 + $0x874] ss:$24 sps:$4 sm:$0xff]  }
  0x38   :  { %2456 = vmatpush2.bf16.msra.mxu1 %v6125_v61  ;;  %2414 = vmatprep.subr.bf16.mxu0 %v6126_v62  ;;  %v6203_v61 = vld [vmem:[%s9467_s1 + $0xb74] ss:$24 sps:$4 sm:$0xff]   ;;  %v6198_v62 = vld [vmem:[%s9467_s1 + $0x870] ss:$24 sps:$4 sm:$0xff]  }
  0x39   :  { %2457 = vmatprep.subr.bf16.mxu1 %v6128_v63  ;;  %v6201_v63 = vld [vmem:[%s9467_s1 + $0xb70] ss:$24 sps:$4 sm:$0xff]  }
  0x3b   :  { %2415 = vmatpush2.bf16.msra.mxu0 %v6130_v0  ;;  %v6206_v0 = vld [vmem:[%s9467_s1 + $0x844] ss:$24 sps:$4 sm:$0xff]  }
  0x3c   :  { %2458 = vmatpush2.bf16.msra.mxu1 %v6131_v1  ;;  %2416 = vmatprep.subr.bf16.mxu0 %v6132_v2  ;;  %v6209_v1 = vld [vmem:[%s9467_s1 + $0xb44] ss:$24 sps:$4 sm:$0xff]   ;;  %v6204_v2 = vld [vmem:[%s9467_s1 + $0x840] ss:$24 sps:$4 sm:$0xff]  }
  0x3d   :  { %2459 = vmatprep.subr.bf16.mxu1 %v6134_v3  ;;  %v6207_v3 = vld [vmem:[%s9467_s1 + $0xb40] ss:$24 sps:$4 sm:$0xff]  }
  0x3f   :  { %2417 = vmatpush2.bf16.msra.mxu0 %v6136_v4  ;;  %v6212_v4 = vld [vmem:[%s9467_s1 + $0x814] ss:$24 sps:$4 sm:$0xff]  }
  0x40   :  { %2460 = vmatpush2.bf16.msra.mxu1 %v6137_v5  ;;  %2472 = vmatprep.subr.bf16.mxu0 %v6140_v10  ;;  %v6215_v5 = vld [vmem:[%s9467_s1 + $0xb14] ss:$24 sps:$4 sm:$0xff]   ;;  %v6216_v10 = vld [vmem:[%s9467_s1 + $0x7e0] ss:$24 sps:$4 sm:$0xff]  }
  0x41   :  { %2515 = vmatprep.subr.bf16.mxu1 %v6143_v11  ;;  %v6219_v11 = vld [vmem:[%s9467_s1 + $0xae0] ss:$24 sps:$4 sm:$0xff]  }
  0x42   :  { %2419 = vmatmul.mubr.bf16.vlgmr.msra.gmra.mxu0 %v7367_v12 }
  0x43   :  { %2462 = vmatmul.mubr.bf16.vlgmr.msra.gmra.mxu1 %v7369_v13  ;;  %2473 = vmatpush1.bf16.msra.mxu0 %v6138_v14  ;;  %v6224_v14 = vld [vmem:[%s9467_s1 + $0x7b4] ss:$24 sps:$4 sm:$0xff]  }
  0x44   :  { %2516 = vmatpush1.bf16.msra.mxu1 %v6141_v15  ;;  %2474 = vmatprep.subr.bf16.mxu0 %v6146_v16  ;;  %v6227_v15 = vld [vmem:[%s9467_s1 + $0xab4] ss:$24 sps:$4 sm:$0xff]   ;;  %v6222_v16 = vld [vmem:[%s9467_s1 + $0x7b0] ss:$24 sps:$4 sm:$0xff]  }
  0x45   :  { %2517 = vmatprep.subr.bf16.mxu1 %v6149_v17  ;;  %2504 = vmatprep.mubr.bf16.mxu0 %v7466_v45  ;;  %v6225_v17 = vld [vmem:[%s9467_s1 + $0xab0] ss:$24 sps:$4 sm:$0xff]  }
  0x46   :  { %2547 = vmatprep.mubr.bf16.mxu1 %v7471_v47 }
  0x47   :  { %2475 = vmatpush1.bf16.msra.mxu0 %v6144_v18  ;;  %v6230_v18 = vld [vmem:[%s9467_s1 + $0x784] ss:$24 sps:$4 sm:$0xff]  }
  0x48   :  { %2518 = vmatpush1.bf16.msra.mxu1 %v6147_v19  ;;  %2476 = vmatprep.subr.bf16.mxu0 %v6152_v20  ;;  %v6233_v19 = vld [vmem:[%s9467_s1 + $0xa84] ss:$24 sps:$4 sm:$0xff]   ;;  %v6228_v20 = vld [vmem:[%s9467_s1 + $0x780] ss:$24 sps:$4 sm:$0xff]  }
  0x49   :  { %2519 = vmatprep.subr.bf16.mxu1 %v6155_v21  ;;  %v6231_v21 = vld [vmem:[%s9467_s1 + $0xa80] ss:$24 sps:$4 sm:$0xff]  }
  0x4b   :  { %2477 = vmatpush1.bf16.msra.mxu0 %v6150_v22  ;;  %v30_v22 = vld [vmem:[%s9468_s0 + $0x20] sm:$0xff] }
  0x4c   :  { %2520 = vmatpush1.bf16.msra.mxu1 %v6153_v23  ;;  %2478 = vmatprep.subr.bf16.mxu0 %v6158_v24  ;;  %v38_v23 = vld [vmem:[%s9468_s0 + $0x60] sm:$0x1]  ;;  %v32_v24 = vld [vmem:[%s9468_s0 + $0x30] sm:$0xff] }
  0x4d   :  { %2521 = vmatprep.subr.bf16.mxu1 %v6161_v25  ;;  %v40_v25 = vld [vmem:[%s9468_s0 + $0x70] sm:$0x1] }
  0x4f   :  { %2479 = vmatpush1.bf16.msra.mxu0 %v6156_v26  ;;  %v6236_v26 = vld [vmem:[%s9467_s1 + $0x15c] ss:$24 sps:$4 sm:$0xff]  }
  0x50   :  { %2522 = vmatpush1.bf16.msra.mxu1 %v6159_v27  ;;  %2480 = vmatprep.subr.bf16.mxu0 %v6164_v28  ;;  %v6239_v27 = vld [vmem:[%s9467_s1 + $0x45c] ss:$24 sps:$4 sm:$0xff]   ;;  %v7595_v28 = vpack.c.bf16 %v38_v23, %v30_v22  ;;  %v6314_v22 = vld [vmem:[%s9467_s1 + $0x1ec] ss:$24 sps:$4 sm:$0xff]  }
  0x51   :  { %2523 = vmatprep.subr.bf16.mxu1 %v6167_v29  ;;  %v7597_v29 = vpack.c.bf16 %v40_v25, %v32_v24  ;;  %v6317_v23 = vld [vmem:[%s9467_s1 + $0x4ec] ss:$24 sps:$4 sm:$0xff]   ;;  %v6312_v24 = vld [vmem:[%s9467_s1 + $0x1e8] ss:$24 sps:$4 sm:$0xff]  }
  0x52   :  { %v6315_v25 = vld [vmem:[%s9467_s1 + $0x4e8] ss:$24 sps:$4 sm:$0xff]  }
  0x53   :  { %2481 = vmatpush1.bf16.msra.mxu0 %v6162_v30  ;;  %v6234_v30 = vld [vmem:[%s9467_s1 + $0x158] ss:$24 sps:$4 sm:$0xff]  }
  0x54   :  { %2524 = vmatpush1.bf16.msra.mxu1 %v6165_v31  ;;  %2482 = vmatprep.subr.bf16.mxu0 %v6170_v32  ;;  %v6237_v31 = vld [vmem:[%s9467_s1 + $0x458] ss:$24 sps:$4 sm:$0xff]   ;;  %v6242_v32 = vld [vmem:[%s9467_s1 + $0x12c] ss:$24 sps:$4 sm:$0xff]  }
  0x55   :  { %2525 = vmatprep.subr.bf16.mxu1 %v6173_v33  ;;  %v6245_v33 = vld [vmem:[%s9467_s1 + $0x42c] ss:$24 sps:$4 sm:$0xff]  }
  0x57   :  { %2483 = vmatpush1.bf16.msra.mxu0 %v6168_v34  ;;  %v6240_v34 = vld [vmem:[%s9467_s1 + $0x128] ss:$24 sps:$4 sm:$0xff]  }
  0x58   :  { %2526 = vmatpush1.bf16.msra.mxu1 %v6171_v35  ;;  %2484 = vmatprep.subr.bf16.mxu0 %v6176_v36  ;;  %v6243_v35 = vld [vmem:[%s9467_s1 + $0x428] ss:$24 sps:$4 sm:$0xff]   ;;  %v6248_v36 = vld [vmem:[%s9467_s1 + $0xfc] ss:$24 sps:$4 sm:$0xff]  }
  0x59   :  { %2527 = vmatprep.subr.bf16.mxu1 %v6179_v37  ;;  %v6251_v37 = vld [vmem:[%s9467_s1 + $0x3fc] ss:$24 sps:$4 sm:$0xff]  }
  0x5b   :  { %2485 = vmatpush1.bf16.msra.mxu0 %v6174_v38  ;;  %v6246_v38 = vld [vmem:[%s9467_s1 + $0xf8] ss:$24 sps:$4 sm:$0xff]  }
  0x5c   :  { %2528 = vmatpush1.bf16.msra.mxu1 %v6177_v39  ;;  %2486 = vmatprep.subr.bf16.mxu0 %v6182_v43  ;;  %v6249_v39 = vld [vmem:[%s9467_s1 + $0x3f8] ss:$24 sps:$4 sm:$0xff]   ;;  %v6255_v43 = vld [vmem:[%s9467_s1 + $0x3c8] ss:$24 sps:$4 sm:$0xff]  }
  0x5d   :  { %2529 = vmatprep.subr.bf16.mxu1 %v6185_v44  ;;  %v6260_v44 = vld [vmem:[%s9467_s1 + $0x9c] ss:$24 sps:$4 sm:$0xff]  }
  0x5f   :  { %2487 = vmatpush1.bf16.msra.mxu0 %v6180_v48  ;;  %v6258_v48 = vld [vmem:[%s9467_s1 + $0x98] ss:$24 sps:$4 sm:$0xff]  }
  0x60   :  { %2530 = vmatpush1.bf16.msra.mxu1 %v6183_v49  ;;  %2488 = vmatprep.subr.bf16.mxu0 %v6188_v50  ;;  %v6261_v49 = vld [vmem:[%s9467_s1 + $0x398] ss:$24 sps:$4 sm:$0xff]   ;;  %v6266_v50 = vld [vmem:[%s9467_s1 + $0x6c] ss:$24 sps:$4 sm:$0xff]  }
  0x61   :  { %2531 = vmatprep.subr.bf16.mxu1 %v6191_v51  ;;  %v6269_v51 = vld [vmem:[%s9467_s1 + $0x36c] ss:$24 sps:$4 sm:$0xff]  }
  0x63   :  { %2489 = vmatpush2.bf16.msra.mxu0 %v6186_v52  ;;  %v6264_v52 = vld [vmem:[%s9467_s1 + $0x68] ss:$24 sps:$4 sm:$0xff]  }
  0x64   :  { %2532 = vmatpush2.bf16.msra.mxu1 %v6189_v55  ;;  %2490 = vmatprep.subr.bf16.mxu0 %v6194_v56  ;;  %v6267_v55 = vld [vmem:[%s9467_s1 + $0x368] ss:$24 sps:$4 sm:$0xff]   ;;  %v6272_v56 = vld [vmem:[%s9467_s1 + $0x3c] ss:$24 sps:$4 sm:$0xff]  }
  0x65   :  { %2533 = vmatprep.subr.bf16.mxu1 %v6197_v57  ;;  %v6275_v57 = vld [vmem:[%s9467_s1 + $0x33c] ss:$24 sps:$4 sm:$0xff]  }
  0x67   :  { %2491 = vmatpush2.bf16.msra.mxu0 %v6192_v58  ;;  %v6270_v58 = vld [vmem:[%s9467_s1 + $0x38] ss:$24 sps:$4 sm:$0xff]  }
  0x68   :  { %2534 = vmatpush2.bf16.msra.mxu1 %v6195_v59  ;;  %2492 = vmatprep.subr.bf16.mxu0 %v6200_v60  ;;  %v6273_v59 = vld [vmem:[%s9467_s1 + $0x338] ss:$24 sps:$4 sm:$0xff]   ;;  %v6278_v60 = vld [vmem:[%s9467_s1 + $0xc] ss:$24 sps:$4 sm:$0xff]  }
  0x69   :  { %2535 = vmatprep.subr.bf16.mxu1 %v6203_v61  ;;  %v6281_v61 = vld [vmem:[%s9467_s1 + $0x30c] ss:$24 sps:$4 sm:$0xff]  }
  0x6b   :  { %2493 = vmatpush2.bf16.msra.mxu0 %v6198_v62  ;;  %v6276_v62 = vld [vmem:[%s9467_s1 + $0x8] ss:$24 sps:$4 sm:$0xff]  }
  0x6c   :  { %2536 = vmatpush2.bf16.msra.mxu1 %v6201_v63  ;;  %2494 = vmatprep.subr.bf16.mxu0 %v6206_v0  ;;  %v6279_v63 = vld [vmem:[%s9467_s1 + $0x308] ss:$24 sps:$4 sm:$0xff]   ;;  %v6284_v0 = vld [vmem:[%s9467_s1 + $0x2dc] ss:$24 sps:$4 sm:$0xff]  }
  0x6d   :  { %2537 = vmatprep.subr.bf16.mxu1 %v6209_v1  ;;  %v6287_v1 = vld [vmem:[%s9467_s1 + $0x5dc] ss:$24 sps:$4 sm:$0xff]  }
  0x6f   :  { %2495 = vmatpush2.bf16.msra.mxu0 %v6204_v2  ;;  %v6282_v2 = vld [vmem:[%s9467_s1 + $0x2d8] ss:$24 sps:$4 sm:$0xff]  }
  0x70   :  { %2538 = vmatpush2.bf16.msra.mxu1 %v6207_v3  ;;  %2496 = vmatprep.subr.bf16.mxu0 %v6212_v4  ;;  %v6285_v3 = vld [vmem:[%s9467_s1 + $0x5d8] ss:$24 sps:$4 sm:$0xff]   ;;  %v6290_v4 = vld [vmem:[%s9467_s1 + $0x2ac] ss:$24 sps:$4 sm:$0xff]  }
  0x71   :  { %2539 = vmatprep.subr.bf16.mxu1 %v6215_v5  ;;  %v6293_v5 = vld [vmem:[%s9467_s1 + $0x5ac] ss:$24 sps:$4 sm:$0xff]  }
  0x73   :  { %2497 = vmatpush2.bf16.msra.mxu0 %v6210_v6  ;;  %v6288_v6 = vld [vmem:[%s9467_s1 + $0x2a8] ss:$24 sps:$4 sm:$0xff]  }
  0x74   :  { %2540 = vmatpush2.bf16.msra.mxu1 %v6213_v7  ;;  %2498 = vmatprep.subr.bf16.mxu0 %v6218_v8  ;;  %v6291_v7 = vld [vmem:[%s9467_s1 + $0x5a8] ss:$24 sps:$4 sm:$0xff]   ;;  %v6296_v8 = vld [vmem:[%s9467_s1 + $0x27c] ss:$24 sps:$4 sm:$0xff]  }
  0x75   :  { %2541 = vmatprep.subr.bf16.mxu1 %v6221_v9  ;;  %v6299_v9 = vld [vmem:[%s9467_s1 + $0x57c] ss:$24 sps:$4 sm:$0xff]  }
  0x77   :  { %2499 = vmatpush2.bf16.msra.mxu0 %v6216_v10  ;;  %v6294_v10 = vld [vmem:[%s9467_s1 + $0x278] ss:$24 sps:$4 sm:$0xff]  }
  0x78   :  { %2542 = vmatpush2.bf16.msra.mxu1 %v6219_v11  ;;  %2500 = vmatprep.subr.bf16.mxu0 %v6224_v14  ;;  %v6297_v11 = vld [vmem:[%s9467_s1 + $0x578] ss:$24 sps:$4 sm:$0xff]   ;;  %v6302_v14 = vld [vmem:[%s9467_s1 + $0x24c] ss:$24 sps:$4 sm:$0xff]  }
  0x79   :  { %2543 = vmatprep.subr.bf16.mxu1 %v6227_v15  ;;  %v6305_v15 = vld [vmem:[%s9467_s1 + $0x54c] ss:$24 sps:$4 sm:$0xff]  }
  0x7b   :  { %2501 = vmatpush2.bf16.msra.mxu0 %v6222_v16  ;;  %v6300_v16 = vld [vmem:[%s9467_s1 + $0x248] ss:$24 sps:$4 sm:$0xff]  }
  0x7c   :  { %2544 = vmatpush2.bf16.msra.mxu1 %v6225_v17  ;;  %2502 = vmatprep.subr.bf16.mxu0 %v6230_v18  ;;  %v6303_v17 = vld [vmem:[%s9467_s1 + $0x548] ss:$24 sps:$4 sm:$0xff]   ;;  %v6308_v18 = vld [vmem:[%s9467_s1 + $0x21c] ss:$24 sps:$4 sm:$0xff]  }
  0x7d   :  { %2545 = vmatprep.subr.bf16.mxu1 %v6233_v19  ;;  %v6311_v19 = vld [vmem:[%s9467_s1 + $0x51c] ss:$24 sps:$4 sm:$0xff]  }
  0x7f   :  { %2503 = vmatpush2.bf16.msra.mxu0 %v6228_v20  ;;  %v6306_v20 = vld [vmem:[%s9467_s1 + $0x218] ss:$24 sps:$4 sm:$0xff]  }
  0x80   :  { %2546 = vmatpush2.bf16.msra.mxu1 %v6231_v21  ;;  %2558 = vmatprep.subr.bf16.mxu0 %v6236_v26  ;;  %v6309_v21 = vld [vmem:[%s9467_s1 + $0x518] ss:$24 sps:$4 sm:$0xff]   ;;  %v6320_v26 = vld [vmem:[%s9467_s1 + $0x1bc] ss:$24 sps:$4 sm:$0xff]  }
  0x81   :  { %2601 = vmatprep.subr.bf16.mxu1 %v6239_v27  ;;  %v6323_v27 = vld [vmem:[%s9467_s1 + $0x4bc] ss:$24 sps:$4 sm:$0xff]  }
  0x82   :  { %2505 = vmatmul.mubr.bf16.vlgmr.msra.gmra.mxu0 %v7595_v28 }
  0x83   :  { %2548 = vmatmul.mubr.bf16.vlgmr.msra.gmra.mxu1 %v7597_v29  ;;  %2559 = vmatpush1.bf16.msra.mxu0 %v6234_v30  ;;  %v6318_v30 = vld [vmem:[%s9467_s1 + $0x1b8] ss:$24 sps:$4 sm:$0xff]  }
  0x84   :  { %2602 = vmatpush1.bf16.msra.mxu1 %v6237_v31  ;;  %2560 = vmatprep.subr.bf16.mxu0 %v6242_v32  ;;  %v6321_v31 = vld [vmem:[%s9467_s1 + $0x4b8] ss:$24 sps:$4 sm:$0xff]   ;;  %v6326_v32 = vld [vmem:[%s9467_s1 + $0x18c] ss:$24 sps:$4 sm:$0xff]  }
  0x85   :  { %2603 = vmatprep.subr.bf16.mxu1 %v6245_v33  ;;  %2590 = vmatprep.mubr.bf16.mxu0 %v7298_v53  ;;  %v6329_v33 = vld [vmem:[%s9467_s1 + $0x48c] ss:$24 sps:$4 sm:$0xff]  }
  0x86   :  { %2633 = vmatprep.mubr.bf16.mxu1 %v7300_v54 }
  0x87   :  { %2561 = vmatpush1.bf16.msra.mxu0 %v6240_v34  ;;  %v6324_v34 = vld [vmem:[%s9467_s1 + $0x188] ss:$24 sps:$4 sm:$0xff]  }
  0x88   :  { %2604 = vmatpush1.bf16.msra.mxu1 %v6243_v35  ;;  %2562 = vmatprep.subr.bf16.mxu0 %v6248_v36  ;;  %v6327_v35 = vld [vmem:[%s9467_s1 + $0x488] ss:$24 sps:$4 sm:$0xff]   ;;  %v6332_v36 = vld [vmem:[%s9467_s1 + $0x75c] ss:$24 sps:$4 sm:$0xff]  }
  0x89   :  { %2605 = vmatprep.subr.bf16.mxu1 %v6251_v37  ;;  %v6335_v37 = vld [vmem:[%s9467_s1 + $0xa5c] ss:$24 sps:$4 sm:$0xff]  }
  0x8b   :  { %2563 = vmatpush1.bf16.msra.mxu0 %v6246_v38  ;;  %v6330_v38 = vld [vmem:[%s9467_s1 + $0x758] ss:$24 sps:$4 sm:$0xff]  }
  0x8c   :  { %2606 = vmatpush1.bf16.msra.mxu1 %v6249_v39  ;;  %2564 = vmatprep.subr.bf16.mxu0 %v6254_v40  ;;  %v6333_v39 = vld [vmem:[%s9467_s1 + $0xa58] ss:$24 sps:$4 sm:$0xff]   ;;  %v6338_v40 = vld [vmem:[%s9467_s1 + $0x72c] ss:$24 sps:$4 sm:$0xff]  }
  0x8d   :  { %2607 = vmatprep.subr.bf16.mxu1 %v6257_v41  ;;  %v6341_v41 = vld [vmem:[%s9467_s1 + $0xa2c] ss:$24 sps:$4 sm:$0xff]  }
  0x8f   :  { %2565 = vmatpush1.bf16.msra.mxu0 %v6252_v42  ;;  %v6336_v42 = vld [vmem:[%s9467_s1 + $0x728] ss:$24 sps:$4 sm:$0xff]  }
  0x90   :  { %2608 = vmatpush1.bf16.msra.mxu1 %v6255_v43  ;;  %2566 = vmatprep.subr.bf16.mxu0 %v6260_v44  ;;  %v6339_v43 = vld [vmem:[%s9467_s1 + $0xa28] ss:$24 sps:$4 sm:$0xff]   ;;  %v6344_v44 = vld [vmem:[%s9467_s1 + $0x6fc] ss:$24 sps:$4 sm:$0xff]  }
  0x91   :  { %2609 = vmatprep.subr.bf16.mxu1 %v6263_v46  ;;  %v6347_v46 = vld [vmem:[%s9467_s1 + $0x9fc] ss:$24 sps:$4 sm:$0xff]  }
  0x93   :  { %2567 = vmatpush1.bf16.msra.mxu0 %v6258_v48  ;;  %v6342_v48 = vld [vmem:[%s9467_s1 + $0x6f8] ss:$24 sps:$4 sm:$0xff]  }
  0x94   :  { %2610 = vmatpush1.bf16.msra.mxu1 %v6261_v49  ;;  %2568 = vmatprep.subr.bf16.mxu0 %v6266_v50  ;;  %v6345_v49 = vld [vmem:[%s9467_s1 + $0x9f8] ss:$24 sps:$4 sm:$0xff]   ;;  %v6350_v50 = vld [vmem:[%s9467_s1 + $0x6cc] ss:$24 sps:$4 sm:$0xff]  }
  0x95   :  { %2611 = vmatprep.subr.bf16.mxu1 %v6269_v51  ;;  %v6353_v51 = vld [vmem:[%s9467_s1 + $0x9cc] ss:$24 sps:$4 sm:$0xff]  }
  0x97   :  { %2569 = vmatpush1.bf16.msra.mxu0 %v6264_v52  ;;  %v6348_v52 = vld [vmem:[%s9467_s1 + $0x6c8] ss:$24 sps:$4 sm:$0xff]  }
  0x98   :  { %2612 = vmatpush1.bf16.msra.mxu1 %v6267_v55  ;;  %2570 = vmatprep.subr.bf16.mxu0 %v6272_v56  ;;  %v6351_v55 = vld [vmem:[%s9467_s1 + $0x9c8] ss:$24 sps:$4 sm:$0xff]   ;;  %v6356_v56 = vld [vmem:[%s9467_s1 + $0x69c] ss:$24 sps:$4 sm:$0xff]  }
  0x99   :  { %2613 = vmatprep.subr.bf16.mxu1 %v6275_v57  ;;  %v6359_v57 = vld [vmem:[%s9467_s1 + $0x99c] ss:$24 sps:$4 sm:$0xff]  }
  0x9b   :  { %2571 = vmatpush1.bf16.msra.mxu0 %v6270_v58  ;;  %v6354_v58 = vld [vmem:[%s9467_s1 + $0x698] ss:$24 sps:$4 sm:$0xff]  }
  0x9c   :  { %2614 = vmatpush1.bf16.msra.mxu1 %v6273_v59  ;;  %2572 = vmatprep.subr.bf16.mxu0 %v6278_v60  ;;  %v6357_v59 = vld [vmem:[%s9467_s1 + $0x998] ss:$24 sps:$4 sm:$0xff]   ;;  %v6362_v60 = vld [vmem:[%s9467_s1 + $0x66c] ss:$24 sps:$4 sm:$0xff]  }
  0x9d   :  { %2615 = vmatprep.subr.bf16.mxu1 %v6281_v61  ;;  %v6365_v61 = vld [vmem:[%s9467_s1 + $0x96c] ss:$24 sps:$4 sm:$0xff]  }
  0x9f   :  { %2573 = vmatpush1.bf16.msra.mxu0 %v6276_v62  ;;  %v6360_v62 = vld [vmem:[%s9467_s1 + $0x668] ss:$24 sps:$4 sm:$0xff]  }
  0xa0   :  { %2616 = vmatpush1.bf16.msra.mxu1 %v6279_v63  ;;  %2574 = vmatprep.subr.bf16.mxu0 %v6284_v0  ;;  %v6363_v63 = vld [vmem:[%s9467_s1 + $0x968] ss:$24 sps:$4 sm:$0xff]   ;;  %v6368_v0 = vld [vmem:[%s9467_s1 + $0x63c] ss:$24 sps:$4 sm:$0xff]  }
  0xa1   :  { %2617 = vmatprep.subr.bf16.mxu1 %v6287_v1  ;;  %v6371_v1 = vld [vmem:[%s9467_s1 + $0x93c] ss:$24 sps:$4 sm:$0xff]  }
  0xa3   :  { %2575 = vmatpush2.bf16.msra.mxu0 %v6282_v2  ;;  %v6366_v2 = vld [vmem:[%s9467_s1 + $0x638] ss:$24 sps:$4 sm:$0xff]  }
  0xa4   :  { %2618 = vmatpush2.bf16.msra.mxu1 %v6285_v3  ;;  %2576 = vmatprep.subr.bf16.mxu0 %v6290_v4  ;;  %v6369_v3 = vld [vmem:[%s9467_s1 + $0x938] ss:$24 sps:$4 sm:$0xff]   ;;  %v6374_v4 = vld [vmem:[%s9467_s1 + $0x60c] ss:$24 sps:$4 sm:$0xff]  }
  0xa5   :  { %2619 = vmatprep.subr.bf16.mxu1 %v6293_v5  ;;  %v6377_v5 = vld [vmem:[%s9467_s1 + $0x90c] ss:$24 sps:$4 sm:$0xff]  }
  0xa7   :  { %2577 = vmatpush2.bf16.msra.mxu0 %v6288_v6  ;;  %v6372_v6 = vld [vmem:[%s9467_s1 + $0x608] ss:$24 sps:$4 sm:$0xff]  }
  0xa8   :  { %2620 = vmatpush2.bf16.msra.mxu1 %v6291_v7  ;;  %2578 = vmatprep.subr.bf16.mxu0 %v6296_v8  ;;  %v6375_v7 = vld [vmem:[%s9467_s1 + $0x908] ss:$24 sps:$4 sm:$0xff]   ;;  %v6380_v8 = vld [vmem:[%s9467_s1 + $0x8dc] ss:$24 sps:$4 sm:$0xff]  }
  0xa9   :  { %2621 = vmatprep.subr.bf16.mxu1 %v6299_v9  ;;  %v6383_v9 = vld [vmem:[%s9467_s1 + $0xbdc] ss:$24 sps:$4 sm:$0xff]  }
  0xab   :  { %2579 = vmatpush2.bf16.msra.mxu0 %v6294_v10  ;;  %v6378_v10 = vld [vmem:[%s9467_s1 + $0x8d8] ss:$24 sps:$4 sm:$0xff]  }
  0xac   :  { %2622 = vmatpush2.bf16.msra.mxu1 %v6297_v11  ;;  %2580 = vmatprep.subr.bf16.mxu0 %v6302_v14  ;;  %v6381_v11 = vld [vmem:[%s9467_s1 + $0xbd8] ss:$24 sps:$4 sm:$0xff]   ;;  %v6386_v14 = vld [vmem:[%s9467_s1 + $0x8ac] ss:$24 sps:$4 sm:$0xff]  }
  0xad   :  { %2623 = vmatprep.subr.bf16.mxu1 %v6305_v15  ;;  %v6389_v15 = vld [vmem:[%s9467_s1 + $0xbac] ss:$24 sps:$4 sm:$0xff]  }
  0xaf   :  { %2581 = vmatpush2.bf16.msra.mxu0 %v6300_v16  ;;  %v6384_v16 = vld [vmem:[%s9467_s1 + $0x8a8] ss:$24 sps:$4 sm:$0xff]  }
  0xb0   :  { %2624 = vmatpush2.bf16.msra.mxu1 %v6303_v17  ;;  %2582 = vmatprep.subr.bf16.mxu0 %v6308_v18  ;;  %v6387_v17 = vld [vmem:[%s9467_s1 + $0xba8] ss:$24 sps:$4 sm:$0xff]   ;;  %v6392_v18 = vld [vmem:[%s9467_s1 + $0x87c] ss:$24 sps:$4 sm:$0xff]  }
  0xb1   :  { %2625 = vmatprep.subr.bf16.mxu1 %v6311_v19  ;;  %v6395_v19 = vld [vmem:[%s9467_s1 + $0xb7c] ss:$24 sps:$4 sm:$0xff]  }
  0xb3   :  { %2583 = vmatpush2.bf16.msra.mxu0 %v6306_v20  ;;  %v6390_v20 = vld [vmem:[%s9467_s1 + $0x878] ss:$24 sps:$4 sm:$0xff]  }
  0xb4   :  { %2626 = vmatpush2.bf16.msra.mxu1 %v6309_v21  ;;  %2584 = vmatprep.subr.bf16.mxu0 %v6314_v22  ;;  %v6393_v21 = vld [vmem:[%s9467_s1 + $0xb78] ss:$24 sps:$4 sm:$0xff]   ;;  %v6398_v22 = vld [vmem:[%s9467_s1 + $0x84c] ss:$24 sps:$4 sm:$0xff]  }
  0xb5   :  { %2627 = vmatprep.subr.bf16.mxu1 %v6317_v23  ;;  %v6401_v23 = vld [vmem:[%s9467_s1 + $0xb4c] ss:$24 sps:$4 sm:$0xff]  }
  0xb7   :  { %2585 = vmatpush2.bf16.msra.mxu0 %v6312_v24  ;;  %v6396_v24 = vld [vmem:[%s9467_s1 + $0x848] ss:$24 sps:$4 sm:$0xff]  }
  0xb8   :  { %2628 = vmatpush2.bf16.msra.mxu1 %v6315_v25  ;;  %2586 = vmatprep.subr.bf16.mxu0 %v6320_v26  ;;  %v6399_v25 = vld [vmem:[%s9467_s1 + $0xb48] ss:$24 sps:$4 sm:$0xff]   ;;  %v6404_v26 = vld [vmem:[%s9467_s1 + $0x81c] ss:$24 sps:$4 sm:$0xff]  }
  0xb9   :  { %2629 = vmatprep.subr.bf16.mxu1 %v6323_v27  ;;  %v6407_v27 = vld [vmem:[%s9467_s1 + $0xb1c] ss:$24 sps:$4 sm:$0xff]  }
  0xbb   :  { %2587 = vmatpush2.bf16.msra.mxu0 %v6318_v30  ;;  %v6402_v30 = vld [vmem:[%s9467_s1 + $0x818] ss:$24 sps:$4 sm:$0xff]  }
  0xbc   :  { %2630 = vmatpush2.bf16.msra.mxu1 %v6321_v31  ;;  %2588 = vmatprep.subr.bf16.mxu0 %v6326_v32  ;;  %v6405_v31 = vld [vmem:[%s9467_s1 + $0xb18] ss:$24 sps:$4 sm:$0xff]   ;;  %v6410_v32 = vld [vmem:[%s9467_s1 + $0x7ec] ss:$24 sps:$4 sm:$0xff]  }
  0xbd   :  { %2631 = vmatprep.subr.bf16.mxu1 %v6329_v33  ;;  %v6413_v33 = vld [vmem:[%s9467_s1 + $0xaec] ss:$24 sps:$4 sm:$0xff]  }
  0xbf   :  { %2589 = vmatpush2.bf16.msra.mxu0 %v6324_v34  ;;  %v6408_v34 = vld [vmem:[%s9467_s1 + $0x7e8] ss:$24 sps:$4 sm:$0xff]  }
  0xc0   :  { %2632 = vmatpush2.bf16.msra.mxu1 %v6327_v35  ;;  %2644 = vmatprep.subr.bf16.mxu0 %v6332_v36  ;;  %v6411_v35 = vld [vmem:[%s9467_s1 + $0xae8] ss:$24 sps:$4 sm:$0xff]   ;;  %v436_v36 = vlaneseq }
  0xc1   :  { %2687 = vmatprep.subr.bf16.mxu1 %v6335_v37  ;;  %v6416_v37 = vld [vmem:[%s9467_s1 + $0x7bc] ss:$24 sps:$4 sm:$0xff]  }
  0xc2   :  { %2591 = vmatmul.mubr.bf16.vlgmr.msra.gmra.mxu0 %v7367_v12 }
  0xc3   :  { %2634 = vmatmul.mubr.bf16.vlgmr.msra.gmra.mxu1 %v7369_v13  ;;  %2645 = vmatpush1.bf16.msra.mxu0 %v6330_v38  ;;  %v6419_v38 = vld [vmem:[%s9467_s1 + $0xabc] ss:$24 sps:$4 sm:$0xff]  }
  0xc4   :  { %2688 = vmatpush1.bf16.msra.mxu1 %v6333_v39  ;;  %2646 = vmatprep.subr.bf16.mxu0 %v6338_v40  ;;  %v6414_v39 = vld [vmem:[%s9467_s1 + $0x7b8] ss:$24 sps:$4 sm:$0xff]  }
  0xc5   :  { %2689 = vmatprep.subr.bf16.mxu1 %v6341_v41  ;;  %2676 = vmatprep.mubr.bf16.mxu0 %v7466_v45  ;;  %v6417_v40 = vld [vmem:[%s9467_s1 + $0xab8] ss:$24 sps:$4 sm:$0xff]   ;;  %v7973_v41 = vshrl.u32 %v436_v36, 7 }
  0xc6   :  { %2719 = vmatprep.mubr.bf16.mxu1 %v7471_v47  ;;  %v6477_v36 = vld [vmem:[%s9467_s1 + $0x5e0] ss:$24 sps:$4 sm:$0xff]  }
  0xc7   :  { %2647 = vmatpush1.bf16.msra.mxu0 %v6336_v42  ;;  %v6422_v42 = vld [vmem:[%s9467_s1 + $0x78c] ss:$24 sps:$4 sm:$0xff]  }
  0xc8   :  { %2690 = vmatpush1.bf16.msra.mxu1 %v6339_v43  ;;  %2648 = vmatprep.subr.bf16.mxu0 %v6344_v44  ;;  %v6425_v43 = vld [vmem:[%s9467_s1 + $0xa8c] ss:$24 sps:$4 sm:$0xff]   ;;  %v6420_v44 = vld [vmem:[%s9467_s1 + $0x788] ss:$24 sps:$4 sm:$0xff]  }
  0xc9   :  { %2691 = vmatprep.subr.bf16.mxu1 %v6347_v46  ;;  %v6423_v46 = vld [vmem:[%s9467_s1 + $0xa88] ss:$24 sps:$4 sm:$0xff]  }
  0xcb   :  { %2649 = vmatpush1.bf16.msra.mxu0 %v6342_v48  ;;  %v7990_v48 = vld [vmem:[%s9469_s2] sm:$0x3f] }
  0xcc   :  { %2692 = vmatpush1.bf16.msra.mxu1 %v6345_v49  ;;  %2650 = vmatprep.subr.bf16.mxu0 %v6350_v50  ;;  %v7993_v49 = vsub.s32 0, %v7973_v41  ;;  %v6428_v50 = vld [vmem:[%s9467_s1 + $0x164] ss:$24 sps:$4 sm:$0xff]  }
  0xcd   :  { %2693 = vmatprep.subr.bf16.mxu1 %v6353_v51  ;;  %v6431_v51 = vld [vmem:[%s9467_s1 + $0x464] ss:$24 sps:$4 sm:$0xff]  }
  0xcf   :  { %2651 = vmatpush1.bf16.msra.mxu0 %v6348_v52  ;;  %v6426_v52 = vld [vmem:[%s9467_s1 + $0x160] ss:$24 sps:$4 sm:$0xff]  }
  0xd0   :  { %2694 = vmatpush1.bf16.msra.mxu1 %v6351_v55  ;;  %2652 = vmatprep.subr.bf16.mxu0 %v6356_v56  ;;  %v439_v55 = vrot.slane %v7990_v48, %v7993_v49  ;;  %v6429_v56 = vld [vmem:[%s9467_s1 + $0x460] ss:$24 sps:$4 sm:$0xff]  }
  0xd1   :  { %2695 = vmatprep.subr.bf16.mxu1 %v6359_v57  ;;  %v6434_v57 = vld [vmem:[%s9467_s1 + $0x134] ss:$24 sps:$4 sm:$0xff]  }
  0xd3   :  { %2653 = vmatpush1.bf16.msra.mxu0 %v6354_v58  ;;  %v6437_v58 = vld [vmem:[%s9467_s1 + $0x434] ss:$24 sps:$4 sm:$0xff]  }
  0xd4   :  { %2696 = vmatpush1.bf16.msra.mxu1 %v6357_v59  ;;  %2654 = vmatprep.subr.bf16.mxu0 %v6362_v60 }
  0xd5   :  { %2697 = vmatprep.subr.bf16.mxu1 %v6365_v61  ;;  %v6432_v61 = vld [vmem:[%s9467_s1 + $0x130] ss:$24 sps:$4 sm:$0xff]  }
  0xd7   :  { %2655 = vmatpush1.bf16.msra.mxu0 %v6360_v62 }
  0xd8   :  { %2698 = vmatpush1.bf16.msra.mxu1 %v6363_v63  ;;  %2656 = vmatprep.subr.bf16.mxu0 %v6368_v0  ;;  %v6435_v63 = vld [vmem:[%s9467_s1 + $0x430] ss:$24 sps:$4 sm:$0xff]  }
  0xd9   :  { %2699 = vmatprep.subr.bf16.mxu1 %v6371_v1 }
  0xdb   :  { %2657 = vmatpush1.bf16.msra.mxu0 %v6366_v2  ;;  %v6440_v2 = vld [vmem:[%s9467_s1 + $0x104] ss:$24 sps:$4 sm:$0xff]  }
  0xdc   :  { %2700 = vmatpush1.bf16.msra.mxu1 %v6369_v3  ;;  %2658 = vmatprep.subr.bf16.mxu0 %v6374_v4  ;;  %v6443_v3 = vld [vmem:[%s9467_s1 + $0x404] ss:$24 sps:$4 sm:$0xff]  }
  0xdd   :  { %2701 = vmatprep.subr.bf16.mxu1 %v6377_v5  ;;  %v6438_v5 = vld [vmem:[%s9467_s1 + $0x100] ss:$24 sps:$4 sm:$0xff]  }
  0xdf   :  { %2659 = vmatpush1.bf16.msra.mxu0 %v6372_v6 }
  0xe0   :  { %2702 = vmatpush1.bf16.msra.mxu1 %v6375_v7  ;;  %2660 = vmatprep.subr.bf16.mxu0 %v6380_v8  ;;  %v6441_v7 = vld [vmem:[%s9467_s1 + $0x400] ss:$24 sps:$4 sm:$0xff]  }
  0xe1   :  { %2703 = vmatprep.subr.bf16.mxu1 %v6383_v9  ;;  %v6446_v9 = vld [vmem:[%s9467_s1 + $0xd4] ss:$24 sps:$4 sm:$0xff]  }
  0xe3   :  { %2661 = vmatpush2.bf16.msra.mxu0 %v6378_v10 }
  0xe4   :  { %2704 = vmatpush2.bf16.msra.mxu1 %v6381_v11  ;;  %2662 = vmatprep.subr.bf16.mxu0 %v6386_v14  ;;  %v6444_v11 = vld [vmem:[%s9467_s1 + $0xd0] ss:$24 sps:$4 sm:$0xff]  }
  0xe5   :  { %2705 = vmatprep.subr.bf16.mxu1 %v6389_v15  ;;  %v6447_v14 = vld [vmem:[%s9467_s1 + $0x3d0] ss:$24 sps:$4 sm:$0xff]   ;;  %v6452_v15 = vld [vmem:[%s9467_s1 + $0xa4] ss:$24 sps:$4 sm:$0xff]  }
  0xe7   :  { %2663 = vmatpush2.bf16.msra.mxu0 %v6384_v16  ;;  %v6455_v16 = vld [vmem:[%s9467_s1 + $0x3a4] ss:$24 sps:$4 sm:$0xff]  }
  0xe8   :  { %2706 = vmatpush2.bf16.msra.mxu1 %v6387_v17  ;;  %2664 = vmatprep.subr.bf16.mxu0 %v6392_v18  ;;  %v6450_v17 = vld [vmem:[%s9467_s1 + $0xa0] ss:$24 sps:$4 sm:$0xff]  }
  0xe9   :  { %2707 = vmatprep.subr.bf16.mxu1 %v6395_v19  ;;  %v6453_v18 = vld [vmem:[%s9467_s1 + $0x3a0] ss:$24 sps:$4 sm:$0xff]   ;;  %v6458_v19 = vld [vmem:[%s9467_s1 + $0x74] ss:$24 sps:$4 sm:$0xff]  }
  0xeb   :  { %2665 = vmatpush2.bf16.msra.mxu0 %v6390_v20  ;;  %v6461_v20 = vld [vmem:[%s9467_s1 + $0x374] ss:$24 sps:$4 sm:$0xff]  }
  0xec   :  { %2708 = vmatpush2.bf16.msra.mxu1 %v6393_v21  ;;  %2666 = vmatprep.subr.bf16.mxu0 %v6398_v22  ;;  %v6456_v21 = vld [vmem:[%s9467_s1 + $0x70] ss:$24 sps:$4 sm:$0xff]  }
  0xed   :  { %2709 = vmatprep.subr.bf16.mxu1 %v6401_v23  ;;  %v6459_v22 = vld [vmem:[%s9467_s1 + $0x370] ss:$24 sps:$4 sm:$0xff]   ;;  %v6464_v23 = vld [vmem:[%s9467_s1 + $0x44] ss:$24 sps:$4 sm:$0xff]  }
  0xef   :  { %2667 = vmatpush2.bf16.msra.mxu0 %v6396_v24  ;;  %v6467_v24 = vld [vmem:[%s9467_s1 + $0x344] ss:$24 sps:$4 sm:$0xff]  }
  0xf0   :  { %2710 = vmatpush2.bf16.msra.mxu1 %v6399_v25  ;;  %2668 = vmatprep.subr.bf16.mxu0 %v6404_v26  ;;  %v6462_v25 = vld [vmem:[%s9467_s1 + $0x40] ss:$24 sps:$4 sm:$0xff]  }
  0xf1   :  { %2711 = vmatprep.subr.bf16.mxu1 %v6407_v27  ;;  %v6465_v26 = vld [vmem:[%s9467_s1 + $0x340] ss:$24 sps:$4 sm:$0xff]   ;;  %v6470_v27 = vld [vmem:[%s9467_s1 + $0x14] ss:$24 sps:$4 sm:$0xff]  }
  0xf3   :  { %2669 = vmatpush2.bf16.msra.mxu0 %v6402_v30  ;;  %v6473_v30 = vld [vmem:[%s9467_s1 + $0x314] ss:$24 sps:$4 sm:$0xff]  }
  0xf4   :  { %2712 = vmatpush2.bf16.msra.mxu1 %v6405_v31  ;;  %2670 = vmatprep.subr.bf16.mxu0 %v6410_v32  ;;  %v6468_v31 = vld [vmem:[%s9467_s1 + $0x10] ss:$24 sps:$4 sm:$0xff]  }
  0xf5   :  { %2713 = vmatprep.subr.bf16.mxu1 %v6413_v33  ;;  %v6471_v32 = vld [vmem:[%s9467_s1 + $0x310] ss:$24 sps:$4 sm:$0xff]   ;;  %v6476_v33 = vld [vmem:[%s9467_s1 + $0x2e4] ss:$24 sps:$4 sm:$0xff]  }
  0xf7   :  { %2671 = vmatpush2.bf16.msra.mxu0 %v6408_v34  ;;  %v6479_v34 = vld [vmem:[%s9467_s1 + $0x5e4] ss:$24 sps:$4 sm:$0xff]  }
  0xf8   :  { %2714 = vmatpush2.bf16.msra.mxu1 %v6411_v35  ;;  %2672 = vmatprep.subr.bf16.mxu0 %v6416_v37  ;;  %v6474_v35 = vld [vmem:[%s9467_s1 + $0x2e0] ss:$24 sps:$4 sm:$0xff]   ;;  %v6482_v37 = vld [vmem:[%s9467_s1 + $0x2b4] ss:$24 sps:$4 sm:$0xff]  }
  0xf9   :  { %2715 = vmatprep.subr.bf16.mxu1 %v6419_v38  ;;  %v6485_v38 = vld [vmem:[%s9467_s1 + $0x5b4] ss:$24 sps:$4 sm:$0xff]  }
  0xfb   :  { %2673 = vmatpush2.bf16.msra.mxu0 %v6414_v39  ;;  %v6480_v39 = vld [vmem:[%s9467_s1 + $0x2b0] ss:$24 sps:$4 sm:$0xff]  }
  0xfc   :  { %2716 = vmatpush2.bf16.msra.mxu1 %v6417_v40  ;;  %2674 = vmatprep.subr.bf16.mxu0 %v6422_v42  ;;  %v6483_v40 = vld [vmem:[%s9467_s1 + $0x5b0] ss:$24 sps:$4 sm:$0xff]   ;;  %v6488_v42 = vld [vmem:[%s9467_s1 + $0x284] ss:$24 sps:$4 sm:$0xff]  }
  0xfd   :  { %2717 = vmatprep.subr.bf16.mxu1 %v6425_v43  ;;  %v6491_v43 = vld [vmem:[%s9467_s1 + $0x584] ss:$24 sps:$4 sm:$0xff]  }
  0xff   :  { %2675 = vmatpush2.bf16.msra.mxu0 %v6420_v44  ;;  %v6486_v44 = vld [vmem:[%s9467_s1 + $0x280] ss:$24 sps:$4 sm:$0xff]  }
 0x100   :  { %2718 = vmatpush2.bf16.msra.mxu1 %v6423_v46  ;;  %2730 = vmatprep.subr.bf16.mxu0 %v6428_v50  ;;  %v6489_v46 = vld [vmem:[%s9467_s1 + $0x580] ss:$24 sps:$4 sm:$0xff]   ;;  %v6494_v50 = vld [vmem:[%s9467_s1 + $0x254] ss:$24 sps:$4 sm:$0xff]  }
 0x101   :  { %2773 = vmatprep.subr.bf16.mxu1 %v6431_v51  ;;  %v6497_v51 = vld [vmem:[%s9467_s1 + $0x554] ss:$24 sps:$4 sm:$0xff]  }
 0x102   :  { %v2420_v59 = vpop.f32.mrf.mxu0  ;;  %2677 = vmatmul.mubr.bf16.vlgmr.msra.gmra.mxu0 %v7595_v28 }
 0x103   :  { %v2463_v60 = vpop.f32.mrf.mxu1  ;;  %2720 = vmatmul.mubr.bf16.vlgmr.msra.gmra.mxu1 %v7597_v29  ;;  %v2421_v62 = vadd.f32 %v2420_v59, %v439_v55  ;;  %2731 = vmatpush1.bf16.msra.mxu0 %v6426_v52  ;;  %v6492_v52 = vld [vmem:[%s9467_s1 + $0x250] ss:$24 sps:$4 sm:$0xff]   ;;  %v6501_v59 = vld [vmem:[%s9467_s1 + $0x520] ss:$24 sps:$4 sm:$0xff]  }
 0x104   :  { %2774 = vmatpush1.bf16.msra.mxu1 %v6429_v56  ;;  %v8023_v0 = vpop.f32.mrf.mxu0  ;;  %2732 = vmatprep.subr.bf16.mxu0 %v6434_v57  ;;  %v6500_v56 = vld [vmem:[%s9467_s1 + $0x224] ss:$24 sps:$4 sm:$0xff]  }
 0x105   :  { %v8025_v1 = vpop.f32.mrf.mxu1  ;;  %2775 = vmatprep.subr.bf16.mxu1 %v6437_v58  ;;  %v8033_v4 = vadd.f32 %v2463_v60, %v2421_v62  ;;  %2762 = vmatprep.mubr.bf16.mxu0 %v7298_v53  ;;  %v6449_v53 = vld [vmem:[%s9467_s1 + $0x3d4] ss:$24 sps:$4 sm:$0xff]   ;;  %v6503_v57 = vld [vmem:[%s9467_s1 + $0x524] ss:$24 sps:$4 sm:$0xff]   ;;  %v6498_v58 = vld [vmem:[%s9467_s1 + $0x220] ss:$24 sps:$4 sm:$0xff]  }
 0x106   :  { %2805 = vmatprep.mubr.bf16.mxu1 %v7300_v54  ;;  %v2424_v6 = vpop.f32.mrf.mxu0  ;;  %v6506_v60 = vld [vmem:[%s9467_s1 + $0x1f4] ss:$24 sps:$4 sm:$0xff]   ;;  %v6504_v62 = vld [vmem:[%s9467_s1 + $0x1f0] ss:$24 sps:$4 sm:$0xff]  }
 0x107   :  { %v2425_v8 = vadd.f32 %v2424_v6, %v439_v55  ;;  %2733 = vmatpush1.bf16.msra.mxu0 %v6432_v61  ;;  %v2467_v10 = vpop.f32.mrf.mxu1  ;;  %v6495_v55 = vld [vmem:[%s9467_s1 + $0x550] ss:$24 sps:$4 sm:$0xff]   ;;  %v6509_v61 = vld [vmem:[%s9467_s1 + $0x4f4] ss:$24 sps:$4 sm:$0xff]   ;;  %v6513_v6 = vld [vmem:[%s9467_s1 + $0x4c0] ss:$24 sps:$4 sm:$0xff]  }
 0x108   :  { %2776 = vmatpush1.bf16.msra.mxu1 %v6435_v63  ;;  %2734 = vmatprep.subr.bf16.mxu0 %v6440_v2  ;;  %v6507_v63 = vld [vmem:[%s9467_s1 + $0x4f0] ss:$24 sps:$4 sm:$0xff]   ;;  %v6512_v2 = vld [vmem:[%s9467_s1 + $0x1c4] ss:$24 sps:$4 sm:$0xff]  }
 0x109   :  { %2777 = vmatprep.subr.bf16.mxu1 %v6443_v3  ;;  %v8049_v54 = vadd.f32 %v2467_v10, %v2425_v8  ;;  %v6515_v3 = vld [vmem:[%s9467_s1 + $0x4c4] ss:$24 sps:$4 sm:$0xff]   ;;  %v6521_v8 = vld [vmem:[%s9467_s1 + $0x494] ss:$24 sps:$4 sm:$0xff]   ;;  %v6519_v10 = vld [vmem:[%s9467_s1 + $0x490] ss:$24 sps:$4 sm:$0xff]  }
 0x10b   :  { %2735 = vmatpush1.bf16.msra.mxu0 %v6438_v5  ;;  %v6510_v5 = vld [vmem:[%s9467_s1 + $0x1c0] ss:$24 sps:$4 sm:$0xff]  }
 0x10c   :  { %2778 = vmatpush1.bf16.msra.mxu1 %v6441_v7  ;;  %2736 = vmatprep.subr.bf16.mxu0 %v6446_v9  ;;  %v6518_v7 = vld [vmem:[%s9467_s1 + $0x194] ss:$24 sps:$4 sm:$0xff]   ;;  %v6516_v9 = vld [vmem:[%s9467_s1 + $0x190] ss:$24 sps:$4 sm:$0xff]  }
 0x10d   :  { %2779 = vmatprep.subr.bf16.mxu1 %v6449_v53  ;;  %v6524_v53 = vld [vmem:[%s9467_s1 + $0x764] ss:$24 sps:$4 sm:$0xff]  }
 0x10f   :  { %2737 = vmatpush1.bf16.msra.mxu0 %v6444_v11  ;;  %v6527_v11 = vld [vmem:[%s9467_s1 + $0xa64] ss:$24 sps:$4 sm:$0xff]  }
 0x110   :  { %2780 = vmatpush1.bf16.msra.mxu1 %v6447_v14  ;;  %2738 = vmatprep.subr.bf16.mxu0 %v6452_v15  ;;  %v6522_v14 = vld [vmem:[%s9467_s1 + $0x760] ss:$24 sps:$4 sm:$0xff]  }
 0x111   :  { %2781 = vmatprep.subr.bf16.mxu1 %v6455_v16  ;;  %v6525_v15 = vld [vmem:[%s9467_s1 + $0xa60] ss:$24 sps:$4 sm:$0xff]   ;;  %v6530_v16 = vld [vmem:[%s9467_s1 + $0x734] ss:$24 sps:$4 sm:$0xff]  }
 0x113   :  { %2739 = vmatpush1.bf16.msra.mxu0 %v6450_v17  ;;  %v6533_v17 = vld [vmem:[%s9467_s1 + $0xa34] ss:$24 sps:$4 sm:$0xff]  }
 0x114   :  { %2782 = vmatpush1.bf16.msra.mxu1 %v6453_v18  ;;  %2740 = vmatprep.subr.bf16.mxu0 %v6458_v19  ;;  %v8219_v18 = vpop.f32.mrf.mxu0  ;;  %v8221_v19 = vpop.f32.mrf.mxu1 }
 0x115   :  { %2783 = vmatprep.subr.bf16.mxu1 %v6461_v20  ;;  %v6528_v20 = vld [vmem:[%s9467_s1 + $0x730] ss:$24 sps:$4 sm:$0xff]  }
 0x117   :  { %2741 = vmatpush1.bf16.msra.mxu0 %v6456_v21  ;;  %v6531_v21 = vld [vmem:[%s9467_s1 + $0xa30] ss:$24 sps:$4 sm:$0xff]  }
 0x118   :  { %2784 = vmatpush1.bf16.msra.mxu1 %v6459_v22  ;;  %2742 = vmatprep.subr.bf16.mxu0 %v6464_v23 }
 0x119   :  { %2785 = vmatprep.subr.bf16.mxu1 %v6467_v24 }
 0x11b   :  { %2743 = vmatpush1.bf16.msra.mxu0 %v6462_v25  ;;  %v6536_v25 = vld [vmem:[%s9467_s1 + $0x704] ss:$24 sps:$4 sm:$0xff]  }
 0x11c   :  { %2786 = vmatpush1.bf16.msra.mxu1 %v6465_v26  ;;  %2744 = vmatprep.subr.bf16.mxu0 %v6470_v27 }
 0x11d   :  { %2787 = vmatprep.subr.bf16.mxu1 %v6473_v30 }
 0x11f   :  { %2745 = vmatpush1.bf16.msra.mxu0 %v6468_v31 }
 0x120   :  { %2788 = vmatpush1.bf16.msra.mxu1 %v6471_v32  ;;  %2746 = vmatprep.subr.bf16.mxu0 %v6476_v33  ;;  %v6542_v33 = vld [vmem:[%s9467_s1 + $0x6d4] ss:$24 sps:$4 sm:$0xff]  }
 0x121   :  { %2789 = vmatprep.subr.bf16.mxu1 %v6479_v34 }
 0x123   :  { %2747 = vmatpush2.bf16.msra.mxu0 %v6474_v35  ;;  %v6545_v35 = vld [vmem:[%s9467_s1 + $0x9d4] ss:$24 sps:$4 sm:$0xff]  }
 0x124   :  { %2790 = vmatpush2.bf16.msra.mxu1 %v6477_v36  ;;  %2748 = vmatprep.subr.bf16.mxu0 %v6482_v37 }
 0x125   :  { %2791 = vmatprep.subr.bf16.mxu1 %v6485_v38  ;;  %v6548_v38 = vld [vmem:[%s9467_s1 + $0x6a4] ss:$24 sps:$4 sm:$0xff]  }
 0x127   :  { %2749 = vmatpush2.bf16.msra.mxu0 %v6480_v39  ;;  %v6551_v39 = vld [vmem:[%s9467_s1 + $0x9a4] ss:$24 sps:$4 sm:$0xff]  }
 0x128   :  { %2792 = vmatpush2.bf16.msra.mxu1 %v6483_v40  ;;  %2750 = vmatprep.subr.bf16.mxu0 %v6488_v42  ;;  %v6546_v42 = vld [vmem:[%s9467_s1 + $0x6a0] ss:$24 sps:$4 sm:$0xff]  }
 0x129   :  { %2793 = vmatprep.subr.bf16.mxu1 %v6491_v43  ;;  %v6549_v43 = vld [vmem:[%s9467_s1 + $0x9a0] ss:$24 sps:$4 sm:$0xff]  }
 0x12b   :  { %2751 = vmatpush2.bf16.msra.mxu0 %v6486_v44  ;;  %v6554_v44 = vld [vmem:[%s9467_s1 + $0x674] ss:$24 sps:$4 sm:$0xff]  }
 0x12c   :  { %2794 = vmatpush2.bf16.msra.mxu1 %v6489_v46  ;;  %2752 = vmatprep.subr.bf16.mxu0 %v6494_v50  ;;  %v6557_v46 = vld [vmem:[%s9467_s1 + $0x974] ss:$24 sps:$4 sm:$0xff]   ;;  %v6552_v50 = vld [vmem:[%s9467_s1 + $0x670] ss:$24 sps:$4 sm:$0xff]  }
 0x12d   :  { %2795 = vmatprep.subr.bf16.mxu1 %v6497_v51  ;;  %v6555_v51 = vld [vmem:[%s9467_s1 + $0x970] ss:$24 sps:$4 sm:$0xff]  }
 0x12f   :  { %2753 = vmatpush2.bf16.msra.mxu0 %v6492_v52  ;;  %v6560_v52 = vld [vmem:[%s9467_s1 + $0x644] ss:$24 sps:$4 sm:$0xff]  }
 0x130   :  { %2796 = vmatpush2.bf16.msra.mxu1 %v6495_v55  ;;  %2754 = vmatprep.subr.bf16.mxu0 %v6500_v56  ;;  %v6563_v55 = vld [vmem:[%s9467_s1 + $0x944] ss:$24 sps:$4 sm:$0xff]   ;;  %v6558_v56 = vld [vmem:[%s9467_s1 + $0x640] ss:$24 sps:$4 sm:$0xff]  }
 0x131   :  { %2797 = vmatprep.subr.bf16.mxu1 %v6503_v57  ;;  %v6561_v57 = vld [vmem:[%s9467_s1 + $0x940] ss:$24 sps:$4 sm:$0xff]  }
 0x133   :  { %2755 = vmatpush2.bf16.msra.mxu0 %v6498_v58  ;;  %v6566_v58 = vld [vmem:[%s9467_s1 + $0x614] ss:$24 sps:$4 sm:$0xff]  }
 0x134   :  { %2798 = vmatpush2.bf16.msra.mxu1 %v6501_v59  ;;  %2756 = vmatprep.subr.bf16.mxu0 %v6506_v60  ;;  %v6569_v59 = vld [vmem:[%s9467_s1 + $0x914] ss:$24 sps:$4 sm:$0xff]   ;;  %v6564_v60 = vld [vmem:[%s9467_s1 + $0x610] ss:$24 sps:$4 sm:$0xff]  }
 0x135   :  { %2799 = vmatprep.subr.bf16.mxu1 %v6509_v61  ;;  %v6567_v61 = vld [vmem:[%s9467_s1 + $0x910] ss:$24 sps:$4 sm:$0xff]  }
 0x137   :  { %2757 = vmatpush2.bf16.msra.mxu0 %v6504_v62  ;;  %v6572_v62 = vld [vmem:[%s9467_s1 + $0x8e4] ss:$24 sps:$4 sm:$0xff]  }
 0x138   :  { %2800 = vmatpush2.bf16.msra.mxu1 %v6507_v63  ;;  %2758 = vmatprep.subr.bf16.mxu0 %v6512_v2  ;;  %v6575_v63 = vld [vmem:[%s9467_s1 + $0xbe4] ss:$24 sps:$4 sm:$0xff]   ;;  %v6570_v2 = vld [vmem:[%s9467_s1 + $0x8e0] ss:$24 sps:$4 sm:$0xff]  }
 0x139   :  { %2801 = vmatprep.subr.bf16.mxu1 %v6515_v3  ;;  %v6573_v3 = vld [vmem:[%s9467_s1 + $0xbe0] ss:$24 sps:$4 sm:$0xff]  }
 0x13b   :  { %2759 = vmatpush2.bf16.msra.mxu0 %v6510_v5  ;;  %v6578_v5 = vld [vmem:[%s9467_s1 + $0x8b4] ss:$24 sps:$4 sm:$0xff]  }
 0x13c   :  { %2802 = vmatpush2.bf16.msra.mxu1 %v6513_v6  ;;  %2760 = vmatprep.subr.bf16.mxu0 %v6518_v7  ;;  %v6581_v6 = vld [vmem:[%s9467_s1 + $0xbb4] ss:$24 sps:$4 sm:$0xff]   ;;  %v6576_v7 = vld [vmem:[%s9467_s1 + $0x8b0] ss:$24 sps:$4 sm:$0xff]  }
 0x13d   :  { %2803 = vmatprep.subr.bf16.mxu1 %v6521_v8  ;;  %v6579_v8 = vld [vmem:[%s9467_s1 + $0xbb0] ss:$24 sps:$4 sm:$0xff]  }
 0x13f   :  { %2761 = vmatpush2.bf16.msra.mxu0 %v6516_v9  ;;  %v6584_v9 = vld [vmem:[%s9467_s1 + $0x884] ss:$24 sps:$4 sm:$0xff]  }
 0x140   :  { %2804 = vmatpush2.bf16.msra.mxu1 %v6519_v10  ;;  %2816 = vmatprep.subr.bf16.mxu0 %v6524_v53  ;;  %v6587_v10 = vld [vmem:[%s9467_s1 + $0xb84] ss:$24 sps:$4 sm:$0xff]   ;;  %v6582_v53 = vld [vmem:[%s9467_s1 + $0x880] ss:$24 sps:$4 sm:$0xff]  }
 0x141   :  { %2859 = vmatprep.subr.bf16.mxu1 %v6527_v11  ;;  %v6585_v11 = vld [vmem:[%s9467_s1 + $0xb80] ss:$24 sps:$4 sm:$0xff]  }
 0x142   :  { %v2506_v22 = vpop.f32.mrf.mxu0  ;;  %2763 = vmatmul.mubr.bf16.vlgmr.msra.gmra.mxu0 %v7367_v12  ;;  %v6539_v12 = vld [vmem:[%s9467_s1 + $0xa04] ss:$24 sps:$4 sm:$0xff]  }
 0x143   :  { %v2549_v23 = vpop.f32.mrf.mxu1  ;;  %2806 = vmatmul.mubr.bf16.vlgmr.msra.gmra.mxu1 %v7369_v13  ;;  %v2507_v24 = vadd.f32 %v2506_v22, %v8033_v4  ;;  %2817 = vmatpush1.bf16.msra.mxu0 %v6522_v14  ;;  %v6534_v13 = vld [vmem:[%s9467_s1 + $0x700] ss:$24 sps:$4 sm:$0xff]   ;;  %v6590_v14 = vld [vmem:[%s9467_s1 + $0x854] ss:$24 sps:$4 sm:$0xff]   ;;  %v6599_v22 = vld [vmem:[%s9467_s1 + $0xb24] ss:$24 sps:$4 sm:$0xff]  }
 0x144   :  { %2860 = vmatpush1.bf16.msra.mxu1 %v6525_v15  ;;  %v8235_v26 = vpop.f32.mrf.mxu0  ;;  %2818 = vmatprep.subr.bf16.mxu0 %v6530_v16  ;;  %v6537_v4 = vld [vmem:[%s9467_s1 + $0xa00] ss:$24 sps:$4 sm:$0xff]   ;;  %v6593_v15 = vld [vmem:[%s9467_s1 + $0xb54] ss:$24 sps:$4 sm:$0xff]   ;;  %v8356_v16 = vsub.s32 1, %v7973_v41 }
 0x145   :  { %v8237_v27 = vpop.f32.mrf.mxu1  ;;  %2861 = vmatprep.subr.bf16.mxu1 %v6533_v17  ;;  %v2550_v30 = vadd.f32 %v2549_v23, %v2507_v24  ;;  %2848 = vmatprep.mubr.bf16.mxu0 %v7466_v45  ;;  %v6540_v45 = vld [vmem:[%s9467_s1 + $0x6d0] ss:$24 sps:$4 sm:$0xff]  }
 0x146   :  { %2891 = vmatprep.mubr.bf16.mxu1 %v7471_v47  ;;  %v2510_v31 = vpop.f32.mrf.mxu0  ;;  %v6543_v47 = vld [vmem:[%s9467_s1 + $0x9d0] ss:$24 sps:$4 sm:$0xff]   ;;  %v443_v23 = vrot.slane %v7990_v48, %v8356_v16  ;;  %v6605_v48 = vld [vmem:[%s9467_s1 + $0xaf4] ss:$24 sps:$4 sm:$0xff]  }
 0x147   :  { %v2511_v32 = vadd.f32 %v2510_v31, %v8049_v54  ;;  %2819 = vmatpush1.bf16.msra.mxu0 %v6528_v20  ;;  %v2553_v34 = vpop.f32.mrf.mxu1  ;;  %v2902_v54 = vmax.f32 %v2550_v30, 0.0  ;;  %v6588_v17 = vld [vmem:[%s9467_s1 + $0x850] ss:$24 sps:$4 sm:$0xff]   ;;  %v6602_v30 = vld [vmem:[%s9467_s1 + $0x7f4] ss:$24 sps:$4 sm:$0xff]  }
 0x148   :  { %2862 = vmatpush1.bf16.msra.mxu1 %v6531_v21  ;;  %2820 = vmatprep.subr.bf16.mxu0 %v6536_v25  ;;  %v6591_v20 = vld [vmem:[%s9467_s1 + $0xb50] ss:$24 sps:$4 sm:$0xff]   ;;  %v6596_v21 = vld [vmem:[%s9467_s1 + $0x824] ss:$24 sps:$4 sm:$0xff]   ;;  %v2427_v24 = vadd.f32 %v8219_v18, %v443_v23  ;;  %v6594_v25 = vld [vmem:[%s9467_s1 + $0x820] ss:$24 sps:$4 sm:$0xff]   ;;  %v2423_v18 = vadd.f32 %v8023_v0, %v443_v23 }
 0x149   :  { %2863 = vmatprep.subr.bf16.mxu1 %v6539_v12  ;;  %v2554_v36 = vadd.f32 %v2553_v34, %v2511_v32  ;;  %v6597_v12 = vld [vmem:[%s9467_s1 + $0xb20] ss:$24 sps:$4 sm:$0xff]   ;;  %v6600_v31 = vld [vmem:[%s9467_s1 + $0x7f0] ss:$24 sps:$4 sm:$0xff]   ;;  %v6611_v0 = vld [vmem:[%s9467_s1 + $0xac4] ss:$24 sps:$4 sm:$0xff]  }
 0x14a   :  { %v6603_v32 = vld [vmem:[%s9467_s1 + $0xaf0] ss:$24 sps:$4 sm:$0xff]  }
 0x14b   :  { %v2908_v37 = vmax.f32 %v2554_v36, 0.0  ;;  %2821 = vmatpush1.bf16.msra.mxu0 %v6534_v13  ;;  %v2512_v13 = vpop.f32.mrf.mxu0  ;;  %v6606_v36 = vld [vmem:[%s9467_s1 + $0x7c0] ss:$24 sps:$4 sm:$0xff]  }
 0x14c   :  { %2864 = vmatpush1.bf16.msra.mxu1 %v6537_v4  ;;  %2822 = vmatprep.subr.bf16.mxu0 %v6542_v33  ;;  %v2470_v4 = vadd.f32 %v8221_v19, %v2427_v24  ;;  %v6608_v33 = vld [vmem:[%s9467_s1 + $0x7c4] ss:$24 sps:$4 sm:$0xff]   ;;  %v2466_v19 = vadd.f32 %v8025_v1, %v2423_v18  ;;  %v6614_v1 = vld [vmem:[%s9467_s1 + $0x794] ss:$24 sps:$4 sm:$0xff]   ;;  %v6672_v23 = vld [vmem:[%s9470_s3 + $0x200] ss:$16 sps:$4 sm:$0xff]  }
 0x14d   :  { %2865 = vmatprep.subr.bf16.mxu1 %v6545_v35  ;;  %v8269_v40 = vpack.c.bf16 %v2908_v37, %v2902_v54  ;;  %v6680_v24 = vld [vmem:[%s9470_s3 + $0x3e4] ss:$16 sps:$4 sm:$0xff]   ;;  %v6663_v18 = vld [vmem:[%s9470_s3 + $0x1c0] ss:$16 sps:$4 sm:$0xff]  }
 0x14e   :  { %v2513_v34 = vadd.f32 %v2512_v13, %v2470_v4  ;;  %v2509_v35 = vadd.f32 %v8235_v26, %v2466_v19  ;;  %v6617_v26 = vld [vmem:[%s9467_s1 + $0xa94] ss:$24 sps:$4 sm:$0xff]   ;;  %v6684_v4 = vld [vmem:[%s9470_s3 + $0x3c0] ss:$16 sps:$4 sm:$0xff]  }
 0x14f   :  { %2823 = vmatpush1.bf16.msra.mxu0 %v6540_v45  ;;  %v6609_v45 = vld [vmem:[%s9467_s1 + $0xac0] ss:$24 sps:$4 sm:$0xff]   ;;  %v6671_v13 = vld [vmem:[%s9470_s3 + $0x1a4] ss:$16 sps:$4 sm:$0xff]  }
 0x150   :  { %2866 = vmatpush1.bf16.msra.mxu1 %v6543_v47  ;;  %2824 = vmatprep.subr.bf16.mxu0 %v6548_v38  ;;  %v2555_v47 = vpop.f32.mrf.mxu1  ;;  %v2552_v37 = vadd.f32 %v8237_v27, %v2509_v35  ;;  %v6612_v38 = vld [vmem:[%s9467_s1 + $0x790] ss:$24 sps:$4 sm:$0xff]   ;;  %v6632_v27 = vld [vmem:[%s9470_s3 + $0x2e4] ss:$16 sps:$4 sm:$0xff]  }
 0x151   :  { %2867 = vmatprep.subr.bf16.mxu1 %v6551_v39  ;;  %v2556_v54 = vadd.f32 %v2555_v47, %v2513_v34  ;;  %v6615_v39 = vld [vmem:[%s9467_s1 + $0xa90] ss:$24 sps:$4 sm:$0xff]   ;;  %v6698_v19 = vld [vmem:[%s9470_s3 + $0x384] ss:$16 sps:$4 sm:$0xff]  }
 0x152   :  { %v6675_v34 = vld [vmem:[%s9470_s3 + $0x180] ss:$16 sps:$4 sm:$0xff]   ;;  %v6683_v35 = vld [vmem:[%s9470_s3 + $0x164] ss:$16 sps:$4 sm:$0xff]  }
 0x153   :  { %2825 = vmatpush1.bf16.msra.mxu0 %v6546_v42  ;;  %v6620_v42 = vld [vmem:[%s9470_s3 + $0xe4] ss:$16 sps:$4 sm:$0xff]   ;;  %v6681_v47 = vld [vmem:[%s9470_s3 + $0x160] ss:$16 sps:$4 sm:$0xff]  }
 0x154   :  { %2868 = vmatpush1.bf16.msra.mxu1 %v6549_v43  ;;  %2826 = vmatprep.subr.bf16.mxu0 %v6554_v44  ;;  %v2909_v43 = vmax.f32 %v2556_v54, 0.0  ;;  %v2903_v44 = vmax.f32 %v2552_v37, 0.0  ;;  %v6707_v54 = vld [vmem:[%s9470_s3 + $0x344] ss:$16 sps:$4 sm:$0xff]   ;;  %v6687_v37 = vld [vmem:[%s9470_s3 + $0x140] ss:$16 sps:$4 sm:$0xff]  }
 0x155   :  { %2869 = vmatprep.subr.bf16.mxu1 %v6557_v46  ;;  %v6618_v46 = vld [vmem:[%s9470_s3 + $0xe0] ss:$16 sps:$4 sm:$0xff]  }
 0x157   :  { %2827 = vmatpush1.bf16.msra.mxu0 %v6552_v50  ;;  %v6623_v50 = vld [vmem:[%s9470_s3 + $0xc4] ss:$16 sps:$4 sm:$0xff]  }
 0x158   :  { %2870 = vmatpush1.bf16.msra.mxu1 %v6555_v51  ;;  %2828 = vmatprep.subr.bf16.mxu0 %v6560_v52  ;;  %v6630_v51 = vld [vmem:[%s9470_s3 + $0x2e0] ss:$16 sps:$4 sm:$0xff]   ;;  %v8435_v52 = vpack.c.bf16 %v2909_v43, %v2903_v44  ;;  %v6710_v43 = vld [vmem:[%s9470_s3 + $0x324] ss:$16 sps:$4 sm:$0xff]   ;;  %v8600_v44 = vsub.s32 3, %v7973_v41 }
 0x159   :  { %2871 = vmatprep.subr.bf16.mxu1 %v6563_v55  ;;  %v6638_v55 = vld [vmem:[%s9470_s3 + $0x2c4] ss:$16 sps:$4 sm:$0xff]  }
 0x15b   :  { %2829 = vmatpush1.bf16.msra.mxu0 %v6558_v56  ;;  %v6621_v56 = vld [vmem:[%s9470_s3 + $0xc0] ss:$16 sps:$4 sm:$0xff]  }
 0x15c   :  { %2872 = vmatpush1.bf16.msra.mxu1 %v6561_v57  ;;  %2830 = vmatprep.subr.bf16.mxu0 %v6566_v58  ;;  %v6626_v57 = vld [vmem:[%s9470_s3 + $0xa4] ss:$16 sps:$4 sm:$0xff]   ;;  %v6636_v58 = vld [vmem:[%s9470_s3 + $0x2c0] ss:$16 sps:$4 sm:$0xff]  }
 0x15d   :  { %2873 = vmatprep.subr.bf16.mxu1 %v6569_v59  ;;  %v6629_v59 = vld [vmem:[%s9470_s3 + $0x84] ss:$16 sps:$4 sm:$0xff]  }
 0x15f   :  { %2831 = vmatpush1.bf16.msra.mxu0 %v6564_v60  ;;  %v6642_v60 = vld [vmem:[%s9470_s3 + $0x2a0] ss:$16 sps:$4 sm:$0xff]  }
 0x160   :  { %2874 = vmatpush1.bf16.msra.mxu1 %v6567_v61  ;;  %2832 = vmatprep.subr.bf16.mxu0 %v6572_v62  ;;  %v6650_v61 = vld [vmem:[%s9470_s3 + $0x284] ss:$16 sps:$4 sm:$0xff]   ;;  %v6627_v62 = vld [vmem:[%s9470_s3 + $0x80] ss:$16 sps:$4 sm:$0xff]  }
 0x161   :  { %2875 = vmatprep.subr.bf16.mxu1 %v6575_v63  ;;  %v6635_v63 = vld [vmem:[%s9470_s3 + $0x64] ss:$16 sps:$4 sm:$0xff]  }
 0x163   :  { %2833 = vmatpush2.bf16.msra.mxu0 %v6570_v2  ;;  %v6648_v2 = vld [vmem:[%s9470_s3 + $0x280] ss:$16 sps:$4 sm:$0xff]  }
 0x164   :  { %2876 = vmatpush2.bf16.msra.mxu1 %v6573_v3  ;;  %2834 = vmatprep.subr.bf16.mxu0 %v6578_v5  ;;  %v6656_v3 = vld [vmem:[%s9470_s3 + $0x264] ss:$16 sps:$4 sm:$0xff]   ;;  %v6633_v5 = vld [vmem:[%s9470_s3 + $0x60] ss:$16 sps:$4 sm:$0xff]  }
 0x165   :  { %2877 = vmatprep.subr.bf16.mxu1 %v6581_v6  ;;  %v6641_v6 = vld [vmem:[%s9470_s3 + $0x44] ss:$16 sps:$4 sm:$0xff]  }
 0x167   :  { %2835 = vmatpush2.bf16.msra.mxu0 %v6576_v7  ;;  %v6654_v7 = vld [vmem:[%s9470_s3 + $0x260] ss:$16 sps:$4 sm:$0xff]  }
 0x168   :  { %2878 = vmatpush2.bf16.msra.mxu1 %v6579_v8  ;;  %2836 = vmatprep.subr.bf16.mxu0 %v6584_v9  ;;  %v6662_v8 = vld [vmem:[%s9470_s3 + $0x244] ss:$16 sps:$4 sm:$0xff]   ;;  %v6639_v9 = vld [vmem:[%s9470_s3 + $0x40] ss:$16 sps:$4 sm:$0xff]  }
 0x169   :  { %2879 = vmatprep.subr.bf16.mxu1 %v6587_v10  ;;  %v6647_v10 = vld [vmem:[%s9470_s3 + $0x24] ss:$16 sps:$4 sm:$0xff]  }
 0x16b   :  { %2837 = vmatpush2.bf16.msra.mxu0 %v6582_v53  ;;  %v6660_v53 = vld [vmem:[%s9470_s3 + $0x240] ss:$16 sps:$4 sm:$0xff]  }
 0x16c   :  { %2880 = vmatpush2.bf16.msra.mxu1 %v6585_v11  ;;  %2838 = vmatprep.subr.bf16.mxu0 %v6590_v14  ;;  %v6668_v11 = vld [vmem:[%s9470_s3 + $0x224] ss:$16 sps:$4 sm:$0xff]   ;;  %v6645_v14 = vld [vmem:[%s9470_s3 + $0x20] ss:$16 sps:$4 sm:$0xff]  }
 0x16d   :  { %2881 = vmatprep.subr.bf16.mxu1 %v6593_v15  ;;  %v6653_v15 = vld [vmem:[%s9470_s3 + $0x4] ss:$16 sps:$4 sm:$0xff]  }
 0x16f   :  { %2839 = vmatpush2.bf16.msra.mxu0 %v6588_v17  ;;  %v6666_v17 = vld [vmem:[%s9470_s3 + $0x220] ss:$16 sps:$4 sm:$0xff]  }
 0x170   :  { %2882 = vmatpush2.bf16.msra.mxu1 %v6591_v20  ;;  %2840 = vmatprep.subr.bf16.mxu0 %v6596_v21  ;;  %v6674_v20 = vld [vmem:[%s9470_s3 + $0x204] ss:$16 sps:$4 sm:$0xff]   ;;  %v6651_v21 = vld [vmem:[%s9470_s3] ss:$16 sps:$4 sm:$0xff]  }
 0x171   :  { %2883 = vmatprep.subr.bf16.mxu1 %v6599_v22  ;;  %v6659_v22 = vld [vmem:[%s9470_s3 + $0x1e4] ss:$16 sps:$4 sm:$0xff]  }
 0x173   :  { %2841 = vmatpush2.bf16.msra.mxu0 %v6594_v25  ;;  %v6657_v25 = vld [vmem:[%s9470_s3 + $0x1e0] ss:$16 sps:$4 sm:$0xff]  }
 0x174   :  { %2884 = vmatpush2.bf16.msra.mxu1 %v6597_v12  ;;  %2842 = vmatprep.subr.bf16.mxu0 %v6602_v30  ;;  %v6665_v12 = vld [vmem:[%s9470_s3 + $0x1c4] ss:$16 sps:$4 sm:$0xff]   ;;  %v6678_v30 = vld [vmem:[%s9470_s3 + $0x3e0] ss:$16 sps:$4 sm:$0xff]  }
 0x175   :  { %2885 = vmatprep.subr.bf16.mxu1 %v6605_v48  ;;  %v6686_v48 = vld [vmem:[%s9470_s3 + $0x3c4] ss:$16 sps:$4 sm:$0xff]  }
 0x177   :  { %2843 = vmatpush2.bf16.msra.mxu0 %v6600_v31  ;;  %v6692_v31 = vld [vmem:[%s9470_s3 + $0x3a4] ss:$16 sps:$4 sm:$0xff]  }
 0x178   :  { %2886 = vmatpush2.bf16.msra.mxu1 %v6603_v32  ;;  %2844 = vmatprep.subr.bf16.mxu0 %v6608_v33  ;;  %v6669_v32 = vld [vmem:[%s9470_s3 + $0x1a0] ss:$16 sps:$4 sm:$0xff]   ;;  %v6677_v33 = vld [vmem:[%s9470_s3 + $0x184] ss:$16 sps:$4 sm:$0xff]  }
 0x179   :  { %2887 = vmatprep.subr.bf16.mxu1 %v6611_v0  ;;  %v6690_v0 = vld [vmem:[%s9470_s3 + $0x3a0] ss:$16 sps:$4 sm:$0xff]  }
 0x17b   :  { %2845 = vmatpush2.bf16.msra.mxu0 %v6606_v36  ;;  %v6696_v36 = vld [vmem:[%s9470_s3 + $0x380] ss:$16 sps:$4 sm:$0xff]  }
 0x17c   :  { %2888 = vmatpush2.bf16.msra.mxu1 %v6609_v45  ;;  %2846 = vmatprep.subr.bf16.mxu0 %v6614_v1  ;;  %v6704_v45 = vld [vmem:[%s9470_s3 + $0x364] ss:$16 sps:$4 sm:$0xff]  }
 0x17d   :  { %2889 = vmatprep.subr.bf16.mxu1 %v6617_v26  ;;  %v6689_v1 = vld [vmem:[%s9470_s3 + $0x144] ss:$16 sps:$4 sm:$0xff]   ;;  %v6702_v26 = vld [vmem:[%s9470_s3 + $0x360] ss:$16 sps:$4 sm:$0xff]  }
 0x17f   :  { %2847 = vmatpush2.bf16.msra.mxu0 %v6612_v38 }
 0x180   :  { %2890 = vmatpush2.bf16.msra.mxu1 %v6615_v39  ;;  %4094 = vmatprep.subr.bf16.mxu0 %v6620_v42  ;;  %v6695_v42 = vld [vmem:[%s9470_s3 + $0x124] ss:$16 sps:$4 sm:$0xff]  }
 0x181   :  { %4137 = vmatprep.subr.bf16.mxu1 %v6632_v27  ;;  %v6705_v27 = vld [vmem:[%s9470_s3 + $0x340] ss:$16 sps:$4 sm:$0xff]  }
 0x182   :  { %2849 = vmatmul.mubr.bf16.vlgmr.msra.gmra.mxu0 %v7595_v28  ;;  %v6644_v28 = vld [vmem:[%s9470_s3 + $0x2a4] ss:$16 sps:$4 sm:$0xff]   ;;  %v2592_v38 = vpop.f32.mrf.mxu0 }
 0x183   :  { %2892 = vmatmul.mubr.bf16.vlgmr.msra.gmra.mxu1 %v7597_v29  ;;  %4095 = vmatpush1.bf16.msra.mxu0 %v6618_v46  ;;  %v6624_v29 = vld [vmem:[%s9470_s3 + $0xa0] ss:$16 sps:$4 sm:$0xff]   ;;  %v2635_v39 = vpop.f32.mrf.mxu1 }
 0x184   :  { %4126 = vmatprep.mubr.bf16.mxu0 %v8435_v52  ;;  %4096 = vmatprep.subr.bf16.mxu0 %v6623_v50  ;;  %v6693_v46 = vld [vmem:[%s9470_s3 + $0x120] ss:$16 sps:$4 sm:$0xff]   ;;  %v8606_v50 = vsub.s32 2, %v7973_v41 }
 0x185   :  { %4138 = vmatpush1.bf16.msra.mxu1 %v6630_v51  ;;  %v2594_v51 = vpop.f32.mrf.mxu0 }
 0x186   :  { %4139 = vmatprep.subr.bf16.mxu1 %v6638_v55  ;;  %v2637_v55 = vpop.f32.mrf.mxu1 }
 0x187   :  { %4097 = vmatpush1.bf16.msra.mxu0 %v6621_v56  ;;  %v6701_v56 = vld [vmem:[%s9470_s3 + $0x104] ss:$16 sps:$4 sm:$0xff]  }
 0x188   :  { %4098 = vmatprep.subr.bf16.mxu0 %v6626_v57  ;;  %v6708_v57 = vld [vmem:[%s9470_s3 + $0x320] ss:$16 sps:$4 sm:$0xff]  }
 0x189   :  { %4140 = vmatpush1.bf16.msra.mxu1 %v6636_v58  ;;  %v6713_v58 = vld [vmem:[%s9470_s3 + $0x304] ss:$16 sps:$4 sm:$0xff]  }
 0x18a   :  { %4141 = vmatprep.subr.bf16.mxu1 %v6644_v28  ;;  %v8620_v28 = vld [vmem:[%s9469_s2] sm:$0x3f] }
 0x18b   :  { %4099 = vmatpush1.bf16.msra.mxu0 %v6624_v29  ;;  %v451_v29 = vrot.slane %v8620_v28, %v8600_v44 }
 0x18c   :  { %4100 = vmatprep.subr.bf16.mxu0 %v6629_v59  ;;  %v6699_v59 = vld [vmem:[%s9470_s3 + $0x100] ss:$16 sps:$4 sm:$0xff]  }
 0x18d   :  { %4142 = vmatpush1.bf16.msra.mxu1 %v6642_v60  ;;  %v447_v60 = vrot.slane %v8620_v28, %v8606_v50 }
 0x18e   :  { %4143 = vmatprep.subr.bf16.mxu1 %v6650_v61  ;;  %v2596_v61 = vpop.f32.mrf.mxu0 }
 0x18f   :  { %4101 = vmatpush1.bf16.msra.mxu0 %v6627_v62  ;;  %v2639_v62 = vpop.f32.mrf.mxu1 }
 0x190   :  { %4102 = vmatprep.subr.bf16.mxu0 %v6635_v63  ;;  %v6711_v63 = vld [vmem:[%s9470_s3 + $0x300] ss:$16 sps:$4 sm:$0xff]  }
 0x191   :  { %4144 = vmatpush1.bf16.msra.mxu1 %v6648_v2  ;;  %v6764_v2 = vld [vmem:[%s9470_s3 + $0x4e4] ss:$16 sps:$4 sm:$0xff]  }
 0x192   :  { %4145 = vmatprep.subr.bf16.mxu1 %v6656_v3  ;;  %v6716_v3 = vld [vmem:[%s9470_s3 + $0xec] ss:$16 sps:$4 sm:$0xff]  }
 0x193   :  { %4103 = vmatpush1.bf16.msra.mxu0 %v6633_v5  ;;  %v2595_v5 = vadd.f32 %v2594_v51, %v451_v29  ;;  %v6794_v51 = vld [vmem:[%s9470_s3 + $0x444] ss:$16 sps:$4 sm:$0xff]  }
 0x194   :  { %4104 = vmatprep.subr.bf16.mxu0 %v6641_v6  ;;  %v6762_v6 = vld [vmem:[%s9470_s3 + $0x4e0] ss:$16 sps:$4 sm:$0xff]  }
 0x195   :  { %4146 = vmatpush1.bf16.msra.mxu1 %v6654_v7  ;;  %v2593_v7 = vadd.f32 %v2592_v38, %v447_v60 }
 0x196   :  { %4147 = vmatprep.subr.bf16.mxu1 %v6662_v8  ;;  %v2598_v8 = vpop.f32.mrf.mxu0 }
 0x197   :  { %4105 = vmatpush1.bf16.msra.mxu0 %v6639_v9  ;;  %v2641_v9 = vpop.f32.mrf.mxu1 }
 0x198   :  { %4106 = vmatprep.subr.bf16.mxu0 %v6647_v10  ;;  %v6770_v10 = vld [vmem:[%s9470_s3 + $0x4c4] ss:$16 sps:$4 sm:$0xff]  }
 0x199   :  { %4148 = vmatpush1.bf16.msra.mxu1 %v6660_v53  ;;  %v2597_v53 = vadd.f32 %v2596_v61, %v447_v60  ;;  %v6806_v60 = vld [vmem:[%s9470_s3 + $0x404] ss:$16 sps:$4 sm:$0xff]   ;;  %v6723_v61 = vld [vmem:[%s9470_s3 + $0x88] ss:$16 sps:$4 sm:$0xff]  }
 0x19a   :  { %4149 = vmatprep.subr.bf16.mxu1 %v6668_v11 }
 0x19b   :  { %4107 = vmatpush1.bf16.msra.mxu0 %v6645_v14 }
 0x19c   :  { %4108 = vmatprep.subr.bf16.mxu0 %v6653_v15  ;;  %v2638_v15 = vadd.f32 %v2637_v55, %v2595_v5  ;;  %v6717_v55 = vld [vmem:[%s9470_s3 + $0xc8] ss:$16 sps:$4 sm:$0xff]   ;;  %v6731_v5 = vld [vmem:[%s9470_s3 + $0x4c] ss:$16 sps:$4 sm:$0xff]  }
 0x19d   :  { %4150 = vmatpush1.bf16.msra.mxu1 %v6666_v17  ;;  %v2599_v17 = vadd.f32 %v2598_v8, %v451_v29  ;;  %v6725_v29 = vld [vmem:[%s9470_s3 + $0x8c] ss:$16 sps:$4 sm:$0xff]   ;;  %v6729_v8 = vld [vmem:[%s9470_s3 + $0x48] ss:$16 sps:$4 sm:$0xff]  }
 0x19e   :  { %4151 = vmatprep.subr.bf16.mxu1 %v6674_v20  ;;  %v6768_v20 = vld [vmem:[%s9470_s3 + $0x4c0] ss:$16 sps:$4 sm:$0xff]  }
 0x19f   :  { %4109 = vmatpush1.bf16.msra.mxu0 %v6651_v21  ;;  %v2636_v21 = vadd.f32 %v2635_v39, %v2593_v7  ;;  %v6818_v7 = vld [vmem:[%s9470_s3 + $0x5c4] ss:$16 sps:$4 sm:$0xff]  }
 0x1a0   :  { %4110 = vmatprep.subr.bf16.mxu0 %v6659_v22 }
 0x1a1   :  { %4152 = vmatpush1.bf16.msra.mxu1 %v6672_v23 }
 0x1a2   :  { %4153 = vmatprep.subr.bf16.mxu1 %v6680_v24  ;;  %v6776_v24 = vld [vmem:[%s9470_s3 + $0x4a4] ss:$16 sps:$4 sm:$0xff]  }
 0x1a3   :  { %4111 = vmatpush2.bf16.msra.mxu0 %v6657_v25  ;;  %v2640_v25 = vadd.f32 %v2639_v62, %v2597_v53  ;;  %v6728_v62 = vld [vmem:[%s9470_s3 + $0x6c] ss:$16 sps:$4 sm:$0xff]   ;;  %v6824_v53 = vld [vmem:[%s9470_s3 + $0x5a4] ss:$16 sps:$4 sm:$0xff]  }
 0x1a4   :  { %4112 = vmatprep.subr.bf16.mxu0 %v6665_v12 }
 0x1a5   :  { %4154 = vmatpush2.bf16.msra.mxu1 %v6678_v30 }
 0x1a6   :  { %4155 = vmatprep.subr.bf16.mxu1 %v6686_v48 }
 0x1a7   :  { %4113 = vmatpush2.bf16.msra.mxu0 %v6663_v18 }
 0x1a8   :  { %4114 = vmatprep.subr.bf16.mxu0 %v6671_v13  ;;  %v2642_v13 = vadd.f32 %v2641_v9, %v2599_v17  ;;  %v6734_v9 = vld [vmem:[%s9470_s3 + $0x2c] ss:$16 sps:$4 sm:$0xff]   ;;  %v6830_v17 = vld [vmem:[%s9470_s3 + $0x584] ss:$16 sps:$4 sm:$0xff]  }
 0x1a9   :  { %4156 = vmatpush2.bf16.msra.mxu1 %v6684_v4 }
 0x1aa   :  { %4157 = vmatprep.subr.bf16.mxu1 %v6692_v31  ;;  %v6774_v31 = vld [vmem:[%s9470_s3 + $0x4a0] ss:$16 sps:$4 sm:$0xff]  }
 0x1ab   :  { %4115 = vmatpush2.bf16.msra.mxu0 %v6669_v32 }
 0x1ac   :  { %4116 = vmatprep.subr.bf16.mxu0 %v6677_v33  ;;  %v6782_v33 = vld [vmem:[%s9470_s3 + $0x484] ss:$16 sps:$4 sm:$0xff]  }
 0x1ad   :  { %4158 = vmatpush2.bf16.msra.mxu1 %v6690_v0 }
 0x1ae   :  { %4159 = vmatprep.subr.bf16.mxu1 %v6698_v19 }
 0x1af   :  { %4117 = vmatpush2.bf16.msra.mxu0 %v6675_v34 }
 0x1b0   :  { %4118 = vmatprep.subr.bf16.mxu0 %v6683_v35 }
 0x1b1   :  { %4160 = vmatpush2.bf16.msra.mxu1 %v6696_v36 }
 0x1b2   :  { %4161 = vmatprep.subr.bf16.mxu1 %v6704_v45 }
 0x1b3   :  { %4119 = vmatpush2.bf16.msra.mxu0 %v6681_v47  ;;  %v6780_v47 = vld [vmem:[%s9470_s3 + $0x480] ss:$16 sps:$4 sm:$0xff]  }
 0x1b4   :  { %4120 = vmatprep.subr.bf16.mxu0 %v6689_v1 }
 0x1b5   :  { %4162 = vmatpush2.bf16.msra.mxu1 %v6702_v26  ;;  %v6788_v26 = vld [vmem:[%s9470_s3 + $0x464] ss:$16 sps:$4 sm:$0xff]  }
 0x1b6   :  { %4163 = vmatprep.subr.bf16.mxu1 %v6707_v54 }
 0x1b7   :  { %4121 = vmatpush2.bf16.msra.mxu0 %v6687_v37 }
 0x1b8   :  { %4122 = vmatprep.subr.bf16.mxu0 %v6695_v42  ;;  %v6714_v42 = vld [vmem:[%s9470_s3 + $0xe8] ss:$16 sps:$4 sm:$0xff]  }
 0x1b9   :  { %4164 = vmatpush2.bf16.msra.mxu1 %v6705_v27 }
 0x1ba   :  { %4165 = vmatprep.subr.bf16.mxu1 %v6710_v43  ;;  %v6719_v43 = vld [vmem:[%s9470_s3 + $0xcc] ss:$16 sps:$4 sm:$0xff]  }
 0x1bb   :  { %4123 = vmatpush2.bf16.msra.mxu0 %v6693_v46  ;;  %v6786_v46 = vld [vmem:[%s9470_s3 + $0x460] ss:$16 sps:$4 sm:$0xff]  }
 0x1bc   :  { %4124 = vmatprep.subr.bf16.mxu0 %v6701_v56  ;;  %v6722_v56 = vld [vmem:[%s9470_s3 + $0xac] ss:$16 sps:$4 sm:$0xff]  }
 0x1bd   :  { %4166 = vmatpush2.bf16.msra.mxu1 %v6708_v57  ;;  %v6792_v57 = vld [vmem:[%s9470_s3 + $0x440] ss:$16 sps:$4 sm:$0xff]  }
 0x1be   :  { %4167 = vmatprep.subr.bf16.mxu1 %v6713_v58  ;;  %v6800_v58 = vld [vmem:[%s9470_s3 + $0x424] ss:$16 sps:$4 sm:$0xff]  }
 0x1bf   :  { %4125 = vmatpush2.bf16.msra.mxu0 %v6699_v59  ;;  %v6798_v59 = vld [vmem:[%s9470_s3 + $0x420] ss:$16 sps:$4 sm:$0xff]  }
 0x1c0   :  { %4180 = vmatprep.subr.bf16.mxu0 %v6764_v2  ;;  %v6812_v2 = vld [vmem:[%s9470_s3 + $0x5e4] ss:$16 sps:$4 sm:$0xff]  }
 0x1c1   :  { %4168 = vmatpush2.bf16.msra.mxu1 %v6711_v63  ;;  %v6804_v63 = vld [vmem:[%s9470_s3 + $0x400] ss:$16 sps:$4 sm:$0xff]  }
 0x1c2   :  { %4223 = vmatprep.subr.bf16.mxu1 %v6716_v3  ;;  %v2678_v11 = vpop.f32.mrf.mxu0  ;;  %4127 = vmatmul.mubr.bf16.vlgmr.msra.gmra.mxu0 %v8269_v40  ;;  %v6726_v3 = vld [vmem:[%s9470_s3 + $0x68] ss:$16 sps:$4 sm:$0xff]  }
 0x1c3   :  { %v2721_v14 = vpop.f32.mrf.mxu1  ;;  %4181 = vmatpush1.bf16.msra.mxu0 %v6762_v6  ;;  %v2679_v30 = vadd.f32 %v2678_v11, %v2636_v21  ;;  %v6810_v6 = vld [vmem:[%s9470_s3 + $0x5e0] ss:$16 sps:$4 sm:$0xff]   ;;  %v6732_v11 = vld [vmem:[%s9470_s3 + $0x28] ss:$16 sps:$4 sm:$0xff]   ;;  %v6740_v21 = vld [vmem:[%s9470_s3 + $0x1ec] ss:$16 sps:$4 sm:$0xff]  }
 0x1c4   :  { %v2680_v22 = vpop.f32.mrf.mxu0  ;;  %4182 = vmatprep.subr.bf16.mxu0 %v6770_v10  ;;  %v6816_v10 = vld [vmem:[%s9470_s3 + $0x5c0] ss:$16 sps:$4 sm:$0xff]  }
 0x1c5   :  { %v2723_v23 = vpop.f32.mrf.mxu1  ;;  %v2681_v12 = vadd.f32 %v2680_v22, %v2638_v15  ;;  %v2722_v35 = vadd.f32 %v2721_v14, %v2679_v30  ;;  %v6737_v14 = vld [vmem:[%s9470_s3 + $0xc] ss:$16 sps:$4 sm:$0xff]   ;;  %v6822_v15 = vld [vmem:[%s9470_s3 + $0x5a0] ss:$16 sps:$4 sm:$0xff]   ;;  %v6842_v30 = vld [vmem:[%s9470_s3 + $0x544] ss:$16 sps:$4 sm:$0xff]  }
 0x1c6   :  { %v2682_v48 = vpop.f32.mrf.mxu0  ;;  %v6828_v22 = vld [vmem:[%s9470_s3 + $0x580] ss:$16 sps:$4 sm:$0xff]  }
 0x1c7   :  { %v2725_v18 = vpop.f32.mrf.mxu1  ;;  %v2683_v4 = vadd.f32 %v2682_v48, %v2640_v25  ;;  %4183 = vmatpush1.bf16.msra.mxu0 %v6768_v20  ;;  %v2724_v0 = vadd.f32 %v2723_v23, %v2681_v12  ;;  %v2904_v38 = vmax.f32 %v2722_v35, 0.0  ;;  %v6735_v20 = vld [vmem:[%s9470_s3 + $0x8] ss:$16 sps:$4 sm:$0xff]   ;;  %v6836_v23 = vld [vmem:[%s9470_s3 + $0x564] ss:$16 sps:$4 sm:$0xff]  }
 0x1c8   :  { %v2684_v32 = vpop.f32.mrf.mxu0  ;;  %4184 = vmatprep.subr.bf16.mxu0 %v6776_v24  ;;  %v6738_v24 = vld [vmem:[%s9470_s3 + $0x1e8] ss:$16 sps:$4 sm:$0xff]   ;;  %v6743_v25 = vld [vmem:[%s9470_s3 + $0x1cc] ss:$16 sps:$4 sm:$0xff]   ;;  %v6834_v12 = vld [vmem:[%s9470_s3 + $0x560] ss:$16 sps:$4 sm:$0xff]  }
 0x1c9   :  { %v2726_v19 = vadd.f32 %v2725_v18, %v2683_v4  ;;  %v2685_v34 = vadd.f32 %v2684_v32, %v2642_v13  ;;  %v2727_v36 = vpop.f32.mrf.mxu1  ;;  %v2905_v54 = vmax.f32 %v2724_v0, 0.0  ;;  %v6741_v48 = vld [vmem:[%s9470_s3 + $0x1c8] ss:$16 sps:$4 sm:$0xff]   ;;  %v6746_v18 = vld [vmem:[%s9470_s3 + $0x1ac] ss:$16 sps:$4 sm:$0xff]  }
 0x1ca   :  { %v6840_v13 = vld [vmem:[%s9470_s3 + $0x540] ss:$16 sps:$4 sm:$0xff]   ;;  %v6848_v4 = vld [vmem:[%s9470_s3 + $0x524] ss:$16 sps:$4 sm:$0xff]   ;;  %v6749_v32 = vld [vmem:[%s9470_s3 + $0x18c] ss:$16 sps:$4 sm:$0xff]  }
 0x1cb   :  { %v2728_v45 = vadd.f32 %v2727_v36, %v2685_v34  ;;  %4185 = vmatpush1.bf16.msra.mxu0 %v6774_v31  ;;  %v2910_v1 = vmax.f32 %v2726_v19, 0.0  ;;  %v6744_v31 = vld [vmem:[%s9470_s3 + $0x1a8] ss:$16 sps:$4 sm:$0xff]   ;;  %v6854_v0 = vld [vmem:[%s9470_s3 + $0x504] ss:$16 sps:$4 sm:$0xff]  }
 0x1cc   :  { %4186 = vmatprep.subr.bf16.mxu0 %v6782_v33  ;;  %v6846_v33 = vld [vmem:[%s9470_s3 + $0x520] ss:$16 sps:$4 sm:$0xff]   ;;  %v6747_v19 = vld [vmem:[%s9470_s3 + $0x188] ss:$16 sps:$4 sm:$0xff]   ;;  %v6752_v34 = vld [vmem:[%s9470_s3 + $0x16c] ss:$16 sps:$4 sm:$0xff]  }
 0x1cd   :  { %v2911_v37 = vmax.f32 %v2728_v45, 0.0  ;;  %v8668_v27 = vpack.c.bf16 %v2910_v1, %v2904_v38  ;;  %v6852_v35 = vld [vmem:[%s9470_s3 + $0x500] ss:$16 sps:$4 sm:$0xff]   ;;  %v6860_v36 = vld [vmem:[%s9470_s3 + $0x2ec] ss:$16 sps:$4 sm:$0xff]  }
 0x1ce   :  { %v6750_v45 = vld [vmem:[%s9470_s3 + $0x168] ss:$16 sps:$4 sm:$0xff]  }
 0x1cf   :  { %v8663_v39 = vpack.c.bf16 %v2911_v37, %v2905_v54  ;;  %4187 = vmatpush1.bf16.msra.mxu0 %v6780_v47  ;;  %v6755_v47 = vld [vmem:[%s9470_s3 + $0x14c] ss:$16 sps:$4 sm:$0xff]   ;;  %v6753_v1 = vld [vmem:[%s9470_s3 + $0x148] ss:$16 sps:$4 sm:$0xff]  }
 0x1d0   :  { %4188 = vmatprep.subr.bf16.mxu0 %v6788_v26  ;;  %v6758_v26 = vld [vmem:[%s9470_s3 + $0x12c] ss:$16 sps:$4 sm:$0xff]   ;;  %v6756_v54 = vld [vmem:[%s9470_s3 + $0x128] ss:$16 sps:$4 sm:$0xff]  }
 0x1d1   :  { %4169 = vmatprep.mubr.bf16.mxu1 %v8663_v39  ;;  %v6761_v37 = vld [vmem:[%s9470_s3 + $0x10c] ss:$16 sps:$4 sm:$0xff]   ;;  %v6759_v38 = vld [vmem:[%s9470_s3 + $0x108] ss:$16 sps:$4 sm:$0xff]  }
 0x1d2   :  { %4170 = vmatmul.mubr.bf16.vlgmr.msra.gmra.mxu1 %v8668_v27 }
 0x1d3   :  { %4224 = vmatpush1.bf16.msra.mxu1 %v6714_v42  ;;  %4255 = vmatprep.mubr.bf16.mxu1 %v8435_v52  ;;  %v6720_v52 = vld [vmem:[%s9470_s3 + $0xa8] ss:$16 sps:$4 sm:$0xff]   ;;  %v6767_v42 = vld [vmem:[%s9470_s3 + $0x4ec] ss:$16 sps:$4 sm:$0xff]  }
 0x1d4   :  { %4225 = vmatprep.subr.bf16.mxu1 %v6719_v43  ;;  %4189 = vmatpush1.bf16.msra.mxu0 %v6786_v46  ;;  %v6765_v43 = vld [vmem:[%s9470_s3 + $0x4e8] ss:$16 sps:$4 sm:$0xff]   ;;  %v6773_v46 = vld [vmem:[%s9470_s3 + $0x4cc] ss:$16 sps:$4 sm:$0xff]  }
 0x1d5   :  { %4190 = vmatprep.subr.bf16.mxu0 %v6794_v51  ;;  %v6771_v51 = vld [vmem:[%s9470_s3 + $0x4c8] ss:$16 sps:$4 sm:$0xff]  }
 0x1d7   :  { %4226 = vmatpush1.bf16.msra.mxu1 %v6717_v55  ;;  %v6779_v55 = vld [vmem:[%s9470_s3 + $0x4ac] ss:$16 sps:$4 sm:$0xff]  }
 0x1d8   :  { %4227 = vmatprep.subr.bf16.mxu1 %v6722_v56  ;;  %4191 = vmatpush1.bf16.msra.mxu0 %v6792_v57  ;;  %v6777_v56 = vld [vmem:[%s9470_s3 + $0x4a8] ss:$16 sps:$4 sm:$0xff]  }
 0x1d9   :  { %4192 = vmatprep.subr.bf16.mxu0 %v6800_v58  ;;  %v6783_v57 = vld [vmem:[%s9470_s3 + $0x488] ss:$16 sps:$4 sm:$0xff]   ;;  %v6791_v58 = vld [vmem:[%s9470_s3 + $0x46c] ss:$16 sps:$4 sm:$0xff]  }
 0x1db   :  { %4228 = vmatpush1.bf16.msra.mxu1 %v6720_v52  ;;  %v6789_v52 = vld [vmem:[%s9470_s3 + $0x468] ss:$16 sps:$4 sm:$0xff]  }
 0x1dc   :  { %4229 = vmatprep.subr.bf16.mxu1 %v6725_v29  ;;  %4193 = vmatpush1.bf16.msra.mxu0 %v6798_v59  ;;  %v6797_v29 = vld [vmem:[%s9470_s3 + $0x44c] ss:$16 sps:$4 sm:$0xff]   ;;  %v6795_v59 = vld [vmem:[%s9470_s3 + $0x448] ss:$16 sps:$4 sm:$0xff]  }
 0x1dd   :  { %4194 = vmatprep.subr.bf16.mxu0 %v6806_v60  ;;  %v6803_v60 = vld [vmem:[%s9470_s3 + $0x42c] ss:$16 sps:$4 sm:$0xff]  }
 0x1df   :  { %4230 = vmatpush1.bf16.msra.mxu1 %v6723_v61  ;;  %v6801_v61 = vld [vmem:[%s9470_s3 + $0x428] ss:$16 sps:$4 sm:$0xff]  }
 0x1e0   :  { %4231 = vmatprep.subr.bf16.mxu1 %v6728_v62  ;;  %4195 = vmatpush1.bf16.msra.mxu0 %v6804_v63  ;;  %v6809_v62 = vld [vmem:[%s9470_s3 + $0x40c] ss:$16 sps:$4 sm:$0xff]   ;;  %v6807_v63 = vld [vmem:[%s9470_s3 + $0x408] ss:$16 sps:$4 sm:$0xff]  }
 0x1e1   :  { %4196 = vmatprep.subr.bf16.mxu0 %v6812_v2  ;;  %v6815_v2 = vld [vmem:[%s9470_s3 + $0x5ec] ss:$16 sps:$4 sm:$0xff]  }
 0x1e3   :  { %4232 = vmatpush1.bf16.msra.mxu1 %v6726_v3  ;;  %v6813_v3 = vld [vmem:[%s9470_s3 + $0x5e8] ss:$16 sps:$4 sm:$0xff]  }
 0x1e4   :  { %4233 = vmatprep.subr.bf16.mxu1 %v6731_v5  ;;  %4197 = vmatpush2.bf16.msra.mxu0 %v6810_v6  ;;  %v6821_v5 = vld [vmem:[%s9470_s3 + $0x5cc] ss:$16 sps:$4 sm:$0xff]   ;;  %v6819_v6 = vld [vmem:[%s9470_s3 + $0x5c8] ss:$16 sps:$4 sm:$0xff]  }
 0x1e5   :  { %4198 = vmatprep.subr.bf16.mxu0 %v6818_v7 }
 0x1e7   :  { %4234 = vmatpush1.bf16.msra.mxu1 %v6729_v8 }
 0x1e8   :  { %4235 = vmatprep.subr.bf16.mxu1 %v6734_v9  ;;  %4199 = vmatpush2.bf16.msra.mxu0 %v6816_v10  ;;  %v6827_v9 = vld [vmem:[%s9470_s3 + $0x5ac] ss:$16 sps:$4 sm:$0xff]   ;;  %v458_v10 = vsub.s32 5, %v7973_v41 }
 0x1e9   :  { %4200 = vmatprep.subr.bf16.mxu0 %v6824_v53  ;;  %v6825_v53 = vld [vmem:[%s9470_s3 + $0x5a8] ss:$16 sps:$4 sm:$0xff]  }
 0x1eb   :  { %4236 = vmatpush1.bf16.msra.mxu1 %v6732_v11  ;;  %v454_v11 = vsub.s32 4, %v7973_v41  ;;  %v6839_v41 = vld [vmem:[%s9470_s3 + $0x56c] ss:$16 sps:$4 sm:$0xff]  }
 0x1ec   :  { %4237 = vmatprep.subr.bf16.mxu1 %v6737_v14  ;;  %4201 = vmatpush2.bf16.msra.mxu0 %v6822_v15 }
 0x1ed   :  { %4202 = vmatprep.subr.bf16.mxu0 %v6830_v17  ;;  %v6833_v17 = vld [vmem:[%s9470_s3 + $0x58c] ss:$16 sps:$4 sm:$0xff]  }
 0x1ef   :  { %4238 = vmatpush1.bf16.msra.mxu1 %v6735_v20  ;;  %v459_v20 = vrot.slane %v8620_v28, %v458_v10  ;;  %v6870_v10 = vld [vmem:[%s9470_s3 + $0x268] ss:$16 sps:$4 sm:$0xff]  }
 0x1f0   :  { %4239 = vmatprep.subr.bf16.mxu1 %v6740_v21  ;;  %4203 = vmatpush2.bf16.msra.mxu0 %v6828_v22  ;;  %v6831_v21 = vld [vmem:[%s9470_s3 + $0x588] ss:$16 sps:$4 sm:$0xff]   ;;  %v455_v22 = vrot.slane %v8620_v28, %v454_v11  ;;  %v6845_v28 = vld [vmem:[%s9470_s3 + $0x54c] ss:$16 sps:$4 sm:$0xff]  }
 0x1f1   :  { %4204 = vmatprep.subr.bf16.mxu0 %v6836_v23  ;;  %v6873_v11 = vld [vmem:[%s9470_s3 + $0x248] ss:$16 sps:$4 sm:$0xff]  }
 0x1f3   :  { %4240 = vmatpush2.bf16.msra.mxu1 %v6738_v24 }
 0x1f4   :  { %4241 = vmatprep.subr.bf16.mxu1 %v6743_v25  ;;  %4205 = vmatpush2.bf16.msra.mxu0 %v6834_v12  ;;  %v6837_v12 = vld [vmem:[%s9470_s3 + $0x568] ss:$16 sps:$4 sm:$0xff]  }
 0x1f5   :  { %4206 = vmatprep.subr.bf16.mxu0 %v6842_v30 }
 0x1f7   :  { %4242 = vmatpush2.bf16.msra.mxu1 %v6741_v48 }
 0x1f8   :  { %4243 = vmatprep.subr.bf16.mxu1 %v6746_v18  ;;  %4207 = vmatpush2.bf16.msra.mxu0 %v6840_v13 }
 0x1f9   :  { %4208 = vmatprep.subr.bf16.mxu0 %v6848_v4 }
 0x1fb   :  { %4244 = vmatpush2.bf16.msra.mxu1 %v6744_v31 }
 0x1fc   :  { %4245 = vmatprep.subr.bf16.mxu1 %v6749_v32  ;;  %4209 = vmatpush2.bf16.msra.mxu0 %v6846_v33 }
 0x1fd   :  { %4210 = vmatprep.subr.bf16.mxu0 %v6854_v0  ;;  %v6843_v0 = vld [vmem:[%s9470_s3 + $0x548] ss:$16 sps:$4 sm:$0xff]  }
 0x1ff   :  { %4246 = vmatpush2.bf16.msra.mxu1 %v6747_v19 }
 0x200   :  { %4247 = vmatprep.subr.bf16.mxu1 %v6752_v34  ;;  %4211 = vmatpush2.bf16.msra.mxu0 %v6852_v35 }
 0x201   :  { %4266 = vmatprep.subr.bf16.mxu0 %v6860_v36  ;;  %v6851_v36 = vld [vmem:[%s9470_s3 + $0x52c] ss:$16 sps:$4 sm:$0xff]  }
 0x202   :  { %v2764_v7 = vpop.f32.mrf.mxu0 }
 0x203   :  { %4248 = vmatpush2.bf16.msra.mxu1 %v6750_v45  ;;  %v2807_v8 = vpop.f32.mrf.mxu1  ;;  %v2765_v30 = vadd.f32 %v2764_v7, %v455_v22  ;;  %v6864_v7 = vld [vmem:[%s9470_s3 + $0x2a8] ss:$16 sps:$4 sm:$0xff]  }
 0x204   :  { %4249 = vmatprep.subr.bf16.mxu1 %v6755_v47  ;;  %v2766_v14 = vpop.f32.mrf.mxu0 }
 0x205   :  { %v2809_v15 = vpop.f32.mrf.mxu1  ;;  %v2767_v25 = vadd.f32 %v2766_v14, %v459_v20  ;;  %v2808_v19 = vadd.f32 %v2807_v8, %v2765_v30  ;;  %v6869_v8 = vld [vmem:[%s9470_s3 + $0x28c] ss:$16 sps:$4 sm:$0xff]   ;;  %v6891_v30 = vld [vmem:[%s9470_s3 + $0x388] ss:$16 sps:$4 sm:$0xff]  }
 0x206   :  { %v2768_v23 = vpop.f32.mrf.mxu0  ;;  %v6878_v14 = vld [vmem:[%s9470_s3 + $0x22c] ss:$16 sps:$4 sm:$0xff]  }
 0x207   :  { %4250 = vmatpush2.bf16.msra.mxu1 %v6753_v1  ;;  %v2811_v24 = vpop.f32.mrf.mxu1  ;;  %v2769_v13 = vadd.f32 %v2768_v23, %v455_v22  ;;  %v2810_v32 = vadd.f32 %v2809_v15, %v2767_v25  ;;  %v6876_v15 = vld [vmem:[%s9470_s3 + $0x228] ss:$16 sps:$4 sm:$0xff]   ;;  %v6887_v23 = vld [vmem:[%s9470_s3 + $0x3cc] ss:$16 sps:$4 sm:$0xff]  }
 0x208   :  { %4251 = vmatprep.subr.bf16.mxu1 %v6758_v26  ;;  %v2770_v48 = vpop.f32.mrf.mxu0  ;;  %v6882_v22 = vld [vmem:[%s9470_s3 + $0x3e8] ss:$16 sps:$4 sm:$0xff]  }
 0x209   :  { %v2813_v18 = vpop.f32.mrf.mxu1  ;;  %v2771_v33 = vadd.f32 %v2770_v48, %v459_v20  ;;  %v2812_v45 = vadd.f32 %v2811_v24, %v2769_v13  ;;  %v6879_v20 = vld [vmem:[%s9470_s3 + $0x208] ss:$16 sps:$4 sm:$0xff]   ;;  %v6896_v48 = vld [vmem:[%s9470_s3 + $0x36c] ss:$16 sps:$4 sm:$0xff]  }
 0x20a   :  { %v6885_v24 = vld [vmem:[%s9470_s3 + $0x3c8] ss:$16 sps:$4 sm:$0xff]  }
 0x20b   :  { %4252 = vmatpush2.bf16.msra.mxu1 %v6756_v54  ;;  %v6888_v25 = vld [vmem:[%s9470_s3 + $0x3a8] ss:$16 sps:$4 sm:$0xff]  }
 0x20c   :  { %4253 = vmatprep.subr.bf16.mxu1 %v6761_v37  ;;  %v2814_v37 = vadd.f32 %v2813_v18, %v2771_v33  ;;  %v6894_v18 = vld [vmem:[%s9470_s3 + $0x368] ss:$16 sps:$4 sm:$0xff]  }
 0x20d   :  { %v6897_v13 = vld [vmem:[%s9470_s3 + $0x348] ss:$16 sps:$4 sm:$0xff]  }
 0x20e   :  { %v6903_v33 = vld [vmem:[%s9470_s3 + $0x308] ss:$16 sps:$4 sm:$0xff]  }
 0x20f   :  { %4254 = vmatpush2.bf16.msra.mxu1 %v6759_v38 }
 0x210   :  { %4309 = vmatprep.subr.bf16.mxu1 %v6767_v42  ;;  %v6849_v42 = vld [vmem:[%s9470_s3 + $0x528] ss:$16 sps:$4 sm:$0xff]  }
 0x212   :  { %4256 = vmatmul.mubr.bf16.vlgmr.msra.gmra.mxu1 %v8269_v40  ;;  %v6785_v40 = vld [vmem:[%s9470_s3 + $0x48c] ss:$16 sps:$4 sm:$0xff]  }
 0x213   :  { %4310 = vmatpush1.bf16.msra.mxu1 %v6765_v43 }
 0x214   :  { %4311 = vmatprep.subr.bf16.mxu1 %v6773_v46  ;;  %v6857_v46 = vld [vmem:[%s9470_s3 + $0x50c] ss:$16 sps:$4 sm:$0xff]  }
 0x217   :  { %4312 = vmatpush1.bf16.msra.mxu1 %v6771_v51 }
 0x218   :  { %4313 = vmatprep.subr.bf16.mxu1 %v6779_v55 }
 0x21b   :  { %4314 = vmatpush1.bf16.msra.mxu1 %v6777_v56 }
 0x21c   :  { %4315 = vmatprep.subr.bf16.mxu1 %v6785_v40 }
 0x21f   :  { %4316 = vmatpush1.bf16.msra.mxu1 %v6783_v57 }
 0x220   :  { %4317 = vmatprep.subr.bf16.mxu1 %v6791_v58 }
 0x223   :  { %4318 = vmatpush1.bf16.msra.mxu1 %v6789_v52  ;;  %v6855_v52 = vld [vmem:[%s9470_s3 + $0x508] ss:$16 sps:$4 sm:$0xff]  }
 0x224   :  { %4319 = vmatprep.subr.bf16.mxu1 %v6797_v29 }
 0x227   :  { %4320 = vmatpush1.bf16.msra.mxu1 %v6795_v59 }
 0x228   :  { %4321 = vmatprep.subr.bf16.mxu1 %v6803_v60 }
 0x22b   :  { %4322 = vmatpush1.bf16.msra.mxu1 %v6801_v61 }
 0x22c   :  { %4323 = vmatprep.subr.bf16.mxu1 %v6809_v62 }
 0x22f   :  { %4324 = vmatpush1.bf16.msra.mxu1 %v6807_v63  ;;  %v6858_v63 = vld [vmem:[%s9470_s3 + $0x2e8] ss:$16 sps:$4 sm:$0xff]  }
 0x230   :  { %4325 = vmatprep.subr.bf16.mxu1 %v6815_v2 }
 0x233   :  { %4326 = vmatpush2.bf16.msra.mxu1 %v6813_v3  ;;  %v6863_v3 = vld [vmem:[%s9470_s3 + $0x2cc] ss:$16 sps:$4 sm:$0xff]  }
 0x234   :  { %4327 = vmatprep.subr.bf16.mxu1 %v6821_v5  ;;  %v6861_v5 = vld [vmem:[%s9470_s3 + $0x2c8] ss:$16 sps:$4 sm:$0xff]  }
 0x237   :  { %4328 = vmatpush2.bf16.msra.mxu1 %v6819_v6  ;;  %v6866_v6 = vld [vmem:[%s9470_s3 + $0x2ac] ss:$16 sps:$4 sm:$0xff]  }
 0x238   :  { %4329 = vmatprep.subr.bf16.mxu1 %v6827_v9  ;;  %v6872_v9 = vld [vmem:[%s9470_s3 + $0x26c] ss:$16 sps:$4 sm:$0xff]  }
 0x23b   :  { %4330 = vmatpush2.bf16.msra.mxu1 %v6825_v53  ;;  %v6875_v53 = vld [vmem:[%s9470_s3 + $0x24c] ss:$16 sps:$4 sm:$0xff]  }
 0x23c   :  { %4331 = vmatprep.subr.bf16.mxu1 %v6833_v17  ;;  %v6881_v17 = vld [vmem:[%s9470_s3 + $0x20c] ss:$16 sps:$4 sm:$0xff]  }
 0x23f   :  { %4332 = vmatpush2.bf16.msra.mxu1 %v6831_v21  ;;  %v6884_v21 = vld [vmem:[%s9470_s3 + $0x3ec] ss:$16 sps:$4 sm:$0xff]  }
 0x240   :  { %4333 = vmatprep.subr.bf16.mxu1 %v6839_v41  ;;  %v6890_v41 = vld [vmem:[%s9470_s3 + $0x3ac] ss:$16 sps:$4 sm:$0xff]  }
 0x242   :  { %v2850_v4 = vpop.f32.mrf.mxu0 }
 0x243   :  { %v2893_v31 = vpop.f32.mrf.mxu1  ;;  %4334 = vmatpush2.bf16.msra.mxu1 %v6837_v12  ;;  %v2851_v1 = vadd.f32 %v2850_v4, %v2808_v19  ;;  %v6893_v12 = vld [vmem:[%s9470_s3 + $0x38c] ss:$16 sps:$4 sm:$0xff]   ;;  %v6906_v19 = vld [vmem:[%s9471_s5 + $0xe0] ss:$16 sps:$4 sm:$0xff]  }
 0x244   :  { %v2852_v34 = vpop.f32.mrf.mxu0  ;;  %4335 = vmatprep.subr.bf16.mxu1 %v6845_v28  ;;  %v6899_v28 = vld [vmem:[%s9470_s3 + $0x34c] ss:$16 sps:$4 sm:$0xff]  }
 0x245   :  { %v2895_v35 = vpop.f32.mrf.mxu1  ;;  %v2853_v47 = vadd.f32 %v2852_v34, %v2810_v32  ;;  %v2894_v40 = vadd.f32 %v2893_v31, %v2851_v1  ;;  %v6902_v4 = vld [vmem:[%s9470_s3 + $0x32c] ss:$16 sps:$4 sm:$0xff]   ;;  %v6900_v31 = vld [vmem:[%s9470_s3 + $0x328] ss:$16 sps:$4 sm:$0xff]   ;;  %v6911_v34 = vld [vmem:[%s9471_s5 + $0xc4] ss:$16 sps:$4 sm:$0xff]  }
 0x246   :  { %v2854_v26 = vpop.f32.mrf.mxu0  ;;  %v6905_v32 = vld [vmem:[%s9470_s3 + $0x30c] ss:$16 sps:$4 sm:$0xff]   ;;  %v6920_v1 = vld [vmem:[%s9471_s5 + $0x64] ss:$16 sps:$4 sm:$0xff]  }
 0x247   :  { %v2897_v54 = vpop.f32.mrf.mxu1  ;;  %v2855_v38 = vadd.f32 %v2854_v26, %v2812_v45  ;;  %4336 = vmatpush2.bf16.msra.mxu1 %v6843_v0  ;;  %v2896_v51 = vadd.f32 %v2895_v35, %v2853_v47  ;;  %v2906_v61 = vmax.f32 %v2894_v40, 0.0  ;;  %v6908_v0 = vld [vmem:[%s9471_s5 + $0xe4] ss:$16 sps:$4 sm:$0xff]   ;;  %v6909_v35 = vld [vmem:[%s9471_s5 + $0xc0] ss:$16 sps:$4 sm:$0xff]  }
 0x248   :  { %v2856_v43 = vpop.f32.mrf.mxu0  ;;  %4337 = vmatprep.subr.bf16.mxu1 %v6851_v36  ;;  %v6914_v36 = vld [vmem:[%s9471_s5 + $0xa4] ss:$16 sps:$4 sm:$0xff]   ;;  %v6912_v45 = vld [vmem:[%s9471_s5 + $0xa0] ss:$16 sps:$4 sm:$0xff]  }
 0x249   :  { %v2898_v55 = vadd.f32 %v2897_v54, %v2855_v38  ;;  %v2857_v56 = vadd.f32 %v2856_v43, %v2814_v37  ;;  %v2899_v57 = vpop.f32.mrf.mxu1  ;;  %v2907_v59 = vmax.f32 %v2896_v51, 0.0  ;;  %v6915_v47 = vld [vmem:[%s9471_s5 + $0x80] ss:$16 sps:$4 sm:$0xff]   ;;  %v6959_v54 = vld [vmem:[%s9471_s5 + $0x2e4] ss:$16 sps:$4 sm:$0xff]  }
 0x24a   :  { %v6918_v26 = vld [vmem:[%s9471_s5 + $0x60] ss:$16 sps:$4 sm:$0xff]   ;;  %v6923_v37 = vld [vmem:[%s9471_s5 + $0x44] ss:$16 sps:$4 sm:$0xff]  }
 0x24b   :  { %v2900_v58 = vadd.f32 %v2899_v57, %v2857_v56  ;;  %4338 = vmatpush2.bf16.msra.mxu1 %v6849_v42  ;;  %v2912_v29 = vmax.f32 %v2898_v55, 0.0  ;;  %v6957_v38 = vld [vmem:[%s9471_s5 + $0x2e0] ss:$16 sps:$4 sm:$0xff]   ;;  %v6965_v43 = vld [vmem:[%s9471_s5 + $0x2c4] ss:$16 sps:$4 sm:$0xff]  }
 0x24c   :  { %4339 = vmatprep.subr.bf16.mxu1 %v6857_v46  ;;  %v6963_v42 = vld [vmem:[%s9471_s5 + $0x2c0] ss:$16 sps:$4 sm:$0xff]   ;;  %v6926_v51 = vld [vmem:[%s9471_s5 + $0x24] ss:$16 sps:$4 sm:$0xff]  }
 0x24d   :  { %v2913_v60 = vmax.f32 %v2900_v58, 0.0  ;;  %v2918_v2 = vpack.c.bf16 %v2912_v29, %v2906_v61  ;;  %v6921_v46 = vld [vmem:[%s9471_s5 + $0x40] ss:$16 sps:$4 sm:$0xff]   ;;  %v6971_v56 = vld [vmem:[%s9471_s5 + $0x2a4] ss:$16 sps:$4 sm:$0xff]  }
 0x24e   :  { %v6969_v55 = vld [vmem:[%s9471_s5 + $0x2a0] ss:$16 sps:$4 sm:$0xff]   ;;  %v6929_v57 = vld [vmem:[%s9471_s5 + $0x4] ss:$16 sps:$4 sm:$0xff]  }
 0x24f   :  { %v2919_v62 = vpack.c.bf16 %v2913_v60, %v2907_v59  ;;  %4340 = vmatpush2.bf16.msra.mxu1 %v6855_v52  ;;  %v6924_v40 = vld [vmem:[%s9471_s5 + $0x20] ss:$16 sps:$4 sm:$0xff]   ;;  %v6977_v52 = vld [vmem:[%s9471_s5 + $0x284] ss:$16 sps:$4 sm:$0xff]  }
 0x250   :  { %5197 = vmatprep.subr.bf16.mxu1 %v6959_v54  ;;  %v6975_v58 = vld [vmem:[%s9471_s5 + $0x280] ss:$16 sps:$4 sm:$0xff]   ;;  %v6932_v59 = vld [vmem:[%s9471_s5 + $0x1e4] ss:$16 sps:$4 sm:$0xff]  }
 0x251   :  { %4212 = vmatprep.mubr.bf16.mxu0 %v2919_v62  ;;  %4341 = vmatprep.mubr.bf16.mxu1 %v2919_v62  ;;  %v6927_v29 = vld [vmem:[%s9471_s5] ss:$16 sps:$4 sm:$0xff]   ;;  %v6983_v61 = vld [vmem:[%s9471_s5 + $0x264] ss:$16 sps:$4 sm:$0xff]  }
 0x252   :  { %4213 = vmatmul.mubr.bf16.vlgmr.msra.gmra.mxu0 %v2918_v2  ;;  %4342 = vmatmul.mubr.bf16.vlgmr.msra.gmra.mxu1 %v2918_v2  ;;  %v6981_v60 = vld [vmem:[%s9471_s5 + $0x260] ss:$16 sps:$4 sm:$0xff]  }
 0x253   :  { %4267 = vmatpush1.bf16.msra.mxu0 %v6858_v63  ;;  %4298 = vmatprep.mubr.bf16.mxu0 %v8663_v39  ;;  %v6867_v39 = vld [vmem:[%s9470_s3 + $0x288] ss:$16 sps:$4 sm:$0xff]   ;;  %v6930_v62 = vld [vmem:[%s9471_s5 + $0x1e0] ss:$16 sps:$4 sm:$0xff]   ;;  %v6935_v63 = vld [vmem:[%s9471_s5 + $0x1c4] ss:$16 sps:$4 sm:$0xff]  }
 0x254   :  { %4268 = vmatprep.subr.bf16.mxu0 %v6863_v3  ;;  %5198 = vmatpush1.bf16.msra.mxu1 %v6957_v38  ;;  %v6987_v2 = vld [vmem:[%s9471_s5 + $0x240] ss:$16 sps:$4 sm:$0xff]   ;;  %v6989_v3 = vld [vmem:[%s9471_s5 + $0x244] ss:$16 sps:$4 sm:$0xff]  }
 0x255   :  { %5199 = vmatprep.subr.bf16.mxu1 %v6965_v43 }
 0x257   :  { %4269 = vmatpush1.bf16.msra.mxu0 %v6861_v5  ;;  %v6933_v5 = vld [vmem:[%s9471_s5 + $0x1c0] ss:$16 sps:$4 sm:$0xff]  }
 0x258   :  { %4270 = vmatprep.subr.bf16.mxu0 %v6866_v6  ;;  %5200 = vmatpush1.bf16.msra.mxu1 %v6963_v42  ;;  %v6938_v6 = vld [vmem:[%s9471_s5 + $0x1a4] ss:$16 sps:$4 sm:$0xff]  }
 0x259   :  { %5201 = vmatprep.subr.bf16.mxu1 %v6971_v56 }
 0x25b   :  { %4271 = vmatpush1.bf16.msra.mxu0 %v6864_v7  ;;  %v6993_v7 = vld [vmem:[%s9471_s5 + $0x220] ss:$16 sps:$4 sm:$0xff]  }
 0x25c   :  { %4272 = vmatprep.subr.bf16.mxu0 %v6869_v8  ;;  %5202 = vmatpush1.bf16.msra.mxu1 %v6969_v55  ;;  %v6995_v8 = vld [vmem:[%s9471_s5 + $0x224] ss:$16 sps:$4 sm:$0xff]  }
 0x25d   :  { %5203 = vmatprep.subr.bf16.mxu1 %v6977_v52 }
 0x25f   :  { %4273 = vmatpush1.bf16.msra.mxu0 %v6867_v39  ;;  %v6936_v39 = vld [vmem:[%s9471_s5 + $0x1a0] ss:$16 sps:$4 sm:$0xff]  }
 0x260   :  { %4274 = vmatprep.subr.bf16.mxu0 %v6872_v9  ;;  %5204 = vmatpush1.bf16.msra.mxu1 %v6975_v58  ;;  %v6941_v9 = vld [vmem:[%s9471_s5 + $0x184] ss:$16 sps:$4 sm:$0xff]  }
 0x261   :  { %5205 = vmatprep.subr.bf16.mxu1 %v6983_v61 }
 0x263   :  { %4275 = vmatpush1.bf16.msra.mxu0 %v6870_v10  ;;  %v6999_v10 = vld [vmem:[%s9471_s5 + $0x200] ss:$16 sps:$4 sm:$0xff]  }
 0x264   :  { %4276 = vmatprep.subr.bf16.mxu0 %v6875_v53  ;;  %5206 = vmatpush1.bf16.msra.mxu1 %v6981_v60  ;;  %v7001_v53 = vld [vmem:[%s9471_s5 + $0x204] ss:$16 sps:$4 sm:$0xff]  }
 0x265   :  { %5207 = vmatprep.subr.bf16.mxu1 %v6989_v3 }
 0x267   :  { %4277 = vmatpush1.bf16.msra.mxu0 %v6873_v11  ;;  %v6939_v11 = vld [vmem:[%s9471_s5 + $0x180] ss:$16 sps:$4 sm:$0xff]  }
 0x268   :  { %4278 = vmatprep.subr.bf16.mxu0 %v6878_v14  ;;  %5208 = vmatpush1.bf16.msra.mxu1 %v6987_v2  ;;  %v6944_v14 = vld [vmem:[%s9471_s5 + $0x164] ss:$16 sps:$4 sm:$0xff]  }
 0x269   :  { %5209 = vmatprep.subr.bf16.mxu1 %v6995_v8 }
 0x26b   :  { %4279 = vmatpush1.bf16.msra.mxu0 %v6876_v15  ;;  %v7005_v15 = vld [vmem:[%s9471_s5 + $0x3e0] ss:$16 sps:$4 sm:$0xff]  }
 0x26c   :  { %4280 = vmatprep.subr.bf16.mxu0 %v6881_v17  ;;  %5210 = vmatpush1.bf16.msra.mxu1 %v6993_v7  ;;  %v7007_v17 = vld [vmem:[%s9471_s5 + $0x3e4] ss:$16 sps:$4 sm:$0xff]  }
 0x26d   :  { %5211 = vmatprep.subr.bf16.mxu1 %v7001_v53  ;;  %v6954_v53 = vld [vmem:[%s9471_s5 + $0xe8] ss:$16 sps:$4 sm:$0xff]  }
 0x26f   :  { %4281 = vmatpush1.bf16.msra.mxu0 %v6879_v20  ;;  %v6942_v20 = vld [vmem:[%s9471_s5 + $0x160] ss:$16 sps:$4 sm:$0xff]  }
 0x270   :  { %4282 = vmatprep.subr.bf16.mxu0 %v6884_v21  ;;  %5212 = vmatpush1.bf16.msra.mxu1 %v6999_v10  ;;  %v6947_v21 = vld [vmem:[%s9471_s5 + $0x144] ss:$16 sps:$4 sm:$0xff]  }
 0x271   :  { %5213 = vmatprep.subr.bf16.mxu1 %v7007_v17  ;;  %v6968_v17 = vld [vmem:[%s9471_s5 + $0xac] ss:$16 sps:$4 sm:$0xff]  }
 0x273   :  { %4283 = vmatpush2.bf16.msra.mxu0 %v6882_v22  ;;  %v7011_v22 = vld [vmem:[%s9471_s5 + $0x3c0] ss:$16 sps:$4 sm:$0xff]  }
 0x274   :  { %4284 = vmatprep.subr.bf16.mxu0 %v6887_v23  ;;  %5214 = vmatpush2.bf16.msra.mxu1 %v7005_v15  ;;  %v7013_v23 = vld [vmem:[%s9471_s5 + $0x3c4] ss:$16 sps:$4 sm:$0xff]   ;;  %v6960_v15 = vld [vmem:[%s9471_s5 + $0xc8] ss:$16 sps:$4 sm:$0xff]  }
 0x275   :  { %5215 = vmatprep.subr.bf16.mxu1 %v7013_v23  ;;  %v6980_v23 = vld [vmem:[%s9471_s5 + $0x6c] ss:$16 sps:$4 sm:$0xff]  }
 0x277   :  { %4285 = vmatpush2.bf16.msra.mxu0 %v6885_v24  ;;  %v6945_v24 = vld [vmem:[%s9471_s5 + $0x140] ss:$16 sps:$4 sm:$0xff]  }
 0x278   :  { %4286 = vmatprep.subr.bf16.mxu0 %v6890_v41  ;;  %v6950_v41 = vld [vmem:[%s9471_s5 + $0x124] ss:$16 sps:$4 sm:$0xff]   ;;  %5216 = vmatpush2.bf16.msra.mxu1 %v7011_v22  ;;  %v6972_v22 = vld [vmem:[%s9471_s5 + $0x88] ss:$16 sps:$4 sm:$0xff]  }
 0x27b   :  { %4287 = vmatpush2.bf16.msra.mxu0 %v6888_v25  ;;  %v7017_v25 = vld [vmem:[%s9471_s5 + $0x3a0] ss:$16 sps:$4 sm:$0xff]  }
 0x27c   :  { %4288 = vmatprep.subr.bf16.mxu0 %v6893_v12  ;;  %v7019_v12 = vld [vmem:[%s9471_s5 + $0x3a4] ss:$16 sps:$4 sm:$0xff]  }
 0x27d   :  { %5217 = vmatprep.subr.bf16.mxu1 %v7019_v12  ;;  %v6992_v12 = vld [vmem:[%s9471_s5 + $0x2c] ss:$16 sps:$4 sm:$0xff]  }
 0x27e   :  { %5218 = vmatpush2.bf16.msra.mxu1 %v7017_v25  ;;  %v6984_v25 = vld [vmem:[%s9471_s5 + $0x48] ss:$16 sps:$4 sm:$0xff]  }
 0x27f   :  { %4289 = vmatpush2.bf16.msra.mxu0 %v6891_v30  ;;  %v6948_v30 = vld [vmem:[%s9471_s5 + $0x120] ss:$16 sps:$4 sm:$0xff]  }
 0x280   :  { %4290 = vmatprep.subr.bf16.mxu0 %v6896_v48  ;;  %v6953_v48 = vld [vmem:[%s9471_s5 + $0x104] ss:$16 sps:$4 sm:$0xff]  }
 0x283   :  { %4291 = vmatpush2.bf16.msra.mxu0 %v6894_v18  ;;  %v7023_v18 = vld [vmem:[%s9471_s5 + $0x380] ss:$16 sps:$4 sm:$0xff]  }
 0x284   :  { %4292 = vmatprep.subr.bf16.mxu0 %v6899_v28  ;;  %v7025_v28 = vld [vmem:[%s9471_s5 + $0x384] ss:$16 sps:$4 sm:$0xff]  }
 0x285   :  { %5219 = vmatprep.subr.bf16.mxu1 %v7025_v28  ;;  %v7004_v28 = vld [vmem:[%s9471_s5 + $0x1ec] ss:$16 sps:$4 sm:$0xff]  }
 0x286   :  { %5220 = vmatpush2.bf16.msra.mxu1 %v7023_v18  ;;  %v6996_v18 = vld [vmem:[%s9471_s5 + $0x8] ss:$16 sps:$4 sm:$0xff]  }
 0x287   :  { %4293 = vmatpush2.bf16.msra.mxu0 %v6897_v13  ;;  %v6951_v13 = vld [vmem:[%s9471_s5 + $0x100] ss:$16 sps:$4 sm:$0xff]  }
 0x288   :  { %4294 = vmatprep.subr.bf16.mxu0 %v6902_v4  ;;  %v6956_v4 = vld [vmem:[%s9471_s5 + $0xec] ss:$16 sps:$4 sm:$0xff]  }
 0x28b   :  { %4295 = vmatpush2.bf16.msra.mxu0 %v6900_v31  ;;  %v7029_v31 = vld [vmem:[%s9471_s5 + $0x360] ss:$16 sps:$4 sm:$0xff]  }
 0x28c   :  { %4296 = vmatprep.subr.bf16.mxu0 %v6905_v32  ;;  %v7031_v32 = vld [vmem:[%s9471_s5 + $0x364] ss:$16 sps:$4 sm:$0xff]  }
 0x28d   :  { %5221 = vmatprep.subr.bf16.mxu1 %v7031_v32  ;;  %v7008_v32 = vld [vmem:[%s9471_s5 + $0x1c8] ss:$16 sps:$4 sm:$0xff]  }
 0x28e   :  { %5222 = vmatpush2.bf16.msra.mxu1 %v7029_v31 }
 0x28f   :  { %4297 = vmatpush2.bf16.msra.mxu0 %v6903_v33  ;;  %v7037_v33 = vld [vmem:[%s9471_s5 + $0x344] ss:$16 sps:$4 sm:$0xff]  }
 0x290   :  { %5154 = vmatprep.subr.bf16.mxu0 %v6908_v0  ;;  %v7035_v0 = vld [vmem:[%s9471_s5 + $0x340] ss:$16 sps:$4 sm:$0xff]   ;;  %5223 = vmatprep.subr.bf16.mxu1 %v7037_v33  ;;  %v7016_v33 = vld [vmem:[%s9471_s5 + $0x1ac] ss:$16 sps:$4 sm:$0xff]  }
 0x292   :  { %4299 = vmatmul.mubr.bf16.vlgmr.msra.gmra.mxu0 %v8668_v27  ;;  %v6917_v27 = vld [vmem:[%s9471_s5 + $0x84] ss:$16 sps:$4 sm:$0xff]   ;;  %5224 = vmatpush2.bf16.msra.mxu1 %v7035_v0 }
 0x293   :  { %5155 = vmatpush1.bf16.msra.mxu0 %v6906_v19  ;;  %v7043_v19 = vld [vmem:[%s9471_s5 + $0x324] ss:$16 sps:$4 sm:$0xff]  }
 0x294   :  { %5156 = vmatprep.subr.bf16.mxu0 %v6911_v34  ;;  %v7041_v34 = vld [vmem:[%s9471_s5 + $0x320] ss:$16 sps:$4 sm:$0xff]   ;;  %5225 = vmatprep.subr.bf16.mxu1 %v7043_v19  ;;  %v7014_v19 = vld [vmem:[%s9471_s5 + $0x1a8] ss:$16 sps:$4 sm:$0xff]  }
 0x296   :  { %5226 = vmatpush2.bf16.msra.mxu1 %v7041_v34  ;;  %v7022_v34 = vld [vmem:[%s9471_s5 + $0x18c] ss:$16 sps:$4 sm:$0xff]  }
 0x297   :  { %5157 = vmatpush1.bf16.msra.mxu0 %v6909_v35  ;;  %v7049_v35 = vld [vmem:[%s9471_s5 + $0x304] ss:$16 sps:$4 sm:$0xff]  }
 0x298   :  { %5158 = vmatprep.subr.bf16.mxu0 %v6914_v36  ;;  %v7047_v36 = vld [vmem:[%s9471_s5 + $0x300] ss:$16 sps:$4 sm:$0xff]   ;;  %5227 = vmatprep.subr.bf16.mxu1 %v7049_v35 }
 0x29a   :  { %5228 = vmatpush2.bf16.msra.mxu1 %v7047_v36  ;;  %v7020_v36 = vld [vmem:[%s9471_s5 + $0x188] ss:$16 sps:$4 sm:$0xff]  }
 0x29b   :  { %5159 = vmatpush1.bf16.msra.mxu0 %v6912_v45  ;;  %v7052_v45 = vld [vmem:[%s9471_s5 + $0x2ec] ss:$16 sps:$4 sm:$0xff]  }
 0x29c   :  { %5160 = vmatprep.subr.bf16.mxu0 %v6917_v27  ;;  %5283 = vmatprep.subr.bf16.mxu1 %v7052_v45  ;;  %v4128_v27 = vpop.f32.mrf.mxu0  ;;  %v7028_v45 = vld [vmem:[%s9471_s5 + $0x16c] ss:$16 sps:$4 sm:$0xff]  }
 0x29f   :  { %5161 = vmatpush1.bf16.msra.mxu0 %v6915_v47  ;;  %v4130_v47 = vpop.f32.mrf.mxu0 }
 0x2a0   :  { %5162 = vmatprep.subr.bf16.mxu0 %v6920_v1  ;;  %v4171_v1 = vpop.f32.mrf.mxu1 }
 0x2a2   :  { %v4173_v54 = vpop.f32.mrf.mxu1 }
 0x2a3   :  { %5163 = vmatpush1.bf16.msra.mxu0 %v6918_v26  ;;  %v4132_v26 = vpop.f32.mrf.mxu0 }
 0x2a4   :  { %5164 = vmatprep.subr.bf16.mxu0 %v6923_v37  ;;  %v9232_v37 = vld [vmem:[%s9472_s4] sm:$0xf] }
 0x2a5   :  { %v3121_v38 = vrot.slane %v9232_v37, %v8356_v16  ;;  %v3117_v42 = vrot.slane %v9232_v37, %v7993_v49  ;;  %v4134_v43 = vpop.f32.mrf.mxu0 }
 0x2a7   :  { %5165 = vmatpush1.bf16.msra.mxu0 %v6921_v46  ;;  %v4175_v46 = vpop.f32.mrf.mxu1  ;;  %v4131_v55 = vadd.f32 %v4130_v47, %v3121_v38  ;;  %v4133_v56 = vadd.f32 %v4132_v26, %v3117_v42  ;;  %v4135_v52 = vadd.f32 %v4134_v43, %v3121_v38  ;;  %v7026_v47 = vld [vmem:[%s9471_s5 + $0x168] ss:$16 sps:$4 sm:$0xff]   ;;  %v7034_v26 = vld [vmem:[%s9471_s5 + $0x14c] ss:$16 sps:$4 sm:$0xff]   ;;  %v3125_v38 = vrot.slane %v9232_v37, %v8606_v50 }
 0x2a8   :  { %5166 = vmatprep.subr.bf16.mxu0 %v6926_v51 }
 0x2ab   :  { %5167 = vmatpush1.bf16.msra.mxu0 %v6924_v40  ;;  %v4129_v40 = vadd.f32 %v4128_v27, %v3117_v42  ;;  %v7032_v42 = vld [vmem:[%s9471_s5 + $0x148] ss:$16 sps:$4 sm:$0xff]  }
 0x2ac   :  { %5168 = vmatprep.subr.bf16.mxu0 %v6929_v57  ;;  %v4177_v57 = vpop.f32.mrf.mxu1 }
 0x2ad   :  { %v4172_v60 = vadd.f32 %v4171_v1, %v4129_v40 }
 0x2af   :  { %5169 = vmatpush1.bf16.msra.mxu0 %v6927_v29  ;;  %v4174_v29 = vadd.f32 %v4173_v54, %v4131_v55  ;;  %v3129_v54 = vrot.slane %v9232_v37, %v8600_v44  ;;  %v7038_v37 = vld [vmem:[%s9471_s5 + $0x128] ss:$16 sps:$4 sm:$0xff]  }
 0x2b0   :  { %5170 = vmatprep.subr.bf16.mxu0 %v6932_v59  ;;  %v4176_v59 = vadd.f32 %v4175_v46, %v4133_v56 }
 0x2b3   :  { %5171 = vmatpush2.bf16.msra.mxu0 %v6930_v62  ;;  %v4178_v62 = vadd.f32 %v4177_v57, %v4135_v52 }
 0x2b4   :  { %5172 = vmatprep.subr.bf16.mxu0 %v6935_v63 }
 0x2b7   :  { %5173 = vmatpush2.bf16.msra.mxu0 %v6933_v5 }
 0x2b8   :  { %5174 = vmatprep.subr.bf16.mxu0 %v6938_v6 }
 0x2bb   :  { %5175 = vmatpush2.bf16.msra.mxu0 %v6936_v39 }
 0x2bc   :  { %5176 = vmatprep.subr.bf16.mxu0 %v6941_v9 }
 0x2bf   :  { %5177 = vmatpush2.bf16.msra.mxu0 %v6939_v11 }
 0x2c0   :  { %5178 = vmatprep.subr.bf16.mxu0 %v6944_v14  ;;  %v6962_v14 = vld [vmem:[%s9471_s5 + $0xcc] ss:$16 sps:$4 sm:$0xff]  }
 0x2c3   :  { %5179 = vmatpush2.bf16.msra.mxu0 %v6942_v20  ;;  %v6966_v20 = vld [vmem:[%s9471_s5 + $0xa8] ss:$16 sps:$4 sm:$0xff]  }
 0x2c4   :  { %5180 = vmatprep.subr.bf16.mxu0 %v6947_v21  ;;  %v6974_v21 = vld [vmem:[%s9471_s5 + $0x8c] ss:$16 sps:$4 sm:$0xff]  }
 0x2c7   :  { %5181 = vmatpush2.bf16.msra.mxu0 %v6945_v24  ;;  %v6978_v24 = vld [vmem:[%s9471_s5 + $0x68] ss:$16 sps:$4 sm:$0xff]  }
 0x2c8   :  { %5182 = vmatprep.subr.bf16.mxu0 %v6950_v41  ;;  %v6986_v41 = vld [vmem:[%s9471_s5 + $0x4c] ss:$16 sps:$4 sm:$0xff]  }
 0x2cb   :  { %5183 = vmatpush2.bf16.msra.mxu0 %v6948_v30  ;;  %v6990_v30 = vld [vmem:[%s9471_s5 + $0x28] ss:$16 sps:$4 sm:$0xff]  }
 0x2cc   :  { %5184 = vmatprep.subr.bf16.mxu0 %v6953_v48  ;;  %v6998_v48 = vld [vmem:[%s9471_s5 + $0xc] ss:$16 sps:$4 sm:$0xff]  }
 0x2cf   :  { %5185 = vmatpush2.bf16.msra.mxu0 %v6951_v13  ;;  %v7002_v13 = vld [vmem:[%s9471_s5 + $0x1e8] ss:$16 sps:$4 sm:$0xff]  }
 0x2d0   :  { %5240 = vmatprep.subr.bf16.mxu0 %v6956_v4  ;;  %v7010_v4 = vld [vmem:[%s9471_s5 + $0x1cc] ss:$16 sps:$4 sm:$0xff]  }
 0x2d2   :  { %v4257_v31 = vpop.f32.mrf.mxu1 }
 0x2d3   :  { %v4258_v56 = vadd.f32 %v4257_v31, %v3125_v38  ;;  %v7076_v31 = vld [vmem:[%s9471_s5 + $0x3ec] ss:$16 sps:$4 sm:$0xff]  }
 0x2d4   :  { %v4259_v0 = vpop.f32.mrf.mxu1 }
 0x2d5   :  { %v4260_v55 = vadd.f32 %v4259_v0, %v3129_v54  ;;  %v7077_v0 = vld [vmem:[%s9471_s5 + $0x3c8] ss:$16 sps:$4 sm:$0xff]  }
 0x2d6   :  { %v4261_v35 = vpop.f32.mrf.mxu1 }
 0x2d7   :  { %v4262_v57 = vadd.f32 %v4261_v35, %v3125_v38  ;;  %v7085_v35 = vld [vmem:[%s9471_s5 + $0x38c] ss:$16 sps:$4 sm:$0xff]  }
 0x2d8   :  { %v4263_v27 = vpop.f32.mrf.mxu1  ;;  %v7097_v38 = vld [vmem:[%s9471_s5 + $0x30c] ss:$16 sps:$4 sm:$0xff]  }
 0x312   :  { %v4214_v51 = vpop.f32.mrf.mxu0  ;;  %v4343_v1 = vpop.f32.mrf.mxu1 }
 0x313   :  { %v4215_v3 = vadd.f32 %v4214_v51, %v4172_v60  ;;  %v7040_v51 = vld [vmem:[%s9471_s5 + $0x12c] ss:$16 sps:$4 sm:$0xff]  }
 0x314   :  { %v4216_v58 = vpop.f32.mrf.mxu0  ;;  %v4345_v43 = vpop.f32.mrf.mxu1  ;;  %v7046_v60 = vld [vmem:[%s9471_s5 + $0x10c] ss:$16 sps:$4 sm:$0xff]  }
 0x315   :  { %v4217_v63 = vadd.f32 %v4216_v58, %v4174_v29  ;;  %v4352_v9 = vmax.f32 %v4215_v3, 0.0 }
 0x316   :  { %v4218_v61 = vpop.f32.mrf.mxu0  ;;  %v4347_v52 = vpop.f32.mrf.mxu1 }
 0x317   :  { %v4219_v2 = vadd.f32 %v4218_v61, %v4176_v59  ;;  %v4353_v8 = vmax.f32 %v4217_v63, 0.0  ;;  %v4264_v61 = vadd.f32 %v4263_v27, %v3129_v54  ;;  %v7086_v27 = vld [vmem:[%s9471_s5 + $0x368] ss:$16 sps:$4 sm:$0xff]  }
 0x318   :  { %v4220_v5 = vpop.f32.mrf.mxu0  ;;  %v7092_v54 = vld [vmem:[%s9471_s5 + $0x328] ss:$16 sps:$4 sm:$0xff]  }
 0x319   :  { %v4221_v6 = vadd.f32 %v4220_v5, %v4178_v62  ;;  %v4356_v7 = vmax.f32 %v4219_v2, 0.0 }
 0x31b   :  { %v4357_v39 = vmax.f32 %v4221_v6, 0.0  ;;  %v9241_v11 = vpack.c.bf16 %v4356_v7, %v4352_v9  ;;  %v7044_v6 = vld [vmem:[%s9471_s5 + $0x108] ss:$16 sps:$4 sm:$0xff]   ;;  %v4349_v7 = vpop.f32.mrf.mxu1 }
 0x31d   :  { %v4361_v10 = vpack.c.bf16 %v4357_v39, %v4353_v8 }
 0x31f   :  { %5186 = vmatprep.mubr.bf16.mxu0 %v4361_v10 }
 0x320   :  { %5187 = vmatmul.mubr.bf16.vlgmr.msra.gmra.mxu0 %v9241_v11 }
 0x321   :  { %5241 = vmatpush1.bf16.msra.mxu0 %v6954_v53  ;;  %5272 = vmatprep.mubr.bf16.mxu0 %v4361_v10 }
 0x322   :  { %5242 = vmatprep.subr.bf16.mxu0 %v6962_v14 }
 0x325   :  { %5243 = vmatpush1.bf16.msra.mxu0 %v6960_v15 }
 0x326   :  { %5244 = vmatprep.subr.bf16.mxu0 %v6968_v17  ;;  %v7050_v17 = vld [vmem:[%s9471_s5 + $0x2e8] ss:$16 sps:$4 sm:$0xff]  }
 0x329   :  { %5245 = vmatpush1.bf16.msra.mxu0 %v6966_v20 }
 0x32a   :  { %5246 = vmatprep.subr.bf16.mxu0 %v6974_v21  ;;  %v7055_v21 = vld [vmem:[%s9471_s5 + $0x2cc] ss:$16 sps:$4 sm:$0xff]  }
 0x32d   :  { %5247 = vmatpush1.bf16.msra.mxu0 %v6972_v22  ;;  %v7053_v22 = vld [vmem:[%s9471_s5 + $0x2c8] ss:$16 sps:$4 sm:$0xff]  }
 0x32e   :  { %5248 = vmatprep.subr.bf16.mxu0 %v6980_v23  ;;  %v7058_v23 = vld [vmem:[%s9471_s5 + $0x2ac] ss:$16 sps:$4 sm:$0xff]  }
 0x331   :  { %5249 = vmatpush1.bf16.msra.mxu0 %v6978_v24  ;;  %v7061_v24 = vld [vmem:[%s9471_s5 + $0x28c] ss:$16 sps:$4 sm:$0xff]  }
 0x332   :  { %5250 = vmatprep.subr.bf16.mxu0 %v6986_v41  ;;  %v7059_v41 = vld [vmem:[%s9471_s5 + $0x288] ss:$16 sps:$4 sm:$0xff]  }
 0x335   :  { %5251 = vmatpush1.bf16.msra.mxu0 %v6984_v25  ;;  %v7064_v25 = vld [vmem:[%s9471_s5 + $0x26c] ss:$16 sps:$4 sm:$0xff]  }
 0x336   :  { %5252 = vmatprep.subr.bf16.mxu0 %v6992_v12  ;;  %v7062_v12 = vld [vmem:[%s9471_s5 + $0x268] ss:$16 sps:$4 sm:$0xff]  }
 0x339   :  { %5253 = vmatpush1.bf16.msra.mxu0 %v6990_v30  ;;  %v7067_v30 = vld [vmem:[%s9471_s5 + $0x24c] ss:$16 sps:$4 sm:$0xff]  }
 0x33a   :  { %5254 = vmatprep.subr.bf16.mxu0 %v6998_v48  ;;  %v7065_v48 = vld [vmem:[%s9471_s5 + $0x248] ss:$16 sps:$4 sm:$0xff]  }
 0x33d   :  { %5255 = vmatpush1.bf16.msra.mxu0 %v6996_v18  ;;  %v7070_v18 = vld [vmem:[%s9471_s5 + $0x22c] ss:$16 sps:$4 sm:$0xff]  }
 0x33e   :  { %5256 = vmatprep.subr.bf16.mxu0 %v7004_v28  ;;  %v7068_v28 = vld [vmem:[%s9471_s5 + $0x228] ss:$16 sps:$4 sm:$0xff]  }
 0x341   :  { %5257 = vmatpush2.bf16.msra.mxu0 %v7002_v13  ;;  %v7073_v13 = vld [vmem:[%s9471_s5 + $0x20c] ss:$16 sps:$4 sm:$0xff]  }
 0x342   :  { %5258 = vmatprep.subr.bf16.mxu0 %v7010_v4  ;;  %v7071_v4 = vld [vmem:[%s9471_s5 + $0x208] ss:$16 sps:$4 sm:$0xff]  }
 0x345   :  { %5259 = vmatpush2.bf16.msra.mxu0 %v7008_v32  ;;  %v7074_v32 = vld [vmem:[%s9471_s5 + $0x3e8] ss:$16 sps:$4 sm:$0xff]  }
 0x346   :  { %5260 = vmatprep.subr.bf16.mxu0 %v7016_v33  ;;  %v7079_v33 = vld [vmem:[%s9471_s5 + $0x3cc] ss:$16 sps:$4 sm:$0xff]  }
 0x349   :  { %5261 = vmatpush2.bf16.msra.mxu0 %v7014_v19  ;;  %v7082_v19 = vld [vmem:[%s9471_s5 + $0x3ac] ss:$16 sps:$4 sm:$0xff]  }
 0x34a   :  { %5262 = vmatprep.subr.bf16.mxu0 %v7022_v34  ;;  %v7080_v34 = vld [vmem:[%s9471_s5 + $0x3a8] ss:$16 sps:$4 sm:$0xff]  }
 0x34d   :  { %5263 = vmatpush2.bf16.msra.mxu0 %v7020_v36  ;;  %v7083_v36 = vld [vmem:[%s9471_s5 + $0x388] ss:$16 sps:$4 sm:$0xff]  }
 0x34e   :  { %5264 = vmatprep.subr.bf16.mxu0 %v7028_v45  ;;  %v7088_v45 = vld [vmem:[%s9471_s5 + $0x36c] ss:$16 sps:$4 sm:$0xff]  }
 0x351   :  { %5265 = vmatpush2.bf16.msra.mxu0 %v7026_v47  ;;  %v7091_v47 = vld [vmem:[%s9471_s5 + $0x34c] ss:$16 sps:$4 sm:$0xff]  }
 0x352   :  { %v4300_v46 = vpop.f32.mrf.mxu0  ;;  %5266 = vmatprep.subr.bf16.mxu0 %v7034_v26  ;;  %v7094_v26 = vld [vmem:[%s9471_s5 + $0x32c] ss:$16 sps:$4 sm:$0xff]  }
 0x353   :  { %v4301_v29 = vadd.f32 %v4300_v46, %v4258_v56  ;;  %v4492_v46 = vld [vmem:[%s9473_s6] sm:$0xf] }
 0x354   :  { %v4302_v40 = vpop.f32.mrf.mxu0  ;;  %v4501_v56 = vrot.slane %v4492_v46, %v8356_v16 }
 0x355   :  { %v4303_v58 = vadd.f32 %v4302_v40, %v4260_v55  ;;  %5267 = vmatpush2.bf16.msra.mxu0 %v7032_v42  ;;  %v4344_v8 = vadd.f32 %v4343_v1, %v4301_v29  ;;  %v7089_v1 = vld [vmem:[%s9471_s5 + $0x348] ss:$16 sps:$4 sm:$0xff]   ;;  %v4497_v55 = vrot.slane %v4492_v46, %v7993_v49 }
 0x356   :  { %v4304_v59 = vpop.f32.mrf.mxu0  ;;  %5268 = vmatprep.subr.bf16.mxu0 %v7040_v51  ;;  %v7095_v42 = vld [vmem:[%s9471_s5 + $0x308] ss:$16 sps:$4 sm:$0xff]  }
 0x357   :  { %v4305_v62 = vadd.f32 %v4304_v59, %v4262_v57  ;;  %v4346_v2 = vadd.f32 %v4345_v43, %v4303_v58  ;;  %v4354_v14 = vmax.f32 %v4344_v8, 0.0 }
 0x358   :  { %v4306_v63 = vpop.f32.mrf.mxu0 }
 0x359   :  { %v4348_v3 = vadd.f32 %v4347_v52, %v4305_v62  ;;  %v4307_v5 = vadd.f32 %v4306_v63, %v4264_v61  ;;  %5269 = vmatpush2.bf16.msra.mxu0 %v7038_v37  ;;  %v4355_v10 = vmax.f32 %v4346_v2, 0.0 }
 0x35a   :  { %5270 = vmatprep.subr.bf16.mxu0 %v7046_v60 }
 0x35b   :  { %v4350_v39 = vadd.f32 %v4349_v7, %v4307_v5  ;;  %v4358_v9 = vmax.f32 %v4348_v3, 0.0  ;;  %v4509_v7 = vrot.slane %v4492_v46, %v8600_v44 }
 0x35d   :  { %v4359_v53 = vmax.f32 %v4350_v39, 0.0  ;;  %5271 = vmatpush2.bf16.msra.mxu0 %v7044_v6  ;;  %v9341_v20 = vpack.c.bf16 %v4358_v9, %v4354_v14  ;;  %v4505_v6 = vrot.slane %v4492_v46, %v8606_v50 }
 0x35f   :  { %v4363_v15 = vpack.c.bf16 %v4359_v53, %v4355_v10 }
 0x360   :  { %5273 = vmatmul.mubr.bf16.vlgmr.msra.gmra.mxu0 %v9241_v11  ;;  %v7056_v11 = vld [vmem:[%s9471_s5 + $0x2a8] ss:$16 sps:$4 sm:$0xff]  }
 0x361   :  { %5229 = vmatprep.mubr.bf16.mxu1 %v4363_v15 }
 0x362   :  { %5230 = vmatmul.mubr.bf16.vlgmr.msra.gmra.mxu1 %v9341_v20 }
 0x363   :  { %5284 = vmatpush1.bf16.msra.mxu1 %v7050_v17  ;;  %5315 = vmatprep.mubr.bf16.mxu1 %v4363_v15 }
 0x364   :  { %5285 = vmatprep.subr.bf16.mxu1 %v7055_v21 }
 0x367   :  { %5286 = vmatpush1.bf16.msra.mxu1 %v7053_v22 }
 0x368   :  { %5287 = vmatprep.subr.bf16.mxu1 %v7058_v23 }
 0x36b   :  { %5288 = vmatpush1.bf16.msra.mxu1 %v7056_v11 }
 0x36c   :  { %5289 = vmatprep.subr.bf16.mxu1 %v7061_v24 }
 0x36f   :  { %5290 = vmatpush1.bf16.msra.mxu1 %v7059_v41 }
 0x370   :  { %5291 = vmatprep.subr.bf16.mxu1 %v7064_v25 }
 0x373   :  { %5292 = vmatpush1.bf16.msra.mxu1 %v7062_v12 }
 0x374   :  { %5293 = vmatprep.subr.bf16.mxu1 %v7067_v30 }
 0x377   :  { %5294 = vmatpush1.bf16.msra.mxu1 %v7065_v48 }
 0x378   :  { %5295 = vmatprep.subr.bf16.mxu1 %v7070_v18 }
 0x37b   :  { %5296 = vmatpush1.bf16.msra.mxu1 %v7068_v28 }
 0x37c   :  { %5297 = vmatprep.subr.bf16.mxu1 %v7073_v13 }
 0x37f   :  { %5298 = vmatpush1.bf16.msra.mxu1 %v7071_v4 }
 0x380   :  { %5299 = vmatprep.subr.bf16.mxu1 %v7076_v31 }
 0x383   :  { %5300 = vmatpush2.bf16.msra.mxu1 %v7074_v32 }
 0x384   :  { %5301 = vmatprep.subr.bf16.mxu1 %v7079_v33 }
 0x387   :  { %5302 = vmatpush2.bf16.msra.mxu1 %v7077_v0 }
 0x388   :  { %5303 = vmatprep.subr.bf16.mxu1 %v7082_v19 }
 0x38b   :  { %5304 = vmatpush2.bf16.msra.mxu1 %v7080_v34 }
 0x38c   :  { %5305 = vmatprep.subr.bf16.mxu1 %v7085_v35 }
 0x38f   :  { %5306 = vmatpush2.bf16.msra.mxu1 %v7083_v36 }
 0x390   :  { %5307 = vmatprep.subr.bf16.mxu1 %v7088_v45 }
 0x393   :  { %5308 = vmatpush2.bf16.msra.mxu1 %v7086_v27 }
 0x394   :  { %5309 = vmatprep.subr.bf16.mxu1 %v7091_v47 }
 0x397   :  { %5310 = vmatpush2.bf16.msra.mxu1 %v7089_v1 }
 0x398   :  { %5311 = vmatprep.subr.bf16.mxu1 %v7094_v26 }
 0x39b   :  { %5312 = vmatpush2.bf16.msra.mxu1 %v7092_v54 }
 0x39c   :  { %5313 = vmatprep.subr.bf16.mxu1 %v7097_v38 }
 0x39f   :  { %5314 = vmatpush2.bf16.msra.mxu1 %v7095_v42 }
 0x3a2   :  { %5316 = vmatmul.mubr.bf16.vlgmr.msra.gmra.mxu1 %v9341_v20 }
 0x3e0   :  { %v5188_v43 = vpop.f32.mrf.mxu0 }
 0x3e1   :  { %v5189_v57 = vadd.f32 %v5188_v43, %v4497_v55 }
 0x3e2   :  { %v5190_v51 = vpop.f32.mrf.mxu0 }
 0x3e3   :  { %v5191_v37 = vadd.f32 %v5190_v51, %v4501_v56 }
 0x3e4   :  { %v5192_v40 = vpop.f32.mrf.mxu0 }
 0x3e5   :  { %v5193_v60 = vadd.f32 %v5192_v40, %v4497_v55 }
 0x3e6   :  { %v5194_v29 = vpop.f32.mrf.mxu0 }
 0x3e7   :  { %v5195_v63 = vadd.f32 %v5194_v29, %v4501_v56 }
 0x420   :  { %v5274_v3 = vpop.f32.mrf.mxu0 }
 0x421   :  { %v5275_v39 = vadd.f32 %v5274_v3, %v4505_v6 }
 0x422   :  { %v5231_v58 = vpop.f32.mrf.mxu1  ;;  %v5276_v5 = vpop.f32.mrf.mxu0 }
 0x423   :  { %v5232_v52 = vadd.f32 %v5231_v58, %v5189_v57  ;;  %v5277_v10 = vadd.f32 %v5276_v5, %v4509_v7 }
 0x424   :  { %v5233_v59 = vpop.f32.mrf.mxu1  ;;  %v5278_v8 = vpop.f32.mrf.mxu0 }
 0x425   :  { %5326 = vst [vmem:[%s9474_s7] sm:$0xff] %v5232_v52  ;;  %v5234_v61 = vadd.f32 %v5233_v59, %v5191_v37  ;;  %v5279_v17 = vadd.f32 %v5278_v8, %v4505_v6 }
 0x426   :  { %v5235_v62 = vpop.f32.mrf.mxu1  ;;  %v5280_v14 = vpop.f32.mrf.mxu0 }
 0x427   :  { %5327 = vst [vmem:[%s9474_s7 + $0x8] sm:$0xff] %v5234_v61  ;;  %v5236_v49 = vadd.f32 %v5235_v62, %v5193_v60  ;;  %v5281_v22 = vadd.f32 %v5280_v14, %v4509_v7 }
 0x428   :  { %v5237_v16 = vpop.f32.mrf.mxu1 }
 0x429   :  { %5330 = vst [vmem:[%s9474_s7 + $0x20] sm:$0x1] %v5236_v49  ;;  %v5238_v2 = vadd.f32 %v5237_v16, %v5195_v63 }
 0x42b   :  { %5331 = vst [vmem:[%s9474_s7 + $0x28] sm:$0x1] %v5238_v2 }
 0x462   :  { %v5317_v9 = vpop.f32.mrf.mxu1 }
 0x463   :  { %v5318_v53 = vadd.f32 %v5317_v9, %v5275_v39 }
 0x464   :  { %v5319_v15 = vpop.f32.mrf.mxu1 }
 0x465   :  { %5328 = vst [vmem:[%s9474_s7 + $0x10] sm:$0xff] %v5318_v53  ;;  %v5320_v20 = vadd.f32 %v5319_v15, %v5277_v10 }
 0x466   :  { %v5321_v21 = vpop.f32.mrf.mxu1 }
 0x467   :  { %5329 = vst [vmem:[%s9474_s7 + $0x18] sm:$0xff] %v5320_v20  ;;  %v5322_v44 = vadd.f32 %v5321_v21, %v5279_v17 }
 0x468   :  { %v5323_v50 = vpop.f32.mrf.mxu1 }
 0x469   :  { %5332 = vst [vmem:[%s9474_s7 + $0x30] sm:$0x1] %v5322_v44  ;;  %v5324_v23 = vadd.f32 %v5323_v50, %v5281_v22 }
 0x46b   :  { %5333 = vst [vmem:[%s9474_s7 + $0x38] sm:$0x1] %v5324_v23 }

</bundles_post_ra>
